<compile_context>
chip_gen: v5e
topology: v5e:2x2
jax: 0.10.0
libtpu: 0.0.40
codegen_flags: <defaults>
</compile_context>

<pallas_src>
import jax
import jax.numpy as jnp
from jax.experimental import pallas as pl
from jax.experimental.pallas import tpu as pltpu


CLASSES = 10
CLASSES_PAD = 16                  # one-hot width, padded
SIZE = 16                         # small image size for the example run (module default 28)
B = 2                             # example batch (kernel/wrapper handle any batch)

IMG_D = 3 * SIZE * SIZE           # 768 = 6*128 -> lane-aligned K for the big matmul
D_IN = IMG_D + CLASSES            # 778 (reference only)
H1, H2, H3, H4 = 1024, 512, 256, 1

LANE = 128
SUB = 8
OUT_PAD = LANE                    # last layer (H4=1) padded to 128 lanes (lane-dense store)


def _pad_to(n, m):
    return ((n + m - 1) // m) * m


def _leaky_relu(x, slope=0.2):
    return jnp.where(x > 0, x, slope * x)


def mlp_kernel(x_ref, lab_ref, labtab_ref,
               q1_ref, s1_ref, b1_ref,
               q2_ref, s2_ref, b2_ref,
               q3_ref, s3_ref, b3_ref,
               w4_ref, b4_ref, o_ref):
    bf = jnp.bfloat16
    f32 = jnp.float32
    b_pad = x_ref.shape[0]

    x = x_ref[...]                                            # [B_PAD, 768] bf16

    # ---- fused nn.Embedding + concat: one_hot(labels) @ (emb @ w1_lab) ----
    lab = lab_ref[...]                                        # [B_PAD, 1] int32
    iota = jax.lax.broadcasted_iota(jnp.int32, (b_pad, CLASSES_PAD), 1)
    one_hot = jnp.where(lab == iota, 1.0, 0.0).astype(bf)     # [B_PAD, 16]

    # ---- layer 1 (W8A16): h1 = (x @ q1)*s1 + one_hot @ labtab + b1 ----
    w1 = q1_ref[...].astype(f32).astype(bf)                   # exact int8 -> bf16
    h = (jnp.dot(x, w1, preferred_element_type=f32) * s1_ref[...]
         + jnp.dot(one_hot, labtab_ref[...], preferred_element_type=f32)
         + b1_ref[...])
    h = _leaky_relu(h)                                        # Dropout(0.3) -> identity (eval)

    # ---- layer 2 ----
    w2 = q2_ref[...].astype(f32).astype(bf)
    h = jnp.dot(h.astype(bf), w2, preferred_element_type=f32) * s2_ref[...] + b2_ref[...]
    h = _leaky_relu(h)                                        # Dropout -> identity

    # ---- layer 3 ----
    w3 = q3_ref[...].astype(f32).astype(bf)
    h = jnp.dot(h.astype(bf), w3, preferred_element_type=f32) * s3_ref[...] + b3_ref[...]
    h = _leaky_relu(h)                                        # Dropout -> identity

    # ---- layer 4: tiny logit layer kept in f32 for sigmoid resolution ----
    h = jnp.dot(h, w4_ref[...], preferred_element_type=f32) + b4_ref[...]
    o_ref[...] = jax.nn.sigmoid(h)                            # [B_PAD, OUT_PAD]


def init_params(key):
    """Deterministic synthetic f32 parameters (PyTorch-like uniform fan-in init)."""
    ks = jax.random.split(key, 9)

    def linear(k, fan_in, fan_out):
        kw, kb = jax.random.split(k)
        bound = 1.0 / jnp.sqrt(fan_in)
        w = jax.random.uniform(kw, (fan_in, fan_out), jnp.float32, -bound, bound)
        b = jax.random.uniform(kb, (1, fan_out), jnp.float32, -bound, bound)
        return w, b

    emb = jax.random.normal(ks[0], (CLASSES, CLASSES), jnp.float32)  # nn.Embedding
    w1, b1 = linear(ks[1], D_IN, H1)
    w2, b2 = linear(ks[2], H1, H2)
    w3, b3 = linear(ks[3], H2, H3)
    w4, b4 = linear(ks[4], H3, H4)
    return emb, (w1, b1), (w2, b2), (w3, b3), (w4, b4)


def prepare_kernel_params(params):
    """One-time (per weight update) transform of the weights for the kernel.

    * Split w1 into its image part (K=768, lane-aligned) and label part.
    * Fold nn.Embedding through the first Linear: emb[l] @ w1_lab == one_hot(l) @ (emb @ w1_lab).
    * Weight-only int8 quantization (per-output-channel scale) of w1_img / w2 / w3.
    * Pad the tiny final layer to 128 output lanes; keep it (and biases) in f32.
    """
    emb, (w1, b1), (w2, b2), (w3, b3), (w4, b4) = params

    w1_img = w1[:IMG_D]                                       # [768, 1024]
    w1_lab = w1[IMG_D:]                                       # [10, 1024]
    labtab = jnp.zeros((CLASSES_PAD, H1), jnp.float32).at[:CLASSES].set(emb @ w1_lab)

    def quant_int8(w):
        s = jnp.max(jnp.abs(w), axis=0, keepdims=True) / 127.0   # per-output-channel
        s = jnp.maximum(s, 1e-12)
        q = jnp.clip(jnp.round(w / s), -127, 127).astype(jnp.int8)
        return q, s.astype(jnp.float32)

    q1, s1 = quant_int8(w1_img)
    q2, s2 = quant_int8(w2)
    q3, s3 = quant_int8(w3)

    w4p = jnp.zeros((H3, OUT_PAD), jnp.float32).at[:, :H4].set(w4)
    b4p = jnp.zeros((1, OUT_PAD), jnp.float32).at[:, :H4].set(b4)

    return (labtab.astype(jnp.bfloat16),
            q1, s1, b1, q2, s2, b2, q3, s3, b3, w4p, b4p)


def discriminator_forward(images, labels, kparams):
    b = images.shape[0]
    b_pad = _pad_to(b, SUB)

    # Minimal wrapper glue: contiguous flatten (torch .view order), bf16 cast, batch pad.
    x = images.reshape(b, IMG_D).astype(jnp.bfloat16)
    x = jnp.pad(x, ((0, b_pad - b), (0, 0)))                          # [B_PAD, 768]
    lab = jnp.pad(labels.astype(jnp.int32), (0, b_pad - b)).reshape(b_pad, 1)

    vmem = pl.BlockSpec(memory_space=pltpu.MemorySpace.VMEM)
    out = pl.pallas_call(
        mlp_kernel,
        out_shape=jax.ShapeDtypeStruct((b_pad, OUT_PAD), jnp.float32),
        in_specs=[vmem] * 14,
        out_specs=vmem,
        compiler_params=pltpu.CompilerParams(vmem_limit_bytes=16 << 20),
    )(x, lab, *kparams)

    # Drop padding, mimic torch's .squeeze() on [B, 1].
    return out[:b, :H4].squeeze()


def reference_forward(images, labels, params):
    """Pure-JAX f32 reference with the original (unpadded, unquantized) weights."""
    emb, (w1, b1), (w2, b2), (w3, b3), (w4, b4) = params
    x = images.reshape(images.shape[0], IMG_D)
    x = jnp.concatenate([x, emb[labels]], axis=1)
    h = _leaky_relu(x @ w1 + b1)
    h = _leaky_relu(h @ w2 + b2)
    h = _leaky_relu(h @ w3 + b3)
    return jax.nn.sigmoid(h @ w4 + b4).squeeze()


if __name__ == "__main__":
    key = jax.random.PRNGKey(0)
    k_img, k_lab, k_par = jax.random.split(key, 3)

    images = jax.random.normal(k_img, (B, 3, SIZE, SIZE), jnp.float32)  # NCHW
    labels = jax.random.randint(k_lab, (B,), 0, CLASSES, jnp.int32)
    params = init_params(k_par)
    kparams = prepare_kernel_params(params)          # split/fold/quantize/pad, once

    out = discriminator_forward(images, labels, kparams)
    out = jax.block_until_ready(out)

    ref = reference_forward(images, labels, params)
    assert out.shape == (B,), out.shape
    # int8 weights + bf16 activations => relaxed tolerance vs. the f32 reference
    assert jnp.allclose(out, ref, atol=3e-2, rtol=3e-2), (out, ref)

    print("KERNEL_OK")
</pallas_src>

<mosaic_0001>
module attributes {stable_mosaic.version = 11 : i64} {
  func.func @mlp_kernel(%arg0: memref<8x768xbf16, #tpu.memory_space<vmem>>, %arg1: memref<8x1xi32, #tpu.memory_space<vmem>>, %arg2: memref<16x1024xbf16, #tpu.memory_space<vmem>>, %arg3: memref<768x1024xi8, #tpu.memory_space<vmem>>, %arg4: memref<1x1024xf32, #tpu.memory_space<vmem>>, %arg5: memref<1x1024xf32, #tpu.memory_space<vmem>>, %arg6: memref<1024x512xi8, #tpu.memory_space<vmem>>, %arg7: memref<1x512xf32, #tpu.memory_space<vmem>>, %arg8: memref<1x512xf32, #tpu.memory_space<vmem>>, %arg9: memref<512x256xi8, #tpu.memory_space<vmem>>, %arg10: memref<1x256xf32, #tpu.memory_space<vmem>>, %arg11: memref<1x256xf32, #tpu.memory_space<vmem>>, %arg12: memref<256x128xf32, #tpu.memory_space<vmem>>, %arg13: memref<1x128xf32, #tpu.memory_space<vmem>>, %arg14: memref<8x128xf32, #tpu.memory_space<vmem>>) attributes {dimension_semantics = [], scalar_prefetch = 0 : i64, scratch_operands = 0 : i64, tpu.core_type = #tpu.core_type<tc>} {
    %c0 = arith.constant 0 : index
    %c0_0 = arith.constant 0 : index
    %0 = vector.load %arg0[%c0, %c0_0] : memref<8x768xbf16, #tpu.memory_space<vmem>>, vector<8x768xbf16>
    %c0_1 = arith.constant 0 : index
    %c0_2 = arith.constant 0 : index
    %1 = vector.load %arg1[%c0_1, %c0_2] : memref<8x1xi32, #tpu.memory_space<vmem>>, vector<8x1xi32>
    %2 = tpu.iota {dimensions = array<i32: 1>} : vector<8x16xi32>
    %3 = vector.broadcast %1 : vector<8x1xi32> to vector<8x16xi32>
    %4 = arith.cmpi eq, %3, %2 : vector<8x16xi32>
    %cst = arith.constant 1.000000e+00 : f32
    %cst_3 = arith.constant 0.000000e+00 : f32
    %5 = vector.broadcast %cst : f32 to vector<8x16xf32>
    %6 = vector.broadcast %cst_3 : f32 to vector<8x16xf32>
    %7 = arith.select %4, %5, %6 : vector<8x16xi1>, vector<8x16xf32>
    %8 = arith.truncf %7 : vector<8x16xf32> to vector<8x16xbf16>
    %c0_4 = arith.constant 0 : index
    %c0_5 = arith.constant 0 : index
    %9 = vector.load %arg3[%c0_4, %c0_5] : memref<768x1024xi8, #tpu.memory_space<vmem>>, vector<768x1024xi8>
    %10 = arith.sitofp %9 : vector<768x1024xi8> to vector<768x1024xf32>
    %11 = arith.truncf %10 : vector<768x1024xf32> to vector<768x1024xbf16>
    %cst_6 = arith.constant dense<0.000000e+00> : vector<8x1024xf32>
    %12 = tpu.matmul %0, %11, %cst_6 {dimension_numbers = #tpu.dot_dimension_numbers<[1], [0], [0], [1], [0, 0, 1, 1], [], []>} : vector<8x768xbf16>, vector<768x1024xbf16>, vector<8x1024xf32> -> vector<8x1024xf32>
    %c0_7 = arith.constant 0 : index
    %c0_8 = arith.constant 0 : index
    %13 = vector.load %arg4[%c0_7, %c0_8] : memref<1x1024xf32, #tpu.memory_space<vmem>>, vector<1x1024xf32>
    %14 = vector.broadcast %13 : vector<1x1024xf32> to vector<8x1024xf32>
    %15 = arith.mulf %12, %14 : vector<8x1024xf32>
    %c0_9 = arith.constant 0 : index
    %c0_10 = arith.constant 0 : index
    %16 = vector.load %arg2[%c0_9, %c0_10] : memref<16x1024xbf16, #tpu.memory_space<vmem>>, vector<16x1024xbf16>
    %cst_11 = arith.constant dense<0.000000e+00> : vector<8x1024xf32>
    %17 = tpu.matmul %8, %16, %cst_11 {dimension_numbers = #tpu.dot_dimension_numbers<[1], [0], [0], [1], [0, 0, 1, 1], [], []>} : vector<8x16xbf16>, vector<16x1024xbf16>, vector<8x1024xf32> -> vector<8x1024xf32>
    %18 = arith.addf %15, %17 : vector<8x1024xf32>
    %c0_12 = arith.constant 0 : index
    %c0_13 = arith.constant 0 : index
    %19 = vector.load %arg5[%c0_12, %c0_13] : memref<1x1024xf32, #tpu.memory_space<vmem>>, vector<1x1024xf32>
    %20 = vector.broadcast %19 : vector<1x1024xf32> to vector<8x1024xf32>
    %21 = arith.addf %18, %20 : vector<8x1024xf32>
    %cst_14 = arith.constant 0.000000e+00 : f32
    %22 = vector.broadcast %cst_14 : f32 to vector<8x1024xf32>
    %23 = arith.cmpf ogt, %21, %22 : vector<8x1024xf32>
    %cst_15 = arith.constant 2.000000e-01 : f32
    %24 = vector.broadcast %cst_15 : f32 to vector<8x1024xf32>
    %25 = arith.mulf %24, %21 : vector<8x1024xf32>
    %26 = arith.select %23, %21, %25 : vector<8x1024xi1>, vector<8x1024xf32>
    %c0_16 = arith.constant 0 : index
    %c0_17 = arith.constant 0 : index
    %27 = vector.load %arg6[%c0_16, %c0_17] : memref<1024x512xi8, #tpu.memory_space<vmem>>, vector<1024x512xi8>
    %28 = arith.sitofp %27 : vector<1024x512xi8> to vector<1024x512xf32>
    %29 = arith.truncf %28 : vector<1024x512xf32> to vector<1024x512xbf16>
    %30 = arith.truncf %26 : vector<8x1024xf32> to vector<8x1024xbf16>
    %cst_18 = arith.constant dense<0.000000e+00> : vector<8x512xf32>
    %31 = tpu.matmul %30, %29, %cst_18 {dimension_numbers = #tpu.dot_dimension_numbers<[1], [0], [0], [1], [0, 0, 1, 1], [], []>} : vector<8x1024xbf16>, vector<1024x512xbf16>, vector<8x512xf32> -> vector<8x512xf32>
    %c0_19 = arith.constant 0 : index
    %c0_20 = arith.constant 0 : index
    %32 = vector.load %arg7[%c0_19, %c0_20] : memref<1x512xf32, #tpu.memory_space<vmem>>, vector<1x512xf32>
    %33 = vector.broadcast %32 : vector<1x512xf32> to vector<8x512xf32>
    %34 = arith.mulf %31, %33 : vector<8x512xf32>
    %c0_21 = arith.constant 0 : index
    %c0_22 = arith.constant 0 : index
    %35 = vector.load %arg8[%c0_21, %c0_22] : memref<1x512xf32, #tpu.memory_space<vmem>>, vector<1x512xf32>
    %36 = vector.broadcast %35 : vector<1x512xf32> to vector<8x512xf32>
    %37 = arith.addf %34, %36 : vector<8x512xf32>
    %cst_23 = arith.constant 0.000000e+00 : f32
    %38 = vector.broadcast %cst_23 : f32 to vector<8x512xf32>
    %39 = arith.cmpf ogt, %37, %38 : vector<8x512xf32>
    %cst_24 = arith.constant 2.000000e-01 : f32
    %40 = vector.broadcast %cst_24 : f32 to vector<8x512xf32>
    %41 = arith.mulf %40, %37 : vector<8x512xf32>
    %42 = arith.select %39, %37, %41 : vector<8x512xi1>, vector<8x512xf32>
    %c0_25 = arith.constant 0 : index
    %c0_26 = arith.constant 0 : index
    %43 = vector.load %arg9[%c0_25, %c0_26] : memref<512x256xi8, #tpu.memory_space<vmem>>, vector<512x256xi8>
    %44 = arith.sitofp %43 : vector<512x256xi8> to vector<512x256xf32>
    %45 = arith.truncf %44 : vector<512x256xf32> to vector<512x256xbf16>
    %46 = arith.truncf %42 : vector<8x512xf32> to vector<8x512xbf16>
    %cst_27 = arith.constant dense<0.000000e+00> : vector<8x256xf32>
    %47 = tpu.matmul %46, %45, %cst_27 {dimension_numbers = #tpu.dot_dimension_numbers<[1], [0], [0], [1], [0, 0, 1, 1], [], []>} : vector<8x512xbf16>, vector<512x256xbf16>, vector<8x256xf32> -> vector<8x256xf32>
    %c0_28 = arith.constant 0 : index
    %c0_29 = arith.constant 0 : index
    %48 = vector.load %arg10[%c0_28, %c0_29] : memref<1x256xf32, #tpu.memory_space<vmem>>, vector<1x256xf32>
    %49 = vector.broadcast %48 : vector<1x256xf32> to vector<8x256xf32>
    %50 = arith.mulf %47, %49 : vector<8x256xf32>
    %c0_30 = arith.constant 0 : index
    %c0_31 = arith.constant 0 : index
    %51 = vector.load %arg11[%c0_30, %c0_31] : memref<1x256xf32, #tpu.memory_space<vmem>>, vector<1x256xf32>
    %52 = vector.broadcast %51 : vector<1x256xf32> to vector<8x256xf32>
    %53 = arith.addf %50, %52 : vector<8x256xf32>
    %cst_32 = arith.constant 0.000000e+00 : f32
    %54 = vector.broadcast %cst_32 : f32 to vector<8x256xf32>
    %55 = arith.cmpf ogt, %53, %54 : vector<8x256xf32>
    %cst_33 = arith.constant 2.000000e-01 : f32
    %56 = vector.broadcast %cst_33 : f32 to vector<8x256xf32>
    %57 = arith.mulf %56, %53 : vector<8x256xf32>
    %58 = arith.select %55, %53, %57 : vector<8x256xi1>, vector<8x256xf32>
    %c0_34 = arith.constant 0 : index
    %c0_35 = arith.constant 0 : index
    %59 = vector.load %arg12[%c0_34, %c0_35] : memref<256x128xf32, #tpu.memory_space<vmem>>, vector<256x128xf32>
    %cst_36 = arith.constant dense<0.000000e+00> : vector<8x128xf32>
    %60 = tpu.matmul %58, %59, %cst_36 {dimension_numbers = #tpu.dot_dimension_numbers<[1], [0], [0], [1], [0, 0, 1, 1], [], []>} : vector<8x256xf32>, vector<256x128xf32>, vector<8x128xf32> -> vector<8x128xf32>
    %c0_37 = arith.constant 0 : index
    %c0_38 = arith.constant 0 : index
    %61 = vector.load %arg13[%c0_37, %c0_38] : memref<1x128xf32, #tpu.memory_space<vmem>>, vector<1x128xf32>
    %62 = vector.broadcast %61 : vector<1x128xf32> to vector<8x128xf32>
    %63 = arith.addf %60, %62 : vector<8x128xf32>
    %64 = arith.negf %63 : vector<8x128xf32>
    %65 = math.exp %64 : vector<8x128xf32>
    %cst_39 = arith.constant 1.000000e+00 : f32
    %66 = vector.broadcast %cst_39 : f32 to vector<8x128xf32>
    %67 = arith.addf %66, %65 : vector<8x128xf32>
    %68 = arith.divf %66, %67 : vector<8x128xf32>
    %c0_40 = arith.constant 0 : index
    %c0_41 = arith.constant 0 : index
    %69 = vector.load %arg14[%c0_40, %c0_41] : memref<8x128xf32, #tpu.memory_space<vmem>>, vector<8x128xf32>
    tpu.vector_store %arg14[%c0_40, %c0_41], %68 {strides = array<i32>} : memref<8x128xf32, #tpu.memory_space<vmem>>, vector<8x128xf32>,
    return
  }
}

</mosaic_0001>

<bundles_post_ra>
// kernel: tpu_custom_call.1
= control target key start
LH: loop header
LB: loop body
LE: loop exit
PB: predicated region body
PF: predicated region fallthrough
CT: control target
= control target key end

     0   :  { %19 = vsyncpa [#allocation3], 0  ;;  %s6712_s0 = inlined_call_operand.hbm [shape: bf16[8,768], index: 0, kind: input, shape index: {}]   ;;  %s6713_s1 = inlined_call_operand.vmem [shape: s32[8,1], index: 1, kind: input, shape index: {}]   ;;  %s6714_s2 = inlined_call_operand.hbm [shape: bf16[16,1024], index: 2, kind: input, shape index: {}]   ;;  %s6715_s3 = inlined_call_operand.hbm [shape: s8[768,1024], index: 3, kind: input, shape index: {}]   ;;  %s6716_s4 = inlined_call_operand.vmem [shape: f32[1,1024], index: 4, kind: input, shape index: {}]   ;;  %s6717_s5 = inlined_call_operand.hbm [shape: f32[1,1024], index: 5, kind: input, shape index: {}]   ;;  %s6718_s6 = inlined_call_operand.hbm [shape: s8[1024,512], index: 6, kind: input, shape index: {}]   ;;  %s6719_s7 = inlined_call_operand.vmem [shape: f32[1,512], index: 7, kind: input, shape index: {}]   ;;  %s6720_s8 = inlined_call_operand.vmem [shape: f32[1,512], index: 8, kind: input, shape index: {}]   ;;  %s6721_s9 = inlined_call_operand.hbm [shape: s8[512,256], index: 9, kind: input, shape index: {}]   ;;  %s6722_s10 = inlined_call_operand.vmem [shape: f32[1,256], index: 10, kind: input, shape index: {}]   ;;  %s6723_s11 = inlined_call_operand.hbm [shape: f32[1,256], index: 11, kind: input, shape index: {}]   ;;  %s6724_s12 = inlined_call_operand.hbm [shape: f32[256,128], index: 12, kind: input, shape index: {}]   ;;  %s6725_s13 = inlined_call_operand.vmem [shape: f32[1,128], index: 13, kind: input, shape index: {}]   ;;  %s6726_s14 = inlined_call_operand.hbm [shape: f32[8,128], index: 14, kind: output, shape index: {}]  }
   0x1   :  { %20 = vsyncpa [#allocation6], 0 }
   0x2   :  { %21 = vsyncpa [#allocation9], 0 }
   0x3   :  { %22 = vsyncpa [#allocation12], 0 }
   0x4   :  { %23 = vsyncpa [#allocation15], 0  ;;  %s42_s15 = sshll.u32 %s6714_s2, 4  ;;  %s43_s15 = int_to_ptr.hbm [resolvable:$true] %s42_s15 }
   0x5   :  { %24 = vsyncpa [#allocation4], 0  ;;  %s5952_s16 = smov [#allocation5]   ;;  %s71_s20 = sshll.u32 %s6717_s5, 4  ;;  %s72_s20 = int_to_ptr.hbm [resolvable:$true] %s71_s20 }
   0x6   :  { %s44_s17 = sshll.u32 %s5952_s16, 4  ;;  %s5953_s21 = smov 512   ;;  %s45_s17 = int_to_ptr.vmem [resolvable:$true] %s44_s17 }
   0x7   :  { %s5954_s22 = smov 32   ;;  %s5955_s23 = smov [#allocation8]  }
   0x8   :  { %50 = dma.hbm_to_vmem [thread:$0]  %s43_s15, 1024, %s45_s17, [#allocation6], %s5953_s21, %s5953_s21, %s5954_s22  }
   0x9   :  { %s73_s24 = sshll.u32 %s5955_s23, 4  ;;  %s98_s26 = sshll.u32 %s6721_s9, 4  ;;  %s74_s24 = int_to_ptr.vmem [resolvable:$true] %s73_s24  ;;  %s99_s26 = int_to_ptr.hbm [resolvable:$true] %s98_s26 }
   0xa   :  { %76 = dma.hbm_to_vmem [thread:$0]  %s72_s20, 128, %s74_s24, [#allocation9]  }
   0xb   :  { %s5956_s27 = smov [#allocation11]   ;;  %s30_s30 = sshll.u32 %s6712_s0, 4  ;;  %s31_s30 = int_to_ptr.hbm [resolvable:$true] %s30_s30 }
   0xc   :  { %s100_s28 = sshll.u32 %s5956_s27, 4  ;;  %s5957_s16 = smov 256   ;;  %s101_s28 = int_to_ptr.vmem [resolvable:$true] %s100_s28 }
   0xd   :  { %s5958_s18 = smov 16   ;;  %s5959_s15 = smov [#allocation2]  }
   0xe   :  { %106 = dma.hbm_to_vmem [thread:$0]  %s99_s26, 4096, %s101_s28, [#allocation12], %s5957_s16, %s5957_s16, %s5958_s18  }
   0xf   :  { %s32_s17 = sshll.u32 %s5959_s15, 4  ;;  %s55_s9 = sshll.u32 %s6715_s3, 4  ;;  %s33_s17 = int_to_ptr.vmem [resolvable:$true] %s32_s17  ;;  %s56_s9 = int_to_ptr.hbm [resolvable:$true] %s55_s9 }
  0x10   :  { %35 = dma.hbm_to_vmem [thread:$0]  %s31_s30, 384, %s33_s17, [#allocation3]  }
  0x11   :  { %s5960_s20 = smov [#allocation7]   ;;  %s81_s0 = sshll.u32 %s6718_s6, 4  ;;  %s82_s0 = int_to_ptr.hbm [resolvable:$true] %s81_s0 }
  0x12   :  { %s57_s24 = sshll.u32 %s5960_s20, 4  ;;  %s5961_s27 = smov 1024   ;;  %s58_s24 = int_to_ptr.vmem [resolvable:$true] %s57_s24 }
  0x13   :  { %s5962_s5 = smov 64   ;;  %s5963_s26 = smov [#allocation10]  }
  0x14   :  { %63 = dma.hbm_to_vmem [thread:$0]  %s56_s9, 24576, %s58_s24, [#allocation6], %s5961_s27, %s5961_s27, %s5962_s5  }
  0x15   :  { %s83_s28 = sshll.u32 %s5963_s26, 4  ;;  %s114_s3 = sshll.u32 %s6723_s11, 4  ;;  %s84_s28 = int_to_ptr.vmem [resolvable:$true] %s83_s28  ;;  %s115_s3 = int_to_ptr.hbm [resolvable:$true] %s114_s3 }
  0x16   :  { %89 = dma.hbm_to_vmem [thread:$0]  %s82_s0, 16384, %s84_s28, [#allocation9], %s5953_s21, %s5953_s21, %s5954_s22  }
  0x17   :  { %s124_s6 = sshll.u32 %s6724_s12, 4  ;;  %s5964_s15 = smov [#allocation13]   ;;  %s125_s6 = int_to_ptr.hbm [resolvable:$true] %s124_s6 }
  0x18   :  { %s116_s17 = sshll.u32 %s5964_s15, 4  ;;  %s5965_s19 = smov [#allocation14]   ;;  %s117_s17 = int_to_ptr.vmem [resolvable:$true] %s116_s17 }
  0x19   :  { %119 = dma.hbm_to_vmem [thread:$0]  %s115_s3, 32, %s117_s17, [#allocation12]  }
  0x1a   :  { %s126_s23 = sshll.u32 %s5965_s19, 4  ;;  %s5966_s9 = smov 128   ;;  %s127_s23 = int_to_ptr.vmem [resolvable:$true] %s126_s23 }
  0x1b   :  { %s5967_s11 = smov 8  }
  0x1c   :  { %132 = dma.hbm_to_vmem [thread:$0]  %s125_s6, 4096, %s127_s23, [#allocation15], %s5966_s9, %s5966_s9, %s5967_s11  }
  0x1d   :  { %5940 = dma.done.wait [#allocation3], 384  }
  0x1e   :  { %5941 = vsyncadd [#allocation3], 4294966912 }
  0x1f   :  { %5942 = dma.done.wait [#allocation6], 25600  }
  0x20   :  { %5943 = vsyncadd [#allocation6], 4294941696 }
  0x21   :  { %5944 = dma.done.wait [#allocation9], 16512  }
  0x22   :  { %5945 = vsyncadd [#allocation9], 4294950784 }
  0x23   :  { %5946 = dma.done.wait [#allocation12], 4128  }
  0x24   :  { %5947 = vsyncadd [#allocation12], 4294963168 }
  0x25   :  { %5948 = dma.done.wait [#allocation15], 4096  }
  0x26   :  { %5949 = vsyncadd [#allocation15], 4294963200  ;;  %v204_v0 = vld [vmem:[#allocation7 + $0xc0] sm:$0xff]  ;;  %vm3011_vm1 = vcmask 130048   ;;  %s5970_s28 = smov [#allocation16]   ;;  %s5634_s3 = sshll.u32 %s6726_s14, 4  ;;  %s5635_s3 = int_to_ptr.hbm [resolvable:$true] %s5634_s3 }
  0x27   :  { %v236_v1 = vld [vmem:[#allocation7 + $0x1c0] sm:$0xff]  ;;  %v484_v3 = vunpack.c.2.s8 %v204_v0  ;;  %v492_v4 = vunpack.c.3.s8 %v204_v0  ;;  %v468_v22 = vunpack.c.0.s8 %v204_v0  ;;  %v476_v23 = vunpack.c.1.s8 %v204_v0  ;;  %s5632_s29 = sshll.u32 %s5970_s28, 4  ;;  %s5633_s29 = int_to_ptr.vmem [resolvable:$true] %s5632_s29 }
  0x28   :  { %v268_v2 = vld [vmem:[#allocation7 + $0x2c0] sm:$0xff]  ;;  %v612_v5 = vunpack.c.2.s8 %v236_v1  ;;  %v620_v6 = vunpack.c.3.s8 %v236_v1  ;;  %v596_v26 = vunpack.c.0.s8 %v236_v1  ;;  %v604_v27 = vunpack.c.1.s8 %v236_v1 }
  0x29   :  { %v300_v7 = vld [vmem:[#allocation7 + $0x3c0] sm:$0xff]  ;;  %v740_v8 = vunpack.c.2.s8 %v268_v2  ;;  %v748_v9 = vunpack.c.3.s8 %v268_v2  ;;  %v1252_v12 = vcvt.s32.f32 %v484_v3  ;;  %v1260_v13 = vcvt.s32.f32 %v492_v4 }
  0x2a   :  { %v868_v10 = vunpack.c.2.s8 %v300_v7  ;;  %v876_v11 = vunpack.c.3.s8 %v300_v7  ;;  %v1380_v14 = vcvt.s32.f32 %v612_v5  ;;  %v1388_v15 = vcvt.s32.f32 %v620_v6  ;;  %v196_v28 = vld [vmem:[#allocation7 + $0x80] sm:$0xff] }
  0x2b   :  { %v1508_v16 = vcvt.s32.f32 %v740_v8  ;;  %v1516_v17 = vcvt.s32.f32 %v748_v9  ;;  %v1964_v20 = vpack.c.bf16 %v1260_v13, %v1252_v12  ;;  %v1236_v29 = vcvt.s32.f32 %v468_v22  ;;  %v228_v37 = vld [vmem:[#allocation7 + $0x180] sm:$0xff] }
  0x2c   :  { %v1636_v18 = vcvt.s32.f32 %v868_v10  ;;  %v1644_v19 = vcvt.s32.f32 %v876_v11  ;;  %v2028_v21 = vpack.c.bf16 %v1388_v15, %v1380_v14  ;;  %v1244_v30 = vcvt.s32.f32 %v476_v23  ;;  %v260_v42 = vld [vmem:[#allocation7 + $0x280] sm:$0xff] }
  0x2d   :  { %v2092_v24 = vpack.c.bf16 %v1516_v17, %v1508_v16  ;;  %2313 = vmatpush.bf16.msra.mxu0 %v1964_v20  ;;  %v724_v31 = vunpack.c.0.s8 %v268_v2  ;;  %v732_v32 = vunpack.c.1.s8 %v268_v2  ;;  %v1364_v33 = vcvt.s32.f32 %v596_v26  ;;  %v292_v47 = vld [vmem:[#allocation7 + $0x380] sm:$0xff] }
  0x2e   :  { %v2156_v25 = vpack.c.bf16 %v1644_v19, %v1636_v18  ;;  %2326 = vmatpush.bf16.msra.mxu1 %v2028_v21  ;;  %v1372_v34 = vcvt.s32.f32 %v604_v27  ;;  %v852_v35 = vunpack.c.0.s8 %v300_v7  ;;  %v860_v36 = vunpack.c.1.s8 %v300_v7  ;;  %v188_v8 = vld [vmem:[#allocation7 + $0x40] sm:$0xff] }
  0x2f   :  { %2339 = vmatpush.bf16.msra.mxu2 %v2092_v24  ;;  %v1956_v38 = vpack.c.bf16 %v1244_v30, %v1236_v29  ;;  %v1492_v39 = vcvt.s32.f32 %v724_v31  ;;  %v1500_v40 = vcvt.s32.f32 %v732_v32  ;;  %v452_v41 = vunpack.c.2.s8 %v196_v28  ;;  %v220_v17 = vld [vmem:[#allocation7 + $0x140] sm:$0xff] }
  0x30   :  { %2352 = vmatpush.bf16.msra.mxu3 %v2156_v25  ;;  %v2020_v43 = vpack.c.bf16 %v1372_v34, %v1364_v33  ;;  %v1620_v44 = vcvt.s32.f32 %v852_v35  ;;  %v1628_v45 = vcvt.s32.f32 %v860_v36  ;;  %v460_v46 = vunpack.c.3.s8 %v196_v28  ;;  %v252_v22 = vld [vmem:[#allocation7 + $0x240] sm:$0xff] }
  0x31   :  { %2314 = vmatpush.bf16.msra.mxu0 %v1956_v38  ;;  %v2084_v48 = vpack.c.bf16 %v1500_v40, %v1492_v39  ;;  %v1220_v49 = vcvt.s32.f32 %v452_v41  ;;  %v580_v50 = vunpack.c.2.s8 %v228_v37  ;;  %v588_v51 = vunpack.c.3.s8 %v228_v37  ;;  %v284_v27 = vld [vmem:[#allocation7 + $0x340] sm:$0xff] }
  0x32   :  { %2327 = vmatpush.bf16.msra.mxu1 %v2020_v43  ;;  %v2148_v52 = vpack.c.bf16 %v1628_v45, %v1620_v44  ;;  %v1228_v53 = vcvt.s32.f32 %v460_v46  ;;  %v708_v54 = vunpack.c.2.s8 %v260_v42  ;;  %v716_v55 = vunpack.c.3.s8 %v260_v42 }
  0x33   :  { %2340 = vmatpush.bf16.msra.mxu2 %v2084_v48  ;;  %v1348_v56 = vcvt.s32.f32 %v580_v50  ;;  %v1356_v57 = vcvt.s32.f32 %v588_v51  ;;  %v836_v58 = vunpack.c.2.s8 %v292_v47  ;;  %v844_v59 = vunpack.c.3.s8 %v292_v47 }
  0x34   :  { %2353 = vmatpush.bf16.msra.mxu3 %v2148_v52  ;;  %v1948_v60 = vpack.c.bf16 %v1228_v53, %v1220_v49  ;;  %v1476_v61 = vcvt.s32.f32 %v708_v54  ;;  %v1484_v62 = vcvt.s32.f32 %v716_v55  ;;  %v436_v63 = vunpack.c.0.s8 %v196_v28  ;;  %v180_v52 = vld [vmem:[#allocation7] sm:$0xff] }
  0x35   :  { %v2012_v0 = vpack.c.bf16 %v1356_v57, %v1348_v56  ;;  %v1604_v1 = vcvt.s32.f32 %v836_v58  ;;  %v1612_v2 = vcvt.s32.f32 %v844_v59  ;;  %v444_v3 = vunpack.c.1.s8 %v196_v28 }
  0x36   :  { %2315 = vmatpush.bf16.msra.mxu0 %v1948_v60  ;;  %v2076_v4 = vpack.c.bf16 %v1484_v62, %v1476_v61  ;;  %v1204_v5 = vcvt.s32.f32 %v436_v63  ;;  %v564_v6 = vunpack.c.0.s8 %v228_v37  ;;  %v572_v7 = vunpack.c.1.s8 %v228_v37  ;;  %v212_v61 = vld [vmem:[#allocation7 + $0x100] sm:$0xff] }
  0x37   :  { %2328 = vmatpush.bf16.msra.mxu1 %v2012_v0  ;;  %v2140_v9 = vpack.c.bf16 %v1612_v2, %v1604_v1  ;;  %v1212_v10 = vcvt.s32.f32 %v444_v3  ;;  %v692_v11 = vunpack.c.0.s8 %v260_v42  ;;  %v700_v12 = vunpack.c.1.s8 %v260_v42  ;;  %v244_v2 = vld [vmem:[#allocation7 + $0x200] sm:$0xff] }
  0x38   :  { %2341 = vmatpush.bf16.msra.mxu2 %v2076_v4  ;;  %v1332_v13 = vcvt.s32.f32 %v564_v6  ;;  %v1340_v14 = vcvt.s32.f32 %v572_v7  ;;  %v820_v15 = vunpack.c.0.s8 %v292_v47  ;;  %v828_v16 = vunpack.c.1.s8 %v292_v47  ;;  %v276_v7 = vld [vmem:[#allocation7 + $0x300] sm:$0xff] }
  0x39   :  { %2354 = vmatpush.bf16.msra.mxu3 %v2140_v9  ;;  %v1940_v18 = vpack.c.bf16 %v1212_v10, %v1204_v5  ;;  %v1460_v19 = vcvt.s32.f32 %v692_v11  ;;  %v1468_v20 = vcvt.s32.f32 %v700_v12  ;;  %v420_v21 = vunpack.c.2.s8 %v188_v8 }
  0x3a   :  { %v2004_v23 = vpack.c.bf16 %v1340_v14, %v1332_v13  ;;  %v1588_v24 = vcvt.s32.f32 %v820_v15  ;;  %v1596_v25 = vcvt.s32.f32 %v828_v16  ;;  %v428_v26 = vunpack.c.3.s8 %v188_v8 }
  0x3b   :  { %2316 = vmatpush.bf16.msra.mxu0 %v1940_v18  ;;  %v2068_v28 = vpack.c.bf16 %v1468_v20, %v1460_v19  ;;  %v1188_v29 = vcvt.s32.f32 %v420_v21  ;;  %v548_v30 = vunpack.c.2.s8 %v220_v17  ;;  %v556_v31 = vunpack.c.3.s8 %v220_v17 }
  0x3c   :  { %2329 = vmatpush.bf16.msra.mxu1 %v2004_v23  ;;  %v2132_v32 = vpack.c.bf16 %v1596_v25, %v1588_v24  ;;  %v1196_v33 = vcvt.s32.f32 %v428_v26  ;;  %v676_v34 = vunpack.c.2.s8 %v252_v22  ;;  %v684_v35 = vunpack.c.3.s8 %v252_v22 }
  0x3d   :  { %2342 = vmatpush.bf16.msra.mxu2 %v2068_v28  ;;  %v1316_v36 = vcvt.s32.f32 %v548_v30  ;;  %v1324_v37 = vcvt.s32.f32 %v556_v31  ;;  %v804_v38 = vunpack.c.2.s8 %v284_v27  ;;  %v812_v39 = vunpack.c.3.s8 %v284_v27 }
  0x3e   :  { %2355 = vmatpush.bf16.msra.mxu3 %v2132_v32  ;;  %v1932_v40 = vpack.c.bf16 %v1196_v33, %v1188_v29  ;;  %v1444_v41 = vcvt.s32.f32 %v676_v34  ;;  %v1452_v42 = vcvt.s32.f32 %v684_v35  ;;  %v404_v43 = vunpack.c.0.s8 %v188_v8  ;;  %v332_v32 = vld [vmem:[#allocation7 + $0x4c0] sm:$0xff] }
  0x3f   :  { %v1996_v44 = vpack.c.bf16 %v1324_v37, %v1316_v36  ;;  %v1572_v45 = vcvt.s32.f32 %v804_v38  ;;  %v1580_v46 = vcvt.s32.f32 %v812_v39  ;;  %v412_v47 = vunpack.c.1.s8 %v188_v8 }
  0x40   :  { %2317 = vmatpush.bf16.msra.mxu0 %v1932_v40  ;;  %v2060_v48 = vpack.c.bf16 %v1452_v42, %v1444_v41  ;;  %v1172_v49 = vcvt.s32.f32 %v404_v43  ;;  %v532_v50 = vunpack.c.0.s8 %v220_v17  ;;  %v540_v51 = vunpack.c.1.s8 %v220_v17  ;;  %v364_v41 = vld [vmem:[#allocation7 + $0x5c0] sm:$0xff] }
  0x41   :  { %2330 = vmatpush.bf16.msra.mxu1 %v1996_v44  ;;  %v2124_v53 = vpack.c.bf16 %v1580_v46, %v1572_v45  ;;  %v1180_v54 = vcvt.s32.f32 %v412_v47  ;;  %v660_v55 = vunpack.c.0.s8 %v252_v22  ;;  %v668_v56 = vunpack.c.1.s8 %v252_v22  ;;  %v205_v46 = vld [vmem:[#allocation7 + $0xc8] sm:$0xff] }
  0x42   :  { %2343 = vmatpush.bf16.msra.mxu2 %v2060_v48  ;;  %v1300_v57 = vcvt.s32.f32 %v532_v50  ;;  %v1308_v58 = vcvt.s32.f32 %v540_v51  ;;  %v788_v59 = vunpack.c.0.s8 %v284_v27  ;;  %v796_v60 = vunpack.c.1.s8 %v284_v27  ;;  %v237_v51 = vld [vmem:[#allocation7 + $0x1c8] sm:$0xff] }
  0x43   :  { %2356 = vmatpush.bf16.msra.mxu3 %v2124_v53  ;;  %v1924_v62 = vpack.c.bf16 %v1180_v54, %v1172_v49  ;;  %v1428_v63 = vcvt.s32.f32 %v660_v55  ;;  %v1436_v0 = vcvt.s32.f32 %v668_v56  ;;  %v388_v1 = vunpack.c.2.s8 %v180_v52 }
  0x44   :  { %v1988_v3 = vpack.c.bf16 %v1308_v58, %v1300_v57  ;;  %v1556_v4 = vcvt.s32.f32 %v788_v59  ;;  %v1564_v5 = vcvt.s32.f32 %v796_v60  ;;  %v396_v6 = vunpack.c.3.s8 %v180_v52 }
  0x45   :  { %2318 = vmatpush.bf16.msra.mxu0 %v1924_v62  ;;  %v2052_v8 = vpack.c.bf16 %v1436_v0, %v1428_v63  ;;  %v1156_v9 = vcvt.s32.f32 %v388_v1  ;;  %v516_v10 = vunpack.c.2.s8 %v212_v61  ;;  %v524_v11 = vunpack.c.3.s8 %v212_v61 }
  0x46   :  { %2331 = vmatpush.bf16.msra.mxu1 %v1988_v3  ;;  %v2116_v12 = vpack.c.bf16 %v1564_v5, %v1556_v4  ;;  %v1164_v13 = vcvt.s32.f32 %v396_v6  ;;  %v644_v14 = vunpack.c.2.s8 %v244_v2  ;;  %v652_v15 = vunpack.c.3.s8 %v244_v2 }
  0x47   :  { %2344 = vmatpush.bf16.msra.mxu2 %v2052_v8  ;;  %v1284_v16 = vcvt.s32.f32 %v516_v10  ;;  %v1292_v17 = vcvt.s32.f32 %v524_v11  ;;  %v772_v18 = vunpack.c.2.s8 %v276_v7  ;;  %v780_v19 = vunpack.c.3.s8 %v276_v7 }
  0x48   :  { %2357 = vmatpush.bf16.msra.mxu3 %v2116_v12  ;;  %v1916_v20 = vpack.c.bf16 %v1164_v13, %v1156_v9  ;;  %v1412_v21 = vcvt.s32.f32 %v644_v14  ;;  %v1420_v22 = vcvt.s32.f32 %v652_v15  ;;  %v372_v23 = vunpack.c.0.s8 %v180_v52  ;;  %v324_v12 = vld [vmem:[#allocation7 + $0x480] sm:$0xff] }
  0x49   :  { %v1980_v24 = vpack.c.bf16 %v1292_v17, %v1284_v16  ;;  %v1540_v25 = vcvt.s32.f32 %v772_v18  ;;  %v1548_v26 = vcvt.s32.f32 %v780_v19  ;;  %v380_v27 = vunpack.c.1.s8 %v180_v52 }
  0x4a   :  { %2319 = vmatpush.bf16.msra.mxu0 %v1916_v20  ;;  %v2044_v28 = vpack.c.bf16 %v1420_v22, %v1412_v21  ;;  %v1140_v29 = vcvt.s32.f32 %v372_v23  ;;  %v500_v30 = vunpack.c.0.s8 %v212_v61  ;;  %v508_v31 = vunpack.c.1.s8 %v212_v61  ;;  %v356_v21 = vld [vmem:[#allocation7 + $0x580] sm:$0xff] }
  0x4b   :  { %2332 = vmatpush.bf16.msra.mxu1 %v1980_v24  ;;  %v2108_v33 = vpack.c.bf16 %v1548_v26, %v1540_v25  ;;  %v1148_v34 = vcvt.s32.f32 %v380_v27  ;;  %v628_v35 = vunpack.c.0.s8 %v244_v2  ;;  %v636_v36 = vunpack.c.1.s8 %v244_v2  ;;  %v197_v26 = vld [vmem:[#allocation7 + $0x88] sm:$0xff] }
  0x4c   :  { %2345 = vmatpush.bf16.msra.mxu2 %v2044_v28  ;;  %v1268_v37 = vcvt.s32.f32 %v500_v30  ;;  %v1276_v38 = vcvt.s32.f32 %v508_v31  ;;  %v756_v39 = vunpack.c.0.s8 %v276_v7  ;;  %v764_v40 = vunpack.c.1.s8 %v276_v7  ;;  %v229_v31 = vld [vmem:[#allocation7 + $0x188] sm:$0xff] }
  0x4d   :  { %2358 = vmatpush.bf16.msra.mxu3 %v2108_v33  ;;  %v1908_v42 = vpack.c.bf16 %v1148_v34, %v1140_v29  ;;  %v1396_v43 = vcvt.s32.f32 %v628_v35  ;;  %v1404_v44 = vcvt.s32.f32 %v636_v36  ;;  %v996_v45 = vunpack.c.2.s8 %v332_v32 }
  0x4e   :  { %v1972_v47 = vpack.c.bf16 %v1276_v38, %v1268_v37  ;;  %v1524_v48 = vcvt.s32.f32 %v756_v39  ;;  %v1532_v49 = vcvt.s32.f32 %v764_v40  ;;  %v1004_v50 = vunpack.c.3.s8 %v332_v32 }
  0x4f   :  { %2320 = vmatpush.bf16.msra.mxu0 %v1908_v42  ;;  %v2036_v52 = vpack.c.bf16 %v1404_v44, %v1396_v43  ;;  %v1764_v53 = vcvt.s32.f32 %v996_v45  ;;  %v1124_v54 = vunpack.c.2.s8 %v364_v41  ;;  %v1132_v55 = vunpack.c.3.s8 %v364_v41 }
  0x50   :  { %2333 = vmatpush.bf16.msra.mxu1 %v1972_v47  ;;  %v2100_v56 = vpack.c.bf16 %v1532_v49, %v1524_v48  ;;  %v1772_v57 = vcvt.s32.f32 %v1004_v50  ;;  %v485_v58 = vunpack.c.2.s8 %v205_v46  ;;  %v493_v59 = vunpack.c.3.s8 %v205_v46 }
  0x51   :  { %2346 = vmatpush.bf16.msra.mxu2 %v2036_v52  ;;  %v1892_v60 = vcvt.s32.f32 %v1124_v54  ;;  %v1900_v61 = vcvt.s32.f32 %v1132_v55  ;;  %v613_v62 = vunpack.c.2.s8 %v237_v51  ;;  %v621_v63 = vunpack.c.3.s8 %v237_v51 }
  0x52   :  { %2359 = vmatpush.bf16.msra.mxu3 %v2100_v56  ;;  %v2220_v0 = vpack.c.bf16 %v1772_v57, %v1764_v53  ;;  %v1253_v1 = vcvt.s32.f32 %v485_v58  ;;  %v1261_v2 = vcvt.s32.f32 %v493_v59  ;;  %v980_v3 = vunpack.c.0.s8 %v332_v32  ;;  %v316_v56 = vld [vmem:[#allocation7 + $0x440] sm:$0xff] }
  0x53   :  { %v2284_v4 = vpack.c.bf16 %v1900_v61, %v1892_v60  ;;  %v1381_v5 = vcvt.s32.f32 %v613_v62  ;;  %v1389_v6 = vcvt.s32.f32 %v621_v63  ;;  %v988_v7 = vunpack.c.1.s8 %v332_v32 }
  0x54   :  { %2365 = vmatpush.bf16.msrb.mxu0 %v2220_v0  ;;  %v1965_v8 = vpack.c.bf16 %v1261_v2, %v1253_v1  ;;  %v1748_v9 = vcvt.s32.f32 %v980_v3  ;;  %v1108_v10 = vunpack.c.0.s8 %v364_v41  ;;  %v1116_v11 = vunpack.c.1.s8 %v364_v41  ;;  %v348_v1 = vld [vmem:[#allocation7 + $0x540] sm:$0xff] }
  0x55   :  { %2378 = vmatpush.bf16.msrb.mxu1 %v2284_v4  ;;  %v2029_v13 = vpack.c.bf16 %v1389_v6, %v1381_v5  ;;  %v1756_v14 = vcvt.s32.f32 %v988_v7  ;;  %v469_v15 = vunpack.c.0.s8 %v205_v46  ;;  %v477_v16 = vunpack.c.1.s8 %v205_v46  ;;  %v189_v6 = vld [vmem:[#allocation7 + $0x48] sm:$0xff] }
  0x56   :  { %2391 = vmatpush.bf16.msrb.mxu2 %v1965_v8  ;;  %v1876_v17 = vcvt.s32.f32 %v1108_v10  ;;  %v1884_v18 = vcvt.s32.f32 %v1116_v11  ;;  %v597_v19 = vunpack.c.0.s8 %v237_v51  ;;  %v605_v20 = vunpack.c.1.s8 %v237_v51  ;;  %v221_v11 = vld [vmem:[#allocation7 + $0x148] sm:$0xff] }
  0x57   :  { %2404 = vmatpush.bf16.msrb.mxu3 %v2029_v13  ;;  %v2212_v22 = vpack.c.bf16 %v1756_v14, %v1748_v9  ;;  %v1237_v23 = vcvt.s32.f32 %v469_v15  ;;  %v1245_v24 = vcvt.s32.f32 %v477_v16  ;;  %v964_v25 = vunpack.c.2.s8 %v324_v12 }
  0x58   :  { %v2276_v27 = vpack.c.bf16 %v1884_v18, %v1876_v17  ;;  %v1365_v28 = vcvt.s32.f32 %v597_v19  ;;  %v1373_v29 = vcvt.s32.f32 %v605_v20  ;;  %v972_v30 = vunpack.c.3.s8 %v324_v12 }
  0x59   :  { %2366 = vmatpush.bf16.msrb.mxu0 %v2212_v22  ;;  %v1957_v32 = vpack.c.bf16 %v1245_v24, %v1237_v23  ;;  %v1732_v33 = vcvt.s32.f32 %v964_v25  ;;  %v1092_v34 = vunpack.c.2.s8 %v356_v21  ;;  %v1100_v35 = vunpack.c.3.s8 %v356_v21 }
  0x5a   :  { %2379 = vmatpush.bf16.msrb.mxu1 %v2276_v27  ;;  %v2021_v36 = vpack.c.bf16 %v1373_v29, %v1365_v28  ;;  %v1740_v37 = vcvt.s32.f32 %v972_v30  ;;  %v453_v38 = vunpack.c.2.s8 %v197_v26  ;;  %v461_v39 = vunpack.c.3.s8 %v197_v26 }
  0x5b   :  { %2392 = vmatpush.bf16.msrb.mxu2 %v1957_v32  ;;  %v1860_v40 = vcvt.s32.f32 %v1092_v34  ;;  %v1868_v41 = vcvt.s32.f32 %v1100_v35  ;;  %v581_v42 = vunpack.c.2.s8 %v229_v31  ;;  %v589_v43 = vunpack.c.3.s8 %v229_v31 }
  0x5c   :  { %2405 = vmatpush.bf16.msrb.mxu3 %v2021_v36  ;;  %v2204_v44 = vpack.c.bf16 %v1740_v37, %v1732_v33  ;;  %v1221_v45 = vcvt.s32.f32 %v453_v38  ;;  %v1229_v46 = vcvt.s32.f32 %v461_v39  ;;  %v948_v47 = vunpack.c.0.s8 %v324_v12  ;;  %v169_v36 = vld [vmem:[#allocation2 + $0x8] sm:$0xff] }
  0x5d   :  { %v2268_v48 = vpack.c.bf16 %v1868_v41, %v1860_v40  ;;  %v1349_v49 = vcvt.s32.f32 %v581_v42  ;;  %v1357_v50 = vcvt.s32.f32 %v589_v43  ;;  %v956_v51 = vunpack.c.1.s8 %v324_v12  ;;  %v168_v41 = vld [vmem:[#allocation2] sm:$0xff] }
  0x5e   :  { %2367 = vmatpush.bf16.msrb.mxu0 %v2204_v44  ;;  %v1949_v52 = vpack.c.bf16 %v1229_v46, %v1221_v45  ;;  %v1716_v53 = vcvt.s32.f32 %v948_v47  ;;  %v1076_v54 = vunpack.c.0.s8 %v356_v21  ;;  %v1084_v55 = vunpack.c.1.s8 %v356_v21  ;;  %v308_v46 = vld [vmem:[#allocation7 + $0x400] sm:$0xff] }
  0x5f   :  { %2380 = vmatpush.bf16.msrb.mxu1 %v2268_v48  ;;  %v2013_v57 = vpack.c.bf16 %v1357_v50, %v1349_v49  ;;  %v1724_v58 = vcvt.s32.f32 %v956_v51  ;;  %v437_v59 = vunpack.c.0.s8 %v197_v26  ;;  %v445_v60 = vunpack.c.1.s8 %v197_v26  ;;  %v340_v51 = vld [vmem:[#allocation7 + $0x500] sm:$0xff] }
  0x60   :  { %2393 = vmatpush.bf16.msrb.mxu2 %v1949_v52  ;;  %v1844_v61 = vcvt.s32.f32 %v1076_v54  ;;  %v1852_v62 = vcvt.s32.f32 %v1084_v55  ;;  %v565_v63 = vunpack.c.0.s8 %v229_v31  ;;  %v573_v0 = vunpack.c.1.s8 %v229_v31 }
  0x61   :  { %2406 = vmatpush.bf16.msrb.mxu3 %v2013_v57  ;;  %v2196_v2 = vpack.c.bf16 %v1724_v58, %v1716_v53  ;;  %v1205_v3 = vcvt.s32.f32 %v437_v59  ;;  %v1213_v4 = vcvt.s32.f32 %v445_v60  ;;  %v932_v5 = vunpack.c.2.s8 %v316_v56 }
  0x62   :  { %v2260_v7 = vpack.c.bf16 %v1852_v62, %v1844_v61  ;;  %v1333_v8 = vcvt.s32.f32 %v565_v63  ;;  %v1341_v9 = vcvt.s32.f32 %v573_v0  ;;  %v940_v10 = vunpack.c.3.s8 %v316_v56  ;;  %v213_v61 = vld [vmem:[#allocation7 + $0x108] sm:$0xff] }
  0x63   :  { %2368 = vmatpush.bf16.msrb.mxu0 %v2196_v2  ;;  %v1941_v12 = vpack.c.bf16 %v1213_v4, %v1205_v3  ;;  %v1700_v13 = vcvt.s32.f32 %v932_v5  ;;  %v1060_v14 = vunpack.c.2.s8 %v348_v1  ;;  %v1068_v15 = vunpack.c.3.s8 %v348_v1 }
  0x64   :  { %2381 = vmatpush.bf16.msrb.mxu1 %v2260_v7  ;;  %v2005_v16 = vpack.c.bf16 %v1341_v9, %v1333_v8  ;;  %v1708_v17 = vcvt.s32.f32 %v940_v10  ;;  %v421_v18 = vunpack.c.2.s8 %v189_v6  ;;  %v429_v19 = vunpack.c.3.s8 %v189_v6 }
  0x65   :  { %2394 = vmatpush.bf16.msrb.mxu2 %v1941_v12  ;;  %v1828_v20 = vcvt.s32.f32 %v1060_v14  ;;  %v1836_v21 = vcvt.s32.f32 %v1068_v15  ;;  %v549_v22 = vunpack.c.2.s8 %v221_v11  ;;  %v557_v23 = vunpack.c.3.s8 %v221_v11 }
  0x66   :  { %2407 = vmatpush.bf16.msrb.mxu3 %v2005_v16  ;;  %v2188_v24 = vpack.c.bf16 %v1708_v17, %v1700_v13  ;;  %v1189_v25 = vcvt.s32.f32 %v421_v18  ;;  %v1197_v26 = vcvt.s32.f32 %v429_v19  ;;  %v916_v27 = vunpack.c.0.s8 %v316_v56 }
  0x67   :  { %v2252_v28 = vpack.c.bf16 %v1836_v21, %v1828_v20  ;;  %v1317_v29 = vcvt.s32.f32 %v549_v22  ;;  %v1325_v30 = vcvt.s32.f32 %v557_v23  ;;  %v924_v31 = vunpack.c.1.s8 %v316_v56  ;;  %v181_v56 = vld [vmem:[#allocation7 + $0x8] sm:$0xff] }
  0x68   :  { %2369 = vmatpush.bf16.msrb.mxu0 %v2188_v24  ;;  %v1933_v32 = vpack.c.bf16 %v1197_v26, %v1189_v25  ;;  %v1684_v33 = vcvt.s32.f32 %v916_v27  ;;  %v1044_v34 = vunpack.c.0.s8 %v348_v1  ;;  %v1052_v35 = vunpack.c.1.s8 %v348_v1  ;;  %v269_v26 = vld [vmem:[#allocation7 + $0x2c8] sm:$0xff] }
  0x69   :  { %2382 = vmatpush.bf16.msrb.mxu1 %v2252_v28  ;;  %v1997_v37 = vpack.c.bf16 %v1325_v30, %v1317_v29  ;;  %v1692_v38 = vcvt.s32.f32 %v924_v31  ;;  %v405_v39 = vunpack.c.0.s8 %v189_v6  ;;  %v413_v40 = vunpack.c.1.s8 %v189_v6 }
  0x6a   :  { %2395 = vmatpush.bf16.msrb.mxu2 %v1933_v32  ;;  %v1812_v42 = vcvt.s32.f32 %v1044_v34  ;;  %v1820_v43 = vcvt.s32.f32 %v1052_v35  ;;  %v533_v44 = vunpack.c.0.s8 %v221_v11  ;;  %v541_v45 = vunpack.c.1.s8 %v221_v11  ;;  %v301_v35 = vld [vmem:[#allocation7 + $0x3c8] sm:$0xff] }
  0x6b   :  { %2408 = vmatpush.bf16.msrb.mxu3 %v1997_v37  ;;  %v2180_v47 = vpack.c.bf16 %v1692_v38, %v1684_v33  ;;  %v1173_v48 = vcvt.s32.f32 %v405_v39  ;;  %v1181_v49 = vcvt.s32.f32 %v413_v40  ;;  %v2297_v50 = vunpack.c.l.b16 %v169_v36  ;;  %v333_v40 = vld [vmem:[#allocation7 + $0x4c8] sm:$0xff] }
  0x6c   :  { %v2244_v52 = vpack.c.bf16 %v1820_v43, %v1812_v42  ;;  %v1301_v53 = vcvt.s32.f32 %v533_v44  ;;  %v1309_v54 = vcvt.s32.f32 %v541_v45  ;;  %v2295_v55 = vunpack.c.l.b16 %v168_v41  ;;  %v365_v45 = vld [vmem:[#allocation7 + $0x5c8] sm:$0xff] }
  0x6d   :  { %2370 = vmatpush.bf16.msrb.mxu0 %v2180_v47  ;;  %v1925_v57 = vpack.c.bf16 %v1181_v49, %v1173_v48  ;;  %v6076_v58 = vpack.c.b16 %v2297_v50, %v2297_v50  ;;  %v2298_v59 = vunpack.c.h.b16 %v169_v36  ;;  %v900_v60 = vunpack.c.2.s8 %v308_v46 }
  0x6e   :  { %2383 = vmatpush.bf16.msrb.mxu1 %v2244_v52  ;;  %v1989_v62 = vpack.c.bf16 %v1309_v54, %v1301_v53  ;;  %v6078_v63 = vpack.c.b16 %v2295_v55, %v2295_v55  ;;  %v908_v0 = vunpack.c.3.s8 %v308_v46  ;;  %v1028_v1 = vunpack.c.2.s8 %v340_v51 }
  0x6f   :  { %2396 = vmatpush.bf16.msrb.mxu2 %v1925_v57  ;;  %v6080_v2 = vpack.c.b16 %v2298_v59, %v2298_v59  ;;  %v1668_v3 = vcvt.s32.f32 %v900_v60  ;;  %v1036_v4 = vunpack.c.3.s8 %v340_v51  ;;  %v389_v5 = vunpack.c.2.s8 %v181_v56 }
  0x70   :  { %2409 = vmatpush.bf16.msrb.mxu3 %v1989_v62  ;;  %2347 = vmatmul.bf16.vlgmr.msra.gmra.mxu2 %v6076_v58  ;;  %v1676_v6 = vcvt.s32.f32 %v908_v0  ;;  %v1796_v7 = vcvt.s32.f32 %v1028_v1  ;;  %v397_v8 = vunpack.c.3.s8 %v181_v56  ;;  %v517_v9 = vunpack.c.2.s8 %v213_v61 }
  0x71   :  { %2321 = vmatmul.bf16.vlgmr.msra.gmra.mxu0 %v6078_v63  ;;  %2360 = vmatmul.bf16.vlgmr.msra.gmra.mxu3 %v6080_v2  ;;  %v1804_v10 = vcvt.s32.f32 %v1036_v4  ;;  %v1157_v11 = vcvt.s32.f32 %v389_v5  ;;  %v525_v12 = vunpack.c.3.s8 %v213_v61  ;;  %v2296_v13 = vunpack.c.h.b16 %v168_v41 }
  0x72   :  { %v2172_v14 = vpack.c.bf16 %v1676_v6, %v1668_v3  ;;  %v1165_v15 = vcvt.s32.f32 %v397_v8  ;;  %v1285_v16 = vcvt.s32.f32 %v517_v9  ;;  %v884_v17 = vunpack.c.0.s8 %v308_v46  ;;  %v6088_v9 = vld [vmem:[#allocation7 + $0x288] sm:$0xff] }
  0x73   :  { %v2236_v18 = vpack.c.bf16 %v1804_v10, %v1796_v7  ;;  %v1293_v19 = vcvt.s32.f32 %v525_v12  ;;  %v6085_v20 = vpack.c.b16 %v2296_v13, %v2296_v13  ;;  %v892_v21 = vunpack.c.1.s8 %v308_v46 }
  0x74   :  { %2371 = vmatpush.bf16.msrb.mxu0 %v2172_v14  ;;  %v1917_v22 = vpack.c.bf16 %v1165_v15, %v1157_v11  ;;  %v1652_v23 = vcvt.s32.f32 %v884_v17  ;;  %v1012_v24 = vunpack.c.0.s8 %v340_v51  ;;  %v1020_v25 = vunpack.c.1.s8 %v340_v51 }
  0x75   :  { %2384 = vmatpush.bf16.msrb.mxu1 %v2236_v18  ;;  %v1981_v27 = vpack.c.bf16 %v1293_v19, %v1285_v16  ;;  %v1660_v28 = vcvt.s32.f32 %v892_v21  ;;  %v373_v29 = vunpack.c.0.s8 %v181_v56  ;;  %v381_v30 = vunpack.c.1.s8 %v181_v56  ;;  %v293_v18 = vld [vmem:[#allocation7 + $0x388] sm:$0xff] }
  0x76   :  { %2397 = vmatpush.bf16.msrb.mxu2 %v1917_v22  ;;  %2334 = vmatmul.bf16.vlgmr.msra.gmra.mxu1 %v6085_v20  ;;  %v1780_v31 = vcvt.s32.f32 %v1012_v24  ;;  %v1788_v32 = vcvt.s32.f32 %v1020_v25  ;;  %v501_v33 = vunpack.c.0.s8 %v213_v61  ;;  %v509_v34 = vunpack.c.1.s8 %v213_v61  ;;  %v325_v24 = vld [vmem:[#allocation7 + $0x488] sm:$0xff] }
  0x77   :  { %2410 = vmatpush.bf16.msrb.mxu3 %v1981_v27  ;;  %v2164_v36 = vpack.c.bf16 %v1660_v28, %v1652_v23  ;;  %v1141_v37 = vcvt.s32.f32 %v373_v29  ;;  %v1149_v38 = vcvt.s32.f32 %v381_v30  ;;  %v741_v39 = vunpack.c.2.s8 %v269_v26  ;;  %v357_v29 = vld [vmem:[#allocation7 + $0x588] sm:$0xff] }
  0x78   :  { %v2228_v41 = vpack.c.bf16 %v1788_v32, %v1780_v31  ;;  %v1269_v42 = vcvt.s32.f32 %v501_v33  ;;  %v1277_v43 = vcvt.s32.f32 %v509_v34  ;;  %v749_v44 = vunpack.c.3.s8 %v269_v26  ;;  %v170_v34 = vld [vmem:[#allocation2 + $0x10] sm:$0xff] }
  0x79   :  { %2372 = vmatpush.bf16.msrb.mxu0 %v2164_v36  ;;  %v1909_v46 = vpack.c.bf16 %v1149_v38, %v1141_v37  ;;  %v1509_v47 = vcvt.s32.f32 %v741_v39  ;;  %v869_v48 = vunpack.c.2.s8 %v301_v35  ;;  %v877_v49 = vunpack.c.3.s8 %v301_v35 }
  0x7a   :  { %2385 = vmatpush.bf16.msrb.mxu1 %v2228_v41  ;;  %v1973_v50 = vpack.c.bf16 %v1277_v43, %v1269_v42  ;;  %v1517_v51 = vcvt.s32.f32 %v749_v44  ;;  %v997_v52 = vunpack.c.2.s8 %v333_v40  ;;  %v1005_v53 = vunpack.c.3.s8 %v333_v40 }
  0x7b   :  { %2398 = vmatpush.bf16.msrb.mxu2 %v1909_v46  ;;  %v1637_v54 = vcvt.s32.f32 %v869_v48  ;;  %v1645_v55 = vcvt.s32.f32 %v877_v49  ;;  %v1125_v56 = vunpack.c.2.s8 %v365_v45  ;;  %v1133_v57 = vunpack.c.3.s8 %v365_v45 }
  0x7c   :  { %2411 = vmatpush.bf16.msrb.mxu3 %v1973_v50  ;;  %v2093_v59 = vpack.c.bf16 %v1517_v51, %v1509_v47  ;;  %v1765_v60 = vcvt.s32.f32 %v997_v52  ;;  %v1773_v61 = vcvt.s32.f32 %v1005_v53  ;;  %v725_v62 = vunpack.c.0.s8 %v269_v26 }
  0x7d   :  { %v2157_v0 = vpack.c.bf16 %v1645_v55, %v1637_v54  ;;  %v1893_v1 = vcvt.s32.f32 %v1125_v56  ;;  %v1901_v3 = vcvt.s32.f32 %v1133_v57  ;;  %v733_v4 = vunpack.c.1.s8 %v269_v26 }
  0x7e   :  { %2417 = vmatpush.bf16.msra.mxu0 %v2093_v59  ;;  %v2221_v5 = vpack.c.bf16 %v1773_v61, %v1765_v60  ;;  %v1493_v6 = vcvt.s32.f32 %v725_v62  ;;  %v853_v7 = vunpack.c.0.s8 %v301_v35  ;;  %v861_v8 = vunpack.c.1.s8 %v301_v35  ;;  %v253_v60 = vld [vmem:[#allocation7 + $0x248] sm:$0xff] }
  0x7f   :  { %2430 = vmatpush.bf16.msra.mxu1 %v2157_v0  ;;  %v2285_v10 = vpack.c.bf16 %v1901_v3, %v1893_v1  ;;  %v1501_v11 = vcvt.s32.f32 %v733_v4  ;;  %v981_v12 = vunpack.c.0.s8 %v333_v40  ;;  %v989_v13 = vunpack.c.1.s8 %v333_v40 }
  0x80   :  { %2443 = vmatpush.bf16.msra.mxu2 %v2221_v5  ;;  %v1621_v14 = vcvt.s32.f32 %v853_v7  ;;  %v1629_v15 = vcvt.s32.f32 %v861_v8  ;;  %v1109_v16 = vunpack.c.0.s8 %v365_v45  ;;  %v1117_v17 = vunpack.c.1.s8 %v365_v45  ;;  %v285_v7 = vld [vmem:[#allocation7 + $0x348] sm:$0xff] }
  0x81   :  { %2456 = vmatpush.bf16.msra.mxu3 %v2285_v10  ;;  %v2085_v19 = vpack.c.bf16 %v1501_v11, %v1493_v6  ;;  %v1749_v21 = vcvt.s32.f32 %v981_v12  ;;  %v1757_v22 = vcvt.s32.f32 %v989_v13  ;;  %v709_v23 = vunpack.c.2.s8 %v6088_v9  ;;  %2399 = vmatmul.bf16.vlgmr.msrb.gmra.mxu2 %v6078_v63  ;;  %v317_v12 = vld [vmem:[#allocation7 + $0x448] sm:$0xff] }
  0x82   :  { %v2149_v25 = vpack.c.bf16 %v1629_v15, %v1621_v14  ;;  %v1877_v26 = vcvt.s32.f32 %v1109_v16  ;;  %v1885_v27 = vcvt.s32.f32 %v1117_v17  ;;  %v717_v28 = vunpack.c.3.s8 %v6088_v9  ;;  %2412 = vmatmul.bf16.vlgmr.msrb.gmra.mxu3 %v6085_v20  ;;  %v349_v17 = vld [vmem:[#allocation7 + $0x548] sm:$0xff] }
  0x83   :  { %2418 = vmatpush.bf16.msra.mxu0 %v2085_v19  ;;  %v2213_v30 = vpack.c.bf16 %v1757_v22, %v1749_v21  ;;  %v1477_v31 = vcvt.s32.f32 %v709_v23  ;;  %v837_v32 = vunpack.c.2.s8 %v293_v18  ;;  %v845_v33 = vunpack.c.3.s8 %v293_v18 }
  0x84   :  { %2431 = vmatpush.bf16.msra.mxu1 %v2149_v25  ;;  %v2277_v35 = vpack.c.bf16 %v1885_v27, %v1877_v26  ;;  %v1485_v36 = vcvt.s32.f32 %v717_v28  ;;  %v965_v37 = vunpack.c.2.s8 %v325_v24  ;;  %v973_v38 = vunpack.c.3.s8 %v325_v24 }
  0x85   :  { %2444 = vmatpush.bf16.msra.mxu2 %v2213_v30  ;;  %v1605_v39 = vcvt.s32.f32 %v837_v32  ;;  %v1613_v40 = vcvt.s32.f32 %v845_v33  ;;  %v1093_v41 = vunpack.c.2.s8 %v357_v29  ;;  %v1101_v42 = vunpack.c.3.s8 %v357_v29 }
  0x86   :  { %2457 = vmatpush.bf16.msra.mxu3 %v2277_v35  ;;  %v2077_v43 = vpack.c.bf16 %v1485_v36, %v1477_v31  ;;  %v1733_v44 = vcvt.s32.f32 %v965_v37  ;;  %v1741_v45 = vcvt.s32.f32 %v973_v38  ;;  %v2299_v46 = vunpack.c.l.b16 %v170_v34 }
  0x87   :  { %v2141_v47 = vpack.c.bf16 %v1613_v40, %v1605_v39  ;;  %v1861_v48 = vcvt.s32.f32 %v1093_v41  ;;  %v1869_v49 = vcvt.s32.f32 %v1101_v42  ;;  %v2300_v50 = vunpack.c.h.b16 %v170_v34 }
  0x88   :  { %2419 = vmatpush.bf16.msra.mxu0 %v2077_v43  ;;  %v2205_v51 = vpack.c.bf16 %v1741_v45, %v1733_v44  ;;  %v6094_v52 = vpack.c.b16 %v2299_v46, %v2299_v46  ;;  %v693_v53 = vunpack.c.0.s8 %v6088_v9  ;;  %v701_v54 = vunpack.c.1.s8 %v6088_v9  ;;  %v245_v43 = vld [vmem:[#allocation7 + $0x208] sm:$0xff] }
  0x89   :  { %2432 = vmatpush.bf16.msra.mxu1 %v2141_v47  ;;  %v2269_v55 = vpack.c.bf16 %v1869_v49, %v1861_v48  ;;  %v6098_v56 = vpack.c.b16 %v2300_v50, %v2300_v50  ;;  %v821_v57 = vunpack.c.0.s8 %v293_v18  ;;  %v829_v59 = vunpack.c.1.s8 %v293_v18 }
  0x8a   :  { %2445 = vmatpush.bf16.msra.mxu2 %v2205_v51  ;;  %2373 = vmatmul.bf16.vlgmr.msrb.gmra.mxu0 %v6094_v52  ;;  %v1461_v61 = vcvt.s32.f32 %v693_v53  ;;  %v1469_v62 = vcvt.s32.f32 %v701_v54  ;;  %v949_v0 = vunpack.c.0.s8 %v325_v24  ;;  %v957_v1 = vunpack.c.1.s8 %v325_v24  ;;  %v277_v53 = vld [vmem:[#allocation7 + $0x308] sm:$0xff] }
  0x8b   :  { %2458 = vmatpush.bf16.msra.mxu3 %v2269_v55  ;;  %2386 = vmatmul.bf16.vlgmr.msrb.gmra.mxu1 %v6098_v56  ;;  %v1589_v3 = vcvt.s32.f32 %v821_v57  ;;  %v1597_v4 = vcvt.s32.f32 %v829_v59  ;;  %v1077_v5 = vunpack.c.0.s8 %v357_v29  ;;  %v1085_v6 = vunpack.c.1.s8 %v357_v29 }
  0x8c   :  { %v2069_v8 = vpack.c.bf16 %v1469_v62, %v1461_v61  ;;  %v1717_v9 = vcvt.s32.f32 %v949_v0  ;;  %v1725_v10 = vcvt.s32.f32 %v957_v1  ;;  %v677_v11 = vunpack.c.2.s8 %v253_v60 }
  0x8d   :  { %v2133_v13 = vpack.c.bf16 %v1597_v4, %v1589_v3  ;;  %v1845_v14 = vcvt.s32.f32 %v1077_v5  ;;  %v1853_v15 = vcvt.s32.f32 %v1085_v6  ;;  %v685_v16 = vunpack.c.3.s8 %v253_v60  ;;  %v341_v3 = vld [vmem:[#allocation7 + $0x508] sm:$0xff] }
  0x8e   :  { %2420 = vmatpush.bf16.msra.mxu0 %v2069_v8  ;;  %v2197_v18 = vpack.c.bf16 %v1725_v10, %v1717_v9  ;;  %v1445_v19 = vcvt.s32.f32 %v677_v11  ;;  %v805_v21 = vunpack.c.2.s8 %v285_v7  ;;  %v813_v22 = vunpack.c.3.s8 %v285_v7 }
  0x8f   :  { %2433 = vmatpush.bf16.msra.mxu1 %v2133_v13  ;;  %v2261_v23 = vpack.c.bf16 %v1853_v15, %v1845_v14  ;;  %v1453_v24 = vcvt.s32.f32 %v685_v16  ;;  %v933_v25 = vunpack.c.2.s8 %v317_v12  ;;  %v941_v26 = vunpack.c.3.s8 %v317_v12 }
  0x90   :  { %2446 = vmatpush.bf16.msra.mxu2 %v2197_v18  ;;  %v1573_v27 = vcvt.s32.f32 %v805_v21  ;;  %v1581_v28 = vcvt.s32.f32 %v813_v22  ;;  %v1061_v29 = vunpack.c.2.s8 %v349_v17  ;;  %v1069_v30 = vunpack.c.3.s8 %v349_v17 }
  0x91   :  { %2459 = vmatpush.bf16.msra.mxu3 %v2261_v23  ;;  %v2061_v31 = vpack.c.bf16 %v1453_v24, %v1445_v19  ;;  %v1701_v32 = vcvt.s32.f32 %v933_v25  ;;  %v1709_v33 = vcvt.s32.f32 %v941_v26  ;;  %v661_v34 = vunpack.c.0.s8 %v253_v60 }
  0x92   :  { %v2125_v35 = vpack.c.bf16 %v1581_v28, %v1573_v27  ;;  %v1829_v36 = vcvt.s32.f32 %v1061_v29  ;;  %v1837_v37 = vcvt.s32.f32 %v1069_v30  ;;  %v669_v38 = vunpack.c.1.s8 %v253_v60  ;;  %v309_v60 = vld [vmem:[#allocation7 + $0x408] sm:$0xff]  ;;  %v206_v29 = vld [vmem:[#allocation7 + $0xd0] sm:$0xff] }
  0x93   :  { %2421 = vmatpush.bf16.msra.mxu0 %v2061_v31  ;;  %v2189_v39 = vpack.c.bf16 %v1709_v33, %v1701_v32  ;;  %v1429_v40 = vcvt.s32.f32 %v661_v34  ;;  %v789_v41 = vunpack.c.0.s8 %v285_v7  ;;  %v797_v42 = vunpack.c.1.s8 %v285_v7 }
  0x94   :  { %2434 = vmatpush.bf16.msra.mxu1 %v2125_v35  ;;  %v2253_v44 = vpack.c.bf16 %v1837_v37, %v1829_v36  ;;  %v1437_v45 = vcvt.s32.f32 %v669_v38  ;;  %v917_v46 = vunpack.c.0.s8 %v317_v12  ;;  %v925_v47 = vunpack.c.1.s8 %v317_v12  ;;  %v238_v38 = vld [vmem:[#allocation7 + $0x1d0] sm:$0xff] }
  0x95   :  { %2447 = vmatpush.bf16.msra.mxu2 %v2189_v39  ;;  %v1557_v48 = vcvt.s32.f32 %v789_v41  ;;  %v1565_v49 = vcvt.s32.f32 %v797_v42  ;;  %v1045_v50 = vunpack.c.0.s8 %v349_v17  ;;  %v1053_v51 = vunpack.c.1.s8 %v349_v17 }
  0x96   :  { %2460 = vmatpush.bf16.msra.mxu3 %v2253_v44  ;;  %v2053_v54 = vpack.c.bf16 %v1437_v45, %v1429_v40  ;;  %v1685_v55 = vcvt.s32.f32 %v917_v46  ;;  %v1693_v57 = vcvt.s32.f32 %v925_v47  ;;  %v645_v59 = vunpack.c.2.s8 %v245_v43 }
  0x97   :  { %v2117_v61 = vpack.c.bf16 %v1565_v49, %v1557_v48  ;;  %v1813_v62 = vcvt.s32.f32 %v1045_v50  ;;  %v1821_v0 = vcvt.s32.f32 %v1053_v51  ;;  %v653_v1 = vunpack.c.3.s8 %v245_v43  ;;  %v302_v48 = vld [vmem:[#allocation7 + $0x3d0] sm:$0xff] }
  0x98   :  { %2422 = vmatpush.bf16.msra.mxu0 %v2053_v54  ;;  %v2181_v4 = vpack.c.bf16 %v1693_v57, %v1685_v55  ;;  %v1413_v5 = vcvt.s32.f32 %v645_v59  ;;  %v773_v6 = vunpack.c.2.s8 %v277_v53  ;;  %v781_v7 = vunpack.c.3.s8 %v277_v53 }
  0x99   :  { %2435 = vmatpush.bf16.msra.mxu1 %v2117_v61  ;;  %v2245_v8 = vpack.c.bf16 %v1821_v0, %v1813_v62  ;;  %v1421_v9 = vcvt.s32.f32 %v653_v1  ;;  %v901_v10 = vunpack.c.2.s8 %v309_v60  ;;  %v909_v11 = vunpack.c.3.s8 %v309_v60 }
  0x9a   :  { %2448 = vmatpush.bf16.msra.mxu2 %v2181_v4  ;;  %v1541_v12 = vcvt.s32.f32 %v773_v6  ;;  %v1549_v13 = vcvt.s32.f32 %v781_v7  ;;  %v1029_v14 = vunpack.c.2.s8 %v341_v3  ;;  %v1037_v15 = vunpack.c.3.s8 %v341_v3 }
  0x9b   :  { %2461 = vmatpush.bf16.msra.mxu3 %v2245_v8  ;;  %v2045_v16 = vpack.c.bf16 %v1421_v9, %v1413_v5  ;;  %v1669_v17 = vcvt.s32.f32 %v901_v10  ;;  %v1677_v18 = vcvt.s32.f32 %v909_v11  ;;  %v629_v19 = vunpack.c.0.s8 %v245_v43 }
  0x9c   :  { %v2109_v21 = vpack.c.bf16 %v1549_v13, %v1541_v12  ;;  %v1797_v22 = vcvt.s32.f32 %v1029_v14  ;;  %v1805_v23 = vcvt.s32.f32 %v1037_v15  ;;  %v637_v24 = vunpack.c.1.s8 %v245_v43  ;;  %v270_v43 = vld [vmem:[#allocation7 + $0x2d0] sm:$0xff] }
  0x9d   :  { %2423 = vmatpush.bf16.msra.mxu0 %v2045_v16  ;;  %v2173_v25 = vpack.c.bf16 %v1677_v18, %v1669_v17  ;;  %v1397_v26 = vcvt.s32.f32 %v629_v19  ;;  %v757_v27 = vunpack.c.0.s8 %v277_v53  ;;  %v765_v28 = vunpack.c.1.s8 %v277_v53  ;;  %v198_v14 = vld [vmem:[#allocation7 + $0x90] sm:$0xff] }
  0x9e   :  { %2436 = vmatpush.bf16.msra.mxu1 %v2109_v21  ;;  %v2237_v30 = vpack.c.bf16 %v1805_v23, %v1797_v22  ;;  %v1405_v31 = vcvt.s32.f32 %v637_v24  ;;  %v885_v32 = vunpack.c.0.s8 %v309_v60  ;;  %v893_v33 = vunpack.c.1.s8 %v309_v60  ;;  %v230_v24 = vld [vmem:[#allocation7 + $0x190] sm:$0xff] }
  0x9f   :  { %2449 = vmatpush.bf16.msra.mxu2 %v2173_v25  ;;  %v1525_v34 = vcvt.s32.f32 %v757_v27  ;;  %v1533_v35 = vcvt.s32.f32 %v765_v28  ;;  %v1013_v36 = vunpack.c.0.s8 %v341_v3  ;;  %v1021_v37 = vunpack.c.1.s8 %v341_v3 }
  0xa0   :  { %2462 = vmatpush.bf16.msra.mxu3 %v2237_v30  ;;  %v2037_v39 = vpack.c.bf16 %v1405_v31, %v1397_v26  ;;  %v1653_v40 = vcvt.s32.f32 %v885_v32  ;;  %v1661_v41 = vcvt.s32.f32 %v893_v33  ;;  %v486_v42 = vunpack.c.2.s8 %v206_v29 }
  0xa1   :  { %v2101_v44 = vpack.c.bf16 %v1533_v35, %v1525_v34  ;;  %v1781_v45 = vcvt.s32.f32 %v1013_v36  ;;  %v1789_v46 = vcvt.s32.f32 %v1021_v37  ;;  %v494_v47 = vunpack.c.3.s8 %v206_v29  ;;  %v294_v34 = vld [vmem:[#allocation7 + $0x390] sm:$0xff] }
  0xa2   :  { %2424 = vmatpush.bf16.msra.mxu0 %v2037_v39  ;;  %v2165_v49 = vpack.c.bf16 %v1661_v41, %v1653_v40  ;;  %v1254_v50 = vcvt.s32.f32 %v486_v42  ;;  %v614_v51 = vunpack.c.2.s8 %v238_v38  ;;  %v622_v53 = vunpack.c.3.s8 %v238_v38 }
  0xa3   :  { %2437 = vmatpush.bf16.msra.mxu1 %v2101_v44  ;;  %v2229_v54 = vpack.c.bf16 %v1789_v46, %v1781_v45  ;;  %v1262_v55 = vcvt.s32.f32 %v494_v47  ;;  %v742_v57 = vunpack.c.2.s8 %v270_v43  ;;  %v750_v59 = vunpack.c.3.s8 %v270_v43 }
  0xa4   :  { %2450 = vmatpush.bf16.msra.mxu2 %v2165_v49  ;;  %v1382_v60 = vcvt.s32.f32 %v614_v51  ;;  %v1390_v61 = vcvt.s32.f32 %v622_v53  ;;  %v870_v62 = vunpack.c.2.s8 %v302_v48  ;;  %v878_v0 = vunpack.c.3.s8 %v302_v48 }
  0xa5   :  { %2463 = vmatpush.bf16.msra.mxu3 %v2229_v54  ;;  %v1966_v1 = vpack.c.bf16 %v1262_v55, %v1254_v50  ;;  %v1510_v3 = vcvt.s32.f32 %v742_v57  ;;  %v1518_v4 = vcvt.s32.f32 %v750_v59  ;;  %v470_v5 = vunpack.c.0.s8 %v206_v29  ;;  %2425 = vmatmul.bf16.vlgmr.msra.gmra.mxu0 %v6076_v58 }
  0xa6   :  { %v2030_v6 = vpack.c.bf16 %v1390_v61, %v1382_v60  ;;  %v1638_v7 = vcvt.s32.f32 %v870_v62  ;;  %v1646_v8 = vcvt.s32.f32 %v878_v0  ;;  %v478_v9 = vunpack.c.1.s8 %v206_v29  ;;  %2438 = vmatmul.bf16.vlgmr.msra.gmra.mxu1 %v6080_v2  ;;  %v262_v29 = vld [vmem:[#allocation7 + $0x290] sm:$0xff] }
  0xa7   :  { %2469 = vmatpush.bf16.msrb.mxu0 %v1966_v1  ;;  %v2094_v10 = vpack.c.bf16 %v1518_v4, %v1510_v3  ;;  %v1238_v11 = vcvt.s32.f32 %v470_v5  ;;  %v598_v12 = vunpack.c.0.s8 %v238_v38  ;;  %v606_v13 = vunpack.c.1.s8 %v238_v38  ;;  %2451 = vmatmul.bf16.vlgmr.msra.gmra.mxu2 %v6094_v52  ;;  %v190_v62 = vld [vmem:[#allocation7 + $0x50] sm:$0xff] }
  0xa8   :  { %2482 = vmatpush.bf16.msrb.mxu1 %v2030_v6  ;;  %v2158_v15 = vpack.c.bf16 %v1646_v8, %v1638_v7  ;;  %v1246_v16 = vcvt.s32.f32 %v478_v9  ;;  %v726_v17 = vunpack.c.0.s8 %v270_v43  ;;  %v734_v18 = vunpack.c.1.s8 %v270_v43  ;;  %2464 = vmatmul.bf16.vlgmr.msra.gmra.mxu3 %v6098_v56  ;;  %v222_v9 = vld [vmem:[#allocation7 + $0x150] sm:$0xff] }
  0xa9   :  { %2495 = vmatpush.bf16.msrb.mxu2 %v2094_v10  ;;  %v1366_v19 = vcvt.s32.f32 %v598_v12  ;;  %v1374_v21 = vcvt.s32.f32 %v606_v13  ;;  %v854_v22 = vunpack.c.0.s8 %v302_v48  ;;  %v862_v23 = vunpack.c.1.s8 %v302_v48 }
  0xaa   :  { %2508 = vmatpush.bf16.msrb.mxu3 %v2158_v15  ;;  %v1958_v25 = vpack.c.bf16 %v1246_v16, %v1238_v11  ;;  %v1494_v26 = vcvt.s32.f32 %v726_v17  ;;  %v1502_v27 = vcvt.s32.f32 %v734_v18  ;;  %v454_v28 = vunpack.c.2.s8 %v198_v14 }
  0xab   :  { %v2022_v30 = vpack.c.bf16 %v1374_v21, %v1366_v19  ;;  %v1622_v31 = vcvt.s32.f32 %v854_v22  ;;  %v1630_v32 = vcvt.s32.f32 %v862_v23  ;;  %v462_v33 = vunpack.c.3.s8 %v198_v14  ;;  %v286_v19 = vld [vmem:[#allocation7 + $0x350] sm:$0xff] }
  0xac   :  { %2470 = vmatpush.bf16.msrb.mxu0 %v1958_v25  ;;  %v2086_v35 = vpack.c.bf16 %v1502_v27, %v1494_v26  ;;  %v1222_v36 = vcvt.s32.f32 %v454_v28  ;;  %v582_v37 = vunpack.c.2.s8 %v230_v24  ;;  %v590_v38 = vunpack.c.3.s8 %v230_v24 }
  0xad   :  { %2483 = vmatpush.bf16.msrb.mxu1 %v2022_v30  ;;  %v2150_v39 = vpack.c.bf16 %v1630_v32, %v1622_v31  ;;  %v1230_v40 = vcvt.s32.f32 %v462_v33  ;;  %v710_v41 = vunpack.c.2.s8 %v262_v29  ;;  %v718_v42 = vunpack.c.3.s8 %v262_v29 }
  0xae   :  { %2496 = vmatpush.bf16.msrb.mxu2 %v2086_v35  ;;  %v1350_v43 = vcvt.s32.f32 %v582_v37  ;;  %v1358_v44 = vcvt.s32.f32 %v590_v38  ;;  %v838_v45 = vunpack.c.2.s8 %v294_v34  ;;  %v846_v46 = vunpack.c.3.s8 %v294_v34 }
  0xaf   :  { %2509 = vmatpush.bf16.msrb.mxu3 %v2150_v39  ;;  %v1950_v47 = vpack.c.bf16 %v1230_v40, %v1222_v36  ;;  %v1478_v48 = vcvt.s32.f32 %v710_v41  ;;  %v1486_v49 = vcvt.s32.f32 %v718_v42  ;;  %v438_v50 = vunpack.c.0.s8 %v198_v14 }
  0xb0   :  { %v2014_v51 = vpack.c.bf16 %v1358_v44, %v1350_v43  ;;  %v1606_v53 = vcvt.s32.f32 %v838_v45  ;;  %v1614_v54 = vcvt.s32.f32 %v846_v46  ;;  %v446_v55 = vunpack.c.1.s8 %v198_v14  ;;  %v254_v14 = vld [vmem:[#allocation7 + $0x250] sm:$0xff] }
  0xb1   :  { %2471 = vmatpush.bf16.msrb.mxu0 %v1950_v47  ;;  %v2078_v57 = vpack.c.bf16 %v1486_v49, %v1478_v48  ;;  %v1206_v59 = vcvt.s32.f32 %v438_v50  ;;  %v566_v60 = vunpack.c.0.s8 %v230_v24  ;;  %v574_v61 = vunpack.c.1.s8 %v230_v24  ;;  %v182_v45 = vld [vmem:[#allocation7 + $0x10] sm:$0xff] }
  0xb2   :  { %2484 = vmatpush.bf16.msrb.mxu1 %v2014_v51  ;;  %v2142_v0 = vpack.c.bf16 %v1614_v54, %v1606_v53  ;;  %v1214_v1 = vcvt.s32.f32 %v446_v55  ;;  %v694_v3 = vunpack.c.0.s8 %v262_v29  ;;  %v702_v4 = vunpack.c.1.s8 %v262_v29  ;;  %v214_v55 = vld [vmem:[#allocation7 + $0x110] sm:$0xff] }
  0xb3   :  { %2497 = vmatpush.bf16.msrb.mxu2 %v2078_v57  ;;  %v1334_v5 = vcvt.s32.f32 %v566_v60  ;;  %v1342_v6 = vcvt.s32.f32 %v574_v61  ;;  %v822_v7 = vunpack.c.0.s8 %v294_v34  ;;  %v830_v8 = vunpack.c.1.s8 %v294_v34 }
  0xb4   :  { %2510 = vmatpush.bf16.msrb.mxu3 %v2142_v0  ;;  %v1942_v10 = vpack.c.bf16 %v1214_v1, %v1206_v59  ;;  %v1462_v11 = vcvt.s32.f32 %v694_v3  ;;  %v1470_v12 = vcvt.s32.f32 %v702_v4  ;;  %v422_v13 = vunpack.c.2.s8 %v190_v62 }
  0xb5   :  { %v2006_v15 = vpack.c.bf16 %v1342_v6, %v1334_v5  ;;  %v1590_v16 = vcvt.s32.f32 %v822_v7  ;;  %v1598_v17 = vcvt.s32.f32 %v830_v8  ;;  %v430_v18 = vunpack.c.3.s8 %v190_v62  ;;  %v278_v5 = vld [vmem:[#allocation7 + $0x310] sm:$0xff] }
  0xb6   :  { %2472 = vmatpush.bf16.msrb.mxu0 %v1942_v10  ;;  %v2070_v21 = vpack.c.bf16 %v1470_v12, %v1462_v11  ;;  %v1190_v22 = vcvt.s32.f32 %v422_v13  ;;  %v550_v23 = vunpack.c.2.s8 %v222_v9  ;;  %v558_v24 = vunpack.c.3.s8 %v222_v9 }
  0xb7   :  { %2485 = vmatpush.bf16.msrb.mxu1 %v2006_v15  ;;  %v2134_v25 = vpack.c.bf16 %v1598_v17, %v1590_v16  ;;  %v1198_v26 = vcvt.s32.f32 %v430_v18  ;;  %v678_v27 = vunpack.c.2.s8 %v254_v14  ;;  %v686_v28 = vunpack.c.3.s8 %v254_v14 }
  0xb8   :  { %2498 = vmatpush.bf16.msrb.mxu2 %v2070_v21  ;;  %v1318_v29 = vcvt.s32.f32 %v550_v23  ;;  %v1326_v30 = vcvt.s32.f32 %v558_v24  ;;  %v806_v31 = vunpack.c.2.s8 %v286_v19  ;;  %v814_v32 = vunpack.c.3.s8 %v286_v19 }
  0xb9   :  { %2511 = vmatpush.bf16.msrb.mxu3 %v2134_v25  ;;  %v1934_v33 = vpack.c.bf16 %v1198_v26, %v1190_v22  ;;  %v1446_v34 = vcvt.s32.f32 %v678_v27  ;;  %v1454_v35 = vcvt.s32.f32 %v686_v28  ;;  %v406_v36 = vunpack.c.0.s8 %v190_v62 }
  0xba   :  { %v1998_v37 = vpack.c.bf16 %v1326_v30, %v1318_v29  ;;  %v1574_v38 = vcvt.s32.f32 %v806_v31  ;;  %v1582_v39 = vcvt.s32.f32 %v814_v32  ;;  %v414_v40 = vunpack.c.1.s8 %v190_v62  ;;  %v246_v62 = vld [vmem:[#allocation7 + $0x210] sm:$0xff] }
  0xbb   :  { %2473 = vmatpush.bf16.msrb.mxu0 %v1934_v33  ;;  %v2062_v41 = vpack.c.bf16 %v1454_v35, %v1446_v34  ;;  %v1174_v42 = vcvt.s32.f32 %v406_v36  ;;  %v534_v43 = vunpack.c.0.s8 %v222_v9  ;;  %v542_v44 = vunpack.c.1.s8 %v222_v9  ;;  %v334_v31 = vld [vmem:[#allocation7 + $0x4d0] sm:$0xff] }
  0xbc   :  { %2486 = vmatpush.bf16.msrb.mxu1 %v1998_v37  ;;  %v2126_v46 = vpack.c.bf16 %v1582_v39, %v1574_v38  ;;  %v1182_v47 = vcvt.s32.f32 %v414_v40  ;;  %v662_v48 = vunpack.c.0.s8 %v254_v14  ;;  %v670_v49 = vunpack.c.1.s8 %v254_v14  ;;  %v366_v40 = vld [vmem:[#allocation7 + $0x5d0] sm:$0xff] }
  0xbd   :  { %2499 = vmatpush.bf16.msrb.mxu2 %v2062_v41  ;;  %v1302_v50 = vcvt.s32.f32 %v534_v43  ;;  %v1310_v51 = vcvt.s32.f32 %v542_v44  ;;  %v790_v53 = vunpack.c.0.s8 %v286_v19  ;;  %v798_v54 = vunpack.c.1.s8 %v286_v19 }
  0xbe   :  { %2512 = vmatpush.bf16.msrb.mxu3 %v2126_v46  ;;  %v1926_v57 = vpack.c.bf16 %v1182_v47, %v1174_v42  ;;  %v1430_v59 = vcvt.s32.f32 %v662_v48  ;;  %v1438_v60 = vcvt.s32.f32 %v670_v49  ;;  %v390_v61 = vunpack.c.2.s8 %v182_v45 }
  0xbf   :  { %v1990_v0 = vpack.c.bf16 %v1310_v51, %v1302_v50  ;;  %v1558_v1 = vcvt.s32.f32 %v790_v53  ;;  %v1566_v3 = vcvt.s32.f32 %v798_v54  ;;  %v398_v4 = vunpack.c.3.s8 %v182_v45  ;;  %v239_v50 = vld [vmem:[#allocation7 + $0x1d8] sm:$0xff] }
  0xc0   :  { %2474 = vmatpush.bf16.msrb.mxu0 %v1926_v57  ;;  %v2054_v6 = vpack.c.bf16 %v1438_v60, %v1430_v59  ;;  %v1158_v7 = vcvt.s32.f32 %v390_v61  ;;  %v518_v8 = vunpack.c.2.s8 %v214_v55  ;;  %v526_v9 = vunpack.c.3.s8 %v214_v55 }
  0xc1   :  { %2487 = vmatpush.bf16.msrb.mxu1 %v1990_v0  ;;  %v2118_v10 = vpack.c.bf16 %v1566_v3, %v1558_v1  ;;  %v1166_v11 = vcvt.s32.f32 %v398_v4  ;;  %v646_v12 = vunpack.c.2.s8 %v246_v62  ;;  %v654_v13 = vunpack.c.3.s8 %v246_v62 }
  0xc2   :  { %2500 = vmatpush.bf16.msrb.mxu2 %v2054_v6  ;;  %v1286_v14 = vcvt.s32.f32 %v518_v8  ;;  %v1294_v15 = vcvt.s32.f32 %v526_v9  ;;  %v774_v16 = vunpack.c.2.s8 %v278_v5  ;;  %v782_v17 = vunpack.c.3.s8 %v278_v5 }
  0xc3   :  { %2513 = vmatpush.bf16.msrb.mxu3 %v2118_v10  ;;  %v1918_v18 = vpack.c.bf16 %v1166_v11, %v1158_v7  ;;  %v1414_v19 = vcvt.s32.f32 %v646_v12  ;;  %v1422_v21 = vcvt.s32.f32 %v654_v13  ;;  %v374_v22 = vunpack.c.0.s8 %v182_v45 }
  0xc4   :  { %v1982_v23 = vpack.c.bf16 %v1294_v15, %v1286_v14  ;;  %v1542_v24 = vcvt.s32.f32 %v774_v16  ;;  %v1550_v25 = vcvt.s32.f32 %v782_v17  ;;  %v382_v26 = vunpack.c.1.s8 %v182_v45  ;;  %v207_v45 = vld [vmem:[#allocation7 + $0xd8] sm:$0xff]  ;;  %v326_v16 = vld [vmem:[#allocation7 + $0x490] sm:$0xff] }
  0xc5   :  { %2475 = vmatpush.bf16.msrb.mxu0 %v1918_v18  ;;  %v2046_v27 = vpack.c.bf16 %v1422_v21, %v1414_v19  ;;  %v1142_v28 = vcvt.s32.f32 %v374_v22  ;;  %v502_v29 = vunpack.c.0.s8 %v214_v55  ;;  %v510_v30 = vunpack.c.1.s8 %v214_v55 }
  0xc6   :  { %2488 = vmatpush.bf16.msrb.mxu1 %v1982_v23  ;;  %v2110_v32 = vpack.c.bf16 %v1550_v25, %v1542_v24  ;;  %v1150_v33 = vcvt.s32.f32 %v382_v26  ;;  %v630_v34 = vunpack.c.0.s8 %v246_v62  ;;  %v638_v35 = vunpack.c.1.s8 %v246_v62  ;;  %v358_v26 = vld [vmem:[#allocation7 + $0x590] sm:$0xff] }
  0xc7   :  { %2501 = vmatpush.bf16.msrb.mxu2 %v2046_v27  ;;  %v1270_v36 = vcvt.s32.f32 %v502_v29  ;;  %v1278_v37 = vcvt.s32.f32 %v510_v30  ;;  %v758_v38 = vunpack.c.0.s8 %v278_v5  ;;  %v766_v39 = vunpack.c.1.s8 %v278_v5 }
  0xc8   :  { %2514 = vmatpush.bf16.msrb.mxu3 %v2110_v32  ;;  %v1910_v41 = vpack.c.bf16 %v1150_v33, %v1142_v28  ;;  %v1398_v42 = vcvt.s32.f32 %v630_v34  ;;  %v1406_v43 = vcvt.s32.f32 %v638_v35  ;;  %v998_v44 = vunpack.c.2.s8 %v334_v31 }
  0xc9   :  { %v1974_v46 = vpack.c.bf16 %v1278_v37, %v1270_v36  ;;  %v1526_v47 = vcvt.s32.f32 %v758_v38  ;;  %v1534_v48 = vcvt.s32.f32 %v766_v39  ;;  %v1006_v49 = vunpack.c.3.s8 %v334_v31  ;;  %v231_v36 = vld [vmem:[#allocation7 + $0x198] sm:$0xff] }
  0xca   :  { %2476 = vmatpush.bf16.msrb.mxu0 %v1910_v41  ;;  %v2038_v51 = vpack.c.bf16 %v1406_v43, %v1398_v42  ;;  %v1766_v53 = vcvt.s32.f32 %v998_v44  ;;  %v1126_v54 = vunpack.c.2.s8 %v366_v40  ;;  %v1134_v55 = vunpack.c.3.s8 %v366_v40 }
  0xcb   :  { %2489 = vmatpush.bf16.msrb.mxu1 %v1974_v46  ;;  %v2102_v57 = vpack.c.bf16 %v1534_v48, %v1526_v47  ;;  %v1774_v59 = vcvt.s32.f32 %v1006_v49  ;;  %v487_v60 = vunpack.c.2.s8 %v207_v45  ;;  %v495_v61 = vunpack.c.3.s8 %v207_v45 }
  0xcc   :  { %2502 = vmatpush.bf16.msrb.mxu2 %v2038_v51  ;;  %v1894_v62 = vcvt.s32.f32 %v1126_v54  ;;  %v1902_v0 = vcvt.s32.f32 %v1134_v55  ;;  %v615_v1 = vunpack.c.2.s8 %v239_v50  ;;  %v623_v3 = vunpack.c.3.s8 %v239_v50 }
  0xcd   :  { %2515 = vmatpush.bf16.msrb.mxu3 %v2102_v57  ;;  %v2222_v4 = vpack.c.bf16 %v1774_v59, %v1766_v53  ;;  %v1255_v5 = vcvt.s32.f32 %v487_v60  ;;  %v1263_v6 = vcvt.s32.f32 %v495_v61  ;;  %v982_v7 = vunpack.c.0.s8 %v334_v31  ;;  %2477 = vmatmul.bf16.vlgmr.msrb.gmra.mxu0 %v6078_v63 }
  0xce   :  { %v2286_v8 = vpack.c.bf16 %v1902_v0, %v1894_v62  ;;  %v1383_v9 = vcvt.s32.f32 %v615_v1  ;;  %v1391_v10 = vcvt.s32.f32 %v623_v3  ;;  %v990_v11 = vunpack.c.1.s8 %v334_v31  ;;  %2490 = vmatmul.bf16.vlgmr.msrb.gmra.mxu1 %v6085_v20  ;;  %v199_v31 = vld [vmem:[#allocation7 + $0x98] sm:$0xff]  ;;  %v318_v1 = vld [vmem:[#allocation7 + $0x450] sm:$0xff] }
  0xcf   :  { %2521 = vmatpush.bf16.msra.mxu0 %v2222_v4  ;;  %v1967_v12 = vpack.c.bf16 %v1263_v6, %v1255_v5  ;;  %v1750_v13 = vcvt.s32.f32 %v982_v7  ;;  %v1110_v14 = vunpack.c.0.s8 %v366_v40  ;;  %v1118_v15 = vunpack.c.1.s8 %v366_v40  ;;  %2503 = vmatmul.bf16.vlgmr.msrb.gmra.mxu2 %v6076_v58 }
  0xd0   :  { %2534 = vmatpush.bf16.msra.mxu1 %v2286_v8  ;;  %v2031_v17 = vpack.c.bf16 %v1391_v10, %v1383_v9  ;;  %v1758_v18 = vcvt.s32.f32 %v990_v11  ;;  %v471_v19 = vunpack.c.0.s8 %v207_v45  ;;  %v479_v21 = vunpack.c.1.s8 %v207_v45  ;;  %2516 = vmatmul.bf16.vlgmr.msrb.gmra.mxu3 %v6080_v2  ;;  %v350_v11 = vld [vmem:[#allocation7 + $0x550] sm:$0xff] }
  0xd1   :  { %2547 = vmatpush.bf16.msra.mxu2 %v1967_v12  ;;  %v1878_v22 = vcvt.s32.f32 %v1110_v14  ;;  %v1886_v23 = vcvt.s32.f32 %v1118_v15  ;;  %v599_v24 = vunpack.c.0.s8 %v239_v50  ;;  %v607_v25 = vunpack.c.1.s8 %v239_v50 }
  0xd2   :  { %2560 = vmatpush.bf16.msra.mxu3 %v2031_v17  ;;  %v2214_v27 = vpack.c.bf16 %v1758_v18, %v1750_v13  ;;  %v1239_v28 = vcvt.s32.f32 %v471_v19  ;;  %v1247_v29 = vcvt.s32.f32 %v479_v21  ;;  %v966_v30 = vunpack.c.2.s8 %v326_v16 }
  0xd3   :  { %v2278_v32 = vpack.c.bf16 %v1886_v23, %v1878_v22  ;;  %v1367_v33 = vcvt.s32.f32 %v599_v24  ;;  %v1375_v34 = vcvt.s32.f32 %v607_v25  ;;  %v974_v35 = vunpack.c.3.s8 %v326_v16  ;;  %v223_v22 = vld [vmem:[#allocation7 + $0x158] sm:$0xff] }
  0xd4   :  { %2522 = vmatpush.bf16.msra.mxu0 %v2214_v27  ;;  %v1959_v37 = vpack.c.bf16 %v1247_v29, %v1239_v28  ;;  %v1734_v38 = vcvt.s32.f32 %v966_v30  ;;  %v1094_v39 = vunpack.c.2.s8 %v358_v26  ;;  %v1102_v40 = vunpack.c.3.s8 %v358_v26 }
  0xd5   :  { %2535 = vmatpush.bf16.msra.mxu1 %v2278_v32  ;;  %v2023_v41 = vpack.c.bf16 %v1375_v34, %v1367_v33  ;;  %v1742_v42 = vcvt.s32.f32 %v974_v35  ;;  %v455_v43 = vunpack.c.2.s8 %v199_v31  ;;  %v463_v44 = vunpack.c.3.s8 %v199_v31 }
  0xd6   :  { %2548 = vmatpush.bf16.msra.mxu2 %v1959_v37  ;;  %v1862_v45 = vcvt.s32.f32 %v1094_v39  ;;  %v1870_v46 = vcvt.s32.f32 %v1102_v40  ;;  %v583_v47 = vunpack.c.2.s8 %v231_v36  ;;  %v591_v48 = vunpack.c.3.s8 %v231_v36 }
  0xd7   :  { %2561 = vmatpush.bf16.msra.mxu3 %v2023_v41  ;;  %v2206_v49 = vpack.c.bf16 %v1742_v42, %v1734_v38  ;;  %v1223_v50 = vcvt.s32.f32 %v455_v43  ;;  %v1231_v51 = vcvt.s32.f32 %v463_v44  ;;  %v950_v53 = vunpack.c.0.s8 %v326_v16 }
  0xd8   :  { %v2270_v54 = vpack.c.bf16 %v1870_v46, %v1862_v45  ;;  %v1351_v55 = vcvt.s32.f32 %v583_v47  ;;  %v1359_v57 = vcvt.s32.f32 %v591_v48  ;;  %v958_v59 = vunpack.c.1.s8 %v326_v16  ;;  %v191_v16 = vld [vmem:[#allocation7 + $0x58] sm:$0xff]  ;;  %v310_v47 = vld [vmem:[#allocation7 + $0x410] sm:$0xff] }
  0xd9   :  { %2523 = vmatpush.bf16.msra.mxu0 %v2206_v49  ;;  %v1951_v60 = vpack.c.bf16 %v1231_v51, %v1223_v50  ;;  %v1718_v61 = vcvt.s32.f32 %v950_v53  ;;  %v1078_v62 = vunpack.c.0.s8 %v358_v26  ;;  %v1086_v0 = vunpack.c.1.s8 %v358_v26 }
  0xda   :  { %2536 = vmatpush.bf16.msra.mxu1 %v2270_v54  ;;  %v2015_v3 = vpack.c.bf16 %v1359_v57, %v1351_v55  ;;  %v1726_v4 = vcvt.s32.f32 %v958_v59  ;;  %v439_v5 = vunpack.c.0.s8 %v199_v31  ;;  %v447_v6 = vunpack.c.1.s8 %v199_v31  ;;  %v342_v59 = vld [vmem:[#allocation7 + $0x510] sm:$0xff] }
  0xdb   :  { %2549 = vmatpush.bf16.msra.mxu2 %v1951_v60  ;;  %v1846_v7 = vcvt.s32.f32 %v1078_v62  ;;  %v1854_v8 = vcvt.s32.f32 %v1086_v0  ;;  %v567_v9 = vunpack.c.0.s8 %v231_v36  ;;  %v575_v10 = vunpack.c.1.s8 %v231_v36 }
  0xdc   :  { %2562 = vmatpush.bf16.msra.mxu3 %v2015_v3  ;;  %v2198_v12 = vpack.c.bf16 %v1726_v4, %v1718_v61  ;;  %v1207_v13 = vcvt.s32.f32 %v439_v5  ;;  %v1215_v14 = vcvt.s32.f32 %v447_v6  ;;  %v934_v15 = vunpack.c.2.s8 %v318_v1 }
  0xdd   :  { %v2262_v17 = vpack.c.bf16 %v1854_v8, %v1846_v7  ;;  %v1335_v18 = vcvt.s32.f32 %v567_v9  ;;  %v1343_v19 = vcvt.s32.f32 %v575_v10  ;;  %v942_v21 = vunpack.c.3.s8 %v318_v1  ;;  %v215_v7 = vld [vmem:[#allocation7 + $0x118] sm:$0xff] }
  0xde   :  { %2524 = vmatpush.bf16.msra.mxu0 %v2198_v12  ;;  %v1943_v23 = vpack.c.bf16 %v1215_v14, %v1207_v13  ;;  %v1702_v24 = vcvt.s32.f32 %v934_v15  ;;  %v1062_v25 = vunpack.c.2.s8 %v350_v11  ;;  %v1070_v26 = vunpack.c.3.s8 %v350_v11 }
  0xdf   :  { %2537 = vmatpush.bf16.msra.mxu1 %v2262_v17  ;;  %v2007_v27 = vpack.c.bf16 %v1343_v19, %v1335_v18  ;;  %v1710_v28 = vcvt.s32.f32 %v942_v21  ;;  %v423_v29 = vunpack.c.2.s8 %v191_v16  ;;  %v431_v30 = vunpack.c.3.s8 %v191_v16 }
  0xe0   :  { %2550 = vmatpush.bf16.msra.mxu2 %v1943_v23  ;;  %v1830_v31 = vcvt.s32.f32 %v1062_v25  ;;  %v1838_v32 = vcvt.s32.f32 %v1070_v26  ;;  %v551_v33 = vunpack.c.2.s8 %v223_v22  ;;  %v559_v34 = vunpack.c.3.s8 %v223_v22 }
  0xe1   :  { %2563 = vmatpush.bf16.msra.mxu3 %v2007_v27  ;;  %v2190_v35 = vpack.c.bf16 %v1710_v28, %v1702_v24  ;;  %v1191_v36 = vcvt.s32.f32 %v423_v29  ;;  %v1199_v37 = vcvt.s32.f32 %v431_v30  ;;  %v918_v38 = vunpack.c.0.s8 %v318_v1 }
  0xe2   :  { %v2254_v39 = vpack.c.bf16 %v1838_v32, %v1830_v31  ;;  %v1319_v40 = vcvt.s32.f32 %v551_v33  ;;  %v1327_v41 = vcvt.s32.f32 %v559_v34  ;;  %v926_v42 = vunpack.c.1.s8 %v318_v1  ;;  %v183_v1 = vld [vmem:[#allocation7 + $0x18] sm:$0xff] }
  0xe3   :  { %2525 = vmatpush.bf16.msra.mxu0 %v2190_v35  ;;  %v1935_v43 = vpack.c.bf16 %v1199_v37, %v1191_v36  ;;  %v1686_v44 = vcvt.s32.f32 %v918_v38  ;;  %v1046_v45 = vunpack.c.0.s8 %v350_v11  ;;  %v1054_v46 = vunpack.c.1.s8 %v350_v11  ;;  %v271_v33 = vld [vmem:[#allocation7 + $0x2d8] sm:$0xff] }
  0xe4   :  { %2538 = vmatpush.bf16.msra.mxu1 %v2254_v39  ;;  %v1999_v48 = vpack.c.bf16 %v1327_v41, %v1319_v40  ;;  %v1694_v49 = vcvt.s32.f32 %v926_v42  ;;  %v407_v50 = vunpack.c.0.s8 %v191_v16  ;;  %v415_v51 = vunpack.c.1.s8 %v191_v16  ;;  %v303_v42 = vld [vmem:[#allocation7 + $0x3d8] sm:$0xff] }
  0xe5   :  { %2551 = vmatpush.bf16.msra.mxu2 %v1935_v43  ;;  %v1814_v53 = vcvt.s32.f32 %v1046_v45  ;;  %v1822_v54 = vcvt.s32.f32 %v1054_v46  ;;  %v535_v55 = vunpack.c.0.s8 %v223_v22  ;;  %v543_v57 = vunpack.c.1.s8 %v223_v22 }
  0xe6   :  { %2564 = vmatpush.bf16.msra.mxu3 %v1999_v48  ;;  %v2182_v60 = vpack.c.bf16 %v1694_v49, %v1686_v44  ;;  %v1175_v61 = vcvt.s32.f32 %v407_v50  ;;  %v1183_v62 = vcvt.s32.f32 %v415_v51  ;;  %v902_v0 = vunpack.c.2.s8 %v310_v47 }
  0xe7   :  { %v2246_v3 = vpack.c.bf16 %v1822_v54, %v1814_v53  ;;  %v1303_v4 = vcvt.s32.f32 %v535_v55  ;;  %v1311_v5 = vcvt.s32.f32 %v543_v57  ;;  %v910_v6 = vunpack.c.3.s8 %v310_v47  ;;  %v367_v53 = vld [vmem:[#allocation7 + $0x5d8] sm:$0xff] }
  0xe8   :  { %2526 = vmatpush.bf16.msra.mxu0 %v2182_v60  ;;  %v1927_v8 = vpack.c.bf16 %v1183_v62, %v1175_v61  ;;  %v1670_v9 = vcvt.s32.f32 %v902_v0  ;;  %v1030_v10 = vunpack.c.2.s8 %v342_v59  ;;  %v1038_v11 = vunpack.c.3.s8 %v342_v59 }
  0xe9   :  { %2539 = vmatpush.bf16.msra.mxu1 %v2246_v3  ;;  %v1991_v12 = vpack.c.bf16 %v1311_v5, %v1303_v4  ;;  %v1678_v13 = vcvt.s32.f32 %v910_v6  ;;  %v391_v14 = vunpack.c.2.s8 %v183_v1  ;;  %v399_v15 = vunpack.c.3.s8 %v183_v1 }
  0xea   :  { %2552 = vmatpush.bf16.msra.mxu2 %v1927_v8  ;;  %v1798_v16 = vcvt.s32.f32 %v1030_v10  ;;  %v1806_v17 = vcvt.s32.f32 %v1038_v11  ;;  %v519_v18 = vunpack.c.2.s8 %v215_v7  ;;  %v527_v19 = vunpack.c.3.s8 %v215_v7 }
  0xeb   :  { %2565 = vmatpush.bf16.msra.mxu3 %v1991_v12  ;;  %v2174_v21 = vpack.c.bf16 %v1678_v13, %v1670_v9  ;;  %v1159_v22 = vcvt.s32.f32 %v391_v14  ;;  %v1167_v23 = vcvt.s32.f32 %v399_v15  ;;  %v886_v24 = vunpack.c.0.s8 %v310_v47 }
  0xec   :  { %v2238_v25 = vpack.c.bf16 %v1806_v17, %v1798_v16  ;;  %v1287_v26 = vcvt.s32.f32 %v519_v18  ;;  %v1295_v27 = vcvt.s32.f32 %v527_v19  ;;  %v894_v28 = vunpack.c.1.s8 %v310_v47  ;;  %v335_v47 = vld [vmem:[#allocation7 + $0x4d8] sm:$0xff] }
  0xed   :  { %2527 = vmatpush.bf16.msra.mxu0 %v2174_v21  ;;  %v1919_v29 = vpack.c.bf16 %v1167_v23, %v1159_v22  ;;  %v1654_v30 = vcvt.s32.f32 %v886_v24  ;;  %v1014_v31 = vunpack.c.0.s8 %v342_v59  ;;  %v1022_v32 = vunpack.c.1.s8 %v342_v59  ;;  %v263_v18 = vld [vmem:[#allocation7 + $0x298] sm:$0xff] }
  0xee   :  { %2540 = vmatpush.bf16.msra.mxu1 %v2238_v25  ;;  %v1983_v34 = vpack.c.bf16 %v1295_v27, %v1287_v26  ;;  %v1662_v35 = vcvt.s32.f32 %v894_v28  ;;  %v375_v36 = vunpack.c.0.s8 %v183_v1  ;;  %v383_v37 = vunpack.c.1.s8 %v183_v1  ;;  %v295_v28 = vld [vmem:[#allocation7 + $0x398] sm:$0xff] }
  0xef   :  { %2553 = vmatpush.bf16.msra.mxu2 %v1919_v29  ;;  %v1782_v38 = vcvt.s32.f32 %v1014_v31  ;;  %v1790_v39 = vcvt.s32.f32 %v1022_v32  ;;  %v503_v40 = vunpack.c.0.s8 %v215_v7  ;;  %v511_v41 = vunpack.c.1.s8 %v215_v7 }
  0xf0   :  { %2566 = vmatpush.bf16.msra.mxu3 %v1983_v34  ;;  %v2166_v43 = vpack.c.bf16 %v1662_v35, %v1654_v30  ;;  %v1143_v44 = vcvt.s32.f32 %v375_v36  ;;  %v1151_v45 = vcvt.s32.f32 %v383_v37  ;;  %v743_v46 = vunpack.c.2.s8 %v271_v33 }
  0xf1   :  { %v2230_v48 = vpack.c.bf16 %v1790_v39, %v1782_v38  ;;  %v1271_v49 = vcvt.s32.f32 %v503_v40  ;;  %v1279_v50 = vcvt.s32.f32 %v511_v41  ;;  %v751_v51 = vunpack.c.3.s8 %v271_v33  ;;  %v359_v38 = vld [vmem:[#allocation7 + $0x598] sm:$0xff] }
  0xf2   :  { %2528 = vmatpush.bf16.msra.mxu0 %v2166_v43  ;;  %v1911_v54 = vpack.c.bf16 %v1151_v45, %v1143_v44  ;;  %v1511_v55 = vcvt.s32.f32 %v743_v46  ;;  %v871_v57 = vunpack.c.2.s8 %v303_v42  ;;  %v879_v59 = vunpack.c.3.s8 %v303_v42 }
  0xf3   :  { %2541 = vmatpush.bf16.msra.mxu1 %v2230_v48  ;;  %v1975_v60 = vpack.c.bf16 %v1279_v50, %v1271_v49  ;;  %v1519_v61 = vcvt.s32.f32 %v751_v51  ;;  %v999_v62 = vunpack.c.2.s8 %v335_v47  ;;  %v1007_v0 = vunpack.c.3.s8 %v335_v47 }
  0xf4   :  { %2554 = vmatpush.bf16.msra.mxu2 %v1911_v54  ;;  %v1639_v1 = vcvt.s32.f32 %v871_v57  ;;  %v1647_v3 = vcvt.s32.f32 %v879_v59  ;;  %v1127_v4 = vunpack.c.2.s8 %v367_v53  ;;  %v1135_v5 = vunpack.c.3.s8 %v367_v53 }
  0xf5   :  { %2567 = vmatpush.bf16.msra.mxu3 %v1975_v60  ;;  %v2095_v6 = vpack.c.bf16 %v1519_v61, %v1511_v55  ;;  %v1767_v7 = vcvt.s32.f32 %v999_v62  ;;  %v1775_v8 = vcvt.s32.f32 %v1007_v0  ;;  %v727_v9 = vunpack.c.0.s8 %v271_v33  ;;  %2529 = vmatmul.bf16.vlgmr.msra.gmra.mxu0 %v6094_v52 }
  0xf6   :  { %v2159_v10 = vpack.c.bf16 %v1647_v3, %v1639_v1  ;;  %v1895_v11 = vcvt.s32.f32 %v1127_v4  ;;  %v1903_v12 = vcvt.s32.f32 %v1135_v5  ;;  %v735_v13 = vunpack.c.1.s8 %v271_v33  ;;  %2542 = vmatmul.bf16.vlgmr.msra.gmra.mxu1 %v6098_v56  ;;  %v327_v33 = vld [vmem:[#allocation7 + $0x498] sm:$0xff] }
  0xf7   :  { %2573 = vmatpush.bf16.msrb.mxu0 %v2095_v6  ;;  %v2223_v14 = vpack.c.bf16 %v1775_v8, %v1767_v7  ;;  %v1495_v15 = vcvt.s32.f32 %v727_v9  ;;  %v855_v16 = vunpack.c.0.s8 %v303_v42  ;;  %v863_v17 = vunpack.c.1.s8 %v303_v42  ;;  %2555 = vmatmul.bf16.vlgmr.msra.gmra.mxu2 %v6078_v63  ;;  %v255_v4 = vld [vmem:[#allocation7 + $0x258] sm:$0xff]  ;;  %v6114_v9 = vpop.f32.mrf.mxu0 }
  0xf8   :  { %2586 = vmatpush.bf16.msrb.mxu1 %v2159_v10  ;;  %v2287_v19 = vpack.c.bf16 %v1903_v12, %v1895_v11  ;;  %v1503_v21 = vcvt.s32.f32 %v735_v13  ;;  %v983_v22 = vunpack.c.0.s8 %v335_v47  ;;  %v991_v23 = vunpack.c.1.s8 %v335_v47  ;;  %2568 = vmatmul.bf16.vlgmr.msra.gmra.mxu3 %v6085_v20 }
  0xf9   :  { %2599 = vmatpush.bf16.msrb.mxu2 %v2223_v14  ;;  %v1623_v24 = vcvt.s32.f32 %v855_v16  ;;  %v1631_v25 = vcvt.s32.f32 %v863_v17  ;;  %v1111_v26 = vunpack.c.0.s8 %v367_v53  ;;  %v1119_v27 = vunpack.c.1.s8 %v367_v53  ;;  %v287_v14 = vld [vmem:[#allocation7 + $0x358] sm:$0xff] }
  0xfa   :  { %2612 = vmatpush.bf16.msrb.mxu3 %v2287_v19  ;;  %v2087_v29 = vpack.c.bf16 %v1503_v21, %v1495_v15  ;;  %v1751_v30 = vcvt.s32.f32 %v983_v22  ;;  %v1759_v31 = vcvt.s32.f32 %v991_v23  ;;  %v711_v32 = vunpack.c.2.s8 %v263_v18  ;;  %v319_v19 = vld [vmem:[#allocation7 + $0x458] sm:$0xff] }
  0xfb   :  { %v2151_v34 = vpack.c.bf16 %v1631_v25, %v1623_v24  ;;  %v1879_v35 = vcvt.s32.f32 %v1111_v26  ;;  %v1887_v36 = vcvt.s32.f32 %v1119_v27  ;;  %v719_v37 = vunpack.c.3.s8 %v263_v18  ;;  %v351_v25 = vld [vmem:[#allocation7 + $0x558] sm:$0xff] }
  0xfc   :  { %2574 = vmatpush.bf16.msrb.mxu0 %v2087_v29  ;;  %v2215_v39 = vpack.c.bf16 %v1759_v31, %v1751_v30  ;;  %v1479_v40 = vcvt.s32.f32 %v711_v32  ;;  %v839_v41 = vunpack.c.2.s8 %v295_v28  ;;  %v847_v42 = vunpack.c.3.s8 %v295_v28 }
  0xfd   :  { %2587 = vmatpush.bf16.msrb.mxu1 %v2151_v34  ;;  %v2279_v43 = vpack.c.bf16 %v1887_v36, %v1879_v35  ;;  %v1487_v44 = vcvt.s32.f32 %v719_v37  ;;  %v967_v45 = vunpack.c.2.s8 %v327_v33  ;;  %v975_v46 = vunpack.c.3.s8 %v327_v33  ;;  %v6116_v34 = vpop.f32.mrf.mxu1  ;;  %v6118_v35 = vpop.f32.mrf.mxu2 }
  0xfe   :  { %2600 = vmatpush.bf16.msrb.mxu2 %v2215_v39  ;;  %v1607_v47 = vcvt.s32.f32 %v839_v41  ;;  %v1615_v48 = vcvt.s32.f32 %v847_v42  ;;  %v1095_v49 = vunpack.c.2.s8 %v359_v38  ;;  %v1103_v50 = vunpack.c.3.s8 %v359_v38 }
  0xff   :  { %2613 = vmatpush.bf16.msrb.mxu3 %v2279_v43  ;;  %v2079_v51 = vpack.c.bf16 %v1487_v44, %v1479_v40  ;;  %v1735_v53 = vcvt.s32.f32 %v967_v45  ;;  %v1743_v54 = vcvt.s32.f32 %v975_v46  ;;  %v695_v55 = vunpack.c.0.s8 %v263_v18 }
 0x100   :  { %v2143_v57 = vpack.c.bf16 %v1615_v48, %v1607_v47  ;;  %v1863_v59 = vcvt.s32.f32 %v1095_v49  ;;  %v1871_v60 = vcvt.s32.f32 %v1103_v50  ;;  %v703_v61 = vunpack.c.1.s8 %v263_v18  ;;  %v2324_v48 = vpop.f32.mrf.mxu0 }
 0x101   :  { %2575 = vmatpush.bf16.msrb.mxu0 %v2079_v51  ;;  %v2207_v62 = vpack.c.bf16 %v1743_v54, %v1735_v53  ;;  %v1463_v0 = vcvt.s32.f32 %v695_v55  ;;  %v823_v1 = vunpack.c.0.s8 %v295_v28  ;;  %v831_v3 = vunpack.c.1.s8 %v295_v28  ;;  %v247_v54 = vld [vmem:[#allocation7 + $0x218] sm:$0xff] }
 0x102   :  { %2588 = vmatpush.bf16.msrb.mxu1 %v2143_v57  ;;  %v2271_v5 = vpack.c.bf16 %v1871_v60, %v1863_v59  ;;  %v1471_v6 = vcvt.s32.f32 %v703_v61  ;;  %v951_v7 = vunpack.c.0.s8 %v327_v33  ;;  %v959_v8 = vunpack.c.1.s8 %v327_v33 }
 0x103   :  { %2601 = vmatpush.bf16.msrb.mxu2 %v2207_v62  ;;  %v1591_v10 = vcvt.s32.f32 %v823_v1  ;;  %v1599_v11 = vcvt.s32.f32 %v831_v3  ;;  %v1079_v12 = vunpack.c.0.s8 %v359_v38  ;;  %v1087_v13 = vunpack.c.1.s8 %v359_v38  ;;  %v279_v3 = vld [vmem:[#allocation7 + $0x318] sm:$0xff] }
 0x104   :  { %2614 = vmatpush.bf16.msrb.mxu3 %v2271_v5  ;;  %v2071_v15 = vpack.c.bf16 %v1471_v6, %v1463_v0  ;;  %v1719_v16 = vcvt.s32.f32 %v951_v7  ;;  %v1727_v17 = vcvt.s32.f32 %v959_v8  ;;  %v679_v18 = vunpack.c.2.s8 %v255_v4  ;;  %v6120_v5 = vpop.f32.mrf.mxu3 }
 0x105   :  { %v2135_v21 = vpack.c.bf16 %v1599_v11, %v1591_v10  ;;  %v1847_v22 = vcvt.s32.f32 %v1079_v12  ;;  %v1855_v23 = vcvt.s32.f32 %v1087_v13  ;;  %v687_v24 = vunpack.c.3.s8 %v255_v4  ;;  %v311_v10 = vld [vmem:[#allocation7 + $0x418] sm:$0xff] }
 0x106   :  { %2576 = vmatpush.bf16.msrb.mxu0 %v2071_v15  ;;  %v2199_v26 = vpack.c.bf16 %v1727_v17, %v1719_v16  ;;  %v1447_v27 = vcvt.s32.f32 %v679_v18  ;;  %v807_v28 = vunpack.c.2.s8 %v287_v14  ;;  %v815_v29 = vunpack.c.3.s8 %v287_v14  ;;  %v343_v15 = vld [vmem:[#allocation7 + $0x518] sm:$0xff]  ;;  %v2337_v16 = vpop.f32.mrf.mxu1  ;;  %v2350_v17 = vpop.f32.mrf.mxu2 }
 0x107   :  { %2589 = vmatpush.bf16.msrb.mxu1 %v2135_v21  ;;  %v2263_v30 = vpack.c.bf16 %v1855_v23, %v1847_v22  ;;  %v1455_v31 = vcvt.s32.f32 %v687_v24  ;;  %v935_v32 = vunpack.c.2.s8 %v319_v19  ;;  %v943_v33 = vunpack.c.3.s8 %v319_v19 }
 0x108   :  { %2602 = vmatpush.bf16.msrb.mxu2 %v2199_v26  ;;  %v1575_v36 = vcvt.s32.f32 %v807_v28  ;;  %v1583_v37 = vcvt.s32.f32 %v815_v29  ;;  %v1063_v38 = vunpack.c.2.s8 %v351_v25  ;;  %v1071_v39 = vunpack.c.3.s8 %v351_v25 }
 0x109   :  { %2615 = vmatpush.bf16.msrb.mxu3 %v2263_v30  ;;  %v2063_v40 = vpack.c.bf16 %v1455_v31, %v1447_v27  ;;  %v1703_v41 = vcvt.s32.f32 %v935_v32  ;;  %v1711_v42 = vcvt.s32.f32 %v943_v33  ;;  %v663_v43 = vunpack.c.0.s8 %v255_v4 }
 0x10a   :  { %v2127_v44 = vpack.c.bf16 %v1583_v37, %v1575_v36  ;;  %v1831_v45 = vcvt.s32.f32 %v1063_v38  ;;  %v1839_v46 = vcvt.s32.f32 %v1071_v39  ;;  %v671_v47 = vunpack.c.1.s8 %v255_v4 }
 0x10b   :  { %2577 = vmatpush.bf16.msrb.mxu0 %v2063_v40  ;;  %v2191_v49 = vpack.c.bf16 %v1711_v42, %v1703_v41  ;;  %v1431_v50 = vcvt.s32.f32 %v663_v43  ;;  %v791_v51 = vunpack.c.0.s8 %v287_v14  ;;  %v799_v53 = vunpack.c.1.s8 %v287_v14 }
 0x10c   :  { %2590 = vmatpush.bf16.msrb.mxu1 %v2127_v44  ;;  %v2255_v55 = vpack.c.bf16 %v1839_v46, %v1831_v45  ;;  %v1439_v57 = vcvt.s32.f32 %v671_v47  ;;  %v919_v59 = vunpack.c.0.s8 %v319_v19  ;;  %v927_v60 = vunpack.c.1.s8 %v319_v19  ;;  %v208_v45 = vld [vmem:[#allocation7 + $0xe0] sm:$0xff]  ;;  %v2363_v46 = vpop.f32.mrf.mxu3 }
 0x10d   :  { %2603 = vmatpush.bf16.msrb.mxu2 %v2191_v49  ;;  %v1559_v61 = vcvt.s32.f32 %v791_v51  ;;  %v1567_v62 = vcvt.s32.f32 %v799_v53  ;;  %v1047_v0 = vunpack.c.0.s8 %v351_v25  ;;  %v1055_v1 = vunpack.c.1.s8 %v351_v25 }
 0x10e   :  { %2616 = vmatpush.bf16.msrb.mxu3 %v2255_v55  ;;  %v2055_v4 = vpack.c.bf16 %v1439_v57, %v1431_v50  ;;  %v1687_v6 = vcvt.s32.f32 %v919_v59  ;;  %v1695_v7 = vcvt.s32.f32 %v927_v60  ;;  %v647_v8 = vunpack.c.2.s8 %v247_v54  ;;  %v240_v59 = vld [vmem:[#allocation7 + $0x1e0] sm:$0xff]  ;;  %v6122_v60 = vpop.f32.mrf.mxu0 }
 0x10f   :  { %v2119_v11 = vpack.c.bf16 %v1567_v62, %v1559_v61  ;;  %v1815_v12 = vcvt.s32.f32 %v1047_v0  ;;  %v1823_v13 = vcvt.s32.f32 %v1055_v1  ;;  %v655_v14 = vunpack.c.3.s8 %v247_v54  ;;  %v272_v1 = vld [vmem:[#allocation7 + $0x2e0] sm:$0xff] }
 0x110   :  { %2578 = vmatpush.bf16.msrb.mxu0 %v2055_v4  ;;  %v2183_v18 = vpack.c.bf16 %v1695_v7, %v1687_v6  ;;  %v1415_v19 = vcvt.s32.f32 %v647_v8  ;;  %v775_v21 = vunpack.c.2.s8 %v279_v3  ;;  %v783_v22 = vunpack.c.3.s8 %v279_v3  ;;  %v304_v8 = vld [vmem:[#allocation7 + $0x3e0] sm:$0xff] }
 0x111   :  { %2591 = vmatpush.bf16.msrb.mxu1 %v2119_v11  ;;  %v2247_v23 = vpack.c.bf16 %v1823_v13, %v1815_v12  ;;  %v1423_v24 = vcvt.s32.f32 %v655_v14  ;;  %v903_v25 = vunpack.c.2.s8 %v311_v10  ;;  %v911_v26 = vunpack.c.3.s8 %v311_v10 }
 0x112   :  { %2604 = vmatpush.bf16.msrb.mxu2 %v2183_v18  ;;  %v1543_v27 = vcvt.s32.f32 %v775_v21  ;;  %v1551_v28 = vcvt.s32.f32 %v783_v22  ;;  %v1031_v29 = vunpack.c.2.s8 %v343_v15  ;;  %v1039_v30 = vunpack.c.3.s8 %v343_v15 }
 0x113   :  { %2617 = vmatpush.bf16.msrb.mxu3 %v2247_v23  ;;  %v2047_v31 = vpack.c.bf16 %v1423_v24, %v1415_v19  ;;  %v1671_v32 = vcvt.s32.f32 %v903_v25  ;;  %v1679_v33 = vcvt.s32.f32 %v911_v26  ;;  %v631_v36 = vunpack.c.0.s8 %v247_v54  ;;  %v6124_v23 = vpop.f32.mrf.mxu1 }
 0x114   :  { %v2111_v37 = vpack.c.bf16 %v1551_v28, %v1543_v27  ;;  %v1799_v38 = vcvt.s32.f32 %v1031_v29  ;;  %v1807_v39 = vcvt.s32.f32 %v1039_v30  ;;  %v639_v40 = vunpack.c.1.s8 %v247_v54 }
 0x115   :  { %2579 = vmatpush.bf16.msrb.mxu0 %v2047_v31  ;;  %v2175_v41 = vpack.c.bf16 %v1679_v33, %v1671_v32  ;;  %v1399_v42 = vcvt.s32.f32 %v631_v36  ;;  %v759_v43 = vunpack.c.0.s8 %v279_v3  ;;  %v767_v44 = vunpack.c.1.s8 %v279_v3 }
 0x116   :  { %2592 = vmatpush.bf16.msrb.mxu1 %v2111_v37  ;;  %v2239_v47 = vpack.c.bf16 %v1807_v39, %v1799_v38  ;;  %v1407_v48 = vcvt.s32.f32 %v639_v40  ;;  %v887_v49 = vunpack.c.0.s8 %v311_v10  ;;  %v895_v50 = vunpack.c.1.s8 %v311_v10  ;;  %v2376_v38 = vpop.f32.mrf.mxu0 }
 0x117   :  { %2605 = vmatpush.bf16.msrb.mxu2 %v2175_v41  ;;  %v1527_v51 = vcvt.s32.f32 %v759_v43  ;;  %v1535_v53 = vcvt.s32.f32 %v767_v44  ;;  %v1015_v55 = vunpack.c.0.s8 %v343_v15  ;;  %v1023_v57 = vunpack.c.1.s8 %v343_v15  ;;  %v200_v43 = vld [vmem:[#allocation7 + $0xa0] sm:$0xff] }
 0x118   :  { %2618 = vmatpush.bf16.msrb.mxu3 %v2239_v47  ;;  %v2039_v54 = vpack.c.bf16 %v1407_v48, %v1399_v42  ;;  %v1655_v61 = vcvt.s32.f32 %v887_v49  ;;  %v1663_v62 = vcvt.s32.f32 %v895_v50  ;;  %v488_v0 = vunpack.c.2.s8 %v208_v45  ;;  %v232_v48 = vld [vmem:[#allocation7 + $0x1a0] sm:$0xff] }
 0x119   :  { %v2103_v3 = vpack.c.bf16 %v1535_v53, %v1527_v51  ;;  %v1783_v4 = vcvt.s32.f32 %v1015_v55  ;;  %v1791_v6 = vcvt.s32.f32 %v1023_v57  ;;  %v496_v7 = vunpack.c.3.s8 %v208_v45  ;;  %v264_v55 = vld [vmem:[#allocation7 + $0x2a0] sm:$0xff] }
 0x11a   :  { %2580 = vmatpush.bf16.msrb.mxu0 %v2039_v54  ;;  %v2167_v10 = vpack.c.bf16 %v1663_v62, %v1655_v61  ;;  %v1256_v11 = vcvt.s32.f32 %v488_v0  ;;  %v616_v12 = vunpack.c.2.s8 %v240_v59  ;;  %v624_v13 = vunpack.c.3.s8 %v240_v59  ;;  %v296_v62 = vld [vmem:[#allocation7 + $0x3a0] sm:$0xff] }
 0x11b   :  { %2593 = vmatpush.bf16.msrb.mxu1 %v2103_v3  ;;  %v2231_v14 = vpack.c.bf16 %v1791_v6, %v1783_v4  ;;  %v1264_v15 = vcvt.s32.f32 %v496_v7  ;;  %v744_v16 = vunpack.c.2.s8 %v272_v1  ;;  %v752_v17 = vunpack.c.3.s8 %v272_v1  ;;  %v2389_v6 = vpop.f32.mrf.mxu1 }
 0x11c   :  { %2606 = vmatpush.bf16.msrb.mxu2 %v2167_v10  ;;  %v1384_v18 = vcvt.s32.f32 %v616_v12  ;;  %v1392_v19 = vcvt.s32.f32 %v624_v13  ;;  %v872_v21 = vunpack.c.2.s8 %v304_v8  ;;  %v880_v22 = vunpack.c.3.s8 %v304_v8 }
 0x11d   :  { %2619 = vmatpush.bf16.msrb.mxu3 %v2231_v14  ;;  %v1968_v24 = vpack.c.bf16 %v1264_v15, %v1256_v11  ;;  %v1512_v25 = vcvt.s32.f32 %v744_v16  ;;  %v1520_v26 = vcvt.s32.f32 %v752_v17  ;;  %v472_v27 = vunpack.c.0.s8 %v208_v45  ;;  %2581 = vmatmul.bf16.vlgmr.msrb.gmra.mxu0 %v6076_v58 }
 0x11e   :  { %v2032_v28 = vpack.c.bf16 %v1392_v19, %v1384_v18  ;;  %v1640_v29 = vcvt.s32.f32 %v872_v21  ;;  %v1648_v30 = vcvt.s32.f32 %v880_v22  ;;  %v480_v31 = vunpack.c.1.s8 %v208_v45  ;;  %2594 = vmatmul.bf16.vlgmr.msrb.gmra.mxu1 %v6080_v2 }
 0x11f   :  { %2625 = vmatpush.bf16.msra.mxu0 %v1968_v24  ;;  %v2096_v32 = vpack.c.bf16 %v1520_v26, %v1512_v25  ;;  %v1240_v33 = vcvt.s32.f32 %v472_v27  ;;  %v600_v36 = vunpack.c.0.s8 %v240_v59  ;;  %v608_v37 = vunpack.c.1.s8 %v240_v59  ;;  %2607 = vmatmul.bf16.vlgmr.msrb.gmra.mxu2 %v6094_v52 }
 0x120   :  { %2638 = vmatpush.bf16.msra.mxu1 %v2032_v28  ;;  %v2160_v39 = vpack.c.bf16 %v1648_v30, %v1640_v29  ;;  %v1248_v40 = vcvt.s32.f32 %v480_v31  ;;  %v728_v41 = vunpack.c.0.s8 %v272_v1  ;;  %v736_v42 = vunpack.c.1.s8 %v272_v1  ;;  %2620 = vmatmul.bf16.vlgmr.msrb.gmra.mxu3 %v6098_v56  ;;  %v192_v31 = vld [vmem:[#allocation7 + $0x60] sm:$0xff] }
 0x121   :  { %2651 = vmatpush.bf16.msra.mxu2 %v2096_v32  ;;  %v1368_v44 = vcvt.s32.f32 %v600_v36  ;;  %v1376_v45 = vcvt.s32.f32 %v608_v37  ;;  %v856_v46 = vunpack.c.0.s8 %v304_v8  ;;  %v864_v47 = vunpack.c.1.s8 %v304_v8 }
 0x122   :  { %2664 = vmatpush.bf16.msra.mxu3 %v2160_v39  ;;  %v1960_v49 = vpack.c.bf16 %v1248_v40, %v1240_v33  ;;  %v1496_v50 = vcvt.s32.f32 %v728_v41  ;;  %v1504_v51 = vcvt.s32.f32 %v736_v42  ;;  %v2336_v53 = vadd.f32 %v6116_v34, %v6114_v9 }
 0x123   :  { %v2024_v57 = vpack.c.bf16 %v1376_v45, %v1368_v44  ;;  %v1624_v59 = vcvt.s32.f32 %v856_v46  ;;  %v1632_v54 = vcvt.s32.f32 %v864_v47  ;;  %v456_v61 = vunpack.c.2.s8 %v200_v43  ;;  %v256_v46 = vld [vmem:[#allocation7 + $0x260] sm:$0xff] }
 0x124   :  { %2626 = vmatpush.bf16.msra.mxu0 %v1960_v49  ;;  %v2088_v0 = vpack.c.bf16 %v1504_v51, %v1496_v50  ;;  %v2349_v1 = vadd.f32 %v6118_v35, %v2336_v53  ;;  %v464_v3 = vunpack.c.3.s8 %v200_v43  ;;  %v584_v4 = vunpack.c.2.s8 %v232_v48  ;;  %v288_v51 = vld [vmem:[#allocation7 + $0x360] sm:$0xff] }
 0x125   :  { %2639 = vmatpush.bf16.msra.mxu1 %v2024_v57  ;;  %v2152_v7 = vpack.c.bf16 %v1632_v54, %v1624_v59  ;;  %v1224_v8 = vcvt.s32.f32 %v456_v61  ;;  %v592_v10 = vunpack.c.3.s8 %v232_v48  ;;  %v712_v11 = vunpack.c.2.s8 %v264_v55 }
 0x126   :  { %2652 = vmatpush.bf16.msra.mxu2 %v2088_v0  ;;  %v1232_v9 = vcvt.s32.f32 %v464_v3  ;;  %v1352_v34 = vcvt.s32.f32 %v584_v4  ;;  %v720_v12 = vunpack.c.3.s8 %v264_v55  ;;  %v840_v13 = vunpack.c.2.s8 %v296_v62 }
 0x127   :  { %2665 = vmatpush.bf16.msra.mxu3 %v2152_v7  ;;  %v1360_v14 = vcvt.s32.f32 %v592_v10  ;;  %v1480_v15 = vcvt.s32.f32 %v712_v11  ;;  %v848_v16 = vunpack.c.3.s8 %v296_v62  ;;  %v2362_v17 = vadd.f32 %v6120_v5, %v2349_v1  ;;  %v224_v5 = vld [vmem:[#allocation7 + $0x160] sm:$0xff]  ;;  %v6134_v7 = vpop.f32.mrf.mxu2 }
 0x128   :  { %v1952_v35 = vpack.c.bf16 %v1232_v9, %v1224_v8  ;;  %v1488_v18 = vcvt.s32.f32 %v720_v12  ;;  %v1608_v19 = vcvt.s32.f32 %v840_v13  ;;  %v440_v21 = vunpack.c.0.s8 %v200_v43  ;;  %v6136_v8 = vpop.f32.mrf.mxu3 }
 0x129   :  { %v2016_v22 = vpack.c.bf16 %v1360_v14, %v1352_v34  ;;  %v1616_v24 = vcvt.s32.f32 %v848_v16  ;;  %v448_v25 = vunpack.c.1.s8 %v200_v43  ;;  %v568_v26 = vunpack.c.0.s8 %v232_v48 }
 0x12a   :  { %2627 = vmatpush.bf16.msra.mxu0 %v1952_v35  ;;  %v2080_v27 = vpack.c.bf16 %v1488_v18, %v1480_v15  ;;  %v1208_v28 = vcvt.s32.f32 %v440_v21  ;;  %v576_v29 = vunpack.c.1.s8 %v232_v48  ;;  %v696_v30 = vunpack.c.0.s8 %v264_v55 }
 0x12b   :  { %2640 = vmatpush.bf16.msra.mxu1 %v2016_v22  ;;  %v2144_v32 = vpack.c.bf16 %v1616_v24, %v1608_v19  ;;  %v1216_v33 = vcvt.s32.f32 %v448_v25  ;;  %v1336_v36 = vcvt.s32.f32 %v568_v26  ;;  %v704_v37 = vunpack.c.1.s8 %v264_v55  ;;  %v184_v26 = vld [vmem:[#allocation7 + $0x20] sm:$0xff] }
 0x12c   :  { %2653 = vmatpush.bf16.msra.mxu2 %v2080_v27  ;;  %v1344_v38 = vcvt.s32.f32 %v576_v29  ;;  %v1464_v39 = vcvt.s32.f32 %v696_v30  ;;  %v824_v40 = vunpack.c.0.s8 %v296_v62  ;;  %v832_v41 = vunpack.c.1.s8 %v296_v62  ;;  %v216_v29 = vld [vmem:[#allocation7 + $0x120] sm:$0xff] }
 0x12d   :  { %2666 = vmatpush.bf16.msra.mxu3 %v2144_v32  ;;  %v1944_v42 = vpack.c.bf16 %v1216_v33, %v1208_v28  ;;  %v1472_v43 = vcvt.s32.f32 %v704_v37  ;;  %v424_v44 = vunpack.c.2.s8 %v192_v31  ;;  %v432_v45 = vunpack.c.3.s8 %v192_v31 }
 0x12e   :  { %v2008_v47 = vpack.c.bf16 %v1344_v38, %v1336_v36  ;;  %v1592_v48 = vcvt.s32.f32 %v824_v40  ;;  %v1600_v49 = vcvt.s32.f32 %v832_v41  ;;  %v552_v50 = vunpack.c.2.s8 %v224_v5  ;;  %v248_v36 = vld [vmem:[#allocation7 + $0x220] sm:$0xff] }
 0x12f   :  { %2628 = vmatpush.bf16.msra.mxu0 %v1944_v42  ;;  %v2072_v53 = vpack.c.bf16 %v1472_v43, %v1464_v39  ;;  %v1192_v55 = vcvt.s32.f32 %v424_v44  ;;  %v1200_v57 = vcvt.s32.f32 %v432_v45  ;;  %v560_v59 = vunpack.c.3.s8 %v224_v5  ;;  %v280_v40 = vld [vmem:[#allocation7 + $0x320] sm:$0xff]  ;;  %v2402_v45 = vpop.f32.mrf.mxu2 }
 0x130   :  { %2641 = vmatpush.bf16.msra.mxu1 %v2008_v47  ;;  %v2136_v54 = vpack.c.bf16 %v1600_v49, %v1592_v48  ;;  %v1320_v61 = vcvt.s32.f32 %v552_v50  ;;  %v680_v62 = vunpack.c.2.s8 %v256_v46  ;;  %v688_v0 = vunpack.c.3.s8 %v256_v46 }
 0x131   :  { %2654 = vmatpush.bf16.msra.mxu2 %v2072_v53  ;;  %v1936_v1 = vpack.c.bf16 %v1200_v57, %v1192_v55  ;;  %v1328_v3 = vcvt.s32.f32 %v560_v59  ;;  %v808_v4 = vunpack.c.2.s8 %v288_v51  ;;  %v816_v6 = vunpack.c.3.s8 %v288_v51 }
 0x132   :  { %2667 = vmatpush.bf16.msra.mxu3 %v2136_v54  ;;  %v1448_v10 = vcvt.s32.f32 %v680_v62  ;;  %v1456_v11 = vcvt.s32.f32 %v688_v0  ;;  %v2375_v9 = vadd.f32 %v6122_v60, %v2362_v17  ;;  %v408_v34 = vunpack.c.0.s8 %v192_v31 }
 0x133   :  { %2629 = vmatpush.bf16.msra.mxu0 %v1936_v1  ;;  %v2000_v12 = vpack.c.bf16 %v1328_v3, %v1320_v61  ;;  %v1576_v13 = vcvt.s32.f32 %v808_v4  ;;  %v1584_v14 = vcvt.s32.f32 %v816_v6  ;;  %v416_v15 = vunpack.c.1.s8 %v192_v31 }
 0x134   :  { %v2064_v16 = vpack.c.bf16 %v1456_v11, %v1448_v10  ;;  %v1176_v35 = vcvt.s32.f32 %v408_v34  ;;  %v536_v18 = vunpack.c.0.s8 %v224_v5  ;;  %v544_v19 = vunpack.c.1.s8 %v224_v5 }
 0x135   :  { %2642 = vmatpush.bf16.msra.mxu1 %v2000_v12  ;;  %v2128_v21 = vpack.c.bf16 %v1584_v14, %v1576_v13  ;;  %v1184_v22 = vcvt.s32.f32 %v416_v15  ;;  %v664_v24 = vunpack.c.0.s8 %v256_v46  ;;  %v672_v25 = vunpack.c.1.s8 %v256_v46  ;;  %v2415_v46 = vpop.f32.mrf.mxu3  ;;  %v336_v14 = vld [vmem:[#allocation7 + $0x4e0] sm:$0xff] }
 0x136   :  { %2655 = vmatpush.bf16.msra.mxu2 %v2064_v16  ;;  %v1304_v27 = vcvt.s32.f32 %v536_v18  ;;  %v1312_v28 = vcvt.s32.f32 %v544_v19  ;;  %v792_v60 = vunpack.c.0.s8 %v288_v51  ;;  %v800_v17 = vunpack.c.1.s8 %v288_v51  ;;  %v368_v19 = vld [vmem:[#allocation7 + $0x5e0] sm:$0xff] }
 0x137   :  { %2668 = vmatpush.bf16.msra.mxu3 %v2128_v21  ;;  %v1928_v30 = vpack.c.bf16 %v1184_v22, %v1176_v35  ;;  %v1432_v32 = vcvt.s32.f32 %v664_v24  ;;  %v1440_v31 = vcvt.s32.f32 %v672_v25  ;;  %v6140_v33 = vadd.f32 %v6124_v23, %v2375_v9  ;;  %v6142_v21 = vpop.f32.mrf.mxu0  ;;  %v6144_v22 = vpop.f32.mrf.mxu1 }
 0x138   :  { %v1992_v37 = vpack.c.bf16 %v1312_v28, %v1304_v27  ;;  %v1560_v5 = vcvt.s32.f32 %v792_v60  ;;  %v1568_v38 = vcvt.s32.f32 %v800_v17  ;;  %v392_v39 = vunpack.c.2.s8 %v184_v26  ;;  %v209_v28 = vld [vmem:[#allocation7 + $0xe8] sm:$0xff]  ;;  %v6149_v46 = vpop.f32.mrf.mxu2 }
 0x139   :  { %2630 = vmatpush.bf16.msra.mxu0 %v1928_v30  ;;  %v2056_v41 = vpack.c.bf16 %v1440_v31, %v1432_v32  ;;  %v400_v42 = vunpack.c.3.s8 %v184_v26  ;;  %v520_v43 = vunpack.c.2.s8 %v216_v29  ;;  %v528_v44 = vunpack.c.3.s8 %v216_v29  ;;  %v6146_v32 = vld [vmem:[#allocation7 + $0x1e8] sm:$0xff] }
 0x13a   :  { %2643 = vmatpush.bf16.msra.mxu1 %v1992_v37  ;;  %v2120_v47 = vpack.c.bf16 %v1568_v38, %v1560_v5  ;;  %v1160_v48 = vcvt.s32.f32 %v392_v39  ;;  %v648_v49 = vunpack.c.2.s8 %v248_v36  ;;  %v656_v50 = vunpack.c.3.s8 %v248_v36 }
 0x13b   :  { %2656 = vmatpush.bf16.msra.mxu2 %v2056_v41  ;;  %v1168_v23 = vcvt.s32.f32 %v400_v42  ;;  %v1288_v51 = vcvt.s32.f32 %v520_v43  ;;  %v1296_v53 = vcvt.s32.f32 %v528_v44  ;;  %v776_v55 = vunpack.c.2.s8 %v280_v40 }
 0x13c   :  { %2669 = vmatpush.bf16.msra.mxu3 %v2120_v47  ;;  %v1416_v57 = vcvt.s32.f32 %v648_v49  ;;  %v1424_v59 = vcvt.s32.f32 %v656_v50  ;;  %v784_v54 = vunpack.c.3.s8 %v280_v40  ;;  %v376_v61 = vunpack.c.0.s8 %v184_v26 }
 0x13d   :  { %v1920_v62 = vpack.c.bf16 %v1168_v23, %v1160_v48  ;;  %v1984_v0 = vpack.c.bf16 %v1296_v53, %v1288_v51  ;;  %v1544_v1 = vcvt.s32.f32 %v776_v55  ;;  %v384_v3 = vunpack.c.1.s8 %v184_v26  ;;  %v6151_v47 = vpop.f32.mrf.mxu3 }
 0x13e   :  { %v2048_v4 = vpack.c.bf16 %v1424_v59, %v1416_v57  ;;  %v1552_v6 = vcvt.s32.f32 %v784_v54  ;;  %v1144_v10 = vcvt.s32.f32 %v376_v61  ;;  %v504_v11 = vunpack.c.0.s8 %v216_v29 }
 0x13f   :  { %2631 = vmatpush.bf16.msra.mxu0 %v1920_v62  ;;  %2644 = vmatpush.bf16.msra.mxu1 %v1984_v0  ;;  %v1152_v9 = vcvt.s32.f32 %v384_v3  ;;  %v512_v34 = vunpack.c.1.s8 %v216_v29  ;;  %v632_v12 = vunpack.c.0.s8 %v248_v36  ;;  %v640_v13 = vunpack.c.1.s8 %v248_v36  ;;  %v2428_v0 = vpop.f32.mrf.mxu0 }
 0x140   :  { %2657 = vmatpush.bf16.msra.mxu2 %v2048_v4  ;;  %v2112_v15 = vpack.c.bf16 %v1552_v6, %v1544_v1  ;;  %v1272_v16 = vcvt.s32.f32 %v504_v11  ;;  %v760_v35 = vunpack.c.0.s8 %v280_v40  ;;  %v768_v18 = vunpack.c.1.s8 %v280_v40  ;;  %v2441_v1 = vpop.f32.mrf.mxu1  ;;  %v328_v11 = vld [vmem:[#allocation7 + $0x4a0] sm:$0xff] }
 0x141   :  { %v1912_v24 = vpack.c.bf16 %v1152_v9, %v1144_v10  ;;  %v1280_v25 = vcvt.s32.f32 %v512_v34  ;;  %v1400_v26 = vcvt.s32.f32 %v632_v12  ;;  %v1408_v27 = vcvt.s32.f32 %v640_v13 }
 0x142   :  { %2670 = vmatpush.bf16.msra.mxu3 %v2112_v15  ;;  %v1528_v60 = vcvt.s32.f32 %v760_v35  ;;  %v1536_v17 = vcvt.s32.f32 %v768_v18  ;;  %v1000_v29 = vunpack.c.2.s8 %v336_v14  ;;  %v1008_v30 = vunpack.c.3.s8 %v336_v14 }
 0x143   :  { %2632 = vmatpush.bf16.msra.mxu0 %v1912_v24  ;;  %v1976_v31 = vpack.c.bf16 %v1280_v25, %v1272_v16  ;;  %v2040_v36 = vpack.c.bf16 %v1408_v27, %v1400_v26  ;;  %v1128_v37 = vunpack.c.2.s8 %v368_v19  ;;  %v1136_v5 = vunpack.c.3.s8 %v368_v19 }
 0x144   :  { %v2104_v38 = vpack.c.bf16 %v1536_v17, %v1528_v60  ;;  %v1768_v39 = vcvt.s32.f32 %v1000_v29  ;;  %v1776_v40 = vcvt.s32.f32 %v1008_v30  ;;  %v489_v41 = vunpack.c.2.s8 %v209_v28 }
 0x145   :  { %2645 = vmatpush.bf16.msra.mxu1 %v1976_v31  ;;  %2658 = vmatpush.bf16.msra.mxu2 %v2040_v36  ;;  %v1896_v42 = vcvt.s32.f32 %v1128_v37  ;;  %v1904_v43 = vcvt.s32.f32 %v1136_v5  ;;  %v497_v44 = vunpack.c.3.s8 %v209_v28  ;;  %v617_v45 = vunpack.c.2.s8 %v6146_v32  ;;  %v2454_v31 = vpop.f32.mrf.mxu2  ;;  %v2467_v36 = vpop.f32.mrf.mxu3 }
 0x146   :  { %2671 = vmatpush.bf16.msra.mxu3 %v2104_v38  ;;  %v2224_v48 = vpack.c.bf16 %v1776_v40, %v1768_v39  ;;  %v1257_v49 = vcvt.s32.f32 %v489_v41  ;;  %v625_v50 = vunpack.c.3.s8 %v6146_v32  ;;  %v984_v23 = vunpack.c.0.s8 %v336_v14  ;;  %2633 = vmatmul.bf16.vlgmr.msra.gmra.mxu0 %v6078_v63 }
 0x147   :  { %v2288_v51 = vpack.c.bf16 %v1904_v43, %v1896_v42  ;;  %v1265_v53 = vcvt.s32.f32 %v497_v44  ;;  %v1385_v55 = vcvt.s32.f32 %v617_v45  ;;  %v992_v57 = vunpack.c.1.s8 %v336_v14  ;;  %v360_v14 = vld [vmem:[#allocation7 + $0x5a0] sm:$0xff] }
 0x148   :  { %2677 = vmatpush.bf16.msrb.mxu0 %v2224_v48  ;;  %v1393_v59 = vcvt.s32.f32 %v625_v50  ;;  %v1752_v54 = vcvt.s32.f32 %v984_v23  ;;  %v1112_v61 = vunpack.c.0.s8 %v368_v19  ;;  %v1120_v62 = vunpack.c.1.s8 %v368_v19  ;;  %2659 = vmatmul.bf16.vlgmr.msra.gmra.mxu2 %v6076_v58  ;;  %v201_v19 = vld [vmem:[#allocation7 + $0xa8] sm:$0xff] }
 0x149   :  { %2690 = vmatpush.bf16.msrb.mxu1 %v2288_v51  ;;  %v1969_v3 = vpack.c.bf16 %v1265_v53, %v1257_v49  ;;  %v1760_v4 = vcvt.s32.f32 %v992_v57  ;;  %v473_v6 = vunpack.c.0.s8 %v209_v28  ;;  %v481_v10 = vunpack.c.1.s8 %v209_v28  ;;  %2672 = vmatmul.bf16.vlgmr.msra.gmra.mxu3 %v6080_v2  ;;  %v233_v28 = vld [vmem:[#allocation7 + $0x1a8] sm:$0xff] }
 0x14a   :  { %v2033_v9 = vpack.c.bf16 %v1393_v59, %v1385_v55  ;;  %v1880_v34 = vcvt.s32.f32 %v1112_v61  ;;  %v1888_v12 = vcvt.s32.f32 %v1120_v62  ;;  %v601_v13 = vunpack.c.0.s8 %v6146_v32  ;;  %2646 = vmatmul.bf16.vlgmr.msra.gmra.mxu1 %v6085_v20  ;;  %v320_v62 = vld [vmem:[#allocation7 + $0x460] sm:$0xff] }
 0x14b   :  { %2703 = vmatpush.bf16.msrb.mxu2 %v1969_v3  ;;  %v2216_v15 = vpack.c.bf16 %v1760_v4, %v1752_v54  ;;  %v1241_v16 = vcvt.s32.f32 %v473_v6  ;;  %v1249_v35 = vcvt.s32.f32 %v481_v10  ;;  %v609_v18 = vunpack.c.1.s8 %v6146_v32  ;;  %v352_v6 = vld [vmem:[#allocation7 + $0x560] sm:$0xff] }
 0x14c   :  { %2716 = vmatpush.bf16.msrb.mxu3 %v2033_v9  ;;  %v2280_v24 = vpack.c.bf16 %v1888_v12, %v1880_v34  ;;  %v1369_v25 = vcvt.s32.f32 %v601_v13  ;;  %v6162_v26 = vadd.f32 %v6136_v8, %v6134_v7  ;;  %v968_v27 = vunpack.c.2.s8 %v328_v11  ;;  %v193_v12 = vld [vmem:[#allocation7 + $0x68] sm:$0xff] }
 0x14d   :  { %2678 = vmatpush.bf16.msrb.mxu0 %v2216_v15  ;;  %v1961_v60 = vpack.c.bf16 %v1249_v35, %v1241_v16  ;;  %v1377_v17 = vcvt.s32.f32 %v609_v18  ;;  %v976_v29 = vunpack.c.3.s8 %v328_v11  ;;  %v1096_v30 = vunpack.c.2.s8 %v360_v14 }
 0x14e   :  { %2691 = vmatpush.bf16.msrb.mxu1 %v2280_v24  ;;  %v1736_v37 = vcvt.s32.f32 %v968_v27  ;;  %v1104_v32 = vunpack.c.3.s8 %v360_v14  ;;  %v457_v5 = vunpack.c.2.s8 %v201_v19  ;;  %v465_v38 = vunpack.c.3.s8 %v201_v19  ;;  %v225_v27 = vld [vmem:[#allocation7 + $0x168] sm:$0xff] }
 0x14f   :  { %2704 = vmatpush.bf16.msrb.mxu2 %v1961_v60  ;;  %v2025_v39 = vpack.c.bf16 %v1377_v17, %v1369_v25  ;;  %v1744_v40 = vcvt.s32.f32 %v976_v29  ;;  %v1864_v41 = vcvt.s32.f32 %v1096_v30  ;;  %v585_v7 = vunpack.c.2.s8 %v233_v28 }
 0x150   :  { %v1872_v8 = vcvt.s32.f32 %v1104_v32  ;;  %v1225_v42 = vcvt.s32.f32 %v457_v5  ;;  %v1233_v43 = vcvt.s32.f32 %v465_v38  ;;  %v593_v44 = vunpack.c.3.s8 %v233_v28 }
 0x151   :  { %2717 = vmatpush.bf16.msrb.mxu3 %v2025_v39  ;;  %v2208_v45 = vpack.c.bf16 %v1744_v40, %v1736_v37  ;;  %v1353_v48 = vcvt.s32.f32 %v585_v7  ;;  %v952_v49 = vunpack.c.0.s8 %v328_v11  ;;  %v960_v50 = vunpack.c.1.s8 %v328_v11 }
 0x152   :  { %v2272_v23 = vpack.c.bf16 %v1872_v8, %v1864_v41  ;;  %v1953_v51 = vpack.c.bf16 %v1233_v43, %v1225_v42  ;;  %v1361_v53 = vcvt.s32.f32 %v593_v44  ;;  %v1080_v55 = vunpack.c.0.s8 %v360_v14 }
 0x153   :  { %2679 = vmatpush.bf16.msrb.mxu0 %v2208_v45  ;;  %v1720_v57 = vcvt.s32.f32 %v952_v49  ;;  %v1728_v59 = vcvt.s32.f32 %v960_v50  ;;  %v1088_v54 = vunpack.c.1.s8 %v360_v14  ;;  %v441_v61 = vunpack.c.0.s8 %v201_v19 }
 0x154   :  { %2692 = vmatpush.bf16.msrb.mxu1 %v2272_v23  ;;  %2705 = vmatpush.bf16.msrb.mxu2 %v1953_v51  ;;  %v2017_v0 = vpack.c.bf16 %v1361_v53, %v1353_v48  ;;  %v1848_v1 = vcvt.s32.f32 %v1080_v55  ;;  %v449_v3 = vunpack.c.1.s8 %v201_v19  ;;  %v569_v4 = vunpack.c.0.s8 %v233_v28  ;;  %v312_v23 = vld [vmem:[#allocation7 + $0x420] sm:$0xff] }
 0x155   :  { %v2200_v10 = vpack.c.bf16 %v1728_v59, %v1720_v57  ;;  %v1856_v9 = vcvt.s32.f32 %v1088_v54  ;;  %v1209_v11 = vcvt.s32.f32 %v441_v61  ;;  %v577_v34 = vunpack.c.1.s8 %v233_v28  ;;  %v344_v61 = vld [vmem:[#allocation7 + $0x520] sm:$0xff] }
 0x156   :  { %2718 = vmatpush.bf16.msrb.mxu3 %v2017_v0  ;;  %v1217_v13 = vcvt.s32.f32 %v449_v3  ;;  %v1337_v15 = vcvt.s32.f32 %v569_v4  ;;  %v936_v16 = vunpack.c.2.s8 %v320_v62  ;;  %v944_v35 = vunpack.c.3.s8 %v320_v62 }
 0x157   :  { %2680 = vmatpush.bf16.msrb.mxu0 %v2200_v10  ;;  %v2264_v14 = vpack.c.bf16 %v1856_v9, %v1848_v1  ;;  %v1345_v18 = vcvt.s32.f32 %v577_v34  ;;  %v1064_v24 = vunpack.c.2.s8 %v352_v6  ;;  %v1072_v25 = vunpack.c.3.s8 %v352_v6 }
 0x158   :  { %v1945_v60 = vpack.c.bf16 %v1217_v13, %v1209_v11  ;;  %v1704_v19 = vcvt.s32.f32 %v936_v16  ;;  %v1712_v17 = vcvt.s32.f32 %v944_v35  ;;  %v425_v29 = vunpack.c.2.s8 %v193_v12  ;;  %v217_v11 = vld [vmem:[#allocation7 + $0x128] sm:$0xff] }
 0x159   :  { %2693 = vmatpush.bf16.msrb.mxu1 %v2264_v14  ;;  %v2009_v30 = vpack.c.bf16 %v1345_v18, %v1337_v15  ;;  %v1832_v31 = vcvt.s32.f32 %v1064_v24  ;;  %v1840_v28 = vcvt.s32.f32 %v1072_v25  ;;  %v433_v36 = vunpack.c.3.s8 %v193_v12 }
 0x15a   :  { %2706 = vmatpush.bf16.msrb.mxu2 %v1945_v60  ;;  %v2192_v37 = vpack.c.bf16 %v1712_v17, %v1704_v19  ;;  %v1193_v32 = vcvt.s32.f32 %v425_v29  ;;  %v553_v5 = vunpack.c.2.s8 %v225_v27  ;;  %v561_v38 = vunpack.c.3.s8 %v225_v27 }
 0x15b   :  { %2719 = vmatpush.bf16.msrb.mxu3 %v2009_v30  ;;  %v2256_v39 = vpack.c.bf16 %v1840_v28, %v1832_v31  ;;  %v1201_v40 = vcvt.s32.f32 %v433_v36  ;;  %v2427_v41 = vadd.f32 %v6142_v21, %v6162_v26  ;;  %v920_v7 = vunpack.c.0.s8 %v320_v62 }
 0x15c   :  { %2681 = vmatpush.bf16.msrb.mxu0 %v2192_v37  ;;  %v1321_v8 = vcvt.s32.f32 %v553_v5  ;;  %v1329_v42 = vcvt.s32.f32 %v561_v38  ;;  %v928_v43 = vunpack.c.1.s8 %v320_v62  ;;  %v1048_v44 = vunpack.c.0.s8 %v352_v6 }
 0x15d   :  { %2694 = vmatpush.bf16.msrb.mxu1 %v2256_v39  ;;  %v1937_v45 = vpack.c.bf16 %v1201_v40, %v1193_v32  ;;  %v2440_v48 = vadd.f32 %v6144_v22, %v2427_v41  ;;  %v1688_v49 = vcvt.s32.f32 %v920_v7  ;;  %v1056_v50 = vunpack.c.1.s8 %v352_v6  ;;  %v185_v22 = vld [vmem:[#allocation7 + $0x28] sm:$0xff] }
 0x15e   :  { %v2001_v51 = vpack.c.bf16 %v1329_v42, %v1321_v8  ;;  %v1696_v53 = vcvt.s32.f32 %v928_v43  ;;  %v1816_v55 = vcvt.s32.f32 %v1048_v44  ;;  %v409_v57 = vunpack.c.0.s8 %v193_v12  ;;  %v273_v7 = vld [vmem:[#allocation7 + $0x2e8] sm:$0xff] }
 0x15f   :  { %2707 = vmatpush.bf16.msrb.mxu2 %v1937_v45  ;;  %v1824_v59 = vcvt.s32.f32 %v1056_v50  ;;  %v417_v21 = vunpack.c.1.s8 %v193_v12  ;;  %v537_v26 = vunpack.c.0.s8 %v225_v27  ;;  %v545_v54 = vunpack.c.1.s8 %v225_v27  ;;  %v305_v45 = vld [vmem:[#allocation7 + $0x3e8] sm:$0xff] }
 0x160   :  { %2720 = vmatpush.bf16.msrb.mxu3 %v2001_v51  ;;  %v2184_v62 = vpack.c.bf16 %v1696_v53, %v1688_v49  ;;  %v1177_v0 = vcvt.s32.f32 %v409_v57  ;;  %v2453_v1 = vadd.f32 %v6149_v46, %v2440_v48  ;;  %v904_v3 = vunpack.c.2.s8 %v312_v23  ;;  %v337_v51 = vld [vmem:[#allocation7 + $0x4e8] sm:$0xff] }
 0x161   :  { %v2248_v4 = vpack.c.bf16 %v1824_v59, %v1816_v55  ;;  %v1185_v6 = vcvt.s32.f32 %v417_v21  ;;  %v1305_v10 = vcvt.s32.f32 %v537_v26  ;;  %v1313_v9 = vcvt.s32.f32 %v545_v54 }
 0x162   :  { %2682 = vmatpush.bf16.msrb.mxu0 %v2184_v62  ;;  %v6169_v34 = vadd.f32 %v6151_v47, %v2453_v1  ;;  %v912_v12 = vunpack.c.3.s8 %v312_v23  ;;  %v1672_v13 = vcvt.s32.f32 %v904_v3  ;;  %v1032_v15 = vunpack.c.2.s8 %v344_v61  ;;  %v369_v62 = vld [vmem:[#allocation7 + $0x5e8] sm:$0xff] }
 0x163   :  { %2695 = vmatpush.bf16.msrb.mxu1 %v2248_v4  ;;  %v1929_v16 = vpack.c.bf16 %v1185_v6, %v1177_v0  ;;  %v1993_v35 = vpack.c.bf16 %v1313_v9, %v1305_v10  ;;  %v1040_v14 = vunpack.c.3.s8 %v344_v61  ;;  %v393_v18 = vunpack.c.2.s8 %v185_v22 }
 0x164   :  { %v1680_v46 = vcvt.s32.f32 %v912_v12  ;;  %v1800_v24 = vcvt.s32.f32 %v1032_v15  ;;  %v401_v25 = vunpack.c.3.s8 %v185_v22  ;;  %v521_v27 = vunpack.c.2.s8 %v217_v11 }
 0x165   :  { %2708 = vmatpush.bf16.msrb.mxu2 %v1929_v16  ;;  %2721 = vmatpush.bf16.msrb.mxu3 %v1993_v35  ;;  %v1808_v60 = vcvt.s32.f32 %v1040_v14  ;;  %v1161_v19 = vcvt.s32.f32 %v393_v18  ;;  %v529_v17 = vunpack.c.3.s8 %v217_v11  ;;  %v888_v29 = vunpack.c.0.s8 %v312_v23 }
 0x166   :  { %v2176_v47 = vpack.c.bf16 %v1680_v46, %v1672_v13  ;;  %v1169_v30 = vcvt.s32.f32 %v401_v25  ;;  %v1289_v31 = vcvt.s32.f32 %v521_v27  ;;  %v896_v28 = vunpack.c.1.s8 %v312_v23 }
 0x167   :  { %v2240_v36 = vpack.c.bf16 %v1808_v60, %v1800_v24  ;;  %v1297_v37 = vcvt.s32.f32 %v529_v17  ;;  %v1656_v32 = vcvt.s32.f32 %v888_v29  ;;  %v1016_v5 = vunpack.c.0.s8 %v344_v61 }
 0x168   :  { %2683 = vmatpush.bf16.msrb.mxu0 %v2176_v47  ;;  %v1921_v38 = vpack.c.bf16 %v1169_v30, %v1161_v19  ;;  %v1664_v39 = vcvt.s32.f32 %v896_v28  ;;  %v1024_v40 = vunpack.c.1.s8 %v344_v61  ;;  %v377_v41 = vunpack.c.0.s8 %v185_v22  ;;  %v265_v47 = vld [vmem:[#allocation7 + $0x2a8] sm:$0xff] }
 0x169   :  { %2696 = vmatpush.bf16.msrb.mxu1 %v2240_v36  ;;  %v1985_v8 = vpack.c.bf16 %v1297_v37, %v1289_v31  ;;  %v1784_v42 = vcvt.s32.f32 %v1016_v5  ;;  %v385_v43 = vunpack.c.1.s8 %v185_v22  ;;  %v505_v44 = vunpack.c.0.s8 %v217_v11  ;;  %v297_v37 = vld [vmem:[#allocation7 + $0x3a8] sm:$0xff] }
 0x16a   :  { %2709 = vmatpush.bf16.msrb.mxu2 %v1921_v38  ;;  %v2168_v48 = vpack.c.bf16 %v1664_v39, %v1656_v32  ;;  %v1792_v49 = vcvt.s32.f32 %v1024_v40  ;;  %v1145_v50 = vcvt.s32.f32 %v377_v41  ;;  %v513_v23 = vunpack.c.1.s8 %v217_v11  ;;  %v329_v40 = vld [vmem:[#allocation7 + $0x4a8] sm:$0xff] }
 0x16b   :  { %2722 = vmatpush.bf16.msrb.mxu3 %v1985_v8  ;;  %v1153_v53 = vcvt.s32.f32 %v385_v43  ;;  %v1273_v55 = vcvt.s32.f32 %v505_v44  ;;  %v745_v57 = vunpack.c.2.s8 %v273_v7  ;;  %v753_v59 = vunpack.c.3.s8 %v273_v7 }
 0x16c   :  { %2684 = vmatpush.bf16.msrb.mxu0 %v2168_v48  ;;  %v2232_v21 = vpack.c.bf16 %v1792_v49, %v1784_v42  ;;  %v1281_v26 = vcvt.s32.f32 %v513_v23  ;;  %v873_v54 = vunpack.c.2.s8 %v305_v45  ;;  %v881_v61 = vunpack.c.3.s8 %v305_v45  ;;  %v361_v49 = vld [vmem:[#allocation7 + $0x5a8] sm:$0xff] }
 0x16d   :  { %v1913_v0 = vpack.c.bf16 %v1153_v53, %v1145_v50  ;;  %v1513_v1 = vcvt.s32.f32 %v745_v57  ;;  %v1521_v3 = vcvt.s32.f32 %v753_v59  ;;  %v1001_v22 = vunpack.c.2.s8 %v337_v51 }
 0x16e   :  { %2697 = vmatpush.bf16.msrb.mxu1 %v2232_v21  ;;  %v1977_v4 = vpack.c.bf16 %v1281_v26, %v1273_v55  ;;  %v1641_v6 = vcvt.s32.f32 %v873_v54  ;;  %v1649_v10 = vcvt.s32.f32 %v881_v61  ;;  %v1009_v9 = vunpack.c.3.s8 %v337_v51 }
 0x16f   :  { %2710 = vmatpush.bf16.msrb.mxu2 %v1913_v0  ;;  %v2097_v11 = vpack.c.bf16 %v1521_v3, %v1513_v1  ;;  %v1769_v12 = vcvt.s32.f32 %v1001_v22  ;;  %v1129_v13 = vunpack.c.2.s8 %v369_v62  ;;  %v1137_v15 = vunpack.c.3.s8 %v369_v62  ;;  %2685 = vmatmul.bf16.vlgmr.msrb.gmra.mxu0 %v6094_v52 }
 0x170   :  { %2723 = vmatpush.bf16.msrb.mxu3 %v1977_v4  ;;  %v2161_v16 = vpack.c.bf16 %v1649_v10, %v1641_v6  ;;  %v1777_v35 = vcvt.s32.f32 %v1009_v9  ;;  %v729_v14 = vunpack.c.0.s8 %v273_v7  ;;  %v737_v18 = vunpack.c.1.s8 %v273_v7 }
 0x171   :  { %2729 = vmatpush.bf16.msra.mxu0 %v2097_v11  ;;  %v1897_v46 = vcvt.s32.f32 %v1129_v13  ;;  %v1905_v24 = vcvt.s32.f32 %v1137_v15  ;;  %v857_v25 = vunpack.c.0.s8 %v305_v45  ;;  %v865_v27 = vunpack.c.1.s8 %v305_v45  ;;  %2698 = vmatmul.bf16.vlgmr.msrb.gmra.mxu1 %v6098_v56 }
 0x172   :  { %2742 = vmatpush.bf16.msra.mxu1 %v2161_v16  ;;  %v2225_v60 = vpack.c.bf16 %v1777_v35, %v1769_v12  ;;  %v1497_v19 = vcvt.s32.f32 %v729_v14  ;;  %v1505_v17 = vcvt.s32.f32 %v737_v18  ;;  %v985_v29 = vunpack.c.0.s8 %v337_v51  ;;  %2711 = vmatmul.bf16.vlgmr.msrb.gmra.mxu2 %v6078_v63  ;;  %v257_v16 = vld [vmem:[#allocation7 + $0x268] sm:$0xff] }
 0x173   :  { %v2289_v30 = vpack.c.bf16 %v1905_v24, %v1897_v46  ;;  %v1625_v31 = vcvt.s32.f32 %v857_v25  ;;  %v1633_v28 = vcvt.s32.f32 %v865_v27  ;;  %v993_v36 = vunpack.c.1.s8 %v337_v51  ;;  %2724 = vmatmul.bf16.vlgmr.msrb.gmra.mxu3 %v6085_v20  ;;  %v6175_v24 = vld [vmem:[#allocation7 + $0x368] sm:$0xff]  ;;  %v6177_v25 = vpop.f32.mrf.mxu0 }
 0x174   :  { %2755 = vmatpush.bf16.msra.mxu2 %v2225_v60  ;;  %v2089_v32 = vpack.c.bf16 %v1505_v17, %v1497_v19  ;;  %v1753_v5 = vcvt.s32.f32 %v985_v29  ;;  %v1113_v38 = vunpack.c.0.s8 %v369_v62  ;;  %v1121_v39 = vunpack.c.1.s8 %v369_v62  ;;  %v171_v29 = vld [vmem:[%s6713_s1] sm:$0xff] }
 0x175   :  { %2768 = vmatpush.bf16.msra.mxu3 %v2289_v30  ;;  %v2153_v41 = vpack.c.bf16 %v1633_v28, %v1625_v31  ;;  %v1761_v7 = vcvt.s32.f32 %v993_v36  ;;  %v713_v8 = vunpack.c.2.s8 %v265_v47  ;;  %v721_v42 = vunpack.c.3.s8 %v265_v47 }
 0x176   :  { %2730 = vmatpush.bf16.msra.mxu0 %v2089_v32  ;;  %v1881_v43 = vcvt.s32.f32 %v1113_v38  ;;  %v1889_v44 = vcvt.s32.f32 %v1121_v39  ;;  %v841_v45 = vunpack.c.2.s8 %v297_v37  ;;  %v849_v48 = vunpack.c.3.s8 %v297_v37  ;;  %v353_v39 = vld [vmem:[#allocation7 + $0x568] sm:$0xff] }
 0x177   :  { %2743 = vmatpush.bf16.msra.mxu1 %v2153_v41  ;;  %v2217_v50 = vpack.c.bf16 %v1761_v7, %v1753_v5  ;;  %v1481_v23 = vcvt.s32.f32 %v713_v8  ;;  %v1489_v51 = vcvt.s32.f32 %v721_v42  ;;  %v969_v53 = vunpack.c.2.s8 %v329_v40 }
 0x178   :  { %v2281_v55 = vpack.c.bf16 %v1889_v44, %v1881_v43  ;;  %v1609_v57 = vcvt.s32.f32 %v841_v45  ;;  %v1617_v59 = vcvt.s32.f32 %v849_v48  ;;  %v977_v21 = vunpack.c.3.s8 %v329_v40  ;;  %v6184_v48 = vpop.f32.mrf.mxu1 }
 0x179   :  { %2756 = vmatpush.bf16.msra.mxu2 %v2217_v50  ;;  %v2081_v26 = vpack.c.bf16 %v1489_v51, %v1481_v23  ;;  %v1737_v54 = vcvt.s32.f32 %v969_v53  ;;  %v1097_v61 = vunpack.c.2.s8 %v361_v49  ;;  %v1105_v62 = vunpack.c.3.s8 %v361_v49 }
 0x17a   :  { %2769 = vmatpush.bf16.msra.mxu3 %v2281_v55  ;;  %v2145_v0 = vpack.c.bf16 %v1617_v59, %v1609_v57  ;;  %v1745_v1 = vcvt.s32.f32 %v977_v21  ;;  %v697_v3 = vunpack.c.0.s8 %v265_v47  ;;  %v705_v22 = vunpack.c.1.s8 %v265_v47  ;;  %v321_v47 = vld [vmem:[#allocation7 + $0x468] sm:$0xff] }
 0x17b   :  { %2731 = vmatpush.bf16.msra.mxu0 %v2081_v26  ;;  %v1865_v4 = vcvt.s32.f32 %v1097_v61  ;;  %v1873_v6 = vcvt.s32.f32 %v1105_v62  ;;  %v825_v10 = vunpack.c.0.s8 %v297_v37  ;;  %v833_v9 = vunpack.c.1.s8 %v297_v37 }
 0x17c   :  { %2744 = vmatpush.bf16.msra.mxu1 %v2145_v0  ;;  %v2209_v11 = vpack.c.bf16 %v1745_v1, %v1737_v54  ;;  %v1465_v12 = vcvt.s32.f32 %v697_v3  ;;  %v1473_v13 = vcvt.s32.f32 %v705_v22  ;;  %v953_v15 = vunpack.c.0.s8 %v329_v40  ;;  %v2480_v0 = vpop.f32.mrf.mxu0 }
 0x17d   :  { %v2273_v35 = vpack.c.bf16 %v1873_v6, %v1865_v4  ;;  %v1593_v14 = vcvt.s32.f32 %v825_v10  ;;  %v1601_v18 = vcvt.s32.f32 %v833_v9  ;;  %v961_v46 = vunpack.c.1.s8 %v329_v40  ;;  %v249_v6 = vld [vmem:[#allocation7 + $0x228] sm:$0xff]  ;;  %v210_v0 = vld [vmem:[#allocation7 + $0xf0] sm:$0xff] }
 0x17e   :  { %2757 = vmatpush.bf16.msra.mxu2 %v2209_v11  ;;  %v2073_v27 = vpack.c.bf16 %v1473_v13, %v1465_v12  ;;  %v1721_v60 = vcvt.s32.f32 %v953_v15  ;;  %v1081_v19 = vunpack.c.0.s8 %v361_v49  ;;  %v1089_v17 = vunpack.c.1.s8 %v361_v49  ;;  %v6186_v49 = vpop.f32.mrf.mxu2  ;;  %v281_v13 = vld [vmem:[#allocation7 + $0x328] sm:$0xff]  ;;  %v6190_v15 = vpop.f32.mrf.mxu3 }
 0x17f   :  { %2770 = vmatpush.bf16.msra.mxu3 %v2273_v35  ;;  %v2137_v30 = vpack.c.bf16 %v1601_v18, %v1593_v14  ;;  %v1729_v31 = vcvt.s32.f32 %v961_v46  ;;  %v681_v28 = vunpack.c.2.s8 %v257_v16  ;;  %v5968_v32 = vmov 0  }
 0x180   :  { %2732 = vmatpush.bf16.msra.mxu0 %v2073_v27  ;;  %v1849_v36 = vcvt.s32.f32 %v1081_v19  ;;  %v1857_v37 = vcvt.s32.f32 %v1089_v17  ;;  %5716 = vset.pattern.permute.xlu0 %v5968_v32  ;;  %v689_v5 = vunpack.c.3.s8 %v257_v16  ;;  %v809_v38 = vunpack.c.2.s8 %v6175_v24 }
 0x181   :  { %2745 = vmatpush.bf16.msra.mxu1 %v2137_v30  ;;  %v2201_v40 = vpack.c.bf16 %v1729_v31, %v1721_v60  ;;  %175 = vperm.xlu0 %5716, %v171_v29   ;;  %v1449_v41 = vcvt.s32.f32 %v681_v28  ;;  %v817_v7 = vunpack.c.3.s8 %v6175_v24  ;;  %v937_v8 = vunpack.c.2.s8 %v321_v47  ;;  %v2493_v28 = vpop.f32.mrf.mxu1 }
 0x182   :  { %v2265_v42 = vpack.c.bf16 %v1857_v37, %v1849_v36  ;;  %v1457_v43 = vcvt.s32.f32 %v689_v5  ;;  %v1577_v44 = vcvt.s32.f32 %v809_v38  ;;  %v945_v45 = vunpack.c.3.s8 %v321_v47 }
 0x183   :  { %2758 = vmatpush.bf16.msra.mxu2 %v2201_v40  ;;  %v1585_v50 = vcvt.s32.f32 %v817_v7  ;;  %v1705_v23 = vcvt.s32.f32 %v937_v8  ;;  %v1065_v51 = vunpack.c.2.s8 %v353_v39  ;;  %v1073_v53 = vunpack.c.3.s8 %v353_v39 }
 0x184   :  { %2771 = vmatpush.bf16.msra.mxu3 %v2265_v42  ;;  %v2065_v55 = vpack.c.bf16 %v1457_v43, %v1449_v41  ;;  %v1713_v57 = vcvt.s32.f32 %v945_v45  ;;  %v665_v59 = vunpack.c.0.s8 %v257_v16  ;;  %v673_v21 = vunpack.c.1.s8 %v257_v16 }
 0x185   :  { %v2129_v26 = vpack.c.bf16 %v1585_v50, %v1577_v44  ;;  %v1833_v54 = vcvt.s32.f32 %v1065_v51  ;;  %v1841_v61 = vcvt.s32.f32 %v1073_v53  ;;  %v793_v62 = vunpack.c.0.s8 %v6175_v24 }
 0x186   :  { %2733 = vmatpush.bf16.msra.mxu0 %v2065_v55  ;;  %v2193_v1 = vpack.c.bf16 %v1713_v57, %v1705_v23  ;;  %v1433_v3 = vcvt.s32.f32 %v665_v59  ;;  %v1441_v22 = vcvt.s32.f32 %v673_v21  ;;  %v801_v4 = vunpack.c.1.s8 %v6175_v24  ;;  %v313_v24 = vld [vmem:[#allocation7 + $0x428] sm:$0xff]  ;;  %v2506_v36 = vpop.f32.mrf.mxu2  ;;  %v2519_v21 = vpop.f32.mrf.mxu3 }
 0x187   :  { %2746 = vmatpush.bf16.msra.mxu1 %v2129_v26  ;;  %v2257_v10 = vpack.c.bf16 %v1841_v61, %v1833_v54  ;;  %v1561_v9 = vcvt.s32.f32 %v793_v62  ;;  %v921_v11 = vunpack.c.0.s8 %v321_v47  ;;  %v929_v12 = vunpack.c.1.s8 %v321_v47  ;;  %v345_v47 = vld [vmem:[#allocation7 + $0x528] sm:$0xff] }
 0x188   :  { %2759 = vmatpush.bf16.msra.mxu2 %v2193_v1  ;;  %v2057_v16 = vpack.c.bf16 %v1441_v22, %v1433_v3  ;;  %v1569_v35 = vcvt.s32.f32 %v801_v4  ;;  %v1049_v14 = vunpack.c.0.s8 %v353_v39  ;;  %v1057_v18 = vunpack.c.1.s8 %v353_v39 }
 0x189   :  { %2772 = vmatpush.bf16.msra.mxu3 %v2257_v10  ;;  %v1689_v46 = vcvt.s32.f32 %v921_v11  ;;  %v1697_v27 = vcvt.s32.f32 %v929_v12  ;;  %v649_v60 = vunpack.c.2.s8 %v249_v6  ;;  %v657_v19 = vunpack.c.3.s8 %v249_v6  ;;  %v242_v10 = vld [vmem:[#allocation7 + $0x1f0] sm:$0xff] }
 0x18a   :  { %2734 = vmatpush.bf16.msra.mxu0 %v2057_v16  ;;  %v2121_v17 = vpack.c.bf16 %v1569_v35, %v1561_v9  ;;  %v1817_v29 = vcvt.s32.f32 %v1049_v14  ;;  %v1825_v30 = vcvt.s32.f32 %v1057_v18  ;;  %v777_v31 = vunpack.c.2.s8 %v281_v13  ;;  %v6192_v16 = vpop.f32.mrf.mxu0 }
 0x18b   :  { %v2185_v37 = vpack.c.bf16 %v1697_v27, %v1689_v46  ;;  %v1417_v32 = vcvt.s32.f32 %v649_v60  ;;  %v1425_v5 = vcvt.s32.f32 %v657_v19  ;;  %v785_v38 = vunpack.c.3.s8 %v281_v13 }
 0x18c   :  { %2747 = vmatpush.bf16.msra.mxu1 %v2121_v17  ;;  %v2249_v39 = vpack.c.bf16 %v1825_v30, %v1817_v29  ;;  %v1545_v40 = vcvt.s32.f32 %v777_v31  ;;  %v905_v41 = vunpack.c.2.s8 %v313_v24  ;;  %v913_v7 = vunpack.c.3.s8 %v313_v24 }
 0x18d   :  { %2760 = vmatpush.bf16.msra.mxu2 %v2185_v37  ;;  %v2049_v8 = vpack.c.bf16 %v1425_v5, %v1417_v32  ;;  %v1553_v42 = vcvt.s32.f32 %v785_v38  ;;  %v1033_v43 = vunpack.c.2.s8 %v345_v47  ;;  %v1041_v44 = vunpack.c.3.s8 %v345_v47 }
 0x18e   :  { %2773 = vmatpush.bf16.msra.mxu3 %v2249_v39  ;;  %v1673_v45 = vcvt.s32.f32 %v905_v41  ;;  %v1681_v50 = vcvt.s32.f32 %v913_v7  ;;  %v633_v23 = vunpack.c.0.s8 %v249_v6  ;;  %v641_v51 = vunpack.c.1.s8 %v249_v6  ;;  %v6195_v41 = vpop.f32.mrf.mxu1 }
 0x18f   :  { %2735 = vmatpush.bf16.msra.mxu0 %v2049_v8  ;;  %v2113_v53 = vpack.c.bf16 %v1553_v42, %v1545_v40  ;;  %v1801_v55 = vcvt.s32.f32 %v1033_v43  ;;  %v1809_v57 = vcvt.s32.f32 %v1041_v44  ;;  %v761_v59 = vunpack.c.0.s8 %v281_v13 }
 0x190   :  { %v2177_v26 = vpack.c.bf16 %v1681_v50, %v1673_v45  ;;  %v1401_v54 = vcvt.s32.f32 %v633_v23  ;;  %v1409_v61 = vcvt.s32.f32 %v641_v51  ;;  %v769_v62 = vunpack.c.1.s8 %v281_v13  ;;  %v274_v13 = vld [vmem:[#allocation7 + $0x2f0] sm:$0xff] }
 0x191   :  { %2748 = vmatpush.bf16.msra.mxu1 %v2113_v53  ;;  %v2241_v1 = vpack.c.bf16 %v1809_v57, %v1801_v55  ;;  %v1529_v3 = vcvt.s32.f32 %v761_v59  ;;  %v889_v22 = vunpack.c.0.s8 %v313_v24  ;;  %v897_v4 = vunpack.c.1.s8 %v313_v24  ;;  %v306_v24 = vld [vmem:[#allocation7 + $0x3f0] sm:$0xff] }
 0x192   :  { %2761 = vmatpush.bf16.msra.mxu2 %v2177_v26  ;;  %v2041_v9 = vpack.c.bf16 %v1409_v61, %v1401_v54  ;;  %v1537_v6 = vcvt.s32.f32 %v769_v62  ;;  %v1017_v11 = vunpack.c.0.s8 %v345_v47  ;;  %v1025_v12 = vunpack.c.1.s8 %v345_v47  ;;  %v202_v59 = vld [vmem:[#allocation7 + $0xb0] sm:$0xff]  ;;  %v2532_v21 = vpop.f32.mrf.mxu0 }
 0x193   :  { %2774 = vmatpush.bf16.msra.mxu3 %v2241_v1  ;;  %v1657_v35 = vcvt.s32.f32 %v889_v22  ;;  %v1665_v14 = vcvt.s32.f32 %v897_v4  ;;  %v490_v18 = vunpack.c.2.s8 %v210_v0  ;;  %v498_v46 = vunpack.c.3.s8 %v210_v0  ;;  %v234_v4 = vld [vmem:[#allocation7 + $0x1b0] sm:$0xff] }
 0x194   :  { %2736 = vmatpush.bf16.msra.mxu0 %v2041_v9  ;;  %v2105_v27 = vpack.c.bf16 %v1537_v6, %v1529_v3  ;;  %v1785_v60 = vcvt.s32.f32 %v1017_v11  ;;  %v1793_v19 = vcvt.s32.f32 %v1025_v12  ;;  %v618_v17 = vunpack.c.2.s8 %v242_v10  ;;  %v266_v12 = vld [vmem:[#allocation7 + $0x2b0] sm:$0xff] }
 0x195   :  { %v2169_v29 = vpack.c.bf16 %v1665_v14, %v1657_v35  ;;  %v1258_v30 = vcvt.s32.f32 %v490_v18  ;;  %v1266_v31 = vcvt.s32.f32 %v498_v46  ;;  %v626_v28 = vunpack.c.3.s8 %v242_v10 }
 0x196   :  { %2749 = vmatpush.bf16.msra.mxu1 %v2105_v27  ;;  %v2233_v47 = vpack.c.bf16 %v1793_v19, %v1785_v60  ;;  %v1386_v36 = vcvt.s32.f32 %v618_v17  ;;  %v746_v37 = vunpack.c.2.s8 %v274_v13  ;;  %v754_v32 = vunpack.c.3.s8 %v274_v13 }
 0x197   :  { %2762 = vmatpush.bf16.msra.mxu2 %v2169_v29  ;;  %v1970_v5 = vpack.c.bf16 %v1266_v31, %v1258_v30  ;;  %v1394_v38 = vcvt.s32.f32 %v626_v28  ;;  %v874_v39 = vunpack.c.2.s8 %v306_v24  ;;  %v882_v40 = vunpack.c.3.s8 %v306_v24  ;;  %2737 = vmatmul.bf16.vlgmr.msra.gmra.mxu0 %v6076_v58 }
 0x198   :  { %2775 = vmatpush.bf16.msra.mxu3 %v2233_v47  ;;  %v1514_v7 = vcvt.s32.f32 %v746_v37  ;;  %v1522_v8 = vcvt.s32.f32 %v754_v32  ;;  %v474_v42 = vunpack.c.0.s8 %v210_v0  ;;  %v482_v43 = vunpack.c.1.s8 %v210_v0 }
 0x199   :  { %2781 = vmatpush.bf16.msrb.mxu0 %v1970_v5  ;;  %v2034_v44 = vpack.c.bf16 %v1394_v38, %v1386_v36  ;;  %v1642_v45 = vcvt.s32.f32 %v874_v39  ;;  %v1650_v50 = vcvt.s32.f32 %v882_v40  ;;  %v602_v23 = vunpack.c.0.s8 %v242_v10  ;;  %2750 = vmatmul.bf16.vlgmr.msra.gmra.mxu1 %v6080_v2 }
 0x19a   :  { %v2098_v51 = vpack.c.bf16 %v1522_v8, %v1514_v7  ;;  %v1242_v53 = vcvt.s32.f32 %v474_v42  ;;  %v1250_v55 = vcvt.s32.f32 %v482_v43  ;;  %v610_v57 = vunpack.c.1.s8 %v242_v10  ;;  %2763 = vmatmul.bf16.vlgmr.msra.gmra.mxu2 %v6094_v52 }
 0x19b   :  { %2794 = vmatpush.bf16.msrb.mxu1 %v2034_v44  ;;  %v2162_v26 = vpack.c.bf16 %v1650_v50, %v1642_v45  ;;  %v1370_v54 = vcvt.s32.f32 %v602_v23  ;;  %v730_v61 = vunpack.c.0.s8 %v274_v13  ;;  %v738_v62 = vunpack.c.1.s8 %v274_v13  ;;  %2776 = vmatmul.bf16.vlgmr.msra.gmra.mxu3 %v6098_v56  ;;  %v298_v13 = vld [vmem:[#allocation7 + $0x3b0] sm:$0xff] }
 0x19c   :  { %2807 = vmatpush.bf16.msrb.mxu2 %v2098_v51  ;;  %v1962_v0 = vpack.c.bf16 %v1250_v55, %v1242_v53  ;;  %v1378_v1 = vcvt.s32.f32 %v610_v57  ;;  %v858_v3 = vunpack.c.0.s8 %v306_v24  ;;  %v866_v22 = vunpack.c.1.s8 %v306_v24  ;;  %v2545_v24 = vpop.f32.mrf.mxu1  ;;  %v194_v45 = vld [vmem:[#allocation7 + $0x70] sm:$0xff] }
 0x19d   :  { %2820 = vmatpush.bf16.msrb.mxu3 %v2162_v26  ;;  %v1498_v9 = vcvt.s32.f32 %v730_v61  ;;  %v1506_v10 = vcvt.s32.f32 %v738_v62  ;;  %v2492_v6 = vadd.f32 %v6184_v48, %v6177_v25  ;;  %v458_v11 = vunpack.c.2.s8 %v202_v59  ;;  %v6206_v24 = vpop.f32.mrf.mxu3 }
 0x19e   :  { %2782 = vmatpush.bf16.msrb.mxu0 %v1962_v0  ;;  %v2026_v35 = vpack.c.bf16 %v1378_v1, %v1370_v54  ;;  %v1626_v14 = vcvt.s32.f32 %v858_v3  ;;  %v1634_v18 = vcvt.s32.f32 %v866_v22  ;;  %v466_v46 = vunpack.c.3.s8 %v202_v59 }
 0x19f   :  { %v2090_v27 = vpack.c.bf16 %v1506_v10, %v1498_v9  ;;  %v2505_v60 = vadd.f32 %v6186_v49, %v2492_v6  ;;  %v1226_v19 = vcvt.s32.f32 %v458_v11  ;;  %v586_v17 = vunpack.c.2.s8 %v234_v4  ;;  %v290_v9 = vld [vmem:[#allocation7 + $0x370] sm:$0xff] }
 0x1a0   :  { %2795 = vmatpush.bf16.msrb.mxu1 %v2026_v35  ;;  %v2154_v29 = vpack.c.bf16 %v1634_v18, %v1626_v14  ;;  %v1234_v30 = vcvt.s32.f32 %v466_v46  ;;  %v594_v31 = vunpack.c.3.s8 %v234_v4  ;;  %v714_v28 = vunpack.c.2.s8 %v266_v12 }
 0x1a1   :  { %2808 = vmatpush.bf16.msrb.mxu2 %v2090_v27  ;;  %v1354_v25 = vcvt.s32.f32 %v586_v17  ;;  %v722_v48 = vunpack.c.3.s8 %v266_v12  ;;  %v842_v47 = vunpack.c.2.s8 %v298_v13  ;;  %v850_v36 = vunpack.c.3.s8 %v298_v13  ;;  %v6204_v17 = vpop.f32.mrf.mxu2 }
 0x1a2   :  { %2821 = vmatpush.bf16.msrb.mxu3 %v2154_v29  ;;  %v1954_v37 = vpack.c.bf16 %v1234_v30, %v1226_v19  ;;  %v1362_v32 = vcvt.s32.f32 %v594_v31  ;;  %v1482_v5 = vcvt.s32.f32 %v714_v28  ;;  %v2518_v38 = vadd.f32 %v6190_v15, %v2505_v60  ;;  %v226_v15 = vld [vmem:[#allocation7 + $0x170] sm:$0xff] }
 0x1a3   :  { %v1490_v49 = vcvt.s32.f32 %v722_v48  ;;  %v1610_v39 = vcvt.s32.f32 %v842_v47  ;;  %v1618_v40 = vcvt.s32.f32 %v850_v36  ;;  %v442_v7 = vunpack.c.0.s8 %v202_v59 }
 0x1a4   :  { %2783 = vmatpush.bf16.msrb.mxu0 %v1954_v37  ;;  %v2018_v8 = vpack.c.bf16 %v1362_v32, %v1354_v25  ;;  %v450_v42 = vunpack.c.1.s8 %v202_v59  ;;  %v570_v43 = vunpack.c.0.s8 %v234_v4  ;;  %v578_v44 = vunpack.c.1.s8 %v234_v4  ;;  %v258_v59 = vld [vmem:[#allocation7 + $0x270] sm:$0xff] }
 0x1a5   :  { %v2082_v50 = vpack.c.bf16 %v1490_v49, %v1482_v5  ;;  %v2146_v23 = vpack.c.bf16 %v1618_v40, %v1610_v39  ;;  %v1210_v51 = vcvt.s32.f32 %v442_v7  ;;  %v698_v53 = vunpack.c.0.s8 %v266_v12 }
 0x1a6   :  { %2796 = vmatpush.bf16.msrb.mxu1 %v2018_v8  ;;  %v1218_v55 = vcvt.s32.f32 %v450_v42  ;;  %v1338_v57 = vcvt.s32.f32 %v570_v43  ;;  %v1346_v21 = vcvt.s32.f32 %v578_v44  ;;  %v706_v26 = vunpack.c.1.s8 %v266_v12  ;;  %v186_v42 = vld [vmem:[#allocation7 + $0x30] sm:$0xff] }
 0x1a7   :  { %2809 = vmatpush.bf16.msrb.mxu2 %v2082_v50  ;;  %2822 = vmatpush.bf16.msrb.mxu3 %v2146_v23  ;;  %v1466_v54 = vcvt.s32.f32 %v698_v53  ;;  %v826_v61 = vunpack.c.0.s8 %v298_v13  ;;  %v834_v62 = vunpack.c.1.s8 %v298_v13  ;;  %v426_v0 = vunpack.c.2.s8 %v194_v45 }
 0x1a8   :  { %v1946_v1 = vpack.c.bf16 %v1218_v55, %v1210_v51  ;;  %v2010_v3 = vpack.c.bf16 %v1346_v21, %v1338_v57  ;;  %v1474_v22 = vcvt.s32.f32 %v706_v26  ;;  %v434_v4 = vunpack.c.3.s8 %v194_v45  ;;  %v218_v55 = vld [vmem:[#allocation7 + $0x130] sm:$0xff] }
 0x1a9   :  { %v1594_v10 = vcvt.s32.f32 %v826_v61  ;;  %v1602_v6 = vcvt.s32.f32 %v834_v62  ;;  %v1194_v11 = vcvt.s32.f32 %v426_v0  ;;  %v554_v35 = vunpack.c.2.s8 %v226_v15 }
 0x1aa   :  { %2784 = vmatpush.bf16.msrb.mxu0 %v1946_v1  ;;  %2797 = vmatpush.bf16.msrb.mxu1 %v2010_v3  ;;  %v2074_v12 = vpack.c.bf16 %v1474_v22, %v1466_v54  ;;  %v1202_v14 = vcvt.s32.f32 %v434_v4  ;;  %v562_v18 = vunpack.c.3.s8 %v226_v15  ;;  %v682_v46 = vunpack.c.2.s8 %v258_v59  ;;  %v282_v1 = vld [vmem:[#allocation7 + $0x330] sm:$0xff]  ;;  %v2571_v3 = vpop.f32.mrf.mxu3 }
 0x1ab   :  { %v2138_v27 = vpack.c.bf16 %v1602_v6, %v1594_v10  ;;  %v1322_v60 = vcvt.s32.f32 %v554_v35  ;;  %v690_v13 = vunpack.c.3.s8 %v258_v59  ;;  %v810_v19 = vunpack.c.2.s8 %v290_v9 }
 0x1ac   :  { %2810 = vmatpush.bf16.msrb.mxu2 %v2074_v12  ;;  %v1938_v29 = vpack.c.bf16 %v1202_v14, %v1194_v11  ;;  %v1330_v30 = vcvt.s32.f32 %v562_v18  ;;  %v1450_v31 = vcvt.s32.f32 %v682_v46  ;;  %v818_v28 = vunpack.c.3.s8 %v290_v9 }
 0x1ad   :  { %2823 = vmatpush.bf16.msrb.mxu3 %v2138_v27  ;;  %v1458_v25 = vcvt.s32.f32 %v690_v13  ;;  %v1578_v48 = vcvt.s32.f32 %v810_v19  ;;  %v2531_v47 = vadd.f32 %v6192_v16, %v2518_v38  ;;  %v410_v36 = vunpack.c.0.s8 %v194_v45 }
 0x1ae   :  { %2785 = vmatpush.bf16.msrb.mxu0 %v1938_v29  ;;  %v2002_v37 = vpack.c.bf16 %v1330_v30, %v1322_v60  ;;  %v1586_v32 = vcvt.s32.f32 %v818_v28  ;;  %v418_v5 = vunpack.c.1.s8 %v194_v45  ;;  %v538_v49 = vunpack.c.0.s8 %v226_v15 }
 0x1af   :  { %v2066_v39 = vpack.c.bf16 %v1458_v25, %v1450_v31  ;;  %v1178_v40 = vcvt.s32.f32 %v410_v36  ;;  %v546_v7 = vunpack.c.1.s8 %v226_v15  ;;  %v666_v8 = vunpack.c.0.s8 %v258_v59  ;;  %v250_v15 = vld [vmem:[#allocation7 + $0x230] sm:$0xff] }
 0x1b0   :  { %2798 = vmatpush.bf16.msrb.mxu1 %v2002_v37  ;;  %v2130_v43 = vpack.c.bf16 %v1586_v32, %v1578_v48  ;;  %v1186_v44 = vcvt.s32.f32 %v418_v5  ;;  %v1306_v50 = vcvt.s32.f32 %v538_v49  ;;  %v674_v23 = vunpack.c.1.s8 %v258_v59  ;;  %v2558_v59 = vpop.f32.mrf.mxu2  ;;  %v6212_v37 = vld [vmem:[#allocation7 + $0x4f0] sm:$0xff] }
 0x1b1   :  { %2811 = vmatpush.bf16.msrb.mxu2 %v2066_v39  ;;  %v1314_v51 = vcvt.s32.f32 %v546_v7  ;;  %v1434_v53 = vcvt.s32.f32 %v666_v8  ;;  %v794_v16 = vunpack.c.0.s8 %v290_v9  ;;  %v802_v38 = vunpack.c.1.s8 %v290_v9 }
 0x1b2   :  { %2824 = vmatpush.bf16.msrb.mxu3 %v2130_v43  ;;  %v1930_v57 = vpack.c.bf16 %v1186_v44, %v1178_v40  ;;  %v1442_v45 = vcvt.s32.f32 %v674_v23  ;;  %v6210_v21 = vadd.f32 %v6195_v41, %v2531_v47  ;;  %v394_v26 = vunpack.c.2.s8 %v186_v42  ;;  %v370_v44 = vld [vmem:[#allocation7 + $0x5f0] sm:$0xff] }
 0x1b3   :  { %v1994_v54 = vpack.c.bf16 %v1314_v51, %v1306_v50  ;;  %v1562_v61 = vcvt.s32.f32 %v794_v16  ;;  %v1570_v62 = vcvt.s32.f32 %v802_v38  ;;  %v402_v0 = vunpack.c.3.s8 %v186_v42  ;;  %v6214_v50 = vpop.f32.mrf.mxu0  ;;  %v211_v38 = vld [vmem:[#allocation7 + $0xf8] sm:$0xff] }
 0x1b4   :  { %2786 = vmatpush.bf16.msrb.mxu0 %v1930_v57  ;;  %v2058_v22 = vpack.c.bf16 %v1442_v45, %v1434_v53  ;;  %v1162_v4 = vcvt.s32.f32 %v394_v26  ;;  %v522_v9 = vunpack.c.2.s8 %v218_v55  ;;  %v530_v10 = vunpack.c.3.s8 %v218_v55 }
 0x1b5   :  { %2799 = vmatpush.bf16.msrb.mxu1 %v1994_v54  ;;  %v2122_v6 = vpack.c.bf16 %v1570_v62, %v1562_v61  ;;  %v1170_v11 = vcvt.s32.f32 %v402_v0  ;;  %v650_v35 = vunpack.c.2.s8 %v250_v15  ;;  %v658_v41 = vunpack.c.3.s8 %v250_v15 }
 0x1b6   :  { %2812 = vmatpush.bf16.msrb.mxu2 %v2058_v22  ;;  %v1290_v12 = vcvt.s32.f32 %v522_v9  ;;  %v1298_v14 = vcvt.s32.f32 %v530_v10  ;;  %v778_v18 = vunpack.c.2.s8 %v282_v1  ;;  %v786_v46 = vunpack.c.3.s8 %v282_v1 }
 0x1b7   :  { %2825 = vmatpush.bf16.msrb.mxu3 %v2122_v6  ;;  %v1922_v27 = vpack.c.bf16 %v1170_v11, %v1162_v4  ;;  %v1418_v60 = vcvt.s32.f32 %v650_v35  ;;  %v1426_v13 = vcvt.s32.f32 %v658_v41  ;;  %v378_v19 = vunpack.c.0.s8 %v186_v42  ;;  %v6222_v35 = vpop.f32.mrf.mxu3 }
 0x1b8   :  { %v1986_v29 = vpack.c.bf16 %v1298_v14, %v1290_v12  ;;  %v1546_v30 = vcvt.s32.f32 %v778_v18  ;;  %v1554_v31 = vcvt.s32.f32 %v786_v46  ;;  %v386_v28 = vunpack.c.1.s8 %v186_v42  ;;  %v6216_v42 = vpop.f32.mrf.mxu1  ;;  %v6220_v11 = vpop.f32.mrf.mxu2 }
 0x1b9   :  { %2787 = vmatpush.bf16.msrb.mxu0 %v1922_v27  ;;  %v2050_v25 = vpack.c.bf16 %v1426_v13, %v1418_v60  ;;  %v1146_v48 = vcvt.s32.f32 %v378_v19  ;;  %v506_v47 = vunpack.c.0.s8 %v218_v55  ;;  %v514_v36 = vunpack.c.1.s8 %v218_v55 }
 0x1ba   :  { %2800 = vmatpush.bf16.msrb.mxu1 %v1986_v29  ;;  %v2114_v32 = vpack.c.bf16 %v1554_v31, %v1546_v30  ;;  %v1154_v5 = vcvt.s32.f32 %v386_v28  ;;  %v634_v49 = vunpack.c.0.s8 %v250_v15  ;;  %v642_v39 = vunpack.c.1.s8 %v250_v15  ;;  %v243_v15 = vld [vmem:[#allocation7 + $0x1f8] sm:$0xff] }
 0x1bb   :  { %2813 = vmatpush.bf16.msrb.mxu2 %v2050_v25  ;;  %v1274_v40 = vcvt.s32.f32 %v506_v47  ;;  %v1282_v7 = vcvt.s32.f32 %v514_v36  ;;  %v762_v8 = vunpack.c.0.s8 %v282_v1  ;;  %v770_v43 = vunpack.c.1.s8 %v282_v1  ;;  %v2584_v28 = vpop.f32.mrf.mxu0 }
 0x1bc   :  { %2826 = vmatpush.bf16.msrb.mxu3 %v2114_v32  ;;  %v1914_v23 = vpack.c.bf16 %v1154_v5, %v1146_v48  ;;  %v1402_v51 = vcvt.s32.f32 %v634_v49  ;;  %v1410_v53 = vcvt.s32.f32 %v642_v39  ;;  %v1002_v16 = vunpack.c.2.s8 %v6212_v37  ;;  %v330_v5 = vld [vmem:[#allocation7 + $0x4b0] sm:$0xff] }
 0x1bd   :  { %v1978_v55 = vpack.c.bf16 %v1282_v7, %v1274_v40  ;;  %v1530_v57 = vcvt.s32.f32 %v762_v8  ;;  %v1538_v45 = vcvt.s32.f32 %v770_v43  ;;  %v1010_v26 = vunpack.c.3.s8 %v6212_v37  ;;  %v362_v7 = vld [vmem:[#allocation7 + $0x5b0] sm:$0xff] }
 0x1be   :  { %2788 = vmatpush.bf16.msrb.mxu0 %v1914_v23  ;;  %v2042_v54 = vpack.c.bf16 %v1410_v53, %v1402_v51  ;;  %v1770_v61 = vcvt.s32.f32 %v1002_v16  ;;  %v1130_v62 = vunpack.c.2.s8 %v370_v44  ;;  %v1138_v0 = vunpack.c.3.s8 %v370_v44  ;;  %v203_v51 = vld [vmem:[#allocation7 + $0xb8] sm:$0xff] }
 0x1bf   :  { %2801 = vmatpush.bf16.msrb.mxu1 %v1978_v55  ;;  %v2106_v1 = vpack.c.bf16 %v1538_v45, %v1530_v57  ;;  %v1778_v59 = vcvt.s32.f32 %v1010_v26  ;;  %v491_v3 = vunpack.c.2.s8 %v211_v38  ;;  %v499_v22 = vunpack.c.3.s8 %v211_v38  ;;  %v235_v57 = vld [vmem:[#allocation7 + $0x1b8] sm:$0xff] }
 0x1c0   :  { %2814 = vmatpush.bf16.msrb.mxu2 %v2042_v54  ;;  %v1898_v4 = vcvt.s32.f32 %v1130_v62  ;;  %v1906_v9 = vcvt.s32.f32 %v1138_v0  ;;  %v619_v10 = vunpack.c.2.s8 %v243_v15  ;;  %v627_v6 = vunpack.c.3.s8 %v243_v15  ;;  %v2597_v25 = vpop.f32.mrf.mxu1  ;;  %v2623_v62 = vpop.f32.mrf.mxu3 }
 0x1c1   :  { %2827 = vmatpush.bf16.msrb.mxu3 %v2106_v1  ;;  %v2226_v41 = vpack.c.bf16 %v1778_v59, %v1770_v61  ;;  %v1259_v12 = vcvt.s32.f32 %v491_v3  ;;  %v1267_v14 = vcvt.s32.f32 %v499_v22  ;;  %v986_v18 = vunpack.c.0.s8 %v6212_v37  ;;  %2789 = vmatmul.bf16.vlgmr.msrb.gmra.mxu0 %v6078_v63  ;;  %v2610_v61 = vpop.f32.mrf.mxu2  ;;  %v322_v25 = vld [vmem:[#allocation7 + $0x470] sm:$0xff] }
 0x1c2   :  { %v2290_v46 = vpack.c.bf16 %v1906_v9, %v1898_v4  ;;  %v1387_v27 = vcvt.s32.f32 %v619_v10  ;;  %v1395_v60 = vcvt.s32.f32 %v627_v6  ;;  %v994_v13 = vunpack.c.1.s8 %v6212_v37  ;;  %2802 = vmatmul.bf16.vlgmr.msrb.gmra.mxu1 %v6085_v20 }
 0x1c3   :  { %2833 = vmatpush.bf16.msra.mxu0 %v2226_v41  ;;  %v1971_v19 = vpack.c.bf16 %v1267_v14, %v1259_v12  ;;  %v1754_v29 = vcvt.s32.f32 %v986_v18  ;;  %v1114_v30 = vunpack.c.0.s8 %v370_v44  ;;  %v1122_v31 = vunpack.c.1.s8 %v370_v44  ;;  %2815 = vmatmul.bf16.vlgmr.msrb.gmra.mxu2 %v6076_v58 }
 0x1c4   :  { %2846 = vmatpush.bf16.msra.mxu1 %v2290_v46  ;;  %v2035_v48 = vpack.c.bf16 %v1395_v60, %v1387_v27  ;;  %v1762_v47 = vcvt.s32.f32 %v994_v13  ;;  %v475_v36 = vunpack.c.0.s8 %v211_v38  ;;  %v483_v32 = vunpack.c.1.s8 %v211_v38  ;;  %2828 = vmatmul.bf16.vlgmr.msrb.gmra.mxu3 %v6080_v2 }
 0x1c5   :  { %2859 = vmatpush.bf16.msra.mxu2 %v1971_v19  ;;  %v1882_v37 = vcvt.s32.f32 %v1114_v30  ;;  %v1890_v49 = vcvt.s32.f32 %v1122_v31  ;;  %v603_v39 = vunpack.c.0.s8 %v243_v15  ;;  %v611_v40 = vunpack.c.1.s8 %v243_v15 }
 0x1c6   :  { %2872 = vmatpush.bf16.msra.mxu3 %v2035_v48  ;;  %v2218_v8 = vpack.c.bf16 %v1762_v47, %v1754_v29  ;;  %v1243_v43 = vcvt.s32.f32 %v475_v36  ;;  %v1251_v44 = vcvt.s32.f32 %v483_v32  ;;  %v6232_v23 = vadd.f32 %v6206_v24, %v6204_v17 }
 0x1c7   :  { %v2282_v53 = vpack.c.bf16 %v1890_v49, %v1882_v37  ;;  %v1371_v16 = vcvt.s32.f32 %v603_v39  ;;  %v1379_v38 = vcvt.s32.f32 %v611_v40  ;;  %v970_v55 = vunpack.c.2.s8 %v330_v5  ;;  %v354_v37 = vld [vmem:[#allocation7 + $0x570] sm:$0xff] }
 0x1c8   :  { %2834 = vmatpush.bf16.msra.mxu0 %v2218_v8  ;;  %v1963_v45 = vpack.c.bf16 %v1251_v44, %v1243_v43  ;;  %v978_v26 = vunpack.c.3.s8 %v330_v5  ;;  %v1098_v54 = vunpack.c.2.s8 %v362_v7  ;;  %v1106_v15 = vunpack.c.3.s8 %v362_v7  ;;  %v195_v8 = vld [vmem:[#allocation7 + $0x78] sm:$0xff] }
 0x1c9   :  { %2847 = vmatpush.bf16.msra.mxu1 %v2282_v53  ;;  %v2027_v0 = vpack.c.bf16 %v1379_v38, %v1371_v16  ;;  %v1738_v1 = vcvt.s32.f32 %v970_v55  ;;  %v459_v59 = vunpack.c.2.s8 %v203_v51  ;;  %v467_v3 = vunpack.c.3.s8 %v203_v51 }
 0x1ca   :  { %2860 = vmatpush.bf16.msra.mxu2 %v1963_v45  ;;  %v1746_v17 = vcvt.s32.f32 %v978_v26  ;;  %v1866_v24 = vcvt.s32.f32 %v1098_v54  ;;  %v1874_v22 = vcvt.s32.f32 %v1106_v15  ;;  %v587_v4 = vunpack.c.2.s8 %v235_v57 }
 0x1cb   :  { %2873 = vmatpush.bf16.msra.mxu3 %v2027_v0  ;;  %v1227_v9 = vcvt.s32.f32 %v459_v59  ;;  %v1235_v10 = vcvt.s32.f32 %v467_v3  ;;  %v595_v6 = vunpack.c.3.s8 %v235_v57  ;;  %v954_v41 = vunpack.c.0.s8 %v330_v5 }
 0x1cc   :  { %v2210_v12 = vpack.c.bf16 %v1746_v17, %v1738_v1  ;;  %v2274_v14 = vpack.c.bf16 %v1874_v22, %v1866_v24  ;;  %v1355_v18 = vcvt.s32.f32 %v587_v4  ;;  %v962_v46 = vunpack.c.1.s8 %v330_v5 }
 0x1cd   :  { %v1955_v27 = vpack.c.bf16 %v1235_v10, %v1227_v9  ;;  %v1363_v60 = vcvt.s32.f32 %v595_v6  ;;  %v1722_v13 = vcvt.s32.f32 %v954_v41  ;;  %v1082_v19 = vunpack.c.0.s8 %v362_v7 }
 0x1ce   :  { %2835 = vmatpush.bf16.msra.mxu0 %v2210_v12  ;;  %2848 = vmatpush.bf16.msra.mxu1 %v2274_v14  ;;  %v1730_v29 = vcvt.s32.f32 %v962_v46  ;;  %v1090_v30 = vunpack.c.1.s8 %v362_v7  ;;  %v443_v31 = vunpack.c.0.s8 %v203_v51  ;;  %v451_v28 = vunpack.c.1.s8 %v203_v51  ;;  %v227_v7 = vld [vmem:[#allocation7 + $0x178] sm:$0xff] }
 0x1cf   :  { %2861 = vmatpush.bf16.msra.mxu2 %v1955_v27  ;;  %v2019_v48 = vpack.c.bf16 %v1363_v60, %v1355_v18  ;;  %v1850_v47 = vcvt.s32.f32 %v1082_v19  ;;  %v571_v36 = vunpack.c.0.s8 %v235_v57  ;;  %v579_v32 = vunpack.c.1.s8 %v235_v57 }
 0x1d0   :  { %v2202_v49 = vpack.c.bf16 %v1730_v29, %v1722_v13  ;;  %v1858_v39 = vcvt.s32.f32 %v1090_v30  ;;  %v1211_v5 = vcvt.s32.f32 %v443_v31  ;;  %v1219_v40 = vcvt.s32.f32 %v451_v28  ;;  %v314_v13 = vld [vmem:[#allocation7 + $0x430] sm:$0xff] }
 0x1d1   :  { %2874 = vmatpush.bf16.msra.mxu3 %v2019_v48  ;;  %v1339_v43 = vcvt.s32.f32 %v571_v36  ;;  %v1347_v44 = vcvt.s32.f32 %v579_v32  ;;  %v938_v53 = vunpack.c.2.s8 %v322_v25  ;;  %v946_v16 = vunpack.c.3.s8 %v322_v25 }
 0x1d2   :  { %2836 = vmatpush.bf16.msra.mxu0 %v2202_v49  ;;  %v2266_v51 = vpack.c.bf16 %v1858_v39, %v1850_v47  ;;  %v1947_v38 = vpack.c.bf16 %v1219_v40, %v1211_v5  ;;  %v1066_v55 = vunpack.c.2.s8 %v354_v37  ;;  %v1074_v45 = vunpack.c.3.s8 %v354_v37  ;;  %v346_v47 = vld [vmem:[#allocation7 + $0x530] sm:$0xff]  ;;  %v187_v49 = vld [vmem:[#allocation7 + $0x38] sm:$0xff] }
 0x1d3   :  { %v2011_v26 = vpack.c.bf16 %v1347_v44, %v1339_v43  ;;  %v1706_v54 = vcvt.s32.f32 %v938_v53  ;;  %v1714_v57 = vcvt.s32.f32 %v946_v16  ;;  %v427_v15 = vunpack.c.2.s8 %v195_v8  ;;  %v219_v43 = vld [vmem:[#allocation7 + $0x138] sm:$0xff] }
 0x1d4   :  { %2849 = vmatpush.bf16.msra.mxu1 %v2266_v51  ;;  %2862 = vmatpush.bf16.msra.mxu2 %v1947_v38  ;;  %v1834_v61 = vcvt.s32.f32 %v1066_v55  ;;  %v1842_v62 = vcvt.s32.f32 %v1074_v45  ;;  %v435_v0 = vunpack.c.3.s8 %v195_v8  ;;  %v555_v1 = vunpack.c.2.s8 %v227_v7 }
 0x1d5   :  { %2875 = vmatpush.bf16.msra.mxu3 %v2011_v26  ;;  %v2194_v59 = vpack.c.bf16 %v1714_v57, %v1706_v54  ;;  %v1195_v3 = vcvt.s32.f32 %v427_v15  ;;  %v563_v17 = vunpack.c.3.s8 %v227_v7  ;;  %v2583_v24 = vadd.f32 %v6214_v50, %v6232_v23 }
 0x1d6   :  { %v2258_v22 = vpack.c.bf16 %v1842_v62, %v1834_v61  ;;  %v1203_v4 = vcvt.s32.f32 %v435_v0  ;;  %v1323_v9 = vcvt.s32.f32 %v555_v1  ;;  %v922_v10 = vunpack.c.0.s8 %v322_v25 }
 0x1d7   :  { %2837 = vmatpush.bf16.msra.mxu0 %v2194_v59  ;;  %v1331_v6 = vcvt.s32.f32 %v563_v17  ;;  %v2596_v41 = vadd.f32 %v6216_v42, %v2583_v24  ;;  %v930_v12 = vunpack.c.1.s8 %v322_v25  ;;  %v1050_v14 = vunpack.c.0.s8 %v354_v37 }
 0x1d8   :  { %2850 = vmatpush.bf16.msra.mxu1 %v2258_v22  ;;  %v1939_v18 = vpack.c.bf16 %v1203_v4, %v1195_v3  ;;  %v1690_v46 = vcvt.s32.f32 %v922_v10  ;;  %v1058_v27 = vunpack.c.1.s8 %v354_v37  ;;  %v411_v60 = vunpack.c.0.s8 %v195_v8  ;;  %v275_v4 = vld [vmem:[#allocation7 + $0x2f8] sm:$0xff] }
 0x1d9   :  { %v2003_v19 = vpack.c.bf16 %v1331_v6, %v1323_v9  ;;  %v1698_v29 = vcvt.s32.f32 %v930_v12  ;;  %v1818_v30 = vcvt.s32.f32 %v1050_v14  ;;  %v419_v50 = vunpack.c.1.s8 %v195_v8 }
 0x1da   :  { %2863 = vmatpush.bf16.msra.mxu2 %v1939_v18  ;;  %v1826_v23 = vcvt.s32.f32 %v1058_v27  ;;  %v1179_v31 = vcvt.s32.f32 %v411_v60  ;;  %v539_v28 = vunpack.c.0.s8 %v227_v7  ;;  %v547_v48 = vunpack.c.1.s8 %v227_v7  ;;  %v307_v27 = vld [vmem:[#allocation7 + $0x3f8] sm:$0xff] }
 0x1db   :  { %2876 = vmatpush.bf16.msra.mxu3 %v2003_v19  ;;  %v2186_v42 = vpack.c.bf16 %v1698_v29, %v1690_v46  ;;  %v1187_v25 = vcvt.s32.f32 %v419_v50  ;;  %v2609_v36 = vadd.f32 %v6220_v11, %v2596_v41  ;;  %v906_v32 = vunpack.c.2.s8 %v314_v13 }
 0x1dc   :  { %v2250_v37 = vpack.c.bf16 %v1826_v23, %v1818_v30  ;;  %v1307_v39 = vcvt.s32.f32 %v539_v28  ;;  %v1315_v5 = vcvt.s32.f32 %v547_v48  ;;  %v914_v40 = vunpack.c.3.s8 %v314_v13  ;;  %v339_v30 = vld [vmem:[#allocation7 + $0x4f8] sm:$0xff] }
 0x1dd   :  { %2838 = vmatpush.bf16.msra.mxu0 %v2186_v42  ;;  %v1931_v8 = vpack.c.bf16 %v1187_v25, %v1179_v31  ;;  %v6239_v44 = vadd.f32 %v6222_v35, %v2609_v36  ;;  %v1674_v53 = vcvt.s32.f32 %v906_v32  ;;  %v1034_v16 = vunpack.c.2.s8 %v346_v47  ;;  %v371_v48 = vld [vmem:[#allocation7 + $0x5f8] sm:$0xff] }
 0x1de   :  { %2851 = vmatpush.bf16.msra.mxu1 %v2250_v37  ;;  %v1995_v7 = vpack.c.bf16 %v1315_v5, %v1307_v39  ;;  %v1682_v51 = vcvt.s32.f32 %v914_v40  ;;  %v1042_v38 = vunpack.c.3.s8 %v346_v47  ;;  %v395_v55 = vunpack.c.2.s8 %v187_v49 }
 0x1df   :  { %2864 = vmatpush.bf16.msra.mxu2 %v1931_v8  ;;  %v1802_v11 = vcvt.s32.f32 %v1034_v16  ;;  %v403_v45 = vunpack.c.3.s8 %v187_v49  ;;  %v523_v26 = vunpack.c.2.s8 %v219_v43  ;;  %v531_v54 = vunpack.c.3.s8 %v219_v43 }
 0x1e0   :  { %2877 = vmatpush.bf16.msra.mxu3 %v1995_v7  ;;  %v2178_v57 = vpack.c.bf16 %v1682_v51, %v1674_v53  ;;  %v1810_v15 = vcvt.s32.f32 %v1042_v38  ;;  %v1163_v61 = vcvt.s32.f32 %v395_v55  ;;  %v890_v62 = vunpack.c.0.s8 %v314_v13 }
 0x1e1   :  { %v1171_v0 = vcvt.s32.f32 %v403_v45  ;;  %v1291_v35 = vcvt.s32.f32 %v523_v26  ;;  %v1299_v1 = vcvt.s32.f32 %v531_v54  ;;  %v898_v59 = vunpack.c.1.s8 %v314_v13 }
 0x1e2   :  { %2839 = vmatpush.bf16.msra.mxu0 %v2178_v57  ;;  %v2242_v3 = vpack.c.bf16 %v1810_v15, %v1802_v11  ;;  %v1658_v17 = vcvt.s32.f32 %v890_v62  ;;  %v1018_v24 = vunpack.c.0.s8 %v346_v47  ;;  %v1026_v22 = vunpack.c.1.s8 %v346_v47 }
 0x1e3   :  { %v1923_v9 = vpack.c.bf16 %v1171_v0, %v1163_v61  ;;  %v1987_v10 = vpack.c.bf16 %v1299_v1, %v1291_v35  ;;  %v1666_v6 = vcvt.s32.f32 %v898_v59  ;;  %v379_v41 = vunpack.c.0.s8 %v187_v49  ;;  %v267_v1 = vld [vmem:[#allocation7 + $0x2b8] sm:$0xff] }
 0x1e4   :  { %2852 = vmatpush.bf16.msra.mxu1 %v2242_v3  ;;  %v1786_v12 = vcvt.s32.f32 %v1018_v24  ;;  %v1794_v14 = vcvt.s32.f32 %v1026_v22  ;;  %v387_v18 = vunpack.c.1.s8 %v187_v49  ;;  %v507_v46 = vunpack.c.0.s8 %v219_v43  ;;  %v299_v22 = vld [vmem:[#allocation7 + $0x3b8] sm:$0xff] }
 0x1e5   :  { %2865 = vmatpush.bf16.msra.mxu2 %v1923_v9  ;;  %2878 = vmatpush.bf16.msra.mxu3 %v1987_v10  ;;  %v2170_v60 = vpack.c.bf16 %v1666_v6, %v1658_v17  ;;  %v1147_v13 = vcvt.s32.f32 %v379_v41  ;;  %v515_v19 = vunpack.c.1.s8 %v219_v43  ;;  %v747_v29 = vunpack.c.2.s8 %v275_v4  ;;  %v331_v41 = vld [vmem:[#allocation7 + $0x4b8] sm:$0xff] }
 0x1e6   :  { %v2234_v50 = vpack.c.bf16 %v1794_v14, %v1786_v12  ;;  %v1155_v23 = vcvt.s32.f32 %v387_v18  ;;  %v1275_v31 = vcvt.s32.f32 %v507_v46  ;;  %v755_v28 = vunpack.c.3.s8 %v275_v4 }
 0x1e7   :  { %2840 = vmatpush.bf16.msra.mxu0 %v2170_v60  ;;  %v1283_v47 = vcvt.s32.f32 %v515_v19  ;;  %v1515_v42 = vcvt.s32.f32 %v747_v29  ;;  %v875_v25 = vunpack.c.2.s8 %v307_v27  ;;  %v883_v36 = vunpack.c.3.s8 %v307_v27 }
 0x1e8   :  { %2853 = vmatpush.bf16.msra.mxu1 %v2234_v50  ;;  %v1915_v32 = vpack.c.bf16 %v1155_v23, %v1147_v13  ;;  %v1523_v49 = vcvt.s32.f32 %v755_v28  ;;  %v1003_v37 = vunpack.c.2.s8 %v339_v30  ;;  %v1011_v39 = vunpack.c.3.s8 %v339_v30 }
 0x1e9   :  { %v1979_v5 = vpack.c.bf16 %v1283_v47, %v1275_v31  ;;  %v1643_v40 = vcvt.s32.f32 %v875_v25  ;;  %v1651_v43 = vcvt.s32.f32 %v883_v36  ;;  %v1131_v8 = vunpack.c.2.s8 %v371_v48 }
 0x1ea   :  { %2866 = vmatpush.bf16.msra.mxu2 %v1915_v32  ;;  %v2099_v53 = vpack.c.bf16 %v1523_v49, %v1515_v42  ;;  %v1771_v16 = vcvt.s32.f32 %v1003_v37  ;;  %v1779_v7 = vcvt.s32.f32 %v1011_v39  ;;  %v1139_v51 = vunpack.c.3.s8 %v371_v48  ;;  %2841 = vmatmul.bf16.vlgmr.msra.gmra.mxu0 %v6094_v52 }
 0x1eb   :  { %2879 = vmatpush.bf16.msra.mxu3 %v1979_v5  ;;  %v2163_v38 = vpack.c.bf16 %v1651_v43, %v1643_v40  ;;  %v1899_v55 = vcvt.s32.f32 %v1131_v8  ;;  %v731_v11 = vunpack.c.0.s8 %v275_v4  ;;  %v739_v45 = vunpack.c.1.s8 %v275_v4  ;;  %2854 = vmatmul.bf16.vlgmr.msra.gmra.mxu1 %v6098_v56 }
 0x1ec   :  { %2885 = vmatpush.bf16.msrb.mxu0 %v2099_v53  ;;  %v2227_v26 = vpack.c.bf16 %v1779_v7, %v1771_v16  ;;  %v1907_v54 = vcvt.s32.f32 %v1139_v51  ;;  %v859_v57 = vunpack.c.0.s8 %v307_v27  ;;  %v867_v15 = vunpack.c.1.s8 %v307_v27  ;;  %v6245_v53 = vpop.f32.mrf.mxu0  ;;  %v6247_v16 = vpop.f32.mrf.mxu1 }
 0x1ed   :  { %2898 = vmatpush.bf16.msrb.mxu1 %v2163_v38  ;;  %v1499_v61 = vcvt.s32.f32 %v731_v11  ;;  %v1507_v62 = vcvt.s32.f32 %v739_v45  ;;  %v987_v0 = vunpack.c.0.s8 %v339_v30  ;;  %v995_v35 = vunpack.c.1.s8 %v339_v30  ;;  %2867 = vmatmul.bf16.vlgmr.msra.gmra.mxu2 %v6078_v63  ;;  %v363_v63 = vld [vmem:[#allocation7 + $0x5b8] sm:$0xff]  ;;  %v6249_v45 = vpop.f32.mrf.mxu2 }
 0x1ee   :  { %2911 = vmatpush.bf16.msrb.mxu2 %v2227_v26  ;;  %v2291_v59 = vpack.c.bf16 %v1907_v54, %v1899_v55  ;;  %v1627_v3 = vcvt.s32.f32 %v859_v57  ;;  %v1635_v17 = vcvt.s32.f32 %v867_v15  ;;  %v1115_v24 = vunpack.c.0.s8 %v371_v48  ;;  %2880 = vmatmul.bf16.vlgmr.msra.gmra.mxu3 %v6085_v20  ;;  %v259_v11 = vld [vmem:[#allocation7 + $0x278] sm:$0xff]  ;;  %v6251_v26 = vpop.f32.mrf.mxu3 }
 0x1ef   :  { %v2091_v4 = vpack.c.bf16 %v1507_v62, %v1499_v61  ;;  %v1755_v9 = vcvt.s32.f32 %v987_v0  ;;  %v1763_v10 = vcvt.s32.f32 %v995_v35  ;;  %v1123_v6 = vunpack.c.1.s8 %v371_v48  ;;  %v291_v62 = vld [vmem:[#allocation7 + $0x378] sm:$0xff] }
 0x1f0   :  { %2924 = vmatpush.bf16.msrb.mxu3 %v2291_v59  ;;  %v2155_v12 = vpack.c.bf16 %v1635_v17, %v1627_v3  ;;  %v1883_v14 = vcvt.s32.f32 %v1115_v24  ;;  %v715_v18 = vunpack.c.2.s8 %v267_v1  ;;  %v723_v46 = vunpack.c.3.s8 %v267_v1  ;;  %v323_v3 = vld [vmem:[#allocation7 + $0x478] sm:$0xff] }
 0x1f1   :  { %2886 = vmatpush.bf16.msrb.mxu0 %v2091_v4  ;;  %v2219_v27 = vpack.c.bf16 %v1763_v10, %v1755_v9  ;;  %v1891_v60 = vcvt.s32.f32 %v1123_v6  ;;  %v843_v13 = vunpack.c.2.s8 %v299_v22  ;;  %v851_v19 = vunpack.c.3.s8 %v299_v22  ;;  %v355_v9 = vld [vmem:[#allocation7 + $0x578] sm:$0xff] }
 0x1f2   :  { %2899 = vmatpush.bf16.msrb.mxu1 %v2155_v12  ;;  %v1483_v29 = vcvt.s32.f32 %v715_v18  ;;  %v1491_v30 = vcvt.s32.f32 %v723_v46  ;;  %v971_v20 = vunpack.c.2.s8 %v331_v41  ;;  %v979_v50 = vunpack.c.3.s8 %v331_v41 }
 0x1f3   :  { %2912 = vmatpush.bf16.msrb.mxu2 %v2219_v27  ;;  %v2283_v23 = vpack.c.bf16 %v1891_v60, %v1883_v14  ;;  %v1611_v31 = vcvt.s32.f32 %v843_v13  ;;  %v1619_v28 = vcvt.s32.f32 %v851_v19  ;;  %v1099_v48 = vunpack.c.2.s8 %v363_v63 }
 0x1f4   :  { %v2083_v47 = vpack.c.bf16 %v1491_v30, %v1483_v29  ;;  %v1739_v42 = vcvt.s32.f32 %v971_v20  ;;  %v1747_v25 = vcvt.s32.f32 %v979_v50  ;;  %v1107_v36 = vunpack.c.3.s8 %v363_v63 }
 0x1f5   :  { %2925 = vmatpush.bf16.msrb.mxu3 %v2283_v23  ;;  %v2147_v32 = vpack.c.bf16 %v1619_v28, %v1611_v31  ;;  %v1867_v49 = vcvt.s32.f32 %v1099_v48  ;;  %v699_v37 = vunpack.c.0.s8 %v267_v1  ;;  %v707_v39 = vunpack.c.1.s8 %v267_v1  ;;  %v2636_v23 = vpop.f32.mrf.mxu0  ;;  %v2649_v31 = vpop.f32.mrf.mxu1 }
 0x1f6   :  { %2887 = vmatpush.bf16.msrb.mxu0 %v2083_v47  ;;  %v2211_v5 = vpack.c.bf16 %v1747_v25, %v1739_v42  ;;  %v1875_v40 = vcvt.s32.f32 %v1107_v36  ;;  %v827_v43 = vunpack.c.0.s8 %v299_v22  ;;  %v835_v8 = vunpack.c.1.s8 %v299_v22  ;;  %v2662_v25 = vpop.f32.mrf.mxu2  ;;  %v2675_v36 = vpop.f32.mrf.mxu3 }
 0x1f7   :  { %2900 = vmatpush.bf16.msrb.mxu1 %v2147_v32  ;;  %v1467_v7 = vcvt.s32.f32 %v699_v37  ;;  %v1475_v51 = vcvt.s32.f32 %v707_v39  ;;  %v955_v38 = vunpack.c.0.s8 %v331_v41  ;;  %v963_v55 = vunpack.c.1.s8 %v331_v41 }
 0x1f8   :  { %2913 = vmatpush.bf16.msrb.mxu2 %v2211_v5  ;;  %v2275_v54 = vpack.c.bf16 %v1875_v40, %v1867_v49  ;;  %v1595_v57 = vcvt.s32.f32 %v827_v43  ;;  %v1603_v15 = vcvt.s32.f32 %v835_v8  ;;  %v1083_v61 = vunpack.c.0.s8 %v363_v63 }
 0x1f9   :  { %v2075_v0 = vpack.c.bf16 %v1475_v51, %v1467_v7  ;;  %v1723_v35 = vcvt.s32.f32 %v955_v38  ;;  %v1731_v1 = vcvt.s32.f32 %v963_v55  ;;  %v1091_v59 = vunpack.c.1.s8 %v363_v63  ;;  %v251_v7 = vld [vmem:[#allocation7 + $0x238] sm:$0xff] }
 0x1fa   :  { %2926 = vmatpush.bf16.msrb.mxu3 %v2275_v54  ;;  %v2139_v17 = vpack.c.bf16 %v1603_v15, %v1595_v57  ;;  %v1851_v24 = vcvt.s32.f32 %v1083_v61  ;;  %v683_v22 = vunpack.c.2.s8 %v259_v11  ;;  %v691_v4 = vunpack.c.3.s8 %v259_v11  ;;  %v283_v57 = vld [vmem:[#allocation7 + $0x338] sm:$0xff] }
 0x1fb   :  { %2888 = vmatpush.bf16.msrb.mxu0 %v2075_v0  ;;  %v2203_v10 = vpack.c.bf16 %v1731_v1, %v1723_v35  ;;  %v1859_v6 = vcvt.s32.f32 %v1091_v59  ;;  %v811_v41 = vunpack.c.2.s8 %v291_v62  ;;  %v819_v12 = vunpack.c.3.s8 %v291_v62  ;;  %v315_v35 = vld [vmem:[#allocation7 + $0x438] sm:$0xff] }
 0x1fc   :  { %2901 = vmatpush.bf16.msrb.mxu1 %v2139_v17  ;;  %v1451_v14 = vcvt.s32.f32 %v683_v22  ;;  %v1459_v18 = vcvt.s32.f32 %v691_v4  ;;  %v939_v46 = vunpack.c.2.s8 %v323_v3  ;;  %v947_v27 = vunpack.c.3.s8 %v323_v3 }
 0x1fd   :  { %2914 = vmatpush.bf16.msrb.mxu2 %v2203_v10  ;;  %v2267_v60 = vpack.c.bf16 %v1859_v6, %v1851_v24  ;;  %v1579_v63 = vcvt.s32.f32 %v811_v41  ;;  %v1587_v13 = vcvt.s32.f32 %v819_v12  ;;  %v1067_v19 = vunpack.c.2.s8 %v355_v9  ;;  %v6253_v24 = vld [vmem:[#allocation7 + $0x538] sm:$0xff] }
 0x1fe   :  { %v2067_v29 = vpack.c.bf16 %v1459_v18, %v1451_v14  ;;  %v1707_v30 = vcvt.s32.f32 %v939_v46  ;;  %v1715_v20 = vcvt.s32.f32 %v947_v27  ;;  %v1075_v50 = vunpack.c.3.s8 %v355_v9  ;;  %v6255_v18 = vpop.f32.mrf.mxu0 }
 0x1ff   :  { %2927 = vmatpush.bf16.msrb.mxu3 %v2267_v60  ;;  %v2131_v28 = vpack.c.bf16 %v1587_v13, %v1579_v63  ;;  %v1835_v48 = vcvt.s32.f32 %v1067_v19  ;;  %v667_v47 = vunpack.c.0.s8 %v259_v11  ;;  %v675_v42 = vunpack.c.1.s8 %v259_v11  ;;  %v6260_v13 = vpop.f32.mrf.mxu2 }
 0x200   :  { %2889 = vmatpush.bf16.msrb.mxu0 %v2067_v29  ;;  %v2195_v32 = vpack.c.bf16 %v1715_v20, %v1707_v30  ;;  %v1843_v49 = vcvt.s32.f32 %v1075_v50  ;;  %v795_v37 = vunpack.c.0.s8 %v291_v62  ;;  %v803_v39 = vunpack.c.1.s8 %v291_v62 }
 0x201   :  { %2902 = vmatpush.bf16.msrb.mxu1 %v2131_v28  ;;  %v1435_v5 = vcvt.s32.f32 %v667_v47  ;;  %v1443_v40 = vcvt.s32.f32 %v675_v42  ;;  %v923_v43 = vunpack.c.0.s8 %v323_v3  ;;  %v931_v8 = vunpack.c.1.s8 %v323_v3 }
 0x202   :  { %2915 = vmatpush.bf16.msrb.mxu2 %v2195_v32  ;;  %v2259_v51 = vpack.c.bf16 %v1843_v49, %v1835_v48  ;;  %v1563_v38 = vcvt.s32.f32 %v795_v37  ;;  %v1571_v55 = vcvt.s32.f32 %v803_v39  ;;  %v1051_v54 = vunpack.c.0.s8 %v355_v9 }
 0x203   :  { %v2059_v11 = vpack.c.bf16 %v1443_v40, %v1435_v5  ;;  %v1691_v15 = vcvt.s32.f32 %v923_v43  ;;  %v1699_v61 = vcvt.s32.f32 %v931_v8  ;;  %v1059_v0 = vunpack.c.1.s8 %v355_v9  ;;  %v6257_v9 = vpop.f32.mrf.mxu1  ;;  %v5650_v8 = vld [vmem:[#allocation5] sm:$0xf] }
 0x204   :  { %2928 = vmatpush.bf16.msrb.mxu3 %v2259_v51  ;;  %v2123_v1 = vpack.c.bf16 %v1571_v55, %v1563_v38  ;;  %v1819_v62 = vcvt.s32.f32 %v1051_v54  ;;  %v651_v59 = vunpack.c.2.s8 %v251_v7  ;;  %v659_v17 = vunpack.c.3.s8 %v251_v7  ;;  %v5693_v51 = vld [vmem:[#allocation5 + $0x1c] sm:$0xf0] }
 0x205   :  { %2890 = vmatpush.bf16.msrb.mxu0 %v2059_v11  ;;  %v2187_v3 = vpack.c.bf16 %v1699_v61, %v1691_v15  ;;  %v1827_v22 = vcvt.s32.f32 %v1059_v0  ;;  %v779_v4 = vunpack.c.2.s8 %v283_v57  ;;  %v787_v10 = vunpack.c.3.s8 %v283_v57  ;;  %v5689_v11 = vld [vmem:[#allocation5 + $0x4] sm:$0xf]  ;;  %v5666_v15 = vld [vmem:[#allocation5 + $0x10] sm:$0xf] }
 0x206   :  { %2903 = vmatpush.bf16.msrb.mxu1 %v2123_v1  ;;  %v1419_v6 = vcvt.s32.f32 %v651_v59  ;;  %v1427_v41 = vcvt.s32.f32 %v659_v17  ;;  %v907_v12 = vunpack.c.2.s8 %v315_v35  ;;  %v915_v14 = vunpack.c.3.s8 %v315_v35  ;;  %v5695_v1 = vld [vmem:[#allocation5 + $0x2c] sm:$0xf0]  ;;  %v5668_v59 = vld [vmem:[#allocation5 + $0x30] sm:$0xf0]  ;;  %v2688_v17 = vpop.f32.mrf.mxu0 }
 0x207   :  { %2916 = vmatpush.bf16.msrb.mxu2 %v2187_v3  ;;  %v2251_v46 = vpack.c.bf16 %v1827_v22, %v1819_v62  ;;  %v1547_v27 = vcvt.s32.f32 %v779_v4  ;;  %v1555_v60 = vcvt.s32.f32 %v787_v10  ;;  %v1035_v63 = vunpack.c.2.s8 %v6253_v24  ;;  %v5691_v62 = vld [vmem:[#allocation5 + $0x14] sm:$0xf] }
 0x208   :  { %v2051_v19 = vpack.c.bf16 %v1427_v41, %v1419_v6  ;;  %v1675_v29 = vcvt.s32.f32 %v907_v12  ;;  %v1683_v30 = vcvt.s32.f32 %v915_v14  ;;  %v1043_v20 = vunpack.c.3.s8 %v6253_v24  ;;  %v5658_v6 = vld [vmem:[#allocation5 + $0x8] sm:$0xf]  ;;  %v2714_v41 = vpop.f32.mrf.mxu2 }
 0x209   :  { %2929 = vmatpush.bf16.msrb.mxu3 %v2251_v46  ;;  %v2115_v50 = vpack.c.bf16 %v1555_v60, %v1547_v27  ;;  %v1803_v23 = vcvt.s32.f32 %v1035_v63  ;;  %v635_v31 = vunpack.c.0.s8 %v251_v7  ;;  %v643_v28 = vunpack.c.1.s8 %v251_v7  ;;  %v5690_v27 = vld [vmem:[#allocation5 + $0xc] sm:$0xf] }
 0x20a   :  { %2891 = vmatpush.bf16.msrb.mxu0 %v2051_v19  ;;  %v2179_v48 = vpack.c.bf16 %v1683_v30, %v1675_v29  ;;  %v1811_v47 = vcvt.s32.f32 %v1043_v20  ;;  %v763_v42 = vunpack.c.0.s8 %v283_v57  ;;  %v771_v25 = vunpack.c.1.s8 %v283_v57  ;;  %v5652_v57 = vld [vmem:[#allocation5 + $0x20] sm:$0xf0]  ;;  %v5660_v60 = vld [vmem:[#allocation5 + $0x28] sm:$0xf0] }
 0x20b   :  { %2904 = vmatpush.bf16.msrb.mxu1 %v2115_v50  ;;  %v1403_v36 = vcvt.s32.f32 %v635_v31  ;;  %v1411_v32 = vcvt.s32.f32 %v643_v28  ;;  %v891_v49 = vunpack.c.0.s8 %v315_v35  ;;  %v899_v37 = vunpack.c.1.s8 %v315_v35  ;;  %v2701_v3 = vpop.f32.mrf.mxu1  ;;  %v176_v50 = vpop.permute.xlu0 %175 }
 0x20c   :  { %2917 = vmatpush.bf16.msrb.mxu2 %v2179_v48  ;;  %v2243_v39 = vpack.c.bf16 %v1811_v47, %v1803_v23  ;;  %v1531_v5 = vcvt.s32.f32 %v763_v42  ;;  %v1539_v40 = vcvt.s32.f32 %v771_v25  ;;  %v1019_v43 = vunpack.c.0.s8 %v6253_v24 }
 0x20d   :  { %v2043_v38 = vpack.c.bf16 %v1411_v32, %v1403_v36  ;;  %v1659_v7 = vcvt.s32.f32 %v891_v49  ;;  %v1667_v55 = vcvt.s32.f32 %v899_v37  ;;  %v1027_v54 = vunpack.c.1.s8 %v6253_v24  ;;  %v5694_v24 = vld [vmem:[#allocation5 + $0x24] sm:$0xf0]  ;;  %v5674_v36 = vld [vmem:[#allocation5 + $0x18] sm:$0xf]  ;;  %v5692_v37 = vld [vmem:[#allocation5 + $0x1c] sm:$0xf] }
 0x20e   :  { %2930 = vmatpush.bf16.msrb.mxu3 %v2243_v39  ;;  %v2107_v61 = vpack.c.bf16 %v1539_v40, %v1531_v5  ;;  %v1787_v0 = vcvt.s32.f32 %v1019_v43  ;;  %v2648_v35 = vadd.f32 %v6247_v16, %v6245_v53  ;;  %v5651_v10 = vor.u32 %v5693_v51, %v5650_v8  ;;  %v5676_v39 = vld [vmem:[#allocation5 + $0x38] sm:$0xf0] }
 0x20f   :  { %2892 = vmatpush.bf16.msrb.mxu0 %v2043_v38  ;;  %v2171_v22 = vpack.c.bf16 %v1667_v55, %v1659_v7  ;;  %v1795_v4 = vcvt.s32.f32 %v1027_v54  ;;  %v172_v14 = vlaneseq  ;;  %v5655_v46 = vor.u32 %v5689_v11, %v5652_v57  ;;  %v3189_v38 = vld [vmem:[#allocation10 + $0x60] sm:$0xff] }
 0x210   :  { %2905 = vmatpush.bf16.msrb.mxu1 %v2107_v61  ;;  %v2661_v12 = vadd.f32 %v6249_v45, %v2648_v35  ;;  %v5667_v16 = vor.u32 %v5695_v1, %v5666_v15  ;;  %v5671_v63 = vor.u32 %v5691_v62, %v5668_v59  ;;  %v5659_v29 = vor.u32 %v5694_v24, %v5658_v6  ;;  %v3205_v7 = vld [vmem:[#allocation10 + $0xe0] sm:$0xff] }
 0x211   :  { %2918 = vmatpush.bf16.msrb.mxu2 %v2171_v22  ;;  %v2235_v53 = vpack.c.bf16 %v1795_v4, %v1787_v0  ;;  %v5663_v30 = vor.u32 %v5690_v27, %v5660_v60  ;;  %v173_v45 = vand.u32 127, %v172_v14  ;;  %v5969_v28 = vmov 0.0  }
 0x212   :  { %2893 = vmatmul.bf16.vlgmr.msrb.gmra.mxu0 %v6076_v58  ;;  %v2674_v19 = vadd.f32 %v6251_v26, %v2661_v12  ;;  %v2725_v26 = vpop.f32.mrf.mxu3  ;;  %v3361_v55 = vunpack.c.2.s8 %v3189_v38  ;;  %v3365_v54 = vunpack.c.3.s8 %v3189_v38  ;;  %v3425_v11 = vunpack.c.2.s8 %v3205_v7 }
 0x213   :  { %2931 = vmatpush.bf16.msrb.mxu3 %v2235_v53  ;;  %2906 = vmatmul.bf16.vlgmr.msrb.gmra.mxu1 %v6080_v2  ;;  %v2726_v2 = vadd.f32 %v2725_v26, %v6260_v13  ;;  %vm177_vm0 = vcmp.eq.s32.totalorder %v176_v50, %v173_v45  ;;  %v5679_v13 = vor.u32 %v5692_v37, %v5676_v39  ;;  %v3429_v57 = vunpack.c.3.s8 %v3205_v7  ;;  %v3201_v50 = vld [vmem:[#allocation10 + $0xc0] sm:$0xff] }
 0x214   :  { %2919 = vmatmul.bf16.vlgmr.msrb.gmra.mxu2 %v6094_v52  ;;  %v2687_v20 = vadd.f32 %v6255_v18, %v2674_v19  ;;  %3074 = vmatpush.bf16.msra.mxu0 %v5667_v16  ;;  %v2738_v23 = vpop.f32.mrf.mxu0  ;;  %v178_v48 = vsel %vm177_vm0, 1.0, %v5969_v28  ;;  %v3873_v15 = vcvt.s32.f32 %v3361_v55  ;;  %v3877_v61 = vcvt.s32.f32 %v3365_v54 }
 0x215   :  { %3022 = vmatpush.bf16.msra.mxu2 %v5651_v10  ;;  %3087 = vmatpush.bf16.msra.mxu1 %v5671_v63  ;;  %v2739_v52 = vadd.f32 %v2738_v23, %v2726_v2  ;;  %v179_v42 = vpack.c.bf16 %v178_v48, %v178_v48  ;;  %v3937_v0 = vcvt.s32.f32 %v3425_v11  ;;  %v3941_v35 = vcvt.s32.f32 %v3429_v57  ;;  %v3237_v11 = vld [vmem:[#allocation10 + $0x1e0] sm:$0xff] }
 0x216   :  { %2932 = vmatmul.bf16.vlgmr.msrb.gmra.mxu3 %v6098_v56  ;;  %v6275_v58 = vadd.f32 %v6257_v9, %v2687_v20  ;;  %v2751_v31 = vpop.f32.mrf.mxu1  ;;  %v5696_v56 = vld [vmem:[#allocation5 + $0x34] sm:$0xf0]  ;;  %v4357_v1 = vpack.c.bf16 %v3877_v61, %v3873_v15  ;;  %v3353_v41 = vunpack.c.0.s8 %v3189_v38  ;;  %v3357_v12 = vunpack.c.1.s8 %v3189_v38  ;;  %v3185_v20 = vld [vmem:[#allocation10 + $0x40] sm:$0xff] }
 0x217   :  { %3035 = vmatpush.bf16.msra.mxu3 %v5655_v46  ;;  %v2752_v18 = vadd.f32 %v2751_v31, %v2739_v52  ;;  %v5675_v5 = vor.u32 %v5696_v56, %v5674_v36  ;;  %v4389_v62 = vpack.c.bf16 %v3941_v35, %v3937_v0  ;;  %v3417_v14 = vunpack.c.0.s8 %v3205_v7 }
 0x218   :  { %4593 = vmatpush.bf16.msrb.mxu0 %v4357_v1  ;;  %v3421_v46 = vunpack.c.1.s8 %v3205_v7  ;;  %v3865_v60 = vcvt.s32.f32 %v3353_v41  ;;  %v3869_v53 = vcvt.s32.f32 %v3357_v12  ;;  %v3345_v26 = vunpack.c.2.s8 %v3185_v20 }
 0x219   :  { %3048 = vmatpush.bf16.msrb.mxu2 %v5659_v29  ;;  %4606 = vmatpush.bf16.msrb.mxu1 %v4389_v62  ;;  %v3929_v16 = vcvt.s32.f32 %v3417_v14  ;;  %v3349_v23 = vunpack.c.3.s8 %v3185_v20  ;;  %v3409_v2 = vunpack.c.2.s8 %v3201_v50  ;;  %v3413_v31 = vunpack.c.3.s8 %v3201_v50 }
 0x21a   :  { %v2727_v25 = vpop.f32.mrf.mxu3  ;;  %v3933_v63 = vcvt.s32.f32 %v3421_v46  ;;  %v4353_v19 = vpack.c.bf16 %v3869_v53, %v3865_v60  ;;  %v3337_v52 = vunpack.c.0.s8 %v3185_v20  ;;  %v3341_v28 = vunpack.c.1.s8 %v3185_v20  ;;  %v6290_v53 = vld [vmem:[#allocation10] sm:$0xff] }
 0x21b   :  { %3061 = vmatpush.bf16.msrb.mxu3 %v5663_v30  ;;  %v3401_v48 = vunpack.c.0.s8 %v3201_v50  ;;  %v3921_v25 = vcvt.s32.f32 %v3409_v2  ;;  %v3925_v36 = vcvt.s32.f32 %v3413_v31  ;;  %v3553_v61 = vunpack.c.2.s8 %v3237_v11 }
 0x21c   :  { %v2740_v9 = vpop.f32.mrf.mxu0  ;;  %v4385_v29 = vpack.c.bf16 %v3933_v63, %v3929_v16  ;;  %4594 = vmatpush.bf16.msrb.mxu0 %v4353_v19  ;;  %v3849_v56 = vcvt.s32.f32 %v3337_v52  ;;  %v3557_v0 = vunpack.c.3.s8 %v3237_v11  ;;  %v3545_v20 = vunpack.c.0.s8 %v3237_v11 }
 0x21d   :  { %v2764_v47 = vpop.f32.mrf.mxu2  ;;  %v3913_v9 = vcvt.s32.f32 %v3401_v48  ;;  %v4381_v39 = vpack.c.bf16 %v3925_v36, %v3921_v25  ;;  %v3313_v52 = vunpack.c.2.s8 %v6290_v53  ;;  %v6298_v25 = vld [vmem:[#allocation10 + $0x1c0] sm:$0xff] }
 0x21e   :  { %v2765_v32 = vadd.f32 %v2764_v47, %v2752_v18  ;;  %v2753_v49 = vpop.f32.mrf.mxu1  ;;  %4607 = vmatpush.bf16.msrb.mxu1 %v4385_v29  ;;  %v3405_v18 = vunpack.c.1.s8 %v3201_v50  ;;  %v3857_v47 = vcvt.s32.f32 %v3345_v26  ;;  %v3549_v50 = vunpack.c.1.s8 %v3237_v11  ;;  %v6292_v26 = vld [vmem:[#allocation10 + $0x80] sm:$0xff] }
 0x220   :  { %v3917_v49 = vcvt.s32.f32 %v3405_v18  ;;  %v4057_v18 = vcvt.s32.f32 %v3545_v20 }
 0x222   :  { %5684 = vmatmul.msk.bf16.vlgmr.msra.gmra.mxu0 %vm3011_vm1, %v179_v42  ;;  %v2777_v43 = vpop.f32.mrf.mxu3  ;;  %4608 = vmatpush.bf16.msrb.mxu1 %v4381_v39 }
 0x223   :  { %5685 = vmatmul.msk.bf16.vlgmr.msra.gmra.mxu1 %vm3011_vm1, %v179_v42  ;;  %v6282_v8 = vadd.f32 %v2777_v43, %v2765_v32  ;;  %v3853_v32 = vcvt.s32.f32 %v3341_v28  ;;  %v3197_v43 = vld [vmem:[#allocation10 + $0xa0] sm:$0xff] }
 0x224   :  { %5680 = vmatmul.msk.bf16.vlgmr.msra.gmra.mxu2 %vm3011_vm1, %v179_v42  ;;  %v3393_v55 = vunpack.c.2.s8 %v3197_v43  ;;  %v3397_v54 = vunpack.c.3.s8 %v3197_v43  ;;  %v3385_v46 = vunpack.c.0.s8 %v3197_v43  ;;  %v3389_v60 = vunpack.c.1.s8 %v3197_v43  ;;  %v6295_v28 = vld [vmem:[#allocation10 + $0x140] sm:$0xff] }
 0x225   :  { %3100 = vmatpush.bf16.msra.mxu2 %v5675_v5  ;;  %v2766_v40 = vpop.f32.mrf.mxu2  ;;  %v4345_v5 = vpack.c.bf16 %v3853_v32, %v3849_v56  ;;  %v3825_v56 = vcvt.s32.f32 %v3313_v52  ;;  %v3377_v32 = vunpack.c.2.s8 %v6292_v26  ;;  %v3473_v39 = vunpack.c.2.s8 %v6295_v28  ;;  %v3213_v52 = vld [vmem:[#allocation10 + $0x120] sm:$0xff] }
 0x226   :  { %5681 = vmatmul.msk.bf16.vlgmr.msra.gmra.mxu3 %vm3011_vm1, %v179_v42  ;;  %v3181_v40 = vld [vmem:[#allocation10 + $0x20] sm:$0xff]  ;;  %v3905_v62 = vcvt.s32.f32 %v3393_v55  ;;  %v3537_v43 = vunpack.c.2.s8 %v6298_v25 }
 0x227   :  { %3113 = vmatpush.bf16.msra.mxu3 %v5679_v13  ;;  %v4377_v13 = vpack.c.bf16 %v3917_v49, %v3913_v9  ;;  %v3329_v38 = vunpack.c.2.s8 %v3181_v40  ;;  %v3333_v7 = vunpack.c.3.s8 %v3181_v40  ;;  %v3325_v41 = vunpack.c.1.s8 %v3181_v40 }
 0x228   :  { %v3381_v9 = vunpack.c.3.s8 %v6292_v26 }
 0x229   :  { %4609 = vmatpush.bf16.msrb.mxu1 %v4377_v13  ;;  %v3841_v35 = vcvt.s32.f32 %v3329_v38  ;;  %v3845_v1 = vcvt.s32.f32 %v3333_v7  ;;  %v3837_v63 = vcvt.s32.f32 %v3325_v41  ;;  %v3889_v13 = vcvt.s32.f32 %v3377_v32 }
 0x22a   :  { %v2779_v51 = vpop.f32.mrf.mxu3  ;;  %v3985_v7 = vcvt.s32.f32 %v3473_v39  ;;  %v3373_v41 = vunpack.c.1.s8 %v6292_v26  ;;  %v3461_v39 = vunpack.c.3.s8 %v3213_v52 }
 0x22b   :  { %v3221_v51 = vld [vmem:[#allocation10 + $0x160] sm:$0xff] }
 0x22c   :  { %v3489_v57 = vunpack.c.2.s8 %v3221_v51  ;;  %v3493_v15 = vunpack.c.3.s8 %v3221_v51  ;;  %v3481_v19 = vunpack.c.0.s8 %v3221_v51  ;;  %v3485_v29 = vunpack.c.1.s8 %v3221_v51 }
 0x22d   :  { %v3541_v51 = vunpack.c.3.s8 %v6298_v25 }
 0x22e   :  { %v3993_v2 = vcvt.s32.f32 %v3481_v19  ;;  %v3997_v31 = vcvt.s32.f32 %v3485_v29  ;;  %v3253_v19 = vld [vmem:[#allocation10 + $0x260] sm:$0xff] }
 0x230   :  { %v4417_v36 = vpack.c.bf16 %v3997_v31, %v3993_v2 }
 0x234   :  { %5682 = vmatmul.msk.bf16.vlgmr.msrb.gmra.mxu2 %vm3011_vm1, %v179_v42 }
 0x236   :  { %5683 = vmatmul.msk.bf16.vlgmr.msrb.gmra.mxu3 %vm3011_vm1, %v179_v42 }
 0x23e   :  { %v2790_v59 = vpop.f32.mrf.mxu0 }
 0x23f   :  { %v2803_v17 = vpop.f32.mrf.mxu1 }
 0x240   :  { %v2804_v3 = vadd.f32 %v2803_v17, %v2790_v59  ;;  %v3909_v59 = vcvt.s32.f32 %v3397_v54  ;;  %v4001_v17 = vcvt.s32.f32 %v3489_v57  ;;  %v4049_v57 = vcvt.s32.f32 %v3537_v43 }
 0x244   :  { %5686 = vmatmul.msk.bf16.vlgmr.msra.gmra.mxu2 %vm3011_vm1, %v179_v42 }
 0x246   :  { %5687 = vmatmul.msk.bf16.vlgmr.msra.gmra.mxu3 %vm3011_vm1, %v179_v42  ;;  %v2816_v22 = vpop.f32.mrf.mxu2  ;;  %v2792_v4 = vpop.f32.mrf.mxu0  ;;  %v3861_v42 = vcvt.s32.f32 %v3349_v23 }
 0x247   :  { %v2817_v10 = vadd.f32 %v2816_v22, %v2804_v3  ;;  %v2829_v6 = vpop.f32.mrf.mxu3  ;;  %v2805_v24 = vpop.f32.mrf.mxu1  ;;  %v4005_v3 = vcvt.s32.f32 %v3493_v15  ;;  %v4065_v22 = vcvt.s32.f32 %v3553_v61  ;;  %v4069_v4 = vcvt.s32.f32 %v3557_v0 }
 0x248   :  { %v4349_v37 = vpack.c.bf16 %v3861_v42, %v3857_v47  ;;  %v3321_v24 = vunpack.c.0.s8 %v3181_v40  ;;  %v4061_v47 = vcvt.s32.f32 %v3549_v50  ;;  %v3317_v42 = vunpack.c.3.s8 %v6290_v53  ;;  %v3269_v50 = vld [vmem:[#allocation10 + $0x2e0] sm:$0xff] }
 0x249   :  { %v6288_v27 = vadd.f32 %v2829_v6, %v2817_v10  ;;  %v4341_v10 = vpack.c.bf16 %v3845_v1, %v3841_v35  ;;  %v4373_v6 = vpack.c.bf16 %v3909_v59, %v3905_v62  ;;  %v4421_v12 = vpack.c.bf16 %v4005_v3, %v4001_v17  ;;  %v6312_v59 = vld [vmem:[%s6716_s4] sm:$0xff] }
 0x24a   :  { %4595 = vmatpush.bf16.msrb.mxu0 %v4349_v37  ;;  %v4453_v14 = vpack.c.bf16 %v4069_v4, %v4065_v22  ;;  %v3833_v16 = vcvt.s32.f32 %v3321_v24  ;;  %v4449_v49 = vpack.c.bf16 %v4061_v47, %v4057_v18  ;;  %v3829_v37 = vcvt.s32.f32 %v3317_v42  ;;  %v3229_v42 = vld [vmem:[#allocation10 + $0x1a0] sm:$0xff] }
 0x24b   :  { %4610 = vmatpush.bf16.msrb.mxu1 %v4373_v6  ;;  %4619 = vmatpush.bf16.msrb.mxu2 %v4421_v12  ;;  %v3893_v40 = vcvt.s32.f32 %v3381_v9  ;;  %v4053_v15 = vcvt.s32.f32 %v3541_v51  ;;  %v2943_v17 = vperm.slane %v6312_v59, 4  ;;  %v2944_v3 = vperm.slane %v6312_v59, 5 }
 0x24c   :  { %4632 = vmatpush.bf16.msrb.mxu3 %v4453_v14  ;;  %v4337_v23 = vpack.c.bf16 %v3837_v63, %v3833_v16  ;;  %v4333_v38 = vpack.c.bf16 %v3829_v37, %v3825_v56  ;;  %v2940_v22 = vperm.slane %v6312_v59, 1  ;;  %v3309_v6 = vunpack.c.1.s8 %v6290_v53 }
 0x24d   :  { %v4365_v11 = vpack.c.bf16 %v3893_v40, %v3889_v13  ;;  %v4445_v1 = vpack.c.bf16 %v4053_v15, %v4049_v57  ;;  %v3369_v24 = vunpack.c.0.s8 %v6292_v26  ;;  %v3529_v16 = vunpack.c.0.s8 %v6298_v25 }
 0x24e   :  { %v2818_v30 = vpop.f32.mrf.mxu2  ;;  %4596 = vmatpush.bf16.msrb.mxu0 %v4345_v5  ;;  %v3477_v5 = vunpack.c.3.s8 %v6295_v28  ;;  %v3533_v63 = vunpack.c.1.s8 %v6298_v25  ;;  %v3617_v47 = vunpack.c.2.s8 %v3253_v19  ;;  %v3621_v25 = vunpack.c.3.s8 %v3253_v19 }
 0x24f   :  { %v2831_v45 = vpop.f32.mrf.mxu3  ;;  %v3897_v30 = vcvt.s32.f32 %v3385_v46  ;;  %4620 = vmatpush.bf16.msrb.mxu2 %v4417_v36  ;;  %v3465_v46 = vunpack.c.0.s8 %v6295_v28  ;;  %v3881_v20 = vcvt.s32.f32 %v3369_v24  ;;  %v4041_v31 = vcvt.s32.f32 %v3529_v16 }
 0x250   :  { %v3901_v45 = vcvt.s32.f32 %v3389_v60  ;;  %4633 = vmatpush.bf16.msrb.mxu3 %v4449_v49  ;;  %v3989_v55 = vcvt.s32.f32 %v3477_v5  ;;  %v3469_v60 = vunpack.c.1.s8 %v6295_v28  ;;  %v4045_v28 = vcvt.s32.f32 %v3533_v63 }
 0x251   :  { %v3977_v26 = vcvt.s32.f32 %v3465_v46  ;;  %v3681_v56 = vunpack.c.2.s8 %v3269_v50  ;;  %v3685_v32 = vunpack.c.3.s8 %v3269_v50  ;;  %v4129_v49 = vcvt.s32.f32 %v3617_v47 }
 0x252   :  { %4597 = vmatpush.bf16.msrb.mxu0 %v4341_v10  ;;  %v4369_v48 = vpack.c.bf16 %v3901_v45, %v3897_v30  ;;  %v4413_v35 = vpack.c.bf16 %v3989_v55, %v3985_v7  ;;  %v3305_v10 = vunpack.c.0.s8 %v6290_v53  ;;  %v3821_v45 = vcvt.s32.f32 %v3309_v6 }
 0x253   :  { %v3885_v53 = vcvt.s32.f32 %v3373_v41  ;;  %v3981_v2 = vcvt.s32.f32 %v3469_v60  ;;  %v4441_v9 = vpack.c.bf16 %v4045_v28, %v4041_v31  ;;  %v3457_v37 = vunpack.c.2.s8 %v3213_v52 }
 0x254   :  { %4611 = vmatpush.bf16.msrb.mxu1 %v4369_v48  ;;  %4621 = vmatpush.bf16.msrb.mxu2 %v4413_v35  ;;  %v3817_v30 = vcvt.s32.f32 %v3305_v10  ;;  %v4133_v5 = vcvt.s32.f32 %v3621_v25  ;;  %v4193_v13 = vcvt.s32.f32 %v3681_v56  ;;  %v4197_v40 = vcvt.s32.f32 %v3685_v32 }
 0x255   :  { %4634 = vmatpush.bf16.msrb.mxu3 %v4445_v1  ;;  %v4361_v18 = vpack.c.bf16 %v3885_v53, %v3881_v20  ;;  %v4409_v36 = vpack.c.bf16 %v3981_v2, %v3977_v26  ;;  %v3521_v43 = vunpack.c.2.s8 %v3229_v42  ;;  %v3969_v51 = vcvt.s32.f32 %v3457_v37  ;;  %v3209_v53 = vld [vmem:[#allocation10 + $0x100] sm:$0xff] }
 0x256   :  { %4598 = vmatpush.bf16.msrb.mxu0 %v4337_v23  ;;  %v4329_v48 = vpack.c.bf16 %v3821_v45, %v3817_v30  ;;  %v3525_v7 = vunpack.c.3.s8 %v3229_v42  ;;  %v3609_v55 = vunpack.c.0.s8 %v3253_v19  ;;  %v4517_v57 = vpack.c.bf16 %v4197_v40, %v4193_v13 }
 0x257   :  { %v4033_v15 = vcvt.s32.f32 %v3521_v43  ;;  %v3673_v10 = vunpack.c.0.s8 %v3269_v50  ;;  %v3677_v24 = vunpack.c.1.s8 %v3269_v50  ;;  %v3449_v41 = vunpack.c.0.s8 %v3213_v52  ;;  %v3225_v50 = vld [vmem:[#allocation10 + $0x180] sm:$0xff] }
 0x258   :  { %4612 = vmatpush.bf16.msrb.mxu1 %v4365_v11  ;;  %4622 = vmatpush.bf16.msrb.mxu2 %v4409_v36  ;;  %v4485_v11 = vpack.c.bf16 %v4133_v5, %v4129_v49  ;;  %v4037_v1 = vcvt.s32.f32 %v3525_v7  ;;  %v3513_v16 = vunpack.c.0.s8 %v3229_v42  ;;  %v3517_v63 = vunpack.c.1.s8 %v3229_v42 }
 0x259   :  { %4635 = vmatpush.bf16.msrb.mxu3 %v4441_v9  ;;  %v4185_v60 = vcvt.s32.f32 %v3673_v10  ;;  %v3961_v45 = vcvt.s32.f32 %v3449_v41  ;;  %v3441_v56 = vunpack.c.2.s8 %v3209_v53  ;;  %v3445_v49 = vunpack.c.3.s8 %v3209_v53  ;;  %v6332_v41 = vld [vmem:[#allocation10 + $0x2a0] sm:$0xff] }
 0x25a   :  { %4599 = vmatpush.bf16.msrb.mxu0 %v4333_v38  ;;  %v3973_v38 = vcvt.s32.f32 %v3461_v39  ;;  %v4437_v46 = vpack.c.bf16 %v4037_v1, %v4033_v15  ;;  %v4025_v26 = vcvt.s32.f32 %v3513_v16  ;;  %v4029_v2 = vcvt.s32.f32 %v3517_v63  ;;  %v6334_v16 = vld [vmem:[#allocation10 + $0x360] sm:$0xff] }
 0x25b   :  { %v3505_v37 = vunpack.c.2.s8 %v3225_v50  ;;  %v3953_v5 = vcvt.s32.f32 %v3441_v56  ;;  %v3509_v13 = vunpack.c.3.s8 %v3225_v50  ;;  %v2942_v1 = vperm.slane %v6312_v59, 3 }
 0x25c   :  { %4613 = vmatpush.bf16.msrb.mxu1 %v4361_v18  ;;  %v4405_v35 = vpack.c.bf16 %v3973_v38, %v3969_v51  ;;  %v4433_v36 = vpack.c.bf16 %v4029_v2, %v4025_v26  ;;  %v3957_v51 = vcvt.s32.f32 %v3445_v49  ;;  %v3649_v2 = vunpack.c.2.s8 %v6332_v41 }
 0x25d   :  { %4636 = vmatpush.bf16.msrb.mxu3 %v4437_v46  ;;  %v4017_v38 = vcvt.s32.f32 %v3505_v37  ;;  %v3497_v46 = vunpack.c.0.s8 %v3225_v50 }
 0x25e   :  { %4600 = vmatpush.bf16.msrb.mxu0 %v4329_v48  ;;  %4623 = vmatpush.bf16.msrb.mxu2 %v4405_v35  ;;  %v4397_v15 = vpack.c.bf16 %v3957_v51, %v3953_v5  ;;  %v2941_v35 = vperm.slane %v6312_v59, 2  ;;  %v6366_v51 = vmul.f32 %v2944_v3, %v6282_v8 }
 0x260   :  { %4658 = vmatpush.bf16.msra.mxu1 %v4517_v57 }
 0x261   :  { %4637 = vmatpush.bf16.msrb.mxu3 %v4433_v36  ;;  %v3749_v36 = vunpack.c.3.s8 %v6334_v16 }
 0x262   :  { %4645 = vmatpush.bf16.msra.mxu0 %v4485_v11 }
 0x263   :  { %v4261_v49 = vcvt.s32.f32 %v3749_v36 }
 0x267   :  { %v2842_v54 = vpop.f32.mrf.mxu0 }
 0x268   :  { %v2843_v61 = vadd.f32 %v2842_v54, %v6288_v27  ;;  %v2855_v0 = vpop.f32.mrf.mxu1  ;;  %v2939_v27 = vperm.slane %v6312_v59, 0 }
 0x26a   :  { %v6307_v62 = vadd.f32 %v2855_v0, %v2843_v61  ;;  %v3613_v61 = vunpack.c.1.s8 %v3253_v19  ;;  %v4189_v19 = vcvt.s32.f32 %v3677_v24  ;;  %v3433_v24 = vunpack.c.0.s8 %v3209_v53 }
 0x26c   :  { %v4125_v6 = vcvt.s32.f32 %v3613_v61 }
 0x26f   :  { %v2844_v4 = vpop.f32.mrf.mxu0 }
 0x270   :  { %v2868_v12 = vpop.f32.mrf.mxu2  ;;  %v2857_v14 = vpop.f32.mrf.mxu1  ;;  %v4121_v4 = vcvt.s32.f32 %v3609_v55  ;;  %v4021_v55 = vcvt.s32.f32 %v3509_v13  ;;  %v6351_v13 = vmul.f32 %v2939_v27, %v6140_v33 }
 0x271   :  { %v2881_v29 = vpop.f32.mrf.mxu3  ;;  %v3249_v14 = vld [vmem:[#allocation10 + $0x240] sm:$0xff] }
 0x272   :  { %v6326_v23 = vadd.f32 %v2881_v29, %v2868_v12  ;;  %v3453_v12 = vunpack.c.1.s8 %v3213_v52  ;;  %v3265_v29 = vld [vmem:[#allocation10 + $0x2c0] sm:$0xff]  ;;  %v4481_v30 = vpack.c.bf16 %v4125_v6, %v4121_v4  ;;  %v3601_v31 = vunpack.c.2.s8 %v3249_v14 }
 0x273   :  { %v3605_v48 = vunpack.c.3.s8 %v3249_v14  ;;  %v4513_v52 = vpack.c.bf16 %v4189_v19, %v4185_v60  ;;  %v3665_v28 = vunpack.c.2.s8 %v3265_v29  ;;  %v3669_v47 = vunpack.c.3.s8 %v3265_v29 }
 0x274   :  { %v3965_v20 = vcvt.s32.f32 %v3453_v12  ;;  %4646 = vmatpush.bf16.msra.mxu0 %v4481_v30  ;;  %v4113_v25 = vcvt.s32.f32 %v3601_v31  ;;  %v3593_v40 = vunpack.c.0.s8 %v3249_v14  ;;  %v3597_v7 = vunpack.c.1.s8 %v3249_v14  ;;  %v6339_v31 = vld [vmem:[#allocation10 + $0x3e0] sm:$0xff] }
 0x275   :  { %v4117_v42 = vcvt.s32.f32 %v3605_v48  ;;  %4659 = vmatpush.bf16.msra.mxu1 %v4513_v52  ;;  %v4177_v32 = vcvt.s32.f32 %v3665_v28  ;;  %v4181_v9 = vcvt.s32.f32 %v3669_v47  ;;  %v3657_v11 = vunpack.c.0.s8 %v3265_v29 }
 0x276   :  { %v4401_v18 = vpack.c.bf16 %v3965_v20, %v3961_v45  ;;  %v3661_v57 = vunpack.c.1.s8 %v3265_v29  ;;  %v4109_v61 = vcvt.s32.f32 %v3597_v7  ;;  %v4429_v4 = vpack.c.bf16 %v4021_v55, %v4017_v38 }
 0x277   :  { %v4477_v39 = vpack.c.bf16 %v4117_v42, %v4113_v25  ;;  %v4509_v43 = vpack.c.bf16 %v4181_v9, %v4177_v32  ;;  %v4169_v10 = vcvt.s32.f32 %v3657_v11  ;;  %v3437_v14 = vunpack.c.1.s8 %v3209_v53  ;;  %v6345_v9 = vld [vmem:[#allocation8] sm:$0xff] }
 0x278   :  { %v2870_v54 = vpop.f32.mrf.mxu2  ;;  %4624 = vmatpush.bf16.msrb.mxu2 %v4401_v18  ;;  %v4173_v6 = vcvt.s32.f32 %v3661_v57  ;;  %v3501_v60 = vunpack.c.1.s8 %v3225_v50  ;;  %4638 = vmatpush.bf16.msrb.mxu3 %v4429_v4  ;;  %v3945_v29 = vcvt.s32.f32 %v3433_v24  ;;  %v4009_v20 = vcvt.s32.f32 %v3497_v46 }
 0x279   :  { %v2883_v0 = vpop.f32.mrf.mxu3  ;;  %4647 = vmatpush.bf16.msra.mxu0 %v4477_v39  ;;  %v4105_v54 = vcvt.s32.f32 %v3593_v40  ;;  %4660 = vmatpush.bf16.msra.mxu1 %v4509_v43  ;;  %v3949_v45 = vcvt.s32.f32 %v3437_v14  ;;  %v3653_v50 = vunpack.c.3.s8 %v6332_v41  ;;  %v3745_v52 = vunpack.c.2.s8 %v6334_v16 }
 0x27a   :  { %v6328_v0 = vld [vmem:[#allocation10 + $0x220] sm:$0xff]  ;;  %v4505_v63 = vpack.c.bf16 %v4173_v6, %v4169_v10  ;;  %v4013_v26 = vcvt.s32.f32 %v3501_v60  ;;  %v4161_v47 = vcvt.s32.f32 %v3649_v2  ;;  %v3809_v32 = vunpack.c.2.s8 %v6339_v31 }
 0x27b   :  { %v4473_v12 = vpack.c.bf16 %v4109_v61, %v4105_v54  ;;  %v3585_v30 = vunpack.c.2.s8 %v6328_v0  ;;  %v3589_v19 = vunpack.c.3.s8 %v6328_v0  ;;  %v4393_v18 = vpack.c.bf16 %v3949_v45, %v3945_v29  ;;  %v3297_v2 = vld [vmem:[#allocation10 + $0x3c0] sm:$0xff] }
 0x27c   :  { %4625 = vmatpush.bf16.msrb.mxu2 %v4397_v15  ;;  %v4425_v28 = vpack.c.bf16 %v4013_v26, %v4009_v20  ;;  %v4165_v42 = vcvt.s32.f32 %v3653_v50  ;;  %v4257_v56 = vcvt.s32.f32 %v3745_v52  ;;  %v3813_v37 = vunpack.c.3.s8 %v6339_v31 }
 0x27d   :  { %4648 = vmatpush.bf16.msra.mxu0 %v4473_v12  ;;  %4661 = vmatpush.bf16.msra.mxu1 %v4505_v63  ;;  %v4097_v53 = vcvt.s32.f32 %v3585_v30  ;;  %v4101_v48 = vcvt.s32.f32 %v3589_v19  ;;  %v4321_v5 = vcvt.s32.f32 %v3809_v32  ;;  %v6356_v40 = vmul.f32 %v2940_v22, %v6169_v34  ;;  %v3257_v12 = vld [vmem:[#allocation10 + $0x280] sm:$0xff] }
 0x27e   :  { %4639 = vmatpush.bf16.msrb.mxu3 %v4425_v28  ;;  %v4501_v39 = vpack.c.bf16 %v4165_v42, %v4161_v47  ;;  %v6361_v43 = vmul.f32 %v2943_v17, %v6275_v58  ;;  %v4549_v38 = vpack.c.bf16 %v4261_v49, %v4257_v56  ;;  %v4325_v7 = vcvt.s32.f32 %v3813_v37 }
 0x27f   :  { %v4469_v25 = vpack.c.bf16 %v4101_v48, %v4097_v53  ;;  %v3133_v33 = vperm.slane %v6345_v9, 4  ;;  %v3134_v27 = vperm.slane %v6345_v9, 5  ;;  %v6371_v34 = vmul.f32 %v2941_v35, %v6210_v21 }
 0x280   :  { %4626 = vmatpush.bf16.msrb.mxu2 %v4393_v18  ;;  %v6374_v22 = vmul.f32 %v2942_v1, %v6239_v44  ;;  %v4581_v8 = vpack.c.bf16 %v4325_v7, %v4321_v5  ;;  %v3129_v3 = vperm.slane %v6345_v9, 0  ;;  %v3130_v54 = vperm.slane %v6345_v9, 1  ;;  %v3241_v1 = vld [vmem:[#allocation10 + $0x200] sm:$0xff] }
 0x281   :  { %4649 = vmatpush.bf16.msra.mxu0 %v4469_v25  ;;  %4662 = vmatpush.bf16.msra.mxu1 %v4501_v39  ;;  %v3577_v11 = vunpack.c.0.s8 %v6328_v0  ;;  %v3581_v57 = vunpack.c.1.s8 %v6328_v0  ;;  %v3641_v15 = vunpack.c.0.s8 %v6332_v41  ;;  %v3645_v21 = vunpack.c.1.s8 %v6332_v41  ;;  %v3281_v41 = vld [vmem:[#allocation10 + $0x340] sm:$0xff] }
 0x282   :  { %4684 = vmatpush.bf16.msra.mxu3 %v4581_v8  ;;  %v3737_v44 = vunpack.c.0.s8 %v6334_v16  ;;  %v3801_v35 = vunpack.c.0.s8 %v6339_v31  ;;  %v3805_v46 = vunpack.c.1.s8 %v6339_v31  ;;  %v3569_v30 = vunpack.c.2.s8 %v3241_v1 }
 0x283   :  { %v4089_v4 = vcvt.s32.f32 %v3577_v11  ;;  %v4093_v10 = vcvt.s32.f32 %v3581_v57  ;;  %v4153_v6 = vcvt.s32.f32 %v3641_v15  ;;  %v4157_v24 = vcvt.s32.f32 %v3645_v21 }
 0x284   :  { %4671 = vmatpush.bf16.msra.mxu2 %v4549_v38  ;;  %v4249_v14 = vcvt.s32.f32 %v3737_v44  ;;  %v4313_v60 = vcvt.s32.f32 %v3801_v35  ;;  %v3573_v19 = vunpack.c.3.s8 %v3241_v1  ;;  %v3633_v20 = vunpack.c.2.s8 %v3257_v12  ;;  %v6389_v44 = vld [vmem:[#allocation10 + $0x68] sm:$0xff] }
 0x285   :  { %v4465_v63 = vpack.c.bf16 %v4093_v10, %v4089_v4  ;;  %v4497_v29 = vpack.c.bf16 %v4157_v24, %v4153_v6  ;;  %v3637_v26 = vunpack.c.3.s8 %v3257_v12  ;;  %v4081_v50 = vcvt.s32.f32 %v3569_v30 }
 0x286   :  { %v4085_v52 = vcvt.s32.f32 %v3573_v19  ;;  %v3729_v18 = vunpack.c.2.s8 %v3281_v41  ;;  %v3733_v28 = vunpack.c.3.s8 %v3281_v41  ;;  %v4145_v25 = vcvt.s32.f32 %v3633_v20 }
 0x287   :  { %4650 = vmatpush.bf16.msra.mxu0 %v4465_v63  ;;  %4663 = vmatpush.bf16.msra.mxu1 %v4497_v29  ;;  %v4149_v42 = vcvt.s32.f32 %v3637_v26  ;;  %v3793_v39 = vunpack.c.2.s8 %v3297_v2  ;;  %v3797_v7 = vunpack.c.3.s8 %v3297_v2  ;;  %v3565_v8 = vunpack.c.1.s8 %v3241_v1  ;;  %v6396_v26 = vld [vmem:[#allocation10 + $0x320] sm:$0xff] }
 0x288   :  { %v4461_v32 = vpack.c.bf16 %v4085_v52, %v4081_v50  ;;  %v4241_v49 = vcvt.s32.f32 %v3729_v18  ;;  %v4245_v37 = vcvt.s32.f32 %v3733_v28  ;;  %v3625_v11 = vunpack.c.0.s8 %v3257_v12 }
 0x289   :  { %v4493_v38 = vpack.c.bf16 %v4149_v42, %v4145_v25  ;;  %v4309_v57 = vcvt.s32.f32 %v3797_v7  ;;  %v3629_v21 = vunpack.c.1.s8 %v3257_v12  ;;  %v3725_v4 = vunpack.c.1.s8 %v3281_v41  ;;  %v6413_v42 = vld [vmem:[#allocation10 + $0x3a0] sm:$0xff] }
 0x28a   :  { %v4137_v35 = vcvt.s32.f32 %v3625_v11  ;;  %v3785_v10 = vunpack.c.0.s8 %v3297_v2  ;;  %v3362_v12 = vunpack.c.2.s8 %v6389_v44  ;;  %v3366_v20 = vunpack.c.3.s8 %v6389_v44 }
 0x28b   :  { %4651 = vmatpush.bf16.msra.mxu0 %v4461_v32  ;;  %4664 = vmatpush.bf16.msra.mxu1 %v4493_v38  ;;  %v4141_v24 = vcvt.s32.f32 %v3629_v21  ;;  %v4237_v29 = vcvt.s32.f32 %v3725_v4  ;;  %v3717_v25 = vunpack.c.3.s8 %v6396_v26  ;;  %v3777_v7 = vunpack.c.2.s8 %v6413_v42 }
 0x28c   :  { %v4297_v30 = vcvt.s32.f32 %v3785_v10  ;;  %v6399_v50 = vcvt.s32.f32 %v3362_v12  ;;  %v6404_v28 = vcvt.s32.f32 %v3366_v20  ;;  %v3186_v20 = vld [vmem:[#allocation10 + $0x48] sm:$0xff] }
 0x28f   :  { %v2894_v55 = vpop.f32.mrf.mxu0 }
 0x290   :  { %v2895_v58 = vadd.f32 %v2894_v55, %v6326_v23  ;;  %v2907_v17 = vpop.f32.mrf.mxu1  ;;  %v3741_v23 = vunpack.c.1.s8 %v6334_v16  ;;  %v4317_v16 = vcvt.s32.f32 %v3805_v46  ;;  %v3561_v55 = vunpack.c.0.s8 %v3241_v1  ;;  %v6391_v46 = vld [vmem:[#allocation10 + $0xe8] sm:$0xff] }
 0x291   :  { %v3426_v52 = vunpack.c.2.s8 %v6391_v46 }
 0x292   :  { %v2908_v61 = vadd.f32 %v2907_v17, %v2895_v58  ;;  %v4253_v0 = vcvt.s32.f32 %v3741_v23  ;;  %v4577_v36 = vpack.c.bf16 %v4317_v16, %v4313_v60  ;;  %v4541_v58 = vpack.c.bf16 %v4245_v37, %v4241_v49 }
 0x293   :  { %v4305_v17 = vcvt.s32.f32 %v3793_v39  ;;  %v4073_v15 = vcvt.s32.f32 %v3561_v55  ;;  %v4077_v23 = vcvt.s32.f32 %v3565_v8  ;;  %v4489_v16 = vpack.c.bf16 %v4141_v24, %v4137_v35 }
 0x294   :  { %v4545_v45 = vpack.c.bf16 %v4253_v0, %v4249_v14  ;;  %4685 = vmatpush.bf16.msra.mxu3 %v4577_v36  ;;  %v3789_v0 = vunpack.c.1.s8 %v3297_v2  ;;  %v3713_v36 = vunpack.c.2.s8 %v6396_v26  ;;  %v4229_v37 = vcvt.s32.f32 %v3717_v25 }
 0x295   :  { %v4573_v6 = vpack.c.bf16 %v4309_v57, %v4305_v17  ;;  %v4457_v63 = vpack.c.bf16 %v4077_v23, %v4073_v15  ;;  %4665 = vmatpush.bf16.msra.mxu1 %v4489_v16  ;;  %v3781_v55 = vunpack.c.3.s8 %v6413_v42  ;;  %v3354_v15 = vunpack.c.0.s8 %v6389_v44 }
 0x296   :  { %4672 = vmatpush.bf16.msra.mxu2 %v4545_v45  ;;  %v4289_v35 = vcvt.s32.f32 %v3777_v7  ;;  %v3709_v16 = vunpack.c.1.s8 %v6396_v26 }
 0x297   :  { %v2920_v53 = vpop.f32.mrf.mxu2  ;;  %v2896_v48 = vpop.f32.mrf.mxu0  ;;  %4652 = vmatpush.bf16.msra.mxu0 %v4457_v63  ;;  %v4293_v4 = vcvt.s32.f32 %v3781_v55  ;;  %v6430_v24 = vcvt.s32.f32 %v3354_v15 }
 0x298   :  { %v2921_v31 = vadd.f32 %v2920_v53, %v2908_v61  ;;  %v2909_v47 = vpop.f32.mrf.mxu1  ;;  %v3721_v61 = vunpack.c.0.s8 %v3281_v41  ;;  %4686 = vmatpush.bf16.msra.mxu3 %v4573_v6  ;;  %v4301_v41 = vcvt.s32.f32 %v3789_v0  ;;  %v3358_v6 = vunpack.c.1.s8 %v6389_v44 }
 0x299   :  { %v2933_v56 = vpop.f32.mrf.mxu3  ;;  %v3422_v0 = vunpack.c.1.s8 %v6391_v46  ;;  %v4565_v63 = vpack.c.bf16 %v4293_v4, %v4289_v35  ;;  %v3132_v44 = vperm.slane %v6345_v9, 3 }
 0x29a   :  { %v6387_v5 = vadd.f32 %v2933_v56, %v2921_v31  ;;  %4673 = vmatpush.bf16.msra.mxu2 %v4541_v58  ;;  %v4233_v14 = vcvt.s32.f32 %v3721_v61  ;;  %v4569_v18 = vpack.c.bf16 %v4301_v41, %v4297_v30  ;;  %v3430_v31 = vunpack.c.3.s8 %v6391_v46 }
 0x29b   :  { %v4358_v56 = vpack.c.bf16 %v6404_v28, %v6399_v50  ;;  %v6440_v12 = vcvt.s32.f32 %v3422_v0  ;;  %v3769_v41 = vunpack.c.0.s8 %v6413_v42  ;;  %v3338_v28 = vunpack.c.0.s8 %v3186_v20 }
 0x29c   :  { %v4537_v48 = vpack.c.bf16 %v4237_v29, %v4233_v14  ;;  %4687 = vmatpush.bf16.msra.mxu3 %v4569_v18  ;;  %v6417_v32 = vcvt.s32.f32 %v3430_v31  ;;  %v3418_v14 = vunpack.c.0.s8 %v6391_v46  ;;  %v3870_v29 = vcvt.s32.f32 %v3358_v6 }
 0x29d   :  { %v4221_v18 = vcvt.s32.f32 %v3709_v16  ;;  %v3773_v31 = vunpack.c.1.s8 %v6413_v42  ;;  %v6469_v16 = vld [vmem:[#allocation10 + $0x28] sm:$0xff] }
 0x29e   :  { %4674 = vmatpush.bf16.msra.mxu2 %v4537_v48  ;;  %v6438_v30 = vcvt.s32.f32 %v3418_v14  ;;  %v3342_v14 = vunpack.c.1.s8 %v3186_v20 }
 0x29f   :  { %v2922_v1 = vpop.f32.mrf.mxu2  ;;  %v3076_v60 = vpop.f32.mrf.mxu0  ;;  %v4285_v55 = vcvt.s32.f32 %v3773_v31 }
 0x2a0   :  { %v3123_v19 = vadd.f32 %v3076_v60, %v6361_v43  ;;  %v3089_v45 = vpop.f32.mrf.mxu1  ;;  %4688 = vmatpush.bf16.msra.mxu3 %v4565_v63 }
 0x2a1   :  { %v2935_v2 = vpop.f32.mrf.mxu3  ;;  %v3124_v53 = vadd.f32 %v3089_v45, %v6366_v51  ;;  %v6409_v51 = vcvt.s32.f32 %v3426_v52  ;;  %v4386_v45 = vpack.c.bf16 %v6440_v12, %v6438_v30  ;;  %v3854_v12 = vcvt.s32.f32 %v3342_v14 }
 0x2a2   :  { %v3149_v43 = vadd.f32 %v3133_v33, %v3123_v19  ;;  %v3202_v2 = vld [vmem:[#allocation10 + $0xc8] sm:$0xff] }
 0x2a3   :  { %v3150_v47 = vadd.f32 %v3134_v27, %v3124_v53  ;;  %v4225_v27 = vcvt.s32.f32 %v3713_v36  ;;  %v4390_v38 = vpack.c.bf16 %v6417_v32, %v6409_v51  ;;  %v3273_v36 = vld [vmem:[#allocation10 + $0x300] sm:$0xff]  ;;  %v3406_v63 = vunpack.c.1.s8 %v3202_v2 }
 0x2a4   :  { %vm3157_vm2 = vcmp.gt.f32.partialorder %v3149_v43, 0.0  ;;  %v3165_v33 = vmul.f32 0.2, %v3149_v43  ;;  %v3689_v51 = vunpack.c.0.s8 %v3273_v36  ;;  %v3693_v32 = vunpack.c.1.s8 %v3273_v36 }
 0x2a5   :  { %vm3158_vm3 = vcmp.gt.f32.partialorder %v3150_v47, 0.0  ;;  %v3166_v49 = vmul.f32 0.2, %v3150_v47  ;;  %v4533_v57 = vpack.c.bf16 %v4229_v37, %v4225_v27  ;;  %v6454_v27 = vld [vmem:[#allocation10 + $0x380] sm:$0xff] }
 0x2a6   :  { %v3173_v39 = vsel %vm3157_vm2, %v3149_v43, %v3165_v33  ;;  %v3346_v33 = vunpack.c.2.s8 %v3186_v20  ;;  %v3761_v35 = vunpack.c.2.s8 %v6454_v27  ;;  %v3765_v50 = vunpack.c.3.s8 %v6454_v27 }
 0x2a7   :  { %v6423_v58 = vpack.c.bf16 %v3173_v39, %v3173_v39  ;;  %v3174_v17 = vsel %vm3158_vm3, %v3150_v47, %v3166_v49  ;;  %v3024_v8 = vpop.f32.mrf.mxu2  ;;  %v3078_v11 = vpop.f32.mrf.mxu0  ;;  %4675 = vmatpush.bf16.msra.mxu2 %v4533_v57  ;;  %v4281_v47 = vcvt.s32.f32 %v3769_v41  ;;  %v3350_v49 = vunpack.c.3.s8 %v3186_v20 }
 0x2a8   :  { %v6426_v21 = vpack.c.bf16 %v3174_v17, %v3174_v17  ;;  %v3119_v61 = vadd.f32 %v3024_v8, %v6351_v13  ;;  %v3091_v23 = vpop.f32.mrf.mxu1  ;;  %v3131_v13 = vperm.slane %v6345_v9, 2  ;;  %v3414_v17 = vunpack.c.3.s8 %v3202_v2 }
 0x2a9   :  { %v3037_v10 = vpop.f32.mrf.mxu3  ;;  %v3858_v42 = vcvt.s32.f32 %v3346_v33  ;;  %v3862_v8 = vcvt.s32.f32 %v3350_v49  ;;  %v3697_v57 = vunpack.c.2.s8 %v3273_v36  ;;  %v4561_v15 = vpack.c.bf16 %v4285_v55, %v4281_v47 }
 0x2aa   :  { %v3145_v1 = vadd.f32 %v3129_v3, %v3119_v61  ;;  %v3120_v60 = vadd.f32 %v3037_v10, %v6356_v40  ;;  %v3705_v3 = vunpack.c.0.s8 %v6396_v26  ;;  %v4354_v40 = vpack.c.bf16 %v3870_v29, %v6430_v24 }
 0x2ab   :  { %v3410_v26 = vunpack.c.2.s8 %v3202_v2  ;;  %v3926_v61 = vcvt.s32.f32 %v3414_v17  ;;  %v3701_v23 = vunpack.c.3.s8 %v3273_v36  ;;  %v4350_v4 = vpack.c.bf16 %v3862_v8, %v3858_v42  ;;  %4689 = vmatpush.bf16.msra.mxu3 %v4561_v15 }
 0x2ac   :  { %vm3153_vm4 = vcmp.gt.f32.partialorder %v3145_v1, 0.0  ;;  %v3161_v19 = vmul.f32 0.2, %v3145_v1  ;;  %v3146_v46 = vadd.f32 %v3130_v54, %v3120_v60  ;;  %v4217_v52 = vcvt.s32.f32 %v3705_v3 }
 0x2ad   :  { %v3922_v11 = vcvt.s32.f32 %v3410_v26  ;;  %v4209_v10 = vcvt.s32.f32 %v3697_v57  ;;  %v4213_v6 = vcvt.s32.f32 %v3701_v23  ;;  %v4273_v24 = vcvt.s32.f32 %v3761_v35 }
 0x2ae   :  { %v3169_v53 = vsel %vm3153_vm4, %v3145_v1, %v3161_v19  ;;  %vm3154_vm5 = vcmp.gt.f32.partialorder %v3146_v46, 0.0  ;;  %v3162_v48 = vmul.f32 0.2, %v3146_v46  ;;  %v4529_v7 = vpack.c.bf16 %v4221_v18, %v4217_v52 }
 0x2af   :  { %v6451_v43 = vpack.c.bf16 %v3169_v53, %v3169_v53  ;;  %v3026_v54 = vpop.f32.mrf.mxu2  ;;  %v4277_v0 = vcvt.s32.f32 %v3765_v50  ;;  %v3850_v1 = vcvt.s32.f32 %v3338_v28  ;;  %v3402_v60 = vunpack.c.0.s8 %v3202_v2 }
 0x2b0   :  { %v3170_v25 = vsel %vm3154_vm5, %v3146_v46, %v3162_v48  ;;  %4676 = vmatpush.bf16.msra.mxu2 %v4529_v7  ;;  %v4525_v30 = vpack.c.bf16 %v4213_v6, %v4209_v10  ;;  %v3918_v3 = vcvt.s32.f32 %v3406_v63  ;;  %v4201_v20 = vcvt.s32.f32 %v3689_v51  ;;  %v3198_v54 = vld [vmem:[#allocation10 + $0xa8] sm:$0xff] }
 0x2b1   :  { %v6456_v37 = vpack.c.bf16 %v3170_v25, %v3170_v25  ;;  %v3039_v39 = vpop.f32.mrf.mxu3  ;;  %4601 = vmatmul.bf16.vlgmr.msrb.gmra.mxu0 %v6451_v43  ;;  %v4557_v19 = vpack.c.bf16 %v4277_v0, %v4273_v24  ;;  %v3914_v46 = vcvt.s32.f32 %v3402_v60  ;;  %v4205_v53 = vcvt.s32.f32 %v3693_v32  ;;  %v3238_v7 = vld [vmem:[#allocation10 + $0x1e8] sm:$0xff] }
 0x2b2   :  { %4697 = vmatpush.bf16.msrb.mxu0 %v4358_v56  ;;  %v4382_v56 = vpack.c.bf16 %v3926_v61, %v3922_v11  ;;  %v3753_v2 = vunpack.c.0.s8 %v6454_v27  ;;  %v3330_v47 = vunpack.c.2.s8 %v6469_v16  ;;  %v3334_v36 = vunpack.c.3.s8 %v6469_v16 }
 0x2b3   :  { %4614 = vmatmul.bf16.vlgmr.msrb.gmra.mxu1 %v6456_v37  ;;  %4690 = vmatpush.bf16.msra.mxu3 %v4557_v19  ;;  %v4521_v18 = vpack.c.bf16 %v4205_v53, %v4201_v20  ;;  %v3394_v26 = vunpack.c.2.s8 %v3198_v54  ;;  %v3398_v39 = vunpack.c.3.s8 %v3198_v54  ;;  %v3322_v6 = vunpack.c.0.s8 %v6469_v16 }
 0x2b4   :  { %4710 = vmatpush.bf16.msrb.mxu1 %v4390_v38  ;;  %4677 = vmatpush.bf16.msra.mxu2 %v4525_v30  ;;  %v4265_v31 = vcvt.s32.f32 %v3753_v2  ;;  %v3846_v49 = vcvt.s32.f32 %v3334_v36  ;;  %v3390_v30 = vunpack.c.1.s8 %v3198_v54  ;;  %v3550_v53 = vunpack.c.1.s8 %v3238_v7  ;;  %v3178_v2 = vld [vmem:[#allocation10 + $0x8] sm:$0xff] }
 0x2b5   :  { %v3906_v15 = vcvt.s32.f32 %v3394_v26  ;;  %v3834_v63 = vcvt.s32.f32 %v3322_v6  ;;  %v3318_v26 = vunpack.c.3.s8 %v3178_v2  ;;  %v3306_v6 = vunpack.c.0.s8 %v3178_v2 }
 0x2b6   :  { %4698 = vmatpush.bf16.msrb.mxu0 %v4354_v40  ;;  %v4346_v40 = vpack.c.bf16 %v3854_v12, %v3850_v1  ;;  %v3326_v1 = vunpack.c.1.s8 %v6469_v16  ;;  %v4062_v36 = vcvt.s32.f32 %v3550_v53 }
 0x2b7   :  { %v3050_v29 = vpop.f32.mrf.mxu2 }
 0x2b8   :  { %4711 = vmatpush.bf16.msrb.mxu1 %v4386_v45  ;;  %v3121_v38 = vadd.f32 %v3050_v29, %v6371_v34  ;;  %v4378_v34 = vpack.c.bf16 %v3918_v3, %v3914_v46  ;;  %v3757_v45 = vunpack.c.1.s8 %v6454_v27  ;;  %4678 = vmatpush.bf16.msra.mxu2 %v4521_v18  ;;  %v3222_v27 = vld [vmem:[#allocation10 + $0x168] sm:$0xff]  ;;  %v3386_v29 = vunpack.c.0.s8 %v3198_v54 }
 0x2b9   :  { %v3063_v41 = vpop.f32.mrf.mxu3  ;;  %v3490_v23 = vunpack.c.2.s8 %v3222_v27  ;;  %v3494_v35 = vunpack.c.3.s8 %v3222_v27  ;;  %v3838_v51 = vcvt.s32.f32 %v3326_v1  ;;  %v3482_v32 = vunpack.c.0.s8 %v3222_v27 }
 0x2ba   :  { %v3147_v48 = vadd.f32 %v3131_v13, %v3121_v38  ;;  %v3122_v52 = vadd.f32 %v3063_v41, %v6374_v22  ;;  %4699 = vmatpush.bf16.msrb.mxu0 %v4350_v4  ;;  %v4269_v13 = vcvt.s32.f32 %v3757_v45  ;;  %v3842_v22 = vcvt.s32.f32 %v3330_v47 }
 0x2bb   :  { %v3554_v4 = vunpack.c.2.s8 %v3238_v7  ;;  %v4002_v24 = vcvt.s32.f32 %v3490_v23  ;;  %v4006_v14 = vcvt.s32.f32 %v3494_v35  ;;  %v3486_v38 = vunpack.c.1.s8 %v3222_v27 }
 0x2bc   :  { %vm3155_vm6 = vcmp.gt.f32.partialorder %v3147_v48, 0.0  ;;  %v3163_v25 = vmul.f32 0.2, %v3147_v48  ;;  %v3148_v33 = vadd.f32 %v3132_v44, %v3122_v52  ;;  %4712 = vmatpush.bf16.msrb.mxu1 %v4382_v56  ;;  %v4553_v42 = vpack.c.bf16 %v4269_v13, %v4265_v31  ;;  %v6494_v31 = vld [vmem:[#allocation10 + $0x148] sm:$0xff] }
 0x2bd   :  { %v4342_v57 = vpack.c.bf16 %v3846_v49, %v3842_v22  ;;  %v3910_v44 = vcvt.s32.f32 %v3398_v39  ;;  %v3558_v56 = vunpack.c.3.s8 %v3238_v7  ;;  %v4066_v0 = vcvt.s32.f32 %v3554_v4 }
 0x2be   :  { %v3171_v55 = vsel %vm3155_vm6, %v3147_v48, %v3163_v25  ;;  %vm3156_vm7 = vcmp.gt.f32.partialorder %v3148_v33, 0.0  ;;  %v3164_v17 = vmul.f32 0.2, %v3148_v33  ;;  %4700 = vmatpush.bf16.msrb.mxu0 %v4346_v40  ;;  %4691 = vmatpush.bf16.msra.mxu3 %v4553_v42  ;;  %v4422_v12 = vpack.c.bf16 %v4006_v14, %v4002_v24  ;;  %v6490_v48 = vld [vmem:[#allocation10 + $0x88] sm:$0xff] }
 0x2bf   :  { %v6480_v8 = vpack.c.bf16 %v3171_v55, %v3171_v55  ;;  %v3052_v11 = vpop.f32.mrf.mxu2  ;;  %v4374_v28 = vpack.c.bf16 %v3910_v44, %v3906_v15  ;;  %v4070_v60 = vcvt.s32.f32 %v3558_v56  ;;  %v3898_v46 = vcvt.s32.f32 %v3386_v29  ;;  %v3234_v42 = vld [vmem:[#allocation10 + $0x1c8] sm:$0xff] }
 0x2c0   :  { %v3172_v61 = vsel %vm3156_vm7, %v3148_v33, %v3164_v17  ;;  %4713 = vmatpush.bf16.msrb.mxu1 %v4378_v34  ;;  %v3902_v3 = vcvt.s32.f32 %v3390_v30  ;;  %v3546_v41 = vunpack.c.0.s8 %v3238_v7  ;;  %v4338_v40 = vpack.c.bf16 %v3838_v51, %v3834_v63 }
 0x2c1   :  { %v6482_v10 = vpack.c.bf16 %v3172_v61, %v3172_v61  ;;  %v3065_v50 = vpop.f32.mrf.mxu3  ;;  %4627 = vmatmul.bf16.vlgmr.msrb.gmra.mxu2 %v6480_v8  ;;  %4653 = vmatmul.bf16.vlgmr.msra.gmra.mxu0 %v6423_v58  ;;  %v4454_v19 = vpack.c.bf16 %v4070_v60, %v4066_v0  ;;  %v3994_v16 = vcvt.s32.f32 %v3482_v32  ;;  %v3998_v20 = vcvt.s32.f32 %v3486_v38 }
 0x2c2   :  { %4701 = vmatpush.bf16.msrb.mxu0 %v4342_v57  ;;  %4723 = vmatpush.bf16.msrb.mxu2 %v4422_v12  ;;  %v4370_v52 = vpack.c.bf16 %v3902_v3, %v3898_v46  ;;  %v4058_v34 = vcvt.s32.f32 %v3546_v41  ;;  %v2945_v45 = vperm.slane %v6312_v59, 6  ;;  %v3135_v18 = vperm.slane %v6345_v9, 6 }
 0x2c3   :  { %4640 = vmatmul.bf16.vlgmr.msrb.gmra.mxu3 %v6482_v10  ;;  %4666 = vmatmul.bf16.vlgmr.msra.gmra.mxu1 %v6426_v21  ;;  %v4418_v47 = vpack.c.bf16 %v3998_v20, %v3994_v16  ;;  %v2946_v25 = vperm.slane %v6312_v59, 7  ;;  %v3136_v33 = vperm.slane %v6345_v9, 7  ;;  %v3314_v49 = vunpack.c.2.s8 %v3178_v2 }
 0x2c4   :  { %4714 = vmatpush.bf16.msrb.mxu1 %v4374_v28  ;;  %4736 = vmatpush.bf16.msrb.mxu3 %v4454_v19  ;;  %v2961_v13 = vmul.f32 %v2945_v45, %v6307_v62  ;;  %v3378_v39 = vunpack.c.2.s8 %v6490_v48  ;;  %v4450_v27 = vpack.c.bf16 %v4062_v36, %v4058_v34  ;;  %v3382_v55 = vunpack.c.3.s8 %v6490_v48 }
 0x2c5   :  { %v2962_v7 = vmul.f32 %v2946_v25, %v6387_v5  ;;  %v3474_v17 = vunpack.c.2.s8 %v6494_v31  ;;  %v3826_v11 = vcvt.s32.f32 %v3314_v49  ;;  %v3830_v9 = vcvt.s32.f32 %v3318_v26 }
 0x2c6   :  { %4702 = vmatpush.bf16.msrb.mxu0 %v4338_v40  ;;  %4724 = vmatpush.bf16.msrb.mxu2 %v4418_v47  ;;  %v3890_v57 = vcvt.s32.f32 %v3378_v39  ;;  %v3894_v15 = vcvt.s32.f32 %v3382_v55  ;;  %v3478_v44 = vunpack.c.3.s8 %v6494_v31  ;;  %v3538_v4 = vunpack.c.2.s8 %v3234_v42  ;;  %v3254_v40 = vld [vmem:[#allocation10 + $0x268] sm:$0xff] }
 0x2c7   :  { %v3102_v54 = vpop.f32.mrf.mxu2  ;;  %v3986_v61 = vcvt.s32.f32 %v3474_v17  ;;  %v4334_v35 = vpack.c.bf16 %v3830_v9, %v3826_v11  ;;  %v3542_v50 = vunpack.c.3.s8 %v3234_v42  ;;  %v3310_v29 = vunpack.c.1.s8 %v3178_v2 }
 0x2c8   :  { %4715 = vmatpush.bf16.msrb.mxu1 %v4370_v52  ;;  %v3125_v59 = vadd.f32 %v3102_v54, %v2961_v13  ;;  %4737 = vmatpush.bf16.msrb.mxu3 %v4450_v27  ;;  %v4366_v28 = vpack.c.bf16 %v3894_v15, %v3890_v57  ;;  %v3990_v56 = vcvt.s32.f32 %v3478_v44  ;;  %v4050_v14 = vcvt.s32.f32 %v3538_v4  ;;  %v3270_v52 = vld [vmem:[#allocation10 + $0x2e8] sm:$0xff] }
 0x2c9   :  { %v3115_v22 = vpop.f32.mrf.mxu3  ;;  %v4054_v0 = vcvt.s32.f32 %v3542_v50  ;;  %v3818_v51 = vcvt.s32.f32 %v3306_v6  ;;  %v3370_v32 = vunpack.c.0.s8 %v6490_v48  ;;  %v3822_v3 = vcvt.s32.f32 %v3310_v29 }
 0x2ca   :  { %v3126_v62 = vadd.f32 %v3115_v22, %v2962_v7  ;;  %v3151_v23 = vadd.f32 %v3135_v18, %v3125_v59  ;;  %4703 = vmatpush.bf16.msrb.mxu0 %v4334_v35  ;;  %v4414_v63 = vpack.c.bf16 %v3990_v56, %v3986_v61  ;;  %v3374_v41 = vunpack.c.1.s8 %v6490_v48 }
 0x2cb   :  { %v4446_v12 = vpack.c.bf16 %v4054_v0, %v4050_v14  ;;  %v3882_v20 = vcvt.s32.f32 %v3370_v32  ;;  %v3466_v53 = vunpack.c.0.s8 %v6494_v31  ;;  %v3470_v2 = vunpack.c.1.s8 %v6494_v31  ;;  %v3230_v31 = vld [vmem:[#allocation10 + $0x1a8] sm:$0xff] }
 0x2cc   :  { %v3152_v5 = vadd.f32 %v3136_v33, %v3126_v62  ;;  %vm3159_vm8 = vcmp.gt.f32.partialorder %v3151_v23, 0.0  ;;  %v3167_v24 = vmul.f32 0.2, %v3151_v23  ;;  %4716 = vmatpush.bf16.msrb.mxu1 %v4366_v28  ;;  %4725 = vmatpush.bf16.msrb.mxu2 %v4414_v63  ;;  %v4330_v34 = vpack.c.bf16 %v3822_v3, %v3818_v51  ;;  %v3214_v33 = vld [vmem:[#allocation10 + $0x128] sm:$0xff] }
 0x2cd   :  { %4738 = vmatpush.bf16.msrb.mxu3 %v4446_v12  ;;  %v3886_v45 = vcvt.s32.f32 %v3374_v41  ;;  %v3530_v54 = vunpack.c.0.s8 %v3234_v42  ;;  %v3534_v18 = vunpack.c.1.s8 %v3234_v42  ;;  %v3978_v47 = vcvt.s32.f32 %v3466_v53  ;;  %v3250_v0 = vld [vmem:[#allocation10 + $0x248] sm:$0xff] }
 0x2ce   :  { %vm3160_vm9 = vcmp.gt.f32.partialorder %v3152_v5, 0.0  ;;  %v3168_v60 = vmul.f32 0.2, %v3152_v5  ;;  %v3175_v30 = vsel %vm3159_vm8, %v3151_v23, %v3167_v24  ;;  %v3982_v36 = vcvt.s32.f32 %v3470_v2  ;;  %4704 = vmatpush.bf16.msrb.mxu0 %v4330_v34 }
 0x2cf   :  { %v3104_v1 = vpop.f32.mrf.mxu2  ;;  %v6505_v19 = vpack.c.bf16 %v3175_v30, %v3175_v30  ;;  %v3618_v25 = vunpack.c.2.s8 %v3254_v40  ;;  %v3622_v48 = vunpack.c.3.s8 %v3254_v40  ;;  %v4362_v13 = vpack.c.bf16 %v3886_v45, %v3882_v20  ;;  %v3266_v30 = vld [vmem:[#allocation10 + $0x2c8] sm:$0xff] }
 0x2d0   :  { %v3176_v46 = vsel %vm3160_vm9, %v3152_v5, %v3168_v60  ;;  %v4042_v22 = vcvt.s32.f32 %v3530_v54  ;;  %v4046_v49 = vcvt.s32.f32 %v3534_v18  ;;  %v3682_v26 = vunpack.c.2.s8 %v3270_v52  ;;  %v3210_v20 = vld [vmem:[#allocation10 + $0x108] sm:$0xff] }
 0x2d1   :  { %v3117_v38 = vpop.f32.mrf.mxu3  ;;  %v6508_v16 = vpack.c.bf16 %v3176_v46, %v3176_v46  ;;  %4679 = vmatmul.bf16.vlgmr.msra.gmra.mxu2 %v6505_v19  ;;  %v4410_v39 = vpack.c.bf16 %v3982_v36, %v3978_v47  ;;  %v4130_v27 = vcvt.s32.f32 %v3618_v25  ;;  %v4134_v7 = vcvt.s32.f32 %v3622_v48  ;;  %4717 = vmatpush.bf16.msrb.mxu1 %v4362_v13  ;;  %v3226_v45 = vld [vmem:[#allocation10 + $0x188] sm:$0xff] }
 0x2d2   :  { %v3686_v55 = vunpack.c.3.s8 %v3270_v52  ;;  %v4442_v17 = vpack.c.bf16 %v4046_v49, %v4042_v22  ;;  %v4194_v42 = vcvt.s32.f32 %v3682_v26  ;;  %v3458_v59 = vunpack.c.2.s8 %v3214_v33  ;;  %4705 = vmatmul.bf16.vlgmr.msrb.gmra.mxu0 %v6451_v43 }
 0x2d3   :  { %4692 = vmatmul.bf16.vlgmr.msra.gmra.mxu3 %v6508_v16  ;;  %v3462_v11 = vunpack.c.3.s8 %v3214_v33  ;;  %4726 = vmatpush.bf16.msrb.mxu2 %v4410_v39  ;;  %v4486_v9 = vpack.c.bf16 %v4134_v7, %v4130_v27  ;;  %v3522_v62 = vunpack.c.2.s8 %v3230_v31  ;;  %v3526_v15 = vunpack.c.3.s8 %v3230_v31 }
 0x2d4   :  { %v4198_v57 = vcvt.s32.f32 %v3686_v55  ;;  %4739 = vmatpush.bf16.msrb.mxu3 %v4442_v17  ;;  %v3970_v44 = vcvt.s32.f32 %v3458_v59  ;;  %v3610_v23 = vunpack.c.0.s8 %v3254_v40  ;;  %v3614_v35 = vunpack.c.1.s8 %v3254_v40  ;;  %4718 = vmatmul.bf16.vlgmr.msrb.gmra.mxu1 %v6456_v37 }
 0x2d5   :  { %v3974_v61 = vcvt.s32.f32 %v3462_v11  ;;  %4749 = vmatpush.bf16.msra.mxu0 %v4486_v9  ;;  %v4034_v50 = vcvt.s32.f32 %v3522_v62  ;;  %v4038_v5 = vcvt.s32.f32 %v3526_v15  ;;  %v3674_v28 = vunpack.c.0.s8 %v3270_v52 }
 0x2d6   :  { %v4518_v4 = vpack.c.bf16 %v4198_v57, %v4194_v42  ;;  %v4122_v6 = vcvt.s32.f32 %v3610_v23  ;;  %v4126_v24 = vcvt.s32.f32 %v3614_v35  ;;  %v3678_v14 = vunpack.c.1.s8 %v3270_v52 }
 0x2d7   :  { %v4406_v56 = vpack.c.bf16 %v3974_v61, %v3970_v44  ;;  %v4438_v1 = vpack.c.bf16 %v4038_v5, %v4034_v50  ;;  %v4186_v60 = vcvt.s32.f32 %v3674_v28  ;;  %v3450_v63 = vunpack.c.0.s8 %v3214_v33  ;;  %v3246_v44 = vld [vmem:[#allocation10 + $0x228] sm:$0xff] }
 0x2d8   :  { %4762 = vmatpush.bf16.msra.mxu1 %v4518_v4  ;;  %v3454_v29 = vunpack.c.1.s8 %v3214_v33  ;;  %v4482_v12 = vpack.c.bf16 %v4126_v24, %v4122_v6  ;;  %v4190_v51 = vcvt.s32.f32 %v3678_v14  ;;  %v3514_v32 = vunpack.c.0.s8 %v3230_v31  ;;  %v3262_v50 = vld [vmem:[#allocation10 + $0x2a8] sm:$0xff] }
 0x2d9   :  { %4727 = vmatpush.bf16.msrb.mxu2 %v4406_v56  ;;  %v3518_v38 = vunpack.c.1.s8 %v3230_v31  ;;  %4740 = vmatpush.bf16.msrb.mxu3 %v4438_v1  ;;  %v3962_v46 = vcvt.s32.f32 %v3450_v63  ;;  %v3602_v41 = vunpack.c.2.s8 %v3250_v0  ;;  %v3606_v40 = vunpack.c.3.s8 %v3250_v0 }
 0x2da   :  { %v3966_v3 = vcvt.s32.f32 %v3454_v29  ;;  %4750 = vmatpush.bf16.msra.mxu0 %v4482_v12  ;;  %v4514_v53 = vpack.c.bf16 %v4190_v51, %v4186_v60  ;;  %v4026_v2 = vcvt.s32.f32 %v3514_v32  ;;  %v3666_v34 = vunpack.c.2.s8 %v3266_v30  ;;  %v3286_v60 = vld [vmem:[#allocation10 + $0x368] sm:$0xff] }
 0x2db   :  { %v4030_v52 = vcvt.s32.f32 %v3518_v38  ;;  %v4114_v18 = vcvt.s32.f32 %v3602_v41  ;;  %v4118_v47 = vcvt.s32.f32 %v3606_v40  ;;  %v3670_v36 = vunpack.c.3.s8 %v3266_v30  ;;  %v3302_v51 = vld [vmem:[#allocation10 + $0x3e8] sm:$0xff] }
 0x2dc   :  { %v4402_v54 = vpack.c.bf16 %v3966_v3, %v3962_v46  ;;  %4763 = vmatpush.bf16.msra.mxu1 %v4514_v53  ;;  %v4178_v48 = vcvt.s32.f32 %v3666_v34  ;;  %v3442_v33 = vunpack.c.2.s8 %v3210_v20  ;;  %v3446_v13 = vunpack.c.3.s8 %v3210_v20 }
 0x2dd   :  { %v4434_v25 = vpack.c.bf16 %v4030_v52, %v4026_v2  ;;  %v4478_v22 = vpack.c.bf16 %v4118_v47, %v4114_v18  ;;  %v4182_v49 = vcvt.s32.f32 %v3670_v36  ;;  %v3506_v26 = vunpack.c.2.s8 %v3226_v45 }
 0x2de   :  { %4728 = vmatpush.bf16.msrb.mxu2 %v4402_v54  ;;  %v3510_v31 = vunpack.c.3.s8 %v3226_v45  ;;  %v3954_v39 = vcvt.s32.f32 %v3442_v33  ;;  %v3958_v27 = vcvt.s32.f32 %v3446_v13  ;;  %v3594_v7 = vunpack.c.0.s8 %v3250_v0 }
 0x2df   :  { %4741 = vmatpush.bf16.msrb.mxu3 %v4434_v25  ;;  %v3598_v55 = vunpack.c.1.s8 %v3250_v0  ;;  %4751 = vmatpush.bf16.msra.mxu0 %v4478_v22  ;;  %v4510_v17 = vpack.c.bf16 %v4182_v49, %v4178_v48  ;;  %v4018_v42 = vcvt.s32.f32 %v3506_v26  ;;  %v3658_v11 = vunpack.c.0.s8 %v3266_v30 }
 0x2e0   :  { %v4022_v59 = vcvt.s32.f32 %v3510_v31  ;;  %v4398_v9 = vpack.c.bf16 %v3958_v27, %v3954_v39  ;;  %v4106_v57 = vcvt.s32.f32 %v3594_v7  ;;  %v3662_v15 = vunpack.c.1.s8 %v3266_v30  ;;  %v3242_v39 = vld [vmem:[#allocation10 + $0x208] sm:$0xff] }
 0x2e1   :  { %v4110_v62 = vcvt.s32.f32 %v3598_v55  ;;  %4764 = vmatpush.bf16.msra.mxu1 %v4510_v17  ;;  %v4170_v23 = vcvt.s32.f32 %v3658_v11  ;;  %v3434_v35 = vunpack.c.0.s8 %v3210_v20  ;;  %v3438_v4 = vunpack.c.1.s8 %v3210_v20 }
 0x2e2   :  { %v4430_v61 = vpack.c.bf16 %v4022_v59, %v4018_v42  ;;  %4729 = vmatpush.bf16.msrb.mxu2 %v4398_v9  ;;  %v4174_v28 = vcvt.s32.f32 %v3662_v15  ;;  %v3498_v56 = vunpack.c.0.s8 %v3226_v45  ;;  %v3502_v6 = vunpack.c.1.s8 %v3226_v45  ;;  %v3258_v42 = vld [vmem:[#allocation10 + $0x288] sm:$0xff] }
 0x2e3   :  { %v4474_v5 = vpack.c.bf16 %v4110_v62, %v4106_v57  ;;  %v3946_v24 = vcvt.s32.f32 %v3434_v35  ;;  %v3950_v14 = vcvt.s32.f32 %v3438_v4  ;;  %v3586_v0 = vunpack.c.2.s8 %v3246_v44 }
 0x2e4   :  { %4742 = vmatpush.bf16.msrb.mxu3 %v4430_v61  ;;  %v3590_v1 = vunpack.c.3.s8 %v3246_v44  ;;  %v4506_v63 = vpack.c.bf16 %v4174_v28, %v4170_v23  ;;  %v4010_v29 = vcvt.s32.f32 %v3498_v56  ;;  %v4014_v30 = vcvt.s32.f32 %v3502_v6  ;;  %v3282_v23 = vld [vmem:[#allocation10 + $0x348] sm:$0xff] }
 0x2e5   :  { %4752 = vmatpush.bf16.msra.mxu0 %v4474_v5  ;;  %v3650_v12 = vunpack.c.2.s8 %v3262_v50  ;;  %v4394_v32 = vpack.c.bf16 %v3950_v14, %v3946_v24  ;;  %v4098_v38 = vcvt.s32.f32 %v3586_v0  ;;  %v3654_v3 = vunpack.c.3.s8 %v3262_v50  ;;  %v3298_v28 = vld [vmem:[#allocation10 + $0x3c8] sm:$0xff] }
 0x2e6   :  { %v4102_v46 = vcvt.s32.f32 %v3590_v1  ;;  %4765 = vmatpush.bf16.msra.mxu1 %v4506_v63  ;;  %v4426_v41 = vpack.c.bf16 %v4014_v30, %v4010_v29  ;;  %v3746_v20 = vunpack.c.2.s8 %v3286_v60  ;;  %v3750_v53 = vunpack.c.3.s8 %v3286_v60 }
 0x2e7   :  { %v4162_v40 = vcvt.s32.f32 %v3650_v12  ;;  %4730 = vmatpush.bf16.msrb.mxu2 %v4394_v32  ;;  %v4166_v52 = vcvt.s32.f32 %v3654_v3  ;;  %v3810_v34 = vunpack.c.2.s8 %v3302_v51  ;;  %v3814_v45 = vunpack.c.3.s8 %v3302_v51 }
 0x2e8   :  { %v4470_v2 = vpack.c.bf16 %v4102_v46, %v4098_v38  ;;  %4743 = vmatpush.bf16.msrb.mxu3 %v4426_v41  ;;  %v4258_v54 = vcvt.s32.f32 %v3746_v20  ;;  %v4262_v18 = vcvt.s32.f32 %v3750_v53  ;;  %v3578_v47 = vunpack.c.0.s8 %v3246_v44 }
 0x2e9   :  { %v3582_v36 = vunpack.c.1.s8 %v3246_v44  ;;  %v4502_v25 = vpack.c.bf16 %v4166_v52, %v4162_v40  ;;  %v4322_v48 = vcvt.s32.f32 %v3810_v34  ;;  %v4326_v33 = vcvt.s32.f32 %v3814_v45 }
 0x2ea   :  { %4753 = vmatpush.bf16.msra.mxu0 %v4470_v2  ;;  %v3642_v13 = vunpack.c.0.s8 %v3262_v50  ;;  %v4550_v22 = vpack.c.bf16 %v4262_v18, %v4258_v54  ;;  %4731 = vmatmul.bf16.vlgmr.msrb.gmra.mxu2 %v6480_v8  ;;  %v4090_v49 = vcvt.s32.f32 %v3578_v47  ;;  %v3646_v31 = vunpack.c.1.s8 %v3262_v50  ;;  %v3191_v54 = vld [vmem:[#allocation10 + $0x70] sm:$0xff] }
 0x2eb   :  { %v4094_v26 = vcvt.s32.f32 %v3582_v36  ;;  %4766 = vmatpush.bf16.msra.mxu1 %v4502_v25  ;;  %v4582_v27 = vpack.c.bf16 %v4326_v33, %v4322_v48  ;;  %4744 = vmatmul.bf16.vlgmr.msrb.gmra.mxu3 %v6482_v10  ;;  %v3738_v55 = vunpack.c.0.s8 %v3286_v60  ;;  %v3742_v17 = vunpack.c.1.s8 %v3286_v60  ;;  %v3207_v48 = vld [vmem:[#allocation10 + $0xf0] sm:$0xff] }
 0x2ec   :  { %v4154_v7 = vcvt.s32.f32 %v3642_v13  ;;  %4775 = vmatpush.bf16.msra.mxu2 %v4550_v22  ;;  %v4158_v11 = vcvt.s32.f32 %v3646_v31  ;;  %v3802_v9 = vunpack.c.0.s8 %v3302_v51  ;;  %v3806_v57 = vunpack.c.1.s8 %v3302_v51 }
 0x2ed   :  { %v4466_v59 = vpack.c.bf16 %v4094_v26, %v4090_v49  ;;  %4788 = vmatpush.bf16.msra.mxu3 %v4582_v27  ;;  %v4250_v62 = vcvt.s32.f32 %v3738_v55  ;;  %v4254_v15 = vcvt.s32.f32 %v3742_v17  ;;  %v3570_v44 = vunpack.c.2.s8 %v3242_v39 }
 0x2ee   :  { %v3574_v61 = vunpack.c.3.s8 %v3242_v39  ;;  %v4498_v35 = vpack.c.bf16 %v4158_v11, %v4154_v7  ;;  %v4314_v4 = vcvt.s32.f32 %v3802_v9  ;;  %v4318_v50 = vcvt.s32.f32 %v3806_v57  ;;  %v3278_v7 = vld [vmem:[#allocation10 + $0x328] sm:$0xff] }
 0x2ef   :  { %4754 = vmatpush.bf16.msra.mxu0 %v4466_v59  ;;  %v3634_v5 = vunpack.c.2.s8 %v3258_v42  ;;  %v4546_v56 = vpack.c.bf16 %v4254_v15, %v4250_v62  ;;  %v4082_v6 = vcvt.s32.f32 %v3570_v44  ;;  %v3638_v14 = vunpack.c.3.s8 %v3258_v42  ;;  %v3294_v11 = vld [vmem:[#allocation10 + $0x3a8] sm:$0xff] }
 0x2f0   :  { %v4086_v24 = vcvt.s32.f32 %v3574_v61  ;;  %4767 = vmatpush.bf16.msra.mxu1 %v4498_v35  ;;  %v4578_v0 = vpack.c.bf16 %v4318_v50, %v4314_v4  ;;  %v3730_v60 = vunpack.c.2.s8 %v3282_v23  ;;  %v3734_v63 = vunpack.c.3.s8 %v3282_v23 }
 0x2f1   :  { %v4146_v1 = vcvt.s32.f32 %v3634_v5  ;;  %4776 = vmatpush.bf16.msra.mxu2 %v4546_v56  ;;  %v4150_v30 = vcvt.s32.f32 %v3638_v14  ;;  %v3794_v12 = vunpack.c.2.s8 %v3298_v28  ;;  %v3798_v51 = vunpack.c.3.s8 %v3298_v28 }
 0x2f2   :  { %v4462_v29 = vpack.c.bf16 %v4086_v24, %v4082_v6  ;;  %4789 = vmatpush.bf16.msra.mxu3 %v4578_v0  ;;  %v4242_v32 = vcvt.s32.f32 %v3730_v60  ;;  %v4246_v38 = vcvt.s32.f32 %v3734_v63  ;;  %v3562_v46 = vunpack.c.0.s8 %v3242_v39 }
 0x2f3   :  { %v3566_v3 = vunpack.c.1.s8 %v3242_v39  ;;  %v4494_v41 = vpack.c.bf16 %v4150_v30, %v4146_v1  ;;  %v4306_v40 = vcvt.s32.f32 %v3794_v12  ;;  %v4310_v20 = vcvt.s32.f32 %v3798_v51 }
 0x2f4   :  { %4755 = vmatpush.bf16.msra.mxu0 %v4462_v29  ;;  %v3626_v53 = vunpack.c.0.s8 %v3258_v42  ;;  %v4542_v2 = vpack.c.bf16 %v4246_v38, %v4242_v32  ;;  %v4074_v52 = vcvt.s32.f32 %v3562_v46  ;;  %v3630_v45 = vunpack.c.1.s8 %v3258_v42  ;;  %v3187_v32 = vld [vmem:[#allocation10 + $0x50] sm:$0xff] }
 0x2f5   :  { %v4078_v34 = vcvt.s32.f32 %v3566_v3  ;;  %4768 = vmatpush.bf16.msra.mxu1 %v4494_v41  ;;  %v4574_v18 = vpack.c.bf16 %v4310_v20, %v4306_v40  ;;  %v3722_v36 = vunpack.c.0.s8 %v3282_v23  ;;  %v3726_v25 = vunpack.c.1.s8 %v3282_v23  ;;  %v3203_v40 = vld [vmem:[#allocation10 + $0xd0] sm:$0xff] }
 0x2f6   :  { %v4138_v47 = vcvt.s32.f32 %v3626_v53  ;;  %4777 = vmatpush.bf16.msra.mxu2 %v4542_v2  ;;  %v4142_v13 = vcvt.s32.f32 %v3630_v45  ;;  %v3786_v22 = vunpack.c.0.s8 %v3298_v28  ;;  %v3790_v49 = vunpack.c.1.s8 %v3298_v28 }
 0x2f7   :  { %v4458_v33 = vpack.c.bf16 %v4078_v34, %v4074_v52  ;;  %4790 = vmatpush.bf16.msra.mxu3 %v4574_v18  ;;  %v4234_v26 = vcvt.s32.f32 %v3722_v36  ;;  %v4238_v31 = vcvt.s32.f32 %v3726_v25  ;;  %v3363_v39 = vunpack.c.2.s8 %v3191_v54 }
 0x2f8   :  { %v3367_v27 = vunpack.c.3.s8 %v3191_v54  ;;  %v4490_v55 = vpack.c.bf16 %v4142_v13, %v4138_v47  ;;  %v4298_v17 = vcvt.s32.f32 %v3786_v22  ;;  %v4302_v42 = vcvt.s32.f32 %v3790_v49  ;;  %v3274_v47 = vld [vmem:[#allocation10 + $0x308] sm:$0xff] }
 0x2f9   :  { %4756 = vmatpush.bf16.msra.mxu0 %v4458_v33  ;;  %v3427_v59 = vunpack.c.2.s8 %v3207_v48  ;;  %v4538_v9 = vpack.c.bf16 %v4238_v31, %v4234_v26  ;;  %v3875_v57 = vcvt.s32.f32 %v3363_v39  ;;  %v3431_v15 = vunpack.c.3.s8 %v3207_v48  ;;  %v3290_v13 = vld [vmem:[#allocation10 + $0x388] sm:$0xff] }
 0x2fa   :  { %v3879_v62 = vcvt.s32.f32 %v3367_v27  ;;  %4769 = vmatpush.bf16.msra.mxu1 %v4490_v55  ;;  %v4570_v44 = vpack.c.bf16 %v4302_v42, %v4298_v17  ;;  %v3714_v23 = vunpack.c.2.s8 %v3278_v7  ;;  %v3718_v35 = vunpack.c.3.s8 %v3278_v7 }
 0x2fb   :  { %v3939_v61 = vcvt.s32.f32 %v3427_v59  ;;  %4778 = vmatpush.bf16.msra.mxu2 %v4538_v9  ;;  %v3943_v50 = vcvt.s32.f32 %v3431_v15  ;;  %v3778_v5 = vunpack.c.2.s8 %v3294_v11  ;;  %v3782_v28 = vunpack.c.3.s8 %v3294_v11 }
 0x2fc   :  { %v4359_v4 = vpack.c.bf16 %v3879_v62, %v3875_v57  ;;  %4757 = vmatmul.bf16.vlgmr.msra.gmra.mxu0 %v6423_v58  ;;  %4791 = vmatpush.bf16.msra.mxu3 %v4570_v44  ;;  %v4226_v56 = vcvt.s32.f32 %v3714_v23  ;;  %v4230_v6 = vcvt.s32.f32 %v3718_v35  ;;  %v3355_v24 = vunpack.c.0.s8 %v3191_v54 }
 0x2fd   :  { %v3359_v14 = vunpack.c.1.s8 %v3191_v54  ;;  %v4391_v0 = vpack.c.bf16 %v3943_v50, %v3939_v61  ;;  %4770 = vmatmul.bf16.vlgmr.msra.gmra.mxu1 %v6426_v21  ;;  %v4290_v1 = vcvt.s32.f32 %v3778_v5  ;;  %v4294_v60 = vcvt.s32.f32 %v3782_v28 }
 0x2fe   :  { %4801 = vmatpush.bf16.msrb.mxu0 %v4359_v4  ;;  %v3419_v63 = vunpack.c.0.s8 %v3207_v48  ;;  %v4534_v29 = vpack.c.bf16 %v4230_v6, %v4226_v56  ;;  %v3867_v30 = vcvt.s32.f32 %v3355_v24  ;;  %v3423_v51 = vunpack.c.1.s8 %v3207_v48  ;;  %v3183_v56 = vld [vmem:[#allocation10 + $0x30] sm:$0xff] }
 0x2ff   :  { %v3871_v12 = vcvt.s32.f32 %v3359_v14  ;;  %4814 = vmatpush.bf16.msrb.mxu1 %v4391_v0  ;;  %v4566_v38 = vpack.c.bf16 %v4294_v60, %v4290_v1  ;;  %v3706_v3 = vunpack.c.0.s8 %v3278_v7  ;;  %v3710_v41 = vunpack.c.1.s8 %v3278_v7  ;;  %v3199_v1 = vld [vmem:[#allocation10 + $0xb0] sm:$0xff] }
 0x300   :  { %v3931_v46 = vcvt.s32.f32 %v3419_v63  ;;  %4779 = vmatpush.bf16.msra.mxu2 %v4534_v29  ;;  %v3935_v53 = vcvt.s32.f32 %v3423_v51  ;;  %v3770_v2 = vunpack.c.0.s8 %v3294_v11  ;;  %v3774_v52 = vunpack.c.1.s8 %v3294_v11 }
 0x301   :  { %v4355_v20 = vpack.c.bf16 %v3871_v12, %v3867_v30  ;;  %4792 = vmatpush.bf16.msra.mxu3 %v4566_v38  ;;  %v4218_v34 = vcvt.s32.f32 %v3706_v3  ;;  %v4222_v45 = vcvt.s32.f32 %v3710_v41  ;;  %v3347_v54 = vunpack.c.2.s8 %v3187_v32 }
 0x302   :  { %v3351_v18 = vunpack.c.3.s8 %v3187_v32  ;;  %v4387_v36 = vpack.c.bf16 %v3935_v53, %v3931_v46  ;;  %v4282_v25 = vcvt.s32.f32 %v3770_v2  ;;  %v4286_v48 = vcvt.s32.f32 %v3774_v52  ;;  %v3223_v46 = vld [vmem:[#allocation10 + $0x170] sm:$0xff] }
 0x303   :  { %4802 = vmatpush.bf16.msrb.mxu0 %v4355_v20  ;;  %v3411_v33 = vunpack.c.2.s8 %v3203_v40  ;;  %v4530_v22 = vpack.c.bf16 %v4222_v45, %v4218_v34  ;;  %v3859_v49 = vcvt.s32.f32 %v3347_v54  ;;  %v3415_v31 = vunpack.c.3.s8 %v3203_v40  ;;  %v3239_v53 = vld [vmem:[#allocation10 + $0x1f0] sm:$0xff] }
 0x304   :  { %v3863_v26 = vcvt.s32.f32 %v3351_v18  ;;  %4815 = vmatpush.bf16.msrb.mxu1 %v4387_v36  ;;  %v4562_v39 = vpack.c.bf16 %v4286_v48, %v4282_v25  ;;  %v3698_v7 = vunpack.c.2.s8 %v3274_v47  ;;  %v3702_v55 = vunpack.c.3.s8 %v3274_v47 }
 0x305   :  { %v3923_v27 = vcvt.s32.f32 %v3411_v33  ;;  %4780 = vmatpush.bf16.msra.mxu2 %v4530_v22  ;;  %v3927_v42 = vcvt.s32.f32 %v3415_v31  ;;  %v3762_v59 = vunpack.c.2.s8 %v3290_v13  ;;  %v3766_v11 = vunpack.c.3.s8 %v3290_v13 }
 0x306   :  { %v4351_v17 = vpack.c.bf16 %v3863_v26, %v3859_v49  ;;  %4793 = vmatpush.bf16.msra.mxu3 %v4562_v39  ;;  %v4210_v9 = vcvt.s32.f32 %v3698_v7  ;;  %v4214_v57 = vcvt.s32.f32 %v3702_v55  ;;  %v3339_v62 = vunpack.c.0.s8 %v3187_v32 }
 0x307   :  { %v3343_v15 = vunpack.c.1.s8 %v3187_v32  ;;  %v4383_v44 = vpack.c.bf16 %v3927_v42, %v3923_v27  ;;  %v4274_v61 = vcvt.s32.f32 %v3762_v59  ;;  %v4278_v23 = vcvt.s32.f32 %v3766_v11 }
 0x308   :  { %4803 = vmatpush.bf16.msrb.mxu0 %v4351_v17  ;;  %v3403_v35 = vunpack.c.0.s8 %v3203_v40  ;;  %v4526_v4 = vpack.c.bf16 %v4214_v57, %v4210_v9  ;;  %v3851_v50 = vcvt.s32.f32 %v3339_v62  ;;  %v3407_v28 = vunpack.c.1.s8 %v3203_v40  ;;  %v3179_v9 = vld [vmem:[#allocation10 + $0x10] sm:$0xff] }
 0x309   :  { %v3855_v5 = vcvt.s32.f32 %v3343_v15  ;;  %4816 = vmatpush.bf16.msrb.mxu1 %v4383_v44  ;;  %v4558_v6 = vpack.c.bf16 %v4278_v23, %v4274_v61  ;;  %v3690_v14 = vunpack.c.0.s8 %v3274_v47  ;;  %v3694_v0 = vunpack.c.1.s8 %v3274_v47  ;;  %v3195_v61 = vld [vmem:[#allocation10 + $0x90] sm:$0xff] }
 0x30a   :  { %v3915_v24 = vcvt.s32.f32 %v3403_v35  ;;  %4781 = vmatpush.bf16.msra.mxu2 %v4526_v4  ;;  %v3919_v63 = vcvt.s32.f32 %v3407_v28  ;;  %v3754_v29 = vunpack.c.0.s8 %v3290_v13  ;;  %v3758_v30 = vunpack.c.1.s8 %v3290_v13 }
 0x30b   :  { %v4347_v60 = vpack.c.bf16 %v3855_v5, %v3851_v50  ;;  %4794 = vmatpush.bf16.msra.mxu3 %v4558_v6  ;;  %v4202_v12 = vcvt.s32.f32 %v3690_v14  ;;  %v4206_v51 = vcvt.s32.f32 %v3694_v0  ;;  %v3331_v32 = vunpack.c.2.s8 %v3183_v56 }
 0x30c   :  { %v3335_v38 = vunpack.c.3.s8 %v3183_v56  ;;  %v4379_v3 = vpack.c.bf16 %v3919_v63, %v3915_v24  ;;  %v4266_v41 = vcvt.s32.f32 %v3754_v29  ;;  %v4270_v40 = vcvt.s32.f32 %v3758_v30  ;;  %v3219_v24 = vld [vmem:[#allocation10 + $0x150] sm:$0xff] }
 0x30d   :  { %4804 = vmatpush.bf16.msrb.mxu0 %v4347_v60  ;;  %v3395_v20 = vunpack.c.2.s8 %v3199_v1  ;;  %v4522_v2 = vpack.c.bf16 %v4206_v51, %v4202_v12  ;;  %v3843_v52 = vcvt.s32.f32 %v3331_v32  ;;  %v3399_v45 = vunpack.c.3.s8 %v3199_v1  ;;  %v3235_v63 = vld [vmem:[#allocation10 + $0x1d0] sm:$0xff] }
 0x30e   :  { %v3847_v34 = vcvt.s32.f32 %v3335_v38  ;;  %4817 = vmatpush.bf16.msrb.mxu1 %v4379_v3  ;;  %v4554_v54 = vpack.c.bf16 %v4270_v40, %v4266_v41  ;;  %v3491_v47 = vunpack.c.2.s8 %v3223_v46  ;;  %v3495_v36 = vunpack.c.3.s8 %v3223_v46 }
 0x30f   :  { %v3907_v18 = vcvt.s32.f32 %v3395_v20  ;;  %4782 = vmatpush.bf16.msra.mxu2 %v4522_v2  ;;  %v3911_v48 = vcvt.s32.f32 %v3399_v45  ;;  %v3555_v33 = vunpack.c.2.s8 %v3239_v53  ;;  %v3559_v13 = vunpack.c.3.s8 %v3239_v53 }
 0x310   :  { %v4343_v25 = vpack.c.bf16 %v3847_v34, %v3843_v52  ;;  %4795 = vmatpush.bf16.msra.mxu3 %v4554_v54  ;;  %v4003_v22 = vcvt.s32.f32 %v3491_v47  ;;  %v4007_v49 = vcvt.s32.f32 %v3495_v36  ;;  %v3323_v26 = vunpack.c.0.s8 %v3183_v56 }
 0x311   :  { %v3327_v31 = vunpack.c.1.s8 %v3183_v56  ;;  %v4375_v39 = vpack.c.bf16 %v3911_v48, %v3907_v18  ;;  %v4067_v27 = vcvt.s32.f32 %v3555_v33  ;;  %v4071_v7 = vcvt.s32.f32 %v3559_v13 }
 0x312   :  { %4805 = vmatpush.bf16.msrb.mxu0 %v4343_v25  ;;  %v3387_v55 = vunpack.c.0.s8 %v3199_v1  ;;  %v4423_v17 = vpack.c.bf16 %v4007_v49, %v4003_v22  ;;  %4783 = vmatmul.bf16.vlgmr.msra.gmra.mxu2 %v6505_v19  ;;  %v3835_v42 = vcvt.s32.f32 %v3323_v26  ;;  %v3391_v11 = vunpack.c.1.s8 %v3199_v1  ;;  %v3255_v22 = vld [vmem:[#allocation10 + $0x270] sm:$0xff] }
 0x313   :  { %v3839_v59 = vcvt.s32.f32 %v3327_v31  ;;  %4818 = vmatpush.bf16.msrb.mxu1 %v4375_v39  ;;  %v4455_v57 = vpack.c.bf16 %v4071_v7, %v4067_v27  ;;  %4796 = vmatmul.bf16.vlgmr.msra.gmra.mxu3 %v6508_v16  ;;  %v3483_v15 = vunpack.c.0.s8 %v3223_v46  ;;  %v3487_v44 = vunpack.c.1.s8 %v3223_v46  ;;  %v3271_v27 = vld [vmem:[#allocation10 + $0x2f0] sm:$0xff] }
 0x314   :  { %v3899_v62 = vcvt.s32.f32 %v3387_v55  ;;  %4827 = vmatpush.bf16.msrb.mxu2 %v4423_v17  ;;  %v3903_v35 = vcvt.s32.f32 %v3391_v11  ;;  %v3547_v4 = vunpack.c.0.s8 %v3239_v53  ;;  %v3551_v50 = vunpack.c.1.s8 %v3239_v53 }
 0x315   :  { %v4339_v23 = vpack.c.bf16 %v3839_v59, %v3835_v42  ;;  %4840 = vmatpush.bf16.msrb.mxu3 %v4455_v57  ;;  %v3995_v5 = vcvt.s32.f32 %v3483_v15  ;;  %v3999_v28 = vcvt.s32.f32 %v3487_v44  ;;  %v3315_v56 = vunpack.c.2.s8 %v3179_v9 }
 0x316   :  { %v3319_v6 = vunpack.c.3.s8 %v3179_v9  ;;  %v4371_v14 = vpack.c.bf16 %v3903_v35, %v3899_v62  ;;  %v4059_v0 = vcvt.s32.f32 %v3547_v4  ;;  %v4063_v1 = vcvt.s32.f32 %v3551_v50  ;;  %v3215_v62 = vld [vmem:[#allocation10 + $0x130] sm:$0xff] }
 0x317   :  { %4806 = vmatpush.bf16.msrb.mxu0 %v4339_v23  ;;  %v3379_v60 = vunpack.c.2.s8 %v3195_v61  ;;  %v4419_v29 = vpack.c.bf16 %v3999_v28, %v3995_v5  ;;  %v3827_v30 = vcvt.s32.f32 %v3315_v56  ;;  %v3383_v51 = vunpack.c.3.s8 %v3195_v61  ;;  %v3231_v35 = vld [vmem:[#allocation10 + $0x1b0] sm:$0xff] }
 0x318   :  { %v3831_v12 = vcvt.s32.f32 %v3319_v6  ;;  %4819 = vmatpush.bf16.msrb.mxu1 %v4371_v14  ;;  %v4451_v32 = vpack.c.bf16 %v4063_v1, %v4059_v0  ;;  %v3475_v46 = vunpack.c.2.s8 %v3219_v24  ;;  %v3479_v3 = vunpack.c.3.s8 %v3219_v24 }
 0x319   :  { %v3891_v38 = vcvt.s32.f32 %v3379_v60  ;;  %4828 = vmatpush.bf16.msrb.mxu2 %v4419_v29  ;;  %v3895_v40 = vcvt.s32.f32 %v3383_v51  ;;  %v3539_v20 = vunpack.c.2.s8 %v3235_v63  ;;  %v3543_v53 = vunpack.c.3.s8 %v3235_v63 }
 0x31a   :  { %v4335_v41 = vpack.c.bf16 %v3831_v12, %v3827_v30  ;;  %4841 = vmatpush.bf16.msrb.mxu3 %v4451_v32  ;;  %v3987_v2 = vcvt.s32.f32 %v3475_v46  ;;  %v3991_v52 = vcvt.s32.f32 %v3479_v3  ;;  %v3307_v34 = vunpack.c.0.s8 %v3179_v9 }
 0x31b   :  { %v3311_v45 = vunpack.c.1.s8 %v3179_v9  ;;  %v4367_v54 = vpack.c.bf16 %v3895_v40, %v3891_v38  ;;  %v4051_v18 = vcvt.s32.f32 %v3539_v20  ;;  %v4055_v47 = vcvt.s32.f32 %v3543_v53 }
 0x31c   :  { %4807 = vmatpush.bf16.msrb.mxu0 %v4335_v41  ;;  %v3371_v36 = vunpack.c.0.s8 %v3195_v61  ;;  %v4415_v25 = vpack.c.bf16 %v3991_v52, %v3987_v2  ;;  %v3819_v48 = vcvt.s32.f32 %v3307_v34  ;;  %v3375_v13 = vunpack.c.1.s8 %v3195_v61  ;;  %v3251_v2 = vld [vmem:[#allocation10 + $0x250] sm:$0xff] }
 0x31d   :  { %v3823_v33 = vcvt.s32.f32 %v3311_v45  ;;  %4820 = vmatpush.bf16.msrb.mxu1 %v4367_v54  ;;  %v4447_v49 = vpack.c.bf16 %v4055_v47, %v4051_v18  ;;  %v3467_v31 = vunpack.c.0.s8 %v3219_v24  ;;  %v3471_v39 = vunpack.c.1.s8 %v3219_v24  ;;  %v3267_v18 = vld [vmem:[#allocation10 + $0x2d0] sm:$0xff] }
 0x31e   :  { %v3883_v26 = vcvt.s32.f32 %v3371_v36  ;;  %4829 = vmatpush.bf16.msrb.mxu2 %v4415_v25  ;;  %v3887_v55 = vcvt.s32.f32 %v3375_v13  ;;  %v3531_v17 = vunpack.c.0.s8 %v3235_v63  ;;  %v3535_v42 = vunpack.c.1.s8 %v3235_v63 }
 0x31f   :  { %v4331_v7 = vpack.c.bf16 %v3823_v33, %v3819_v48  ;;  %4842 = vmatpush.bf16.msrb.mxu3 %v4447_v49  ;;  %v3979_v59 = vcvt.s32.f32 %v3467_v31  ;;  %v3983_v11 = vcvt.s32.f32 %v3471_v39  ;;  %v3619_v9 = vunpack.c.2.s8 %v3255_v22 }
 0x320   :  { %v3623_v57 = vunpack.c.3.s8 %v3255_v22  ;;  %v4363_v15 = vpack.c.bf16 %v3887_v55, %v3883_v26  ;;  %v4043_v44 = vcvt.s32.f32 %v3531_v17  ;;  %v4047_v61 = vcvt.s32.f32 %v3535_v42  ;;  %v3211_v26 = vld [vmem:[#allocation10 + $0x110] sm:$0xff] }
 0x321   :  { %4808 = vmatpush.bf16.msrb.mxu0 %v4331_v7  ;;  %v3683_v23 = vunpack.c.2.s8 %v3271_v27  ;;  %v4411_v4 = vpack.c.bf16 %v3983_v11, %v3979_v59  ;;  %v4131_v50 = vcvt.s32.f32 %v3619_v9  ;;  %v3687_v28 = vunpack.c.3.s8 %v3271_v27  ;;  %v3227_v55 = vld [vmem:[#allocation10 + $0x190] sm:$0xff] }
 0x322   :  { %v4135_v5 = vcvt.s32.f32 %v3623_v57  ;;  %4821 = vmatpush.bf16.msrb.mxu1 %v4363_v15  ;;  %v4443_v56 = vpack.c.bf16 %v4047_v61, %v4043_v44  ;;  %v3459_v24 = vunpack.c.2.s8 %v3215_v62  ;;  %v3463_v14 = vunpack.c.3.s8 %v3215_v62 }
 0x323   :  { %v4195_v6 = vcvt.s32.f32 %v3683_v23  ;;  %4830 = vmatpush.bf16.msrb.mxu2 %v4411_v4  ;;  %v4199_v1 = vcvt.s32.f32 %v3687_v28  ;;  %v3523_v60 = vunpack.c.2.s8 %v3231_v35  ;;  %v3527_v63 = vunpack.c.3.s8 %v3231_v35 }
 0x324   :  { %v4487_v0 = vpack.c.bf16 %v4135_v5, %v4131_v50  ;;  %4809 = vmatmul.bf16.vlgmr.msrb.gmra.mxu0 %v6451_v43  ;;  %4843 = vmatpush.bf16.msrb.mxu3 %v4443_v56  ;;  %v3971_v29 = vcvt.s32.f32 %v3459_v24  ;;  %v3975_v30 = vcvt.s32.f32 %v3463_v14  ;;  %v3611_v12 = vunpack.c.0.s8 %v3255_v22 }
 0x325   :  { %v3615_v51 = vunpack.c.1.s8 %v3255_v22  ;;  %v4519_v32 = vpack.c.bf16 %v4199_v1, %v4195_v6  ;;  %4822 = vmatmul.bf16.vlgmr.msrb.gmra.mxu1 %v6456_v37  ;;  %v4035_v38 = vcvt.s32.f32 %v3523_v60  ;;  %v4039_v46 = vcvt.s32.f32 %v3527_v63 }
 0x326   :  { %4853 = vmatpush.bf16.msra.mxu0 %v4487_v0  ;;  %v3675_v3 = vunpack.c.0.s8 %v3271_v27  ;;  %v4407_v41 = vpack.c.bf16 %v3975_v30, %v3971_v29  ;;  %v4123_v40 = vcvt.s32.f32 %v3611_v12  ;;  %v3679_v53 = vunpack.c.1.s8 %v3271_v27  ;;  %v3247_v29 = vld [vmem:[#allocation10 + $0x230] sm:$0xff] }
 0x327   :  { %v4127_v20 = vcvt.s32.f32 %v3615_v51  ;;  %4866 = vmatpush.bf16.msra.mxu1 %v4519_v32  ;;  %v4439_v52 = vpack.c.bf16 %v4039_v46, %v4035_v38  ;;  %v3451_v45 = vunpack.c.0.s8 %v3215_v62  ;;  %v3455_v54 = vunpack.c.1.s8 %v3215_v62  ;;  %v3263_v38 = vld [vmem:[#allocation10 + $0x2b0] sm:$0xff] }
 0x328   :  { %v4187_v34 = vcvt.s32.f32 %v3675_v3  ;;  %4831 = vmatpush.bf16.msrb.mxu2 %v4407_v41  ;;  %v4191_v36 = vcvt.s32.f32 %v3679_v53  ;;  %v3515_v25 = vunpack.c.0.s8 %v3231_v35  ;;  %v3519_v48 = vunpack.c.1.s8 %v3231_v35 }
 0x329   :  { %v4483_v47 = vpack.c.bf16 %v4127_v20, %v4123_v40  ;;  %4844 = vmatpush.bf16.msrb.mxu3 %v4439_v52  ;;  %v3963_v33 = vcvt.s32.f32 %v3451_v45  ;;  %v3967_v13 = vcvt.s32.f32 %v3455_v54  ;;  %v3603_v22 = vunpack.c.2.s8 %v3251_v2 }
 0x32a   :  { %v3607_v49 = vunpack.c.3.s8 %v3251_v2  ;;  %v4515_v31 = vpack.c.bf16 %v4191_v36, %v4187_v34  ;;  %v4027_v39 = vcvt.s32.f32 %v3515_v25  ;;  %v4031_v27 = vcvt.s32.f32 %v3519_v48  ;;  %v3287_v34 = vld [vmem:[#allocation10 + $0x370] sm:$0xff] }
 0x32b   :  { %4854 = vmatpush.bf16.msra.mxu0 %v4483_v47  ;;  %v3667_v7 = vunpack.c.2.s8 %v3267_v18  ;;  %v4403_v17 = vpack.c.bf16 %v3967_v13, %v3963_v33  ;;  %v4115_v42 = vcvt.s32.f32 %v3603_v22  ;;  %v3671_v11 = vunpack.c.3.s8 %v3267_v18  ;;  %v3303_v36 = vld [vmem:[#allocation10 + $0x3f0] sm:$0xff] }
 0x32c   :  { %v4119_v59 = vcvt.s32.f32 %v3607_v49  ;;  %4867 = vmatpush.bf16.msra.mxu1 %v4515_v31  ;;  %v4435_v9 = vpack.c.bf16 %v4031_v27, %v4027_v39  ;;  %v3443_v62 = vunpack.c.2.s8 %v3211_v26  ;;  %v3447_v15 = vunpack.c.3.s8 %v3211_v26 }
 0x32d   :  { %v4179_v57 = vcvt.s32.f32 %v3667_v7  ;;  %4832 = vmatpush.bf16.msrb.mxu2 %v4403_v17  ;;  %v4183_v61 = vcvt.s32.f32 %v3671_v11  ;;  %v3507_v23 = vunpack.c.2.s8 %v3227_v55  ;;  %v3511_v35 = vunpack.c.3.s8 %v3227_v55 }
 0x32e   :  { %v4479_v44 = vpack.c.bf16 %v4119_v59, %v4115_v42  ;;  %4845 = vmatpush.bf16.msrb.mxu3 %v4435_v9  ;;  %v3955_v4 = vcvt.s32.f32 %v3443_v62  ;;  %v3959_v50 = vcvt.s32.f32 %v3447_v15  ;;  %v3595_v5 = vunpack.c.0.s8 %v3251_v2 }
 0x32f   :  { %v3599_v28 = vunpack.c.1.s8 %v3251_v2  ;;  %v4511_v56 = vpack.c.bf16 %v4183_v61, %v4179_v57  ;;  %v4019_v6 = vcvt.s32.f32 %v3507_v23  ;;  %v4023_v24 = vcvt.s32.f32 %v3511_v35 }
 0x330   :  { %4855 = vmatpush.bf16.msra.mxu0 %v4479_v44  ;;  %v3659_v14 = vunpack.c.0.s8 %v3267_v18  ;;  %v4399_v0 = vpack.c.bf16 %v3959_v50, %v3955_v4  ;;  %v4107_v1 = vcvt.s32.f32 %v3595_v5  ;;  %v3663_v63 = vunpack.c.1.s8 %v3267_v18  ;;  %v6524_v44 = vpop.f32.mrf.mxu0  ;;  %v6526_v61 = vpop.f32.mrf.mxu1  ;;  %v3243_v5 = vld [vmem:[#allocation10 + $0x210] sm:$0xff] }
 0x331   :  { %v4111_v60 = vcvt.s32.f32 %v3599_v28  ;;  %4868 = vmatpush.bf16.msra.mxu1 %v4511_v56  ;;  %v4431_v30 = vpack.c.bf16 %v4023_v24, %v4019_v6  ;;  %v3435_v51 = vunpack.c.0.s8 %v3211_v26  ;;  %v3439_v32 = vunpack.c.1.s8 %v3211_v26 }
 0x332   :  { %v4171_v12 = vcvt.s32.f32 %v3659_v14  ;;  %4833 = vmatpush.bf16.msrb.mxu2 %v4399_v0  ;;  %v4175_v3 = vcvt.s32.f32 %v3663_v63  ;;  %v3499_v41 = vunpack.c.0.s8 %v3227_v55  ;;  %v3503_v40 = vunpack.c.1.s8 %v3227_v55  ;;  %v3259_v14 = vld [vmem:[#allocation10 + $0x290] sm:$0xff] }
 0x333   :  { %v4475_v46 = vpack.c.bf16 %v4111_v60, %v4107_v1  ;;  %4846 = vmatpush.bf16.msrb.mxu3 %v4431_v30  ;;  %v3947_v20 = vcvt.s32.f32 %v3435_v51  ;;  %v3951_v53 = vcvt.s32.f32 %v3439_v32  ;;  %v3587_v2 = vunpack.c.2.s8 %v3247_v29  ;;  %v3283_v32 = vld [vmem:[#allocation10 + $0x350] sm:$0xff] }
 0x334   :  { %v3591_v52 = vunpack.c.3.s8 %v3247_v29  ;;  %v4507_v45 = vpack.c.bf16 %v4175_v3, %v4171_v12  ;;  %v4011_v54 = vcvt.s32.f32 %v3499_v41  ;;  %v4015_v18 = vcvt.s32.f32 %v3503_v40  ;;  %v3299_v40 = vld [vmem:[#allocation10 + $0x3d0] sm:$0xff] }
 0x335   :  { %4856 = vmatpush.bf16.msra.mxu0 %v4475_v46  ;;  %v3651_v47 = vunpack.c.2.s8 %v3263_v38  ;;  %v4395_v25 = vpack.c.bf16 %v3951_v53, %v3947_v20  ;;  %v4099_v48 = vcvt.s32.f32 %v3587_v2  ;;  %v3655_v13 = vunpack.c.3.s8 %v3263_v38 }
 0x336   :  { %v4103_v33 = vcvt.s32.f32 %v3591_v52  ;;  %4869 = vmatpush.bf16.msra.mxu1 %v4507_v45  ;;  %v4427_v22 = vpack.c.bf16 %v4015_v18, %v4011_v54  ;;  %v3747_v26 = vunpack.c.2.s8 %v3287_v34  ;;  %v3751_v31 = vunpack.c.3.s8 %v3287_v34 }
 0x337   :  { %v4163_v49 = vcvt.s32.f32 %v3651_v47  ;;  %4834 = vmatpush.bf16.msrb.mxu2 %v4395_v25  ;;  %v4167_v27 = vcvt.s32.f32 %v3655_v13  ;;  %v3811_v7 = vunpack.c.2.s8 %v3303_v36  ;;  %v3815_v55 = vunpack.c.3.s8 %v3303_v36 }
 0x338   :  { %v4471_v39 = vpack.c.bf16 %v4103_v33, %v4099_v48  ;;  %4847 = vmatpush.bf16.msrb.mxu3 %v4427_v22  ;;  %v4259_v17 = vcvt.s32.f32 %v3747_v26  ;;  %v4263_v42 = vcvt.s32.f32 %v3751_v31  ;;  %v3579_v59 = vunpack.c.0.s8 %v3247_v29  ;;  %v4604_v33 = vpop.f32.mrf.mxu0  ;;  %v4617_v13 = vpop.f32.mrf.mxu1 }
 0x339   :  { %v3583_v11 = vunpack.c.1.s8 %v3247_v29  ;;  %v4503_v9 = vpack.c.bf16 %v4167_v27, %v4163_v49  ;;  %v4323_v57 = vcvt.s32.f32 %v3811_v7  ;;  %v4327_v62 = vcvt.s32.f32 %v3815_v55 }
 0x33a   :  { %4857 = vmatpush.bf16.msra.mxu0 %v4471_v39  ;;  %v3643_v15 = vunpack.c.0.s8 %v3263_v38  ;;  %v4551_v23 = vpack.c.bf16 %v4263_v42, %v4259_v17  ;;  %4835 = vmatmul.bf16.vlgmr.msrb.gmra.mxu2 %v6480_v8  ;;  %v4091_v35 = vcvt.s32.f32 %v3579_v59  ;;  %v3647_v50 = vunpack.c.1.s8 %v3263_v38 }
 0x33b   :  { %v4095_v4 = vcvt.s32.f32 %v3583_v11  ;;  %4870 = vmatpush.bf16.msra.mxu1 %v4503_v9  ;;  %v4583_v28 = vpack.c.bf16 %v4327_v62, %v4323_v57  ;;  %4848 = vmatmul.bf16.vlgmr.msrb.gmra.mxu3 %v6482_v10  ;;  %v3739_v6 = vunpack.c.0.s8 %v3287_v34  ;;  %v3743_v24 = vunpack.c.1.s8 %v3287_v34  ;;  %v3192_v9 = vld [vmem:[#allocation10 + $0x78] sm:$0xff] }
 0x33c   :  { %v4155_v56 = vcvt.s32.f32 %v3643_v15  ;;  %4879 = vmatpush.bf16.msra.mxu2 %v4551_v23  ;;  %v4159_v1 = vcvt.s32.f32 %v3647_v50  ;;  %v3803_v60 = vunpack.c.0.s8 %v3303_v36  ;;  %v3807_v63 = vunpack.c.1.s8 %v3303_v36 }
 0x33d   :  { %v4467_v0 = vpack.c.bf16 %v4095_v4, %v4091_v35  ;;  %4892 = vmatpush.bf16.msra.mxu3 %v4583_v28  ;;  %v4251_v29 = vcvt.s32.f32 %v3739_v6  ;;  %v4255_v30 = vcvt.s32.f32 %v3743_v24  ;;  %v3571_v12 = vunpack.c.2.s8 %v3243_v5  ;;  %v3208_v35 = vld [vmem:[#allocation10 + $0xf8] sm:$0xff] }
 0x33e   :  { %v3575_v51 = vunpack.c.3.s8 %v3243_v5  ;;  %v4499_v38 = vpack.c.bf16 %v4159_v1, %v4155_v56  ;;  %v4315_v46 = vcvt.s32.f32 %v3803_v60  ;;  %v4319_v3 = vcvt.s32.f32 %v3807_v63  ;;  %v3279_v1 = vld [vmem:[#allocation10 + $0x330] sm:$0xff] }
 0x33f   :  { %4858 = vmatpush.bf16.msra.mxu0 %v4467_v0  ;;  %v3635_v41 = vunpack.c.2.s8 %v3259_v14  ;;  %v4547_v20 = vpack.c.bf16 %v4255_v30, %v4251_v29  ;;  %v4083_v53 = vcvt.s32.f32 %v3571_v12  ;;  %v3639_v52 = vunpack.c.3.s8 %v3259_v14  ;;  %v3295_v30 = vld [vmem:[#allocation10 + $0x3b0] sm:$0xff] }
 0x340   :  { %v4087_v2 = vcvt.s32.f32 %v3575_v51  ;;  %4871 = vmatpush.bf16.msra.mxu1 %v4499_v38  ;;  %v4579_v34 = vpack.c.bf16 %v4319_v3, %v4315_v46  ;;  %v3731_v54 = vunpack.c.2.s8 %v3283_v32  ;;  %v3735_v18 = vunpack.c.3.s8 %v3283_v32 }
 0x341   :  { %v4147_v45 = vcvt.s32.f32 %v3635_v41  ;;  %4880 = vmatpush.bf16.msra.mxu2 %v4547_v20  ;;  %v4151_v36 = vcvt.s32.f32 %v3639_v52  ;;  %v3795_v25 = vunpack.c.2.s8 %v3299_v40  ;;  %v3799_v48 = vunpack.c.3.s8 %v3299_v40 }
 0x342   :  { %v4463_v47 = vpack.c.bf16 %v4087_v2, %v4083_v53  ;;  %4893 = vmatpush.bf16.msra.mxu3 %v4579_v34  ;;  %v4243_v22 = vcvt.s32.f32 %v3731_v54  ;;  %v4247_v49 = vcvt.s32.f32 %v3735_v18  ;;  %v3563_v26 = vunpack.c.0.s8 %v3243_v5 }
 0x343   :  { %v3567_v31 = vunpack.c.1.s8 %v3243_v5  ;;  %v4495_v39 = vpack.c.bf16 %v4151_v36, %v4147_v45  ;;  %v4307_v27 = vcvt.s32.f32 %v3795_v25  ;;  %v4311_v7 = vcvt.s32.f32 %v3799_v48 }
 0x344   :  { %4859 = vmatpush.bf16.msra.mxu0 %v4463_v47  ;;  %v3627_v55 = vunpack.c.0.s8 %v3259_v14  ;;  %v4543_v17 = vpack.c.bf16 %v4247_v49, %v4243_v22  ;;  %v4075_v42 = vcvt.s32.f32 %v3563_v26  ;;  %v3631_v11 = vunpack.c.1.s8 %v3259_v14  ;;  %v3188_v26 = vld [vmem:[#allocation10 + $0x58] sm:$0xff] }
 0x345   :  { %v4079_v59 = vcvt.s32.f32 %v3567_v31  ;;  %4872 = vmatpush.bf16.msra.mxu1 %v4495_v39  ;;  %v4575_v57 = vpack.c.bf16 %v4311_v7, %v4307_v27  ;;  %v3723_v15 = vunpack.c.0.s8 %v3283_v32  ;;  %v3727_v23 = vunpack.c.1.s8 %v3283_v32 }
 0x346   :  { %v4139_v62 = vcvt.s32.f32 %v3627_v55  ;;  %4881 = vmatpush.bf16.msra.mxu2 %v4543_v17  ;;  %v4143_v50 = vcvt.s32.f32 %v3631_v11  ;;  %v3787_v5 = vunpack.c.0.s8 %v3299_v40  ;;  %v3791_v28 = vunpack.c.1.s8 %v3299_v40  ;;  %v3204_v55 = vld [vmem:[#allocation10 + $0xd8] sm:$0xff]  ;;  %v6532_v17 = vpop.f32.mrf.mxu0 }
 0x347   :  { %v4459_v4 = vpack.c.bf16 %v4079_v59, %v4075_v42  ;;  %4894 = vmatpush.bf16.msra.mxu3 %v4575_v57  ;;  %v4235_v56 = vcvt.s32.f32 %v3723_v15  ;;  %v4239_v6 = vcvt.s32.f32 %v3727_v23  ;;  %v3364_v24 = vunpack.c.2.s8 %v3192_v9  ;;  %v6534_v42 = vpop.f32.mrf.mxu1 }
 0x348   :  { %v3368_v0 = vunpack.c.3.s8 %v3192_v9  ;;  %v4491_v14 = vpack.c.bf16 %v4143_v50, %v4139_v62  ;;  %v4299_v60 = vcvt.s32.f32 %v3787_v5  ;;  %v4303_v63 = vcvt.s32.f32 %v3791_v28 }
 0x349   :  { %4860 = vmatpush.bf16.msra.mxu0 %v4459_v4  ;;  %v3428_v29 = vunpack.c.2.s8 %v3208_v35  ;;  %v4539_v12 = vpack.c.bf16 %v4239_v6, %v4235_v56  ;;  %v3876_v51 = vcvt.s32.f32 %v3364_v24  ;;  %v3432_v38 = vunpack.c.3.s8 %v3208_v35  ;;  %v3275_v4 = vld [vmem:[#allocation10 + $0x310] sm:$0xff] }
 0x34a   :  { %v3880_v32 = vcvt.s32.f32 %v3368_v0  ;;  %4873 = vmatpush.bf16.msra.mxu1 %v4491_v14  ;;  %v4571_v46 = vpack.c.bf16 %v4303_v63, %v4299_v60  ;;  %v3715_v41 = vunpack.c.2.s8 %v3279_v1  ;;  %v3719_v40 = vunpack.c.3.s8 %v3279_v1  ;;  %v3291_v6 = vld [vmem:[#allocation10 + $0x390] sm:$0xff] }
 0x34b   :  { %v3940_v3 = vcvt.s32.f32 %v3428_v29  ;;  %4882 = vmatpush.bf16.msra.mxu2 %v4539_v12  ;;  %v3944_v53 = vcvt.s32.f32 %v3432_v38  ;;  %v3779_v2 = vunpack.c.2.s8 %v3295_v30  ;;  %v3783_v52 = vunpack.c.3.s8 %v3295_v30 }
 0x34c   :  { %v4360_v20 = vpack.c.bf16 %v3880_v32, %v3876_v51  ;;  %4861 = vmatmul.bf16.vlgmr.msra.gmra.mxu0 %v6423_v58  ;;  %4895 = vmatpush.bf16.msra.mxu3 %v4571_v46  ;;  %v4227_v34 = vcvt.s32.f32 %v3715_v41  ;;  %v4231_v45 = vcvt.s32.f32 %v3719_v40  ;;  %v3356_v54 = vunpack.c.0.s8 %v3192_v9 }
 0x34d   :  { %v3360_v18 = vunpack.c.1.s8 %v3192_v9  ;;  %v4392_v47 = vpack.c.bf16 %v3944_v53, %v3940_v3  ;;  %4874 = vmatmul.bf16.vlgmr.msra.gmra.mxu1 %v6426_v21  ;;  %v4291_v36 = vcvt.s32.f32 %v3779_v2  ;;  %v4295_v25 = vcvt.s32.f32 %v3783_v52 }
 0x34e   :  { %4905 = vmatpush.bf16.msrb.mxu0 %v4360_v20  ;;  %v3420_v48 = vunpack.c.0.s8 %v3208_v35  ;;  %v4535_v33 = vpack.c.bf16 %v4231_v45, %v4227_v34  ;;  %v3868_v13 = vcvt.s32.f32 %v3356_v54  ;;  %v3424_v49 = vunpack.c.1.s8 %v3208_v35  ;;  %v6540_v34 = vpop.f32.mrf.mxu2 }
 0x34f   :  { %v3872_v22 = vcvt.s32.f32 %v3360_v18  ;;  %4918 = vmatpush.bf16.msrb.mxu1 %v4392_v47  ;;  %v4567_v31 = vpack.c.bf16 %v4295_v25, %v4291_v36  ;;  %v3707_v27 = vunpack.c.0.s8 %v3279_v1  ;;  %v3711_v7 = vunpack.c.1.s8 %v3279_v1  ;;  %v3184_v47 = vld [vmem:[#allocation10 + $0x38] sm:$0xff]  ;;  %v4656_v36 = vpop.f32.mrf.mxu0  ;;  %v4669_v25 = vpop.f32.mrf.mxu1 }
 0x350   :  { %v3932_v39 = vcvt.s32.f32 %v3420_v48  ;;  %4883 = vmatpush.bf16.msra.mxu2 %v4535_v33  ;;  %v3936_v11 = vcvt.s32.f32 %v3424_v49  ;;  %v3771_v9 = vunpack.c.0.s8 %v3295_v30  ;;  %v3775_v57 = vunpack.c.1.s8 %v3295_v30  ;;  %v3200_v49 = vld [vmem:[#allocation10 + $0xb8] sm:$0xff] }
 0x351   :  { %v4356_v59 = vpack.c.bf16 %v3872_v22, %v3868_v13  ;;  %4896 = vmatpush.bf16.msra.mxu3 %v4567_v31  ;;  %v4219_v62 = vcvt.s32.f32 %v3707_v27  ;;  %v4223_v15 = vcvt.s32.f32 %v3711_v7  ;;  %v3348_v23 = vunpack.c.2.s8 %v3188_v26 }
 0x352   :  { %v3352_v35 = vunpack.c.3.s8 %v3188_v26  ;;  %v4388_v50 = vpack.c.bf16 %v3936_v11, %v3932_v39  ;;  %v4283_v5 = vcvt.s32.f32 %v3771_v9  ;;  %v4287_v28 = vcvt.s32.f32 %v3775_v57  ;;  %v3224_v57 = vld [vmem:[#allocation10 + $0x178] sm:$0xff] }
 0x353   :  { %4906 = vmatpush.bf16.msrb.mxu0 %v4356_v59  ;;  %v3412_v56 = vunpack.c.2.s8 %v3204_v55  ;;  %v4531_v24 = vpack.c.bf16 %v4223_v15, %v4219_v62  ;;  %v3860_v0 = vcvt.s32.f32 %v3348_v23  ;;  %v3416_v14 = vunpack.c.3.s8 %v3204_v55 }
 0x354   :  { %v3864_v1 = vcvt.s32.f32 %v3352_v35  ;;  %4919 = vmatpush.bf16.msrb.mxu1 %v4388_v50  ;;  %v4563_v60 = vpack.c.bf16 %v4287_v28, %v4283_v5  ;;  %v6538_v29 = vadd.f32 %v6526_v61, %v6524_v44  ;;  %v3699_v30 = vunpack.c.2.s8 %v3275_v4  ;;  %v6542_v44 = vpop.f32.mrf.mxu3  ;;  %v3240_v35 = vld [vmem:[#allocation10 + $0x1f8] sm:$0xff] }
 0x355   :  { %v3924_v63 = vcvt.s32.f32 %v3412_v56  ;;  %4884 = vmatpush.bf16.msra.mxu2 %v4531_v24  ;;  %v3928_v51 = vcvt.s32.f32 %v3416_v14  ;;  %v3703_v32 = vunpack.c.3.s8 %v3275_v4  ;;  %v3763_v38 = vunpack.c.2.s8 %v3291_v6 }
 0x356   :  { %v4352_v12 = vpack.c.bf16 %v3864_v1, %v3860_v0  ;;  %4897 = vmatpush.bf16.msra.mxu3 %v4563_v60  ;;  %v4211_v46 = vcvt.s32.f32 %v3699_v30  ;;  %v3767_v3 = vunpack.c.3.s8 %v3291_v6  ;;  %v3340_v41 = vunpack.c.0.s8 %v3188_v26  ;;  %v4630_v30 = vpop.f32.mrf.mxu2 }
 0x357   :  { %v3344_v40 = vunpack.c.1.s8 %v3188_v26  ;;  %v4384_v20 = vpack.c.bf16 %v3928_v51, %v3924_v63  ;;  %v4215_v53 = vcvt.s32.f32 %v3703_v32  ;;  %v4275_v2 = vcvt.s32.f32 %v3763_v38 }
 0x358   :  { %4907 = vmatpush.bf16.msrb.mxu0 %v4352_v12  ;;  %v3404_v52 = vunpack.c.0.s8 %v3204_v55  ;;  %v4279_v61 = vcvt.s32.f32 %v3767_v3  ;;  %v3852_v45 = vcvt.s32.f32 %v3340_v41  ;;  %v3408_v18 = vunpack.c.1.s8 %v3204_v55 }
 0x359   :  { %v3856_v54 = vcvt.s32.f32 %v3344_v40  ;;  %4920 = vmatpush.bf16.msrb.mxu1 %v4384_v20  ;;  %v4527_v48 = vpack.c.bf16 %v4215_v53, %v4211_v46  ;;  %v3691_v13 = vunpack.c.0.s8 %v3275_v4  ;;  %v3695_v22 = vunpack.c.1.s8 %v3275_v4 }
 0x35a   :  { %v3916_v33 = vcvt.s32.f32 %v3404_v52  ;;  %v4559_v26 = vpack.c.bf16 %v4279_v61, %v4275_v2  ;;  %v3920_v39 = vcvt.s32.f32 %v3408_v18  ;;  %v3755_v27 = vunpack.c.0.s8 %v3291_v6 }
 0x35b   :  { %v4348_v31 = vpack.c.bf16 %v3856_v54, %v3852_v45  ;;  %4885 = vmatpush.bf16.msra.mxu2 %v4527_v48  ;;  %v4203_v7 = vcvt.s32.f32 %v3691_v13  ;;  %v4207_v59 = vcvt.s32.f32 %v3695_v22  ;;  %v3759_v11 = vunpack.c.1.s8 %v3291_v6  ;;  %v3180_v45 = vld [vmem:[#allocation10 + $0x18] sm:$0xff] }
 0x35c   :  { %v3332_v9 = vunpack.c.2.s8 %v3184_v47  ;;  %4898 = vmatpush.bf16.msra.mxu3 %v4559_v26  ;;  %v4380_v55 = vpack.c.bf16 %v3920_v39, %v3916_v33  ;;  %v4267_v62 = vcvt.s32.f32 %v3755_v27  ;;  %v3336_v15 = vunpack.c.3.s8 %v3184_v47  ;;  %v4643_v12 = vpop.f32.mrf.mxu3  ;;  %v3196_v22 = vld [vmem:[#allocation10 + $0x98] sm:$0xff]  ;;  %v6546_v26 = vpop.f32.mrf.mxu0 }
 0x35d   :  { %4908 = vmatpush.bf16.msrb.mxu0 %v4348_v31  ;;  %v3396_v23 = vunpack.c.2.s8 %v3200_v49  ;;  %v4523_v50 = vpack.c.bf16 %v4207_v59, %v4203_v7  ;;  %v4271_v4 = vcvt.s32.f32 %v3759_v11  ;;  %v3400_v28 = vunpack.c.3.s8 %v3200_v49  ;;  %v6548_v31 = vpop.f32.mrf.mxu1  ;;  %v3220_v59 = vld [vmem:[#allocation10 + $0x158] sm:$0xff] }
 0x35e   :  { %v3844_v5 = vcvt.s32.f32 %v3332_v9  ;;  %4921 = vmatpush.bf16.msrb.mxu1 %v4380_v55  ;;  %v3848_v56 = vcvt.s32.f32 %v3336_v15  ;;  %v3492_v0 = vunpack.c.2.s8 %v3224_v57  ;;  %v3496_v1 = vunpack.c.3.s8 %v3224_v57 }
 0x35f   :  { %v3908_v24 = vcvt.s32.f32 %v3396_v23  ;;  %4886 = vmatpush.bf16.msra.mxu2 %v4523_v50  ;;  %v4555_v6 = vpack.c.bf16 %v4271_v4, %v4267_v62  ;;  %v3912_v14 = vcvt.s32.f32 %v3400_v28  ;;  %v3556_v60 = vunpack.c.2.s8 %v3240_v35  ;;  %v3236_v62 = vld [vmem:[#allocation10 + $0x1d8] sm:$0xff] }
 0x360   :  { %v3560_v63 = vunpack.c.3.s8 %v3240_v35  ;;  %v4344_v51 = vpack.c.bf16 %v3848_v56, %v3844_v5  ;;  %v4004_v32 = vcvt.s32.f32 %v3492_v0  ;;  %v4008_v38 = vcvt.s32.f32 %v3496_v1 }
 0x361   :  { %v3324_v46 = vunpack.c.0.s8 %v3184_v47  ;;  %4899 = vmatpush.bf16.msra.mxu3 %v4555_v6  ;;  %v4376_v3 = vpack.c.bf16 %v3912_v14, %v3908_v24  ;;  %v4068_v41 = vcvt.s32.f32 %v3556_v60  ;;  %v3328_v20 = vunpack.c.1.s8 %v3184_v47 }
 0x362   :  { %v4072_v40 = vcvt.s32.f32 %v3560_v63  ;;  %4909 = vmatpush.bf16.msrb.mxu0 %v4344_v51  ;;  %v4424_v53 = vpack.c.bf16 %v4008_v38, %v4004_v32  ;;  %4887 = vmatmul.bf16.vlgmr.msra.gmra.mxu2 %v6505_v19  ;;  %v3388_v52 = vunpack.c.0.s8 %v3200_v49  ;;  %v3392_v61 = vunpack.c.1.s8 %v3200_v49 }
 0x363   :  { %v3836_v2 = vcvt.s32.f32 %v3324_v46  ;;  %4922 = vmatpush.bf16.msrb.mxu1 %v4376_v3  ;;  %v3840_v18 = vcvt.s32.f32 %v3328_v20  ;;  %v3484_v36 = vunpack.c.0.s8 %v3224_v57  ;;  %v3488_v25 = vunpack.c.1.s8 %v3224_v57  ;;  %v6550_v20 = vld [vmem:[#allocation10 + $0x278] sm:$0xff] }
 0x364   :  { %v4456_v54 = vpack.c.bf16 %v4072_v40, %v4068_v41  ;;  %4931 = vmatpush.bf16.msrb.mxu2 %v4424_v53  ;;  %4900 = vmatmul.bf16.vlgmr.msra.gmra.mxu3 %v6508_v16  ;;  %v3900_v48 = vcvt.s32.f32 %v3388_v52  ;;  %v3904_v33 = vcvt.s32.f32 %v3392_v61  ;;  %v3548_v13 = vunpack.c.0.s8 %v3240_v35  ;;  %v4708_v53 = vpop.f32.mrf.mxu0 }
 0x365   :  { %v3552_v47 = vunpack.c.1.s8 %v3240_v35  ;;  %v4340_v49 = vpack.c.bf16 %v3840_v18, %v3836_v2  ;;  %v3996_v39 = vcvt.s32.f32 %v3484_v36  ;;  %v4000_v27 = vcvt.s32.f32 %v3488_v25  ;;  %v4721_v2 = vpop.f32.mrf.mxu1 }
 0x366   :  { %4944 = vmatpush.bf16.msrb.mxu3 %v4456_v54  ;;  %v3316_v7 = vunpack.c.2.s8 %v3180_v45  ;;  %v4372_v11 = vpack.c.bf16 %v3904_v33, %v3900_v48  ;;  %v4060_v9 = vcvt.s32.f32 %v3548_v13  ;;  %v3320_v55 = vunpack.c.3.s8 %v3180_v45  ;;  %v6552_v13 = vpop.f32.mrf.mxu2 }
 0x367   :  { %v4064_v57 = vcvt.s32.f32 %v3552_v47  ;;  %4910 = vmatpush.bf16.msrb.mxu0 %v4340_v49  ;;  %v4420_v15 = vpack.c.bf16 %v4000_v27, %v3996_v39  ;;  %v3380_v35 = vunpack.c.2.s8 %v3196_v22  ;;  %v3384_v50 = vunpack.c.3.s8 %v3196_v22  ;;  %v6554_v47 = vpop.f32.mrf.mxu3 }
 0x368   :  { %v3828_v23 = vcvt.s32.f32 %v3316_v7  ;;  %4923 = vmatpush.bf16.msrb.mxu1 %v4372_v11  ;;  %v3832_v5 = vcvt.s32.f32 %v3320_v55  ;;  %v3476_v28 = vunpack.c.2.s8 %v3220_v59  ;;  %v3480_v56 = vunpack.c.3.s8 %v3220_v59  ;;  %v3216_v7 = vld [vmem:[#allocation10 + $0x138] sm:$0xff] }
 0x369   :  { %v4452_v4 = vpack.c.bf16 %v4064_v57, %v4060_v9  ;;  %4932 = vmatpush.bf16.msrb.mxu2 %v4420_v15  ;;  %v3892_v24 = vcvt.s32.f32 %v3380_v35  ;;  %v3896_v0 = vcvt.s32.f32 %v3384_v50  ;;  %v3540_v1 = vunpack.c.2.s8 %v3236_v62  ;;  %v3232_v55 = vld [vmem:[#allocation10 + $0x1b8] sm:$0xff] }
 0x36a   :  { %v3544_v6 = vunpack.c.3.s8 %v3236_v62  ;;  %v4336_v14 = vpack.c.bf16 %v3832_v5, %v3828_v23  ;;  %v3988_v60 = vcvt.s32.f32 %v3476_v28  ;;  %v3992_v63 = vcvt.s32.f32 %v3480_v56 }
 0x36b   :  { %4945 = vmatpush.bf16.msrb.mxu3 %v4452_v4  ;;  %v3308_v30 = vunpack.c.0.s8 %v3180_v45  ;;  %v4368_v12 = vpack.c.bf16 %v3896_v0, %v3892_v24  ;;  %v4052_v51 = vcvt.s32.f32 %v3540_v1  ;;  %v3312_v38 = vunpack.c.1.s8 %v3180_v45  ;;  %v3272_v45 = vld [vmem:[#allocation10 + $0x2f8] sm:$0xff] }
 0x36c   :  { %v4056_v32 = vcvt.s32.f32 %v3544_v6  ;;  %4911 = vmatpush.bf16.msrb.mxu0 %v4336_v14  ;;  %v4416_v46 = vpack.c.bf16 %v3992_v63, %v3988_v60  ;;  %v3372_v41 = vunpack.c.0.s8 %v3196_v22  ;;  %v3376_v40 = vunpack.c.1.s8 %v3196_v22 }
 0x36d   :  { %v3820_v3 = vcvt.s32.f32 %v3308_v30  ;;  %4924 = vmatpush.bf16.msrb.mxu1 %v4368_v12  ;;  %v3824_v61 = vcvt.s32.f32 %v3312_v38  ;;  %v3468_v54 = vunpack.c.0.s8 %v3220_v59  ;;  %v3472_v18 = vunpack.c.1.s8 %v3220_v59 }
 0x36e   :  { %v4448_v52 = vpack.c.bf16 %v4056_v32, %v4052_v51  ;;  %4933 = vmatpush.bf16.msrb.mxu2 %v4416_v46  ;;  %v3884_v36 = vcvt.s32.f32 %v3372_v41  ;;  %v3888_v25 = vcvt.s32.f32 %v3376_v40  ;;  %v3532_v48 = vunpack.c.0.s8 %v3236_v62 }
 0x36f   :  { %v3536_v33 = vunpack.c.1.s8 %v3236_v62  ;;  %v4332_v22 = vpack.c.bf16 %v3824_v61, %v3820_v3  ;;  %v3980_v49 = vcvt.s32.f32 %v3468_v54  ;;  %v3984_v39 = vcvt.s32.f32 %v3472_v18  ;;  %v4695_v3 = vpop.f32.mrf.mxu3  ;;  %v3268_v18 = vld [vmem:[#allocation10 + $0x2d8] sm:$0xff] }
 0x370   :  { %4946 = vmatpush.bf16.msrb.mxu3 %v4448_v52  ;;  %v3620_v27 = vunpack.c.2.s8 %v6550_v20  ;;  %v4364_v11 = vpack.c.bf16 %v3888_v25, %v3884_v36  ;;  %v4044_v9 = vcvt.s32.f32 %v3532_v48  ;;  %v3624_v57 = vunpack.c.3.s8 %v6550_v20 }
 0x371   :  { %v4048_v59 = vcvt.s32.f32 %v3536_v33  ;;  %4912 = vmatpush.bf16.msrb.mxu0 %v4332_v22  ;;  %v4412_v62 = vpack.c.bf16 %v3984_v39, %v3980_v49  ;;  %v3684_v23 = vunpack.c.2.s8 %v3272_v45  ;;  %v3688_v35 = vunpack.c.3.s8 %v3272_v45  ;;  %v3212_v39 = vld [vmem:[#allocation10 + $0x118] sm:$0xff] }
 0x372   :  { %v4132_v15 = vcvt.s32.f32 %v3620_v27  ;;  %4925 = vmatpush.bf16.msrb.mxu1 %v4364_v11  ;;  %v4136_v4 = vcvt.s32.f32 %v3624_v57  ;;  %v4629_v5 = vadd.f32 %v6540_v34, %v6538_v29  ;;  %v3460_v28 = vunpack.c.2.s8 %v3216_v7 }
 0x373   :  { %v4444_v50 = vpack.c.bf16 %v4048_v59, %v4044_v9  ;;  %4934 = vmatpush.bf16.msrb.mxu2 %v4412_v62  ;;  %v4196_v56 = vcvt.s32.f32 %v3684_v23  ;;  %v4200_v24 = vcvt.s32.f32 %v3688_v35  ;;  %v3464_v0 = vunpack.c.3.s8 %v3216_v7  ;;  %v3228_v59 = vld [vmem:[#allocation10 + $0x198] sm:$0xff] }
 0x374   :  { %v3524_v1 = vunpack.c.2.s8 %v3232_v55  ;;  %v4488_v6 = vpack.c.bf16 %v4136_v4, %v4132_v15  ;;  %v4642_v14 = vadd.f32 %v6542_v44, %v4629_v5  ;;  %4913 = vmatmul.bf16.vlgmr.msrb.gmra.mxu0 %v6451_v43  ;;  %v3972_v60 = vcvt.s32.f32 %v3460_v28  ;;  %v4682_v44 = vpop.f32.mrf.mxu2 }
 0x375   :  { %4947 = vmatpush.bf16.msrb.mxu3 %v4444_v50  ;;  %v3528_v63 = vunpack.c.3.s8 %v3232_v55  ;;  %v4520_v30 = vpack.c.bf16 %v4200_v24, %v4196_v56  ;;  %4926 = vmatmul.bf16.vlgmr.msrb.gmra.mxu1 %v6456_v37  ;;  %v3976_v12 = vcvt.s32.f32 %v3464_v0  ;;  %v3612_v29 = vunpack.c.0.s8 %v6550_v20  ;;  %v3252_v37 = vld [vmem:[#allocation10 + $0x258] sm:$0xff] }
 0x376   :  { %v4036_v51 = vcvt.s32.f32 %v3524_v1  ;;  %4957 = vmatpush.bf16.msra.mxu0 %v4488_v6  ;;  %v6565_v34 = vadd.f32 %v6532_v17, %v4642_v14  ;;  %v3616_v38 = vunpack.c.1.s8 %v6550_v20  ;;  %v3676_v46 = vunpack.c.0.s8 %v3272_v45 }
 0x377   :  { %v4040_v32 = vcvt.s32.f32 %v3528_v63  ;;  %4970 = vmatpush.bf16.msra.mxu1 %v4520_v30  ;;  %v4408_v43 = vpack.c.bf16 %v3976_v12, %v3972_v60  ;;  %v4124_v41 = vcvt.s32.f32 %v3612_v29  ;;  %v3680_v40 = vunpack.c.1.s8 %v3272_v45 }
 0x378   :  { %v3452_v53 = vunpack.c.0.s8 %v3216_v7  ;;  %v4128_v52 = vcvt.s32.f32 %v3616_v38  ;;  %v4188_v61 = vcvt.s32.f32 %v3676_v46  ;;  %v3456_v54 = vunpack.c.1.s8 %v3216_v7  ;;  %v6572_v38 = vld [vmem:[#allocation10 + $0x238] sm:$0xff] }
 0x379   :  { %v4440_v2 = vpack.c.bf16 %v4040_v32, %v4036_v51  ;;  %4935 = vmatpush.bf16.msrb.mxu2 %v4408_v43  ;;  %v4192_v17 = vcvt.s32.f32 %v3680_v40  ;;  %v3516_v25 = vunpack.c.0.s8 %v3232_v55  ;;  %v3520_v48 = vunpack.c.1.s8 %v3232_v55 }
 0x37a   :  { %v3964_v36 = vcvt.s32.f32 %v3452_v53  ;;  %v4484_v20 = vpack.c.bf16 %v4128_v52, %v4124_v41  ;;  %v3968_v33 = vcvt.s32.f32 %v3456_v54  ;;  %v3604_v22 = vunpack.c.2.s8 %v3252_v37  ;;  %v6574_v53 = vld [vmem:[#allocation10 + $0x2b8] sm:$0xff] }
 0x37b   :  { %4948 = vmatpush.bf16.msrb.mxu3 %v4440_v2  ;;  %v3608_v49 = vunpack.c.3.s8 %v3252_v37  ;;  %v4516_v27 = vpack.c.bf16 %v4192_v17, %v4188_v61  ;;  %v4028_v45 = vcvt.s32.f32 %v3516_v25  ;;  %v4032_v11 = vcvt.s32.f32 %v3520_v48  ;;  %v6577_v54 = vld [vmem:[#allocation10 + $0x378] sm:$0xff] }
 0x37c   :  { %v3668_v9 = vunpack.c.2.s8 %v3268_v18  ;;  %4958 = vmatpush.bf16.msra.mxu0 %v4484_v20  ;;  %v4404_v57 = vpack.c.bf16 %v3968_v33, %v3964_v36  ;;  %v4116_v7 = vcvt.s32.f32 %v3604_v22  ;;  %v3672_v15 = vunpack.c.3.s8 %v3268_v18  ;;  %v6580_v48 = vld [vmem:[#allocation10 + $0x3f8] sm:$0xff] }
 0x37d   :  { %v4120_v62 = vcvt.s32.f32 %v3608_v49  ;;  %4971 = vmatpush.bf16.msra.mxu1 %v4516_v27  ;;  %v4436_v23 = vpack.c.bf16 %v4032_v11, %v4028_v45  ;;  %v3444_v55 = vunpack.c.2.s8 %v3212_v39  ;;  %v3448_v50 = vunpack.c.3.s8 %v3212_v39  ;;  %v6586_v27 = vpop.f32.mrf.mxu3 }
 0x37e   :  { %v4180_v35 = vcvt.s32.f32 %v3668_v9  ;;  %4936 = vmatpush.bf16.msrb.mxu2 %v4404_v57  ;;  %v4184_v5 = vcvt.s32.f32 %v3672_v15  ;;  %v3508_v28 = vunpack.c.2.s8 %v3228_v59  ;;  %v3512_v56 = vunpack.c.3.s8 %v3228_v59  ;;  %v6593_v57 = vld [vmem:[%s6719_s7] sm:$0xf] }
 0x37f   :  { %v4480_v4 = vpack.c.bf16 %v4120_v62, %v4116_v7  ;;  %4949 = vmatpush.bf16.msrb.mxu3 %v4436_v23  ;;  %v3956_v24 = vcvt.s32.f32 %v3444_v55  ;;  %v3960_v0 = vcvt.s32.f32 %v3448_v50  ;;  %v6570_v1 = vadd.f32 %v6548_v31, %v6546_v26 }
 0x380   :  { %v3596_v6 = vunpack.c.0.s8 %v3252_v37  ;;  %v4512_v14 = vpack.c.bf16 %v4184_v5, %v4180_v35  ;;  %v4020_v60 = vcvt.s32.f32 %v3508_v28  ;;  %v4024_v63 = vcvt.s32.f32 %v3512_v56  ;;  %v6600_v35 = vld [vmem:[%s6720_s8] sm:$0xf] }
 0x381   :  { %4959 = vmatpush.bf16.msra.mxu0 %v4480_v4  ;;  %v3600_v30 = vunpack.c.1.s8 %v3252_v37  ;;  %v4400_v12 = vpack.c.bf16 %v3960_v0, %v3956_v24  ;;  %v3660_v29 = vunpack.c.0.s8 %v3268_v18  ;;  %v3664_v32 = vunpack.c.1.s8 %v3268_v18 }
 0x382   :  { %v4108_v51 = vcvt.s32.f32 %v3596_v6  ;;  %4972 = vmatpush.bf16.msra.mxu1 %v4512_v14  ;;  %v4432_v46 = vpack.c.bf16 %v4024_v63, %v4020_v60  ;;  %v3436_v3 = vunpack.c.0.s8 %v3212_v39  ;;  %v3440_v43 = vunpack.c.1.s8 %v3212_v39  ;;  %v6584_v39 = vpop.f32.mrf.mxu2 }
 0x383   :  { %v4112_v44 = vcvt.s32.f32 %v3600_v30  ;;  %4937 = vmatpush.bf16.msrb.mxu2 %v4400_v12  ;;  %v4172_v26 = vcvt.s32.f32 %v3660_v29  ;;  %v4176_v31 = vcvt.s32.f32 %v3664_v32  ;;  %v3500_v41 = vunpack.c.0.s8 %v3228_v59  ;;  %v6615_v29 = vpop.f32.mrf.mxu1 }
 0x384   :  { %v3504_v40 = vunpack.c.1.s8 %v3228_v59  ;;  %4950 = vmatpush.bf16.msrb.mxu3 %v4432_v46  ;;  %v3948_v2 = vcvt.s32.f32 %v3436_v3  ;;  %v3952_v52 = vcvt.s32.f32 %v3440_v43  ;;  %v3588_v61 = vunpack.c.2.s8 %v6572_v38 }
 0x385   :  { %v4476_v37 = vpack.c.bf16 %v4112_v44, %v4108_v51  ;;  %v4508_v18 = vpack.c.bf16 %v4176_v31, %v4172_v26  ;;  %v4012_v17 = vcvt.s32.f32 %v3500_v41  ;;  %v3592_v25 = vunpack.c.3.s8 %v6572_v38  ;;  %v6613_v51 = vpop.f32.mrf.mxu0  ;;  %v3244_v44 = vld [vmem:[#allocation10 + $0x218] sm:$0xff]  ;;  %v4747_v31 = vpop.f32.mrf.mxu3 }
 0x386   :  { %v4016_v36 = vcvt.s32.f32 %v3504_v40  ;;  %v4396_v20 = vpack.c.bf16 %v3952_v52, %v3948_v2  ;;  %v4100_v33 = vcvt.s32.f32 %v3588_v61  ;;  %v3652_v22 = vunpack.c.2.s8 %v6574_v53  ;;  %v3284_v2 = vld [vmem:[#allocation10 + $0x358] sm:$0xff] }
 0x387   :  { %4960 = vmatpush.bf16.msra.mxu0 %v4476_v37  ;;  %v3656_v49 = vunpack.c.3.s8 %v6574_v53  ;;  %4973 = vmatpush.bf16.msra.mxu1 %v4508_v18  ;;  %v4104_v11 = vcvt.s32.f32 %v3592_v25  ;;  %v3748_v9 = vunpack.c.2.s8 %v6577_v54  ;;  %v3752_v59 = vunpack.c.3.s8 %v6577_v54 }
 0x388   :  { %v4428_v45 = vpack.c.bf16 %v4016_v36, %v4012_v17  ;;  %4938 = vmatpush.bf16.msrb.mxu2 %v4396_v20  ;;  %v4164_v7 = vcvt.s32.f32 %v3652_v22  ;;  %v3812_v15 = vunpack.c.2.s8 %v6580_v48  ;;  %v3816_v23 = vunpack.c.3.s8 %v6580_v48 }
 0x389   :  { %v4168_v62 = vcvt.s32.f32 %v3656_v49  ;;  %v4472_v55 = vpack.c.bf16 %v4104_v11, %v4100_v33  ;;  %v4260_v50 = vcvt.s32.f32 %v3748_v9  ;;  %v4264_v4 = vcvt.s32.f32 %v3752_v59  ;;  %v3300_v11 = vld [vmem:[#allocation10 + $0x3d8] sm:$0xff] }
 0x38a   :  { %4951 = vmatpush.bf16.msrb.mxu3 %v4428_v45  ;;  %v4668_v5 = vadd.f32 %v6534_v42, %v6565_v34  ;;  %v4324_v56 = vcvt.s32.f32 %v3812_v15  ;;  %v4328_v24 = vcvt.s32.f32 %v3816_v23  ;;  %v5011_v0 = vperm.slane %v6593_v57, 0  ;;  %v4734_v26 = vpop.f32.mrf.mxu2 }
 0x38b   :  { %v4504_v28 = vpack.c.bf16 %v4168_v62, %v4164_v7  ;;  %4961 = vmatpush.bf16.msra.mxu0 %v4472_v55  ;;  %v4552_v6 = vpack.c.bf16 %v4264_v4, %v4260_v50  ;;  %v5025_v60 = vperm.slane %v6600_v35, 0  ;;  %4939 = vmatmul.bf16.vlgmr.msrb.gmra.mxu2 %v6480_v8  ;;  %v3580_v63 = vunpack.c.0.s8 %v6572_v38  ;;  %v4773_v55 = vpop.f32.mrf.mxu1 }
 0x38c   :  { %v4681_v14 = vadd.f32 %v6552_v13, %v4668_v5  ;;  %v4584_v30 = vpack.c.bf16 %v4328_v24, %v4324_v56  ;;  %v3584_v42 = vunpack.c.1.s8 %v6572_v38  ;;  %v3644_v34 = vunpack.c.0.s8 %v6574_v53 }
 0x38d   :  { %4974 = vmatpush.bf16.msra.mxu1 %v4504_v28  ;;  %4952 = vmatmul.bf16.vlgmr.msrb.gmra.mxu3 %v6482_v10  ;;  %v3648_v12 = vunpack.c.1.s8 %v6574_v53  ;;  %v4092_v8 = vcvt.s32.f32 %v3580_v63  ;;  %v3740_v32 = vunpack.c.0.s8 %v6577_v54  ;;  %v3744_v46 = vunpack.c.1.s8 %v6577_v54  ;;  %v4760_v23 = vpop.f32.mrf.mxu0 }
 0x38e   :  { %4983 = vmatpush.bf16.msra.mxu2 %v4552_v6  ;;  %v4694_v13 = vadd.f32 %v6554_v47, %v4681_v14  ;;  %4996 = vmatpush.bf16.msra.mxu3 %v4584_v30  ;;  %v4096_v10 = vcvt.s32.f32 %v3584_v42  ;;  %v4156_v38 = vcvt.s32.f32 %v3644_v34  ;;  %v3804_v43 = vunpack.c.0.s8 %v6580_v48  ;;  %v3260_v47 = vld [vmem:[#allocation10 + $0x298] sm:$0xff] }
 0x38f   :  { %v4160_v3 = vcvt.s32.f32 %v3648_v12  ;;  %v4252_v40 = vcvt.s32.f32 %v3740_v32  ;;  %v4256_v53 = vcvt.s32.f32 %v3744_v46  ;;  %v3808_v37 = vunpack.c.1.s8 %v6580_v48 }
 0x390   :  { %v5019_v41 = vmul.f32 %v5011_v0, %v4694_v13  ;;  %v4468_v52 = vpack.c.bf16 %v4096_v10, %v4092_v8  ;;  %v4316_v18 = vcvt.s32.f32 %v3804_v43  ;;  %v3572_v54 = vunpack.c.2.s8 %v3244_v44  ;;  %v5055_v13 = vld [vmem:[#allocation11 + $0x30] sm:$0xff] }
 0x391   :  { %v4500_v61 = vpack.c.bf16 %v4160_v3, %v4156_v38  ;;  %v4548_v36 = vpack.c.bf16 %v4256_v53, %v4252_v40  ;;  %v4320_v25 = vcvt.s32.f32 %v3808_v37  ;;  %v3576_v20 = vunpack.c.3.s8 %v3244_v44  ;;  %v3280_v38 = vld [vmem:[#allocation10 + $0x338] sm:$0xff] }
 0x392   :  { %v6622_v17 = vadd.f32 %v5025_v60, %v5019_v41  ;;  %4962 = vmatpush.bf16.msra.mxu0 %v4468_v52  ;;  %v4084_v33 = vcvt.s32.f32 %v3572_v54  ;;  %v3636_v22 = vunpack.c.2.s8 %v3260_v47  ;;  %v3640_v49 = vunpack.c.3.s8 %v3260_v47  ;;  %v3296_v37 = vld [vmem:[#allocation10 + $0x3b8] sm:$0xff]  ;;  %v5063_v54 = vld [vmem:[#allocation11 + $0x70] sm:$0xff] }
 0x393   :  { %4975 = vmatpush.bf16.msra.mxu1 %v4500_v61  ;;  %v3732_v45 = vunpack.c.2.s8 %v3284_v2  ;;  %4984 = vmatpush.bf16.msra.mxu2 %v4548_v36  ;;  %v4580_v48 = vpack.c.bf16 %v4320_v25, %v4316_v18  ;;  %v4088_v9 = vcvt.s32.f32 %v3576_v20  ;;  %v3736_v62 = vunpack.c.3.s8 %v3284_v2 }
 0x394   :  { %v4148_v59 = vcvt.s32.f32 %v3636_v22  ;;  %v4152_v7 = vcvt.s32.f32 %v3640_v49  ;;  %v3796_v4 = vunpack.c.2.s8 %v3300_v11  ;;  %v3800_v5 = vunpack.c.3.s8 %v3300_v11 }
 0x395   :  { %v4244_v15 = vcvt.s32.f32 %v3732_v45  ;;  %4997 = vmatpush.bf16.msra.mxu3 %v4580_v48  ;;  %v4464_v50 = vpack.c.bf16 %v4088_v9, %v4084_v33  ;;  %v6625_v28 = vmul.f32 0.2, %v6622_v17  ;;  %v4248_v24 = vcvt.s32.f32 %v3736_v62 }
 0x396   :  { %v4496_v56 = vpack.c.bf16 %v4152_v7, %v4148_v59  ;;  %v3564_v0 = vunpack.c.0.s8 %v3244_v44  ;;  %v4308_v6 = vcvt.s32.f32 %v3796_v4  ;;  %v4312_v14 = vcvt.s32.f32 %v3800_v5 }
 0x397   :  { %4963 = vmatpush.bf16.msra.mxu0 %v4464_v50  ;;  %v3568_v60 = vunpack.c.1.s8 %v3244_v44  ;;  %v3628_v63 = vunpack.c.0.s8 %v3260_v47  ;;  %vm5037_vm10 = vcmp.gt.f32.partialorder %v6622_v17, 0.0  ;;  %v4544_v30 = vpack.c.bf16 %v4248_v24, %v4244_v15 }
 0x398   :  { %4976 = vmatpush.bf16.msra.mxu1 %v4496_v56  ;;  %v4076_v42 = vcvt.s32.f32 %v3564_v0  ;;  %v3632_v34 = vunpack.c.1.s8 %v3260_v47  ;;  %v3724_v12 = vunpack.c.0.s8 %v3284_v2  ;;  %v4576_v8 = vpack.c.bf16 %v4312_v14, %v4308_v6  ;;  %v5053_v14 = vld [vmem:[#allocation11 + $0x20] sm:$0xff] }
 0x399   :  { %v4080_v32 = vcvt.s32.f32 %v3568_v60  ;;  %v4140_v46 = vcvt.s32.f32 %v3628_v63  ;;  %v3728_v10 = vunpack.c.1.s8 %v3284_v2  ;;  %4985 = vmatpush.bf16.msra.mxu2 %v4544_v30  ;;  %v3788_v26 = vunpack.c.0.s8 %v3300_v11 }
 0x39a   :  { %v4144_v3 = vcvt.s32.f32 %v3632_v34  ;;  %v4236_v43 = vcvt.s32.f32 %v3724_v12  ;;  %v3792_v31 = vunpack.c.1.s8 %v3300_v11  ;;  %4998 = vmatpush.bf16.msra.mxu3 %v4576_v8  ;;  %v5109_v40 = vunpack.c.2.s8 %v5055_v13 }
 0x39b   :  { %v4460_v44 = vpack.c.bf16 %v4080_v32, %v4076_v42  ;;  %v4240_v41 = vcvt.s32.f32 %v3728_v10  ;;  %v5111_v53 = vunpack.c.3.s8 %v5055_v13  ;;  %v4300_v47 = vcvt.s32.f32 %v3788_v26 }
 0x39c   :  { %v4492_v52 = vpack.c.bf16 %v4144_v3, %v4140_v46  ;;  %v4304_v61 = vcvt.s32.f32 %v3792_v31  ;;  %v3716_v18 = vunpack.c.2.s8 %v3280_v38  ;;  %v5237_v2 = vcvt.s32.f32 %v5109_v40  ;;  %v3292_v3 = vld [vmem:[#allocation10 + $0x398] sm:$0xff]  ;;  %v5061_v40 = vld [vmem:[#allocation11 + $0x60] sm:$0xff] }
 0x39d   :  { %4964 = vmatpush.bf16.msra.mxu0 %v4460_v44  ;;  %v4540_v36 = vpack.c.bf16 %v4240_v41, %v4236_v43  ;;  %v5239_v25 = vcvt.s32.f32 %v5111_v53  ;;  %v3720_v20 = vunpack.c.3.s8 %v3280_v38  ;;  %v3780_v49 = vunpack.c.2.s8 %v3296_v37  ;;  %v6641_v43 = vpop.f32.mrf.mxu3 }
 0x39e   :  { %4977 = vmatpush.bf16.msra.mxu1 %v4492_v52  ;;  %v4572_v33 = vpack.c.bf16 %v4304_v61, %v4300_v47  ;;  %v4228_v22 = vcvt.s32.f32 %v3716_v18  ;;  %v3784_v45 = vunpack.c.3.s8 %v3296_v37  ;;  %v5141_v9 = vunpack.c.2.s8 %v5063_v54 }
 0x39f   :  { %4986 = vmatpush.bf16.msra.mxu2 %v4540_v36  ;;  %v5351_v11 = vpack.c.bf16 %v5239_v25, %v5237_v2  ;;  %v4232_v48 = vcvt.s32.f32 %v3720_v20  ;;  %v5143_v59 = vunpack.c.3.s8 %v5063_v54  ;;  %v4292_v7 = vcvt.s32.f32 %v3780_v49 }
 0x3a0   :  { %4999 = vmatpush.bf16.msra.mxu3 %v4572_v33  ;;  %4965 = vmatmul.bf16.vlgmr.msra.gmra.mxu0 %v6423_v58  ;;  %v4296_v62 = vcvt.s32.f32 %v3784_v45  ;;  %v5105_v15 = vunpack.c.0.s8 %v5055_v13  ;;  %v5107_v23 = vunpack.c.1.s8 %v5055_v13  ;;  %v5269_v50 = vcvt.s32.f32 %v5141_v9 }
 0x3a1   :  { %5405 = vmatpush.bf16.msrb.mxu0 %v5351_v11  ;;  %4978 = vmatmul.bf16.vlgmr.msra.gmra.mxu1 %v6426_v21  ;;  %v4536_v55 = vpack.c.bf16 %v4232_v48, %v4228_v22  ;;  %v5271_v4 = vcvt.s32.f32 %v5143_v59  ;;  %v4733_v5 = vadd.f32 %v6584_v39, %v6570_v1  ;;  %v3708_v6 = vunpack.c.0.s8 %v3280_v38  ;;  %v3276_v39 = vld [vmem:[#allocation10 + $0x318] sm:$0xff]  ;;  %v6646_v11 = vpop.f32.mrf.mxu0 }
 0x3a2   :  { %v4568_v56 = vpack.c.bf16 %v4296_v62, %v4292_v7  ;;  %v5233_v24 = vcvt.s32.f32 %v5105_v15  ;;  %v5235_v0 = vcvt.s32.f32 %v5107_v23  ;;  %v6636_v58 = vsel %vm5037_vm10, %v6622_v17, %v6625_v28 }
 0x3a3   :  { %4987 = vmatpush.bf16.msra.mxu2 %v4536_v55  ;;  %v5367_v60 = vpack.c.bf16 %v5271_v4, %v5269_v50  ;;  %v3712_v21 = vunpack.c.1.s8 %v3280_v38  ;;  %v3772_v63 = vunpack.c.0.s8 %v3296_v37  ;;  %v4220_v42 = vcvt.s32.f32 %v3708_v6  ;;  %v6639_v38 = vpop.f32.mrf.mxu2  ;;  %v5051_v50 = vld [vmem:[#allocation11 + $0x10] sm:$0xff] }
 0x3a4   :  { %5000 = vmatpush.bf16.msra.mxu3 %v4568_v56  ;;  %v5349_v30 = vpack.c.bf16 %v5235_v0, %v5233_v24  ;;  %v3776_v34 = vunpack.c.1.s8 %v3296_v37  ;;  %v5137_v1 = vunpack.c.0.s8 %v5063_v54  ;;  %v5139_v8 = vunpack.c.1.s8 %v5063_v54  ;;  %v5059_v0 = vld [vmem:[#allocation11 + $0x50] sm:$0xff] }
 0x3a5   :  { %5418 = vmatpush.bf16.msrb.mxu1 %v5367_v60  ;;  %v4224_v12 = vcvt.s32.f32 %v3712_v21  ;;  %v4284_v13 = vcvt.s32.f32 %v3772_v63  ;;  %v5101_v32 = vunpack.c.2.s8 %v5053_v14  ;;  %v4746_v46 = vadd.f32 %v6586_v27, %v4733_v5 }
 0x3a6   :  { %5406 = vmatpush.bf16.msrb.mxu0 %v5349_v30  ;;  %v4288_v17 = vcvt.s32.f32 %v3776_v34  ;;  %v5265_v28 = vcvt.s32.f32 %v5137_v1  ;;  %v5103_v10 = vunpack.c.3.s8 %v5053_v14  ;;  %v5267_v31 = vcvt.s32.f32 %v5139_v8 }
 0x3a7   :  { %v4532_v26 = vpack.c.bf16 %v4224_v12, %v4220_v42  ;;  %v5229_v44 = vcvt.s32.f32 %v5101_v32  ;;  %v3700_v41 = vunpack.c.2.s8 %v3276_v39  ;;  %v6644_v52 = vadd.f32 %v6613_v51, %v4746_v46  ;;  %v6648_v51 = vpop.f32.mrf.mxu1 }
 0x3a8   :  { %v4564_v53 = vpack.c.bf16 %v4288_v17, %v4284_v13  ;;  %v5231_v37 = vcvt.s32.f32 %v5103_v10  ;;  %v3704_v47 = vunpack.c.3.s8 %v3276_v39  ;;  %v5365_v27 = vpack.c.bf16 %v5267_v31, %v5265_v28 }
 0x3a9   :  { %4988 = vmatpush.bf16.msra.mxu2 %v4532_v26  ;;  %v4212_v61 = vcvt.s32.f32 %v3700_v41  ;;  %v3764_v18 = vunpack.c.2.s8 %v3292_v3  ;;  %v3768_v54 = vunpack.c.3.s8 %v3292_v3  ;;  %v5133_v25 = vunpack.c.2.s8 %v5061_v40 }
 0x3aa   :  { %5001 = vmatpush.bf16.msra.mxu3 %v4564_v53  ;;  %v5347_v36 = vpack.c.bf16 %v5231_v37, %v5229_v44  ;;  %v4216_v2 = vcvt.s32.f32 %v3704_v47  ;;  %v5135_v20 = vunpack.c.3.s8 %v5061_v40  ;;  %5419 = vmatpush.bf16.msrb.mxu1 %v5365_v27  ;;  %v5097_v49 = vunpack.c.0.s8 %v5053_v14  ;;  %v4812_v53 = vpop.f32.mrf.mxu0 }
 0x3ab   :  { %v4276_v33 = vcvt.s32.f32 %v3764_v18  ;;  %v4280_v22 = vcvt.s32.f32 %v3768_v54  ;;  %v5099_v45 = vunpack.c.1.s8 %v5053_v14  ;;  %v5261_v9 = vcvt.s32.f32 %v5133_v25  ;;  %v4786_v6 = vpop.f32.mrf.mxu2  ;;  %v4799_v14 = vpop.f32.mrf.mxu3 }
 0x3ac   :  { %5407 = vmatpush.bf16.msrb.mxu0 %v5347_v36  ;;  %v4528_v48 = vpack.c.bf16 %v4216_v2, %v4212_v61  ;;  %v5263_v59 = vcvt.s32.f32 %v5135_v20  ;;  %v3692_v7 = vunpack.c.0.s8 %v3276_v39  ;;  %v5225_v15 = vcvt.s32.f32 %v5097_v49 }
 0x3ad   :  { %v4560_v62 = vpack.c.bf16 %v4280_v22, %v4276_v33  ;;  %v5227_v23 = vcvt.s32.f32 %v5099_v45  ;;  %v3696_v55 = vunpack.c.1.s8 %v3276_v39  ;;  %v3756_v56 = vunpack.c.0.s8 %v3292_v3  ;;  %v5056_v45 = vld [vmem:[#allocation11 + $0x38] sm:$0xff] }
 0x3ae   :  { %4989 = vmatpush.bf16.msra.mxu2 %v4528_v48  ;;  %v5363_v4 = vpack.c.bf16 %v5263_v59, %v5261_v9  ;;  %v4204_v5 = vcvt.s32.f32 %v3692_v7  ;;  %v3760_v24 = vunpack.c.1.s8 %v3292_v3  ;;  %v5129_v63 = vunpack.c.0.s8 %v5061_v40  ;;  %v5049_v3 = vld [vmem:[#allocation11] sm:$0xff] }
 0x3af   :  { %5002 = vmatpush.bf16.msra.mxu3 %v4560_v62  ;;  %v5345_v60 = vpack.c.bf16 %v5227_v23, %v5225_v15  ;;  %v4208_v21 = vcvt.s32.f32 %v3696_v55  ;;  %v5131_v30 = vunpack.c.1.s8 %v5061_v40  ;;  %v4268_v42 = vcvt.s32.f32 %v3756_v56  ;;  %v5057_v40 = vld [vmem:[#allocation11 + $0x40] sm:$0xff]  ;;  %v4825_v37 = vpop.f32.mrf.mxu1 }
 0x3b0   :  { %5420 = vmatpush.bf16.msrb.mxu1 %v5363_v4  ;;  %v4272_v34 = vcvt.s32.f32 %v3760_v24  ;;  %v5093_v1 = vunpack.c.2.s8 %v5051_v50  ;;  %v5095_v12 = vunpack.c.3.s8 %v5051_v50  ;;  %v5257_v13 = vcvt.s32.f32 %v5129_v63 }
 0x3b1   :  { %5408 = vmatpush.bf16.msrb.mxu0 %v5345_v60  ;;  %v4524_v39 = vpack.c.bf16 %v4208_v21, %v4204_v5  ;;  %v5259_v8 = vcvt.s32.f32 %v5131_v30  ;;  %v5125_v32 = vunpack.c.2.s8 %v5059_v0  ;;  %v5127_v10 = vunpack.c.3.s8 %v5059_v0 }
 0x3b2   :  { %v4556_v46 = vpack.c.bf16 %v4272_v34, %v4268_v42  ;;  %v5221_v17 = vcvt.s32.f32 %v5093_v1  ;;  %v5223_v28 = vcvt.s32.f32 %v5095_v12  ;;  %v5089_v44 = vunpack.c.0.s8 %v5051_v50 }
 0x3b3   :  { %4990 = vmatpush.bf16.msra.mxu2 %v4524_v39  ;;  %v5361_v26 = vpack.c.bf16 %v5259_v8, %v5257_v13  ;;  %v5253_v31 = vcvt.s32.f32 %v5125_v32  ;;  %v5091_v41 = vunpack.c.1.s8 %v5051_v50  ;;  %v5255_v27 = vcvt.s32.f32 %v5127_v10  ;;  %v5064_v50 = vld [vmem:[#allocation11 + $0x78] sm:$0xff]  ;;  %v5054_v32 = vld [vmem:[#allocation11 + $0x28] sm:$0xff] }
 0x3b4   :  { %5003 = vmatpush.bf16.msra.mxu3 %v4556_v46  ;;  %v5343_v47 = vpack.c.bf16 %v5223_v28, %v5221_v17  ;;  %v5121_v61 = vunpack.c.0.s8 %v5059_v0  ;;  %v5123_v18 = vunpack.c.1.s8 %v5059_v0  ;;  %v5217_v54 = vcvt.s32.f32 %v5089_v44 }
 0x3b5   :  { %5421 = vmatpush.bf16.msrb.mxu1 %v5361_v26  ;;  %v5219_v36 = vcvt.s32.f32 %v5091_v41  ;;  %v5085_v2 = vunpack.c.2.s8 %v5049_v3  ;;  %v5087_v25 = vunpack.c.3.s8 %v5049_v3  ;;  %v5359_v20 = vpack.c.bf16 %v5255_v27, %v5253_v31  ;;  %v5062_v31 = vld [vmem:[#allocation11 + $0x68] sm:$0xff] }
 0x3b6   :  { %5409 = vmatpush.bf16.msrb.mxu0 %v5343_v47  ;;  %4991 = vmatmul.bf16.vlgmr.msra.gmra.mxu2 %v6505_v19  ;;  %v5249_v33 = vcvt.s32.f32 %v5121_v61  ;;  %v5251_v22 = vcvt.s32.f32 %v5123_v18  ;;  %v5117_v49 = vunpack.c.2.s8 %v5057_v40  ;;  %v5119_v7 = vunpack.c.3.s8 %v5057_v40 }
 0x3b7   :  { %5004 = vmatmul.bf16.vlgmr.msra.gmra.mxu3 %v6508_v16  ;;  %v5341_v48 = vpack.c.bf16 %v5219_v36, %v5217_v54  ;;  %v5213_v9 = vcvt.s32.f32 %v5085_v2  ;;  %v5215_v59 = vcvt.s32.f32 %v5087_v25  ;;  %v5081_v23 = vunpack.c.0.s8 %v5049_v3 }
 0x3b8   :  { %v5357_v62 = vpack.c.bf16 %v5251_v22, %v5249_v33  ;;  %v5245_v15 = vcvt.s32.f32 %v5117_v49  ;;  %v5083_v55 = vunpack.c.1.s8 %v5049_v3  ;;  %v5247_v5 = vcvt.s32.f32 %v5119_v7 }
 0x3b9   :  { %5422 = vmatpush.bf16.msrb.mxu1 %v5359_v20  ;;  %v5339_v4 = vpack.c.bf16 %v5215_v59, %v5213_v9  ;;  %v5110_v19 = vunpack.c.2.s8 %v5056_v45  ;;  %v5112_v56 = vunpack.c.3.s8 %v5056_v45  ;;  %v5209_v24 = vcvt.s32.f32 %v5081_v23  ;;  %v5052_v9 = vld [vmem:[#allocation11 + $0x18] sm:$0xff] }
 0x3ba   :  { %5410 = vmatpush.bf16.msrb.mxu0 %v5341_v48  ;;  %v5211_v0 = vcvt.s32.f32 %v5083_v55  ;;  %v5113_v6 = vunpack.c.0.s8 %v5057_v40  ;;  %v5115_v14 = vunpack.c.1.s8 %v5057_v40  ;;  %v4772_v16 = vadd.f32 %v6615_v29, %v6644_v52 }
 0x3bb   :  { %v5238_v60 = vcvt.s32.f32 %v5110_v19  ;;  %v5240_v21 = vcvt.s32.f32 %v5112_v56  ;;  %v5142_v63 = vunpack.c.2.s8 %v5064_v50  ;;  %v5355_v30 = vpack.c.bf16 %v5247_v5, %v5245_v15 }
 0x3bc   :  { %v5241_v42 = vcvt.s32.f32 %v5113_v6  ;;  %v5243_v34 = vcvt.s32.f32 %v5115_v14  ;;  %v5144_v1 = vunpack.c.3.s8 %v5064_v50  ;;  %v5337_v12 = vpack.c.bf16 %v5211_v0, %v5209_v24 }
 0x3bd   :  { %5423 = vmatpush.bf16.msrb.mxu1 %v5357_v62  ;;  %v5270_v39 = vcvt.s32.f32 %v5142_v63  ;;  %v4785_v13 = vadd.f32 %v6639_v38, %v4772_v16  ;;  %v5012_v8 = vperm.slane %v6593_v57, 1  ;;  %v5352_v46 = vpack.c.bf16 %v5240_v21, %v5238_v60  ;;  %v6658_v2 = vpop.f32.mrf.mxu2 }
 0x3be   :  { %5411 = vmatpush.bf16.msrb.mxu0 %v5339_v4  ;;  %v5272_v17 = vcvt.s32.f32 %v5144_v1  ;;  %v5026_v29 = vperm.slane %v6600_v35, 1  ;;  %v5106_v52 = vunpack.c.0.s8 %v5056_v45  ;;  %v5108_v10 = vunpack.c.1.s8 %v5056_v45 }
 0x3bf   :  { %v4798_v28 = vadd.f32 %v6641_v43, %v4785_v13  ;;  %v5138_v3 = vunpack.c.0.s8 %v5064_v50  ;;  %v5140_v26 = vunpack.c.1.s8 %v5064_v50  ;;  %v5353_v44 = vpack.c.bf16 %v5243_v34, %v5241_v42  ;;  %v6660_v43 = vpop.f32.mrf.mxu3  ;;  %v5060_v50 = vld [vmem:[#allocation11 + $0x58] sm:$0xff] }
 0x3c0   :  { %v5234_v41 = vcvt.s32.f32 %v5106_v52  ;;  %v5102_v40 = vunpack.c.2.s8 %v5054_v32  ;;  %v5104_v53 = vunpack.c.3.s8 %v5054_v32  ;;  %v5368_v38 = vpack.c.bf16 %v5272_v17, %v5270_v39  ;;  %v5058_v52 = vld [vmem:[#allocation11 + $0x48] sm:$0xff] }
 0x3c1   :  { %5424 = vmatpush.bf16.msrb.mxu1 %v5355_v30  ;;  %v5020_v37 = vmul.f32 %v5012_v8, %v4798_v28  ;;  %v5236_v47 = vcvt.s32.f32 %v5108_v10  ;;  %v5266_v27 = vcvt.s32.f32 %v5138_v3  ;;  %v5268_v61 = vcvt.s32.f32 %v5140_v26 }
 0x3c2   :  { %5412 = vmatpush.bf16.msrb.mxu0 %v5337_v12  ;;  %v5230_v18 = vcvt.s32.f32 %v5102_v40  ;;  %v5232_v54 = vcvt.s32.f32 %v5104_v53  ;;  %v5134_v36 = vunpack.c.2.s8 %v5062_v31  ;;  %v6664_v25 = vpack.c.bf16 %v6636_v58, %v6636_v58 }
 0x3c3   :  { %v5034_v20 = vadd.f32 %v5026_v29, %v5020_v37  ;;  %v5350_v33 = vpack.c.bf16 %v5236_v47, %v5234_v41  ;;  %v5136_v22 = vunpack.c.3.s8 %v5062_v31  ;;  %v5098_v45 = vunpack.c.0.s8 %v5054_v32 }
 0x3c4   :  { %v5262_v49 = vcvt.s32.f32 %v5134_v36  ;;  %v5100_v48 = vunpack.c.1.s8 %v5054_v32  ;;  %v5130_v62 = vunpack.c.0.s8 %v5062_v31  ;;  %v5366_v15 = vpack.c.bf16 %v5268_v61, %v5266_v27  ;;  %v5050_v32 = vld [vmem:[#allocation11 + $0x8] sm:$0xff] }
 0x3c5   :  { %5413 = vmatmul.bf16.vlgmr.msrb.gmra.mxu0 %v6664_v25  ;;  %5425 = vmatpush.bf16.msrb.mxu1 %v5353_v44  ;;  %vm5038_vm11 = vcmp.gt.f32.partialorder %v5034_v20, 0.0  ;;  %v5042_v59 = vmul.f32 0.2, %v5034_v20  ;;  %v5264_v7 = vcvt.s32.f32 %v5136_v22  ;;  %v5348_v23 = vpack.c.bf16 %v5232_v54, %v5230_v18  ;;  %v4838_v12 = vpop.f32.mrf.mxu2 }
 0x3c6   :  { %5457 = vmatpush.bf16.msra.mxu0 %v5352_v46  ;;  %v5226_v58 = vcvt.s32.f32 %v5098_v45  ;;  %v5132_v55 = vunpack.c.1.s8 %v5062_v31  ;;  %v5228_v5 = vcvt.s32.f32 %v5100_v48  ;;  %v5094_v19 = vunpack.c.2.s8 %v5052_v9  ;;  %v5071_v31 = vld [vmem:[#allocation11 + $0xb0] sm:$0xff] }
 0x3c7   :  { %v5046_v4 = vsel %vm5038_vm11, %v5034_v20, %v5042_v59  ;;  %v5096_v56 = vunpack.c.3.s8 %v5052_v9  ;;  %v5364_v0 = vpack.c.bf16 %v5264_v7, %v5262_v49  ;;  %v5258_v14 = vcvt.s32.f32 %v5130_v62  ;;  %v4851_v46 = vpop.f32.mrf.mxu3  ;;  %v5067_v12 = vld [vmem:[#allocation11 + $0x90] sm:$0xff] }
 0x3c8   :  { %v6667_v24 = vpack.c.bf16 %v5046_v4, %v5046_v4  ;;  %v5126_v16 = vunpack.c.2.s8 %v5060_v50  ;;  %v5128_v60 = vunpack.c.3.s8 %v5060_v50  ;;  %v5090_v21 = vunpack.c.0.s8 %v5052_v9 }
 0x3c9   :  { %5470 = vmatpush.bf16.msra.mxu1 %v5368_v38  ;;  %v6669_v6 = vpop.f32.mrf.mxu0  ;;  %v5260_v63 = vcvt.s32.f32 %v5132_v55  ;;  %v5092_v30 = vunpack.c.1.s8 %v5052_v9  ;;  %v5122_v42 = vunpack.c.0.s8 %v5060_v50  ;;  %v5124_v34 = vunpack.c.1.s8 %v5060_v50 }
 0x3ca   :  { %5458 = vmatpush.bf16.msra.mxu0 %v5350_v33  ;;  %v6671_v1 = vpop.f32.mrf.mxu1  ;;  %v5346_v39 = vpack.c.bf16 %v5228_v5, %v5226_v58  ;;  %v5222_v13 = vcvt.s32.f32 %v5094_v19  ;;  %v5224_v8 = vcvt.s32.f32 %v5096_v56  ;;  %5426 = vmatmul.bf16.vlgmr.msrb.gmra.mxu1 %v6667_v24  ;;  %v5254_v17 = vcvt.s32.f32 %v5126_v16  ;;  %v5069_v33 = vld [vmem:[#allocation11 + $0xa0] sm:$0xff] }
 0x3cb   :  { %v5256_v29 = vcvt.s32.f32 %v5128_v60  ;;  %v5218_v28 = vcvt.s32.f32 %v5090_v21  ;;  %v5220_v10 = vcvt.s32.f32 %v5092_v30  ;;  %v5250_v3 = vcvt.s32.f32 %v5122_v42 }
 0x3cc   :  { %v5252_v26 = vcvt.s32.f32 %v5124_v34  ;;  %v5362_v44 = vpack.c.bf16 %v5260_v63, %v5258_v14  ;;  %v5086_v41 = vunpack.c.2.s8 %v5050_v32  ;;  %v5088_v40 = vunpack.c.3.s8 %v5050_v32 }
 0x3cd   :  { %5471 = vmatpush.bf16.msra.mxu1 %v5366_v15  ;;  %v5344_v53 = vpack.c.bf16 %v5224_v8, %v5222_v13  ;;  %v5118_v38 = vunpack.c.2.s8 %v5058_v52  ;;  %v5120_v37 = vunpack.c.3.s8 %v5058_v52  ;;  %v5082_v47 = vunpack.c.0.s8 %v5050_v32 }
 0x3ce   :  { %5459 = vmatpush.bf16.msra.mxu0 %v5348_v23  ;;  %v5173_v27 = vunpack.c.2.s8 %v5071_v31  ;;  %v5360_v18 = vpack.c.bf16 %v5256_v29, %v5254_v17  ;;  %v5342_v54 = vpack.c.bf16 %v5220_v10, %v5218_v28  ;;  %v5358_v36 = vpack.c.bf16 %v5252_v26, %v5250_v3 }
 0x3cf   :  { %v5175_v20 = vunpack.c.3.s8 %v5071_v31  ;;  %v5214_v22 = vcvt.s32.f32 %v5086_v41  ;;  %v5216_v49 = vcvt.s32.f32 %v5088_v40  ;;  %v5084_v45 = vunpack.c.1.s8 %v5050_v32  ;;  %v5065_v40 = vld [vmem:[#allocation11 + $0x80] sm:$0xff] }
 0x3d0   :  { %v5301_v48 = vcvt.s32.f32 %v5173_v27  ;;  %v5246_v59 = vcvt.s32.f32 %v5118_v38  ;;  %v5169_v62 = vunpack.c.0.s8 %v5071_v31  ;;  %v5171_v15 = vunpack.c.1.s8 %v5071_v31 }
 0x3d1   :  { %5472 = vmatpush.bf16.msra.mxu1 %v5364_v0  ;;  %v4864_v61 = vpop.f32.mrf.mxu0  ;;  %v5303_v7 = vcvt.s32.f32 %v5175_v20  ;;  %v5248_v23 = vcvt.s32.f32 %v5120_v37  ;;  %v5210_v58 = vcvt.s32.f32 %v5082_v47  ;;  %v5165_v55 = vunpack.c.2.s8 %v5069_v33 }
 0x3d2   :  { %5460 = vmatpush.bf16.msra.mxu0 %v5346_v39  ;;  %v4877_v9 = vpop.f32.mrf.mxu1  ;;  %v5167_v50 = vunpack.c.3.s8 %v5069_v33  ;;  %v5114_v4 = vunpack.c.0.s8 %v5058_v52  ;;  %v5297_v19 = vcvt.s32.f32 %v5169_v62  ;;  %v5299_v56 = vcvt.s32.f32 %v5171_v15  ;;  %v5072_v61 = vld [vmem:[#allocation11 + $0xb8] sm:$0xff] }
 0x3d3   :  { %v5383_v5 = vpack.c.bf16 %v5303_v7, %v5301_v48  ;;  %v5340_v0 = vpack.c.bf16 %v5216_v49, %v5214_v22  ;;  %v5212_v14 = vcvt.s32.f32 %v5084_v45  ;;  %v5116_v16 = vunpack.c.1.s8 %v5058_v52 }
 0x3d4   :  { %v5161_v60 = vunpack.c.0.s8 %v5069_v33  ;;  %v5381_v21 = vpack.c.bf16 %v5299_v56, %v5297_v19  ;;  %v5293_v63 = vcvt.s32.f32 %v5165_v55  ;;  %v5295_v30 = vcvt.s32.f32 %v5167_v50  ;;  %v5070_v50 = vld [vmem:[#allocation11 + $0xa8] sm:$0xff] }
 0x3d5   :  { %5473 = vmatpush.bf16.msra.mxu1 %v5362_v44  ;;  %5431 = vmatpush.bf16.msrb.mxu2 %v5383_v5  ;;  %v5163_v42 = vunpack.c.1.s8 %v5069_v33  ;;  %v4824_v34 = vadd.f32 %v6648_v51, %v6646_v11  ;;  %v5356_v39 = vpack.c.bf16 %v5248_v23, %v5246_v59  ;;  %v5242_v13 = vcvt.s32.f32 %v5114_v4 }
 0x3d6   :  { %5461 = vmatpush.bf16.msra.mxu0 %v5344_v53  ;;  %v5338_v8 = vpack.c.bf16 %v5212_v14, %v5210_v58  ;;  %v5244_v32 = vcvt.s32.f32 %v5116_v16  ;;  %v5289_v17 = vcvt.s32.f32 %v5161_v60  ;;  %v5379_v29 = vpack.c.bf16 %v5295_v30, %v5293_v63  ;;  %v5079_v63 = vld [vmem:[#allocation11 + $0xf0] sm:$0xff] }
 0x3d7   :  { %v4837_v46 = vadd.f32 %v6658_v2, %v4824_v34  ;;  %v5291_v52 = vcvt.s32.f32 %v5163_v42  ;;  %v5157_v28 = vunpack.c.2.s8 %v5067_v12  ;;  %v5159_v10 = vunpack.c.3.s8 %v5067_v12 }
 0x3d8   :  { %v5354_v3 = vpack.c.bf16 %v5244_v32, %v5242_v13  ;;  %v5153_v11 = vunpack.c.0.s8 %v5067_v12  ;;  %v5155_v41 = vunpack.c.1.s8 %v5067_v12  ;;  %v5149_v53 = vunpack.c.2.s8 %v5065_v40 }
 0x3d9   :  { %5474 = vmatpush.bf16.msra.mxu1 %v5360_v18  ;;  %5432 = vmatpush.bf16.msrb.mxu2 %v5381_v21  ;;  %v4850_v26 = vadd.f32 %v6660_v43, %v4837_v46  ;;  %v5377_v51 = vpack.c.bf16 %v5291_v52, %v5289_v17  ;;  %v5285_v31 = vcvt.s32.f32 %v5157_v28  ;;  %v5287_v44 = vcvt.s32.f32 %v5159_v10  ;;  %v5068_v10 = vld [vmem:[#allocation11 + $0x98] sm:$0xff] }
 0x3da   :  { %5462 = vmatpush.bf16.msra.mxu0 %v5342_v54  ;;  %v5281_v37 = vcvt.s32.f32 %v5153_v11  ;;  %v5283_v47 = vcvt.s32.f32 %v5155_v41  ;;  %v5151_v27 = vunpack.c.3.s8 %v5065_v40  ;;  %v5277_v54 = vcvt.s32.f32 %v5149_v53 }
 0x3db   :  { %v4863_v2 = vadd.f32 %v6669_v6, %v4850_v26  ;;  %v5375_v38 = vpack.c.bf16 %v5287_v44, %v5285_v31  ;;  %v5013_v6 = vperm.slane %v6593_v57, 2  ;;  %v5147_v22 = vunpack.c.1.s8 %v5065_v40 }
 0x3dc   :  { %v5279_v33 = vcvt.s32.f32 %v5151_v27  ;;  %v5174_v49 = vunpack.c.2.s8 %v5072_v61  ;;  %v5176_v48 = vunpack.c.3.s8 %v5072_v61  ;;  %v5027_v59 = vperm.slane %v6600_v35, 2 }
 0x3dd   :  { %5475 = vmatpush.bf16.msra.mxu1 %v5358_v36  ;;  %5433 = vmatpush.bf16.msrb.mxu2 %v5379_v29  ;;  %v4876_v43 = vadd.f32 %v6671_v1, %v4863_v2  ;;  %v5145_v36 = vunpack.c.0.s8 %v5065_v40  ;;  %v5275_v62 = vcvt.s32.f32 %v5147_v22  ;;  %v5170_v55 = vunpack.c.0.s8 %v5072_v61  ;;  %v5077_v22 = vld [vmem:[#allocation11 + $0xe0] sm:$0xff] }
 0x3de   :  { %5463 = vmatpush.bf16.msra.mxu0 %v5340_v0  ;;  %v5371_v7 = vpack.c.bf16 %v5279_v33, %v5277_v54  ;;  %v5302_v15 = vcvt.s32.f32 %v5174_v49  ;;  %v5304_v23 = vcvt.s32.f32 %v5176_v48  ;;  %v5172_v57 = vunpack.c.1.s8 %v5072_v61  ;;  %v5066_v54 = vld [vmem:[#allocation11 + $0x88] sm:$0xff] }
 0x3df   :  { %v5166_v56 = vunpack.c.2.s8 %v5070_v50  ;;  %v5168_v0 = vunpack.c.3.s8 %v5070_v50  ;;  %v5298_v60 = vcvt.s32.f32 %v5170_v55  ;;  %v5205_v42 = vunpack.c.2.s8 %v5079_v63 }
 0x3e0   :  { %v5384_v35 = vpack.c.bf16 %v5304_v23, %v5302_v15  ;;  %v5300_v21 = vcvt.s32.f32 %v5172_v57  ;;  %v5207_v34 = vunpack.c.3.s8 %v5079_v63  ;;  %v5162_v13 = vunpack.c.0.s8 %v5070_v50 }
 0x3e1   :  { %5476 = vmatpush.bf16.msra.mxu1 %v5356_v39  ;;  %5434 = vmatpush.bf16.msrb.mxu2 %v5377_v51  ;;  %v5333_v32 = vcvt.s32.f32 %v5205_v42  ;;  %v5201_v17 = vunpack.c.0.s8 %v5079_v63  ;;  %v5294_v52 = vcvt.s32.f32 %v5166_v56  ;;  %v5296_v28 = vcvt.s32.f32 %v5168_v0 }
 0x3e2   :  { %5464 = vmatpush.bf16.msra.mxu0 %v5338_v8  ;;  %v5164_v8 = vunpack.c.1.s8 %v5070_v50  ;;  %v5335_v46 = vcvt.s32.f32 %v5207_v34  ;;  %v5382_v29 = vpack.c.bf16 %v5300_v21, %v5298_v60  ;;  %v5290_v31 = vcvt.s32.f32 %v5162_v13 }
 0x3e3   :  { %v5329_v11 = vcvt.s32.f32 %v5201_v17  ;;  %v5158_v44 = vunpack.c.2.s8 %v5068_v10  ;;  %v5380_v41 = vpack.c.bf16 %v5296_v28, %v5294_v52  ;;  %v5160_v2 = vunpack.c.3.s8 %v5068_v10  ;;  %v5080_v17 = vld [vmem:[#allocation11 + $0xf8] sm:$0xff] }
 0x3e4   :  { %v5399_v26 = vpack.c.bf16 %v5335_v46, %v5333_v32  ;;  %v5292_v40 = vcvt.s32.f32 %v5164_v8  ;;  %v5156_v27 = vunpack.c.1.s8 %v5068_v10  ;;  %v5152_v33 = vunpack.c.3.s8 %v5066_v54 }
 0x3e5   :  { %5465 = vmatmul.bf16.vlgmr.msra.gmra.mxu0 %v6664_v25  ;;  %5477 = vmatpush.bf16.msra.mxu1 %v5354_v3  ;;  %v4888_v18 = vpop.f32.mrf.mxu2  ;;  %v5373_v25 = vpack.c.bf16 %v5283_v47, %v5281_v37  ;;  %v5203_v3 = vunpack.c.1.s8 %v5079_v63  ;;  %v5154_v47 = vunpack.c.0.s8 %v5068_v10  ;;  %v5286_v61 = vcvt.s32.f32 %v5158_v44 }
 0x3e6   :  { %v4889_v20 = vadd.f32 %v4888_v18, %v4876_v43  ;;  %5435 = vmatpush.bf16.msrb.mxu2 %v5375_v38  ;;  %5444 = vmatpush.bf16.msrb.mxu3 %v5399_v26  ;;  %v5378_v43 = vpack.c.bf16 %v5292_v40, %v5290_v31  ;;  %v5288_v18 = vcvt.s32.f32 %v5160_v2  ;;  %v5197_v49 = vunpack.c.2.s8 %v5077_v22 }
 0x3e7   :  { %v4901_v45 = vpop.f32.mrf.mxu3  ;;  %v5331_v51 = vcvt.s32.f32 %v5203_v3  ;;  %v5193_v48 = vunpack.c.0.s8 %v5077_v22  ;;  %v5280_v23 = vcvt.s32.f32 %v5152_v33  ;;  %v5148_v55 = vunpack.c.1.s8 %v5066_v54 }
 0x3e8   :  { %5478 = vmatmul.bf16.vlgmr.msra.gmra.mxu1 %v6667_v24  ;;  %v4902_v9 = vadd.f32 %v4901_v45, %v4889_v20  ;;  %v5273_v24 = vcvt.s32.f32 %v5145_v36  ;;  %v5282_v36 = vcvt.s32.f32 %v5154_v47  ;;  %v5284_v20 = vcvt.s32.f32 %v5156_v27 }
 0x3e9   :  { %v5397_v53 = vpack.c.bf16 %v5331_v51, %v5329_v11  ;;  %v5199_v45 = vunpack.c.3.s8 %v5077_v22  ;;  %v5276_v60 = vcvt.s32.f32 %v5148_v55  ;;  %v5206_v51 = vunpack.c.2.s8 %v5080_v17 }
 0x3ea   :  { %v5021_v1 = vmul.f32 %v5013_v6, %v4902_v9  ;;  %5436 = vmatpush.bf16.msrb.mxu2 %v5373_v25  ;;  %v5369_v19 = vpack.c.bf16 %v5275_v62, %v5273_v24  ;;  %v5376_v6 = vpack.c.bf16 %v5288_v18, %v5286_v61  ;;  %v5150_v25 = vunpack.c.2.s8 %v5066_v54 }
 0x3eb   :  { %5445 = vmatpush.bf16.msrb.mxu3 %v5397_v53  ;;  %v5195_v9 = vunpack.c.1.s8 %v5077_v22  ;;  %v5321_v24 = vcvt.s32.f32 %v5193_v48  ;;  %v5208_v31 = vunpack.c.3.s8 %v5080_v17  ;;  %v5334_v2 = vcvt.s32.f32 %v5206_v51 }
 0x3ec   :  { %v5035_v58 = vadd.f32 %v5027_v59, %v5021_v1  ;;  %v5374_v59 = vpack.c.bf16 %v5284_v20, %v5282_v36  ;;  %v5325_v1 = vcvt.s32.f32 %v5197_v49  ;;  %v5278_v15 = vcvt.s32.f32 %v5150_v25  ;;  %v5078_v20 = vld [vmem:[#allocation11 + $0xe8] sm:$0xff] }
 0x3ed   :  { %v4890_v4 = vpop.f32.mrf.mxu2  ;;  %v5323_v62 = vcvt.s32.f32 %v5195_v9  ;;  %v5336_v53 = vcvt.s32.f32 %v5208_v31  ;;  %v5204_v36 = vunpack.c.1.s8 %v5080_v17  ;;  %v5200_v25 = vunpack.c.3.s8 %v5078_v20 }
 0x3ee   :  { %vm5039_vm12 = vcmp.gt.f32.partialorder %v5035_v58, 0.0  ;;  %v5043_v5 = vmul.f32 0.2, %v5035_v58  ;;  %5437 = vmatpush.bf16.msrb.mxu2 %v5371_v7  ;;  %v5327_v7 = vcvt.s32.f32 %v5199_v45  ;;  %v5075_v4 = vld [vmem:[#allocation11 + $0xd0] sm:$0xff]  ;;  %v5194_v33 = vunpack.c.0.s8 %v5078_v20 }
 0x3ef   :  { %v4903_v14 = vpop.f32.mrf.mxu3  ;;  %v5393_v50 = vpack.c.bf16 %v5323_v62, %v5321_v24  ;;  %v5185_v56 = vunpack.c.0.s8 %v5075_v4  ;;  %v5187_v0 = vunpack.c.1.s8 %v5075_v4  ;;  %v5400_v27 = vpack.c.bf16 %v5336_v53, %v5334_v2  ;;  %v5076_v24 = vld [vmem:[#allocation11 + $0xd8] sm:$0xff] }
 0x3f0   :  { %v5047_v16 = vsel %vm5039_vm12, %v5035_v58, %v5043_v5  ;;  %v5146_v58 = vunpack.c.0.s8 %v5066_v54  ;;  %v5395_v57 = vpack.c.bf16 %v5327_v7, %v5325_v1  ;;  %v5189_v5 = vunpack.c.2.s8 %v5075_v4  ;;  %v5073_v14 = vld [vmem:[#allocation11 + $0xc0] sm:$0xff] }
 0x3f1   :  { %v6684_v30 = vpop.f32.mrf.mxu0  ;;  %v6686_v12 = vpack.c.bf16 %v5047_v16, %v5047_v16  ;;  %v5181_v42 = vunpack.c.2.s8 %v5073_v14  ;;  %v5313_v13 = vcvt.s32.f32 %v5185_v56  ;;  %v5315_v8 = vcvt.s32.f32 %v5187_v0  ;;  %v5074_v56 = vld [vmem:[#allocation11 + $0xc8] sm:$0xff] }
 0x3f2   :  { %v6688_v39 = vpop.f32.mrf.mxu1  ;;  %5438 = vmatpush.bf16.msrb.mxu2 %v5369_v19  ;;  %5446 = vmatpush.bf16.msrb.mxu3 %v5395_v57  ;;  %v5191_v19 = vunpack.c.3.s8 %v5075_v4  ;;  %v5274_v16 = vcvt.s32.f32 %v5146_v58  ;;  %v5317_v21 = vcvt.s32.f32 %v5189_v5  ;;  %v5183_v32 = vunpack.c.3.s8 %v5073_v14 }
 0x3f3   :  { %v5177_v52 = vunpack.c.0.s8 %v5073_v14  ;;  %v5389_v10 = vpack.c.bf16 %v5315_v8, %v5313_v13  ;;  %v5309_v3 = vcvt.s32.f32 %v5181_v42  ;;  %v5179_v11 = vunpack.c.1.s8 %v5073_v14 }
 0x3f4   :  { %v5319_v63 = vcvt.s32.f32 %v5191_v19  ;;  %v5370_v46 = vpack.c.bf16 %v5276_v60, %v5274_v16  ;;  %v5311_v26 = vcvt.s32.f32 %v5183_v32  ;;  %v5202_v54 = vunpack.c.0.s8 %v5080_v17 }
 0x3f5   :  { %5439 = vmatmul.bf16.vlgmr.msrb.gmra.mxu2 %v6686_v12  ;;  %v5307_v40 = vcvt.s32.f32 %v5179_v11  ;;  %v5196_v22 = vunpack.c.1.s8 %v5078_v20  ;;  %v5332_v45 = vcvt.s32.f32 %v5204_v36  ;;  %v5328_v9 = vcvt.s32.f32 %v5200_v25  ;;  %v5723_v11 = vld [vmem:[%s6720_s8] sm:$0xf] }
 0x3f6   :  { %5483 = vmatpush.bf16.msra.mxu2 %v5384_v35  ;;  %v5372_v35 = vpack.c.bf16 %v5280_v23, %v5278_v15  ;;  %5447 = vmatpush.bf16.msrb.mxu3 %v5393_v50  ;;  %v5391_v34 = vpack.c.bf16 %v5319_v63, %v5317_v21  ;;  %v5387_v44 = vpack.c.bf16 %v5311_v26, %v5309_v3  ;;  %v5330_v49 = vcvt.s32.f32 %v5202_v54 }
 0x3f7   :  { %v5322_v1 = vcvt.s32.f32 %v5194_v33  ;;  %v5324_v7 = vcvt.s32.f32 %v5196_v22  ;;  %v5190_v15 = vunpack.c.2.s8 %v5076_v24  ;;  %v5192_v23 = vunpack.c.3.s8 %v5076_v24  ;;  %v5546_v22 = vld [vmem:[#allocation14 + $0x78] sm:$0xff] }
 0x3f8   :  { %v4928_v58 = vadd.f32 %v6688_v39, %v6684_v30  ;;  %v5186_v5 = vunpack.c.0.s8 %v5076_v24  ;;  %v5188_v19 = vunpack.c.1.s8 %v5076_v24  ;;  %v5182_v14 = vunpack.c.2.s8 %v5074_v56  ;;  %5567 = vmatpush.msrb.mxu0 %v5546_v22  ;;  %v5542_v24 = vld [vmem:[#allocation14 + $0x58] sm:$0xff] }
 0x3f9   :  { %v4916_v38 = vpop.f32.mrf.mxu0  ;;  %v5394_v57 = vpack.c.bf16 %v5324_v7, %v5322_v1  ;;  %v5318_v50 = vcvt.s32.f32 %v5190_v15  ;;  %v5320_v4 = vcvt.s32.f32 %v5192_v23  ;;  %v5184_v21 = vunpack.c.3.s8 %v5074_v56  ;;  %v5543_v1 = vld [vmem:[#allocation14 + $0x60] sm:$0xff]  ;;  %v5560_v7 = vld [vmem:[#allocation14 + $0xe8] sm:$0xff] }
 0x3fa   :  { %5484 = vmatpush.bf16.msra.mxu2 %v5382_v29  ;;  %v4929_v37 = vpop.f32.mrf.mxu1  ;;  %5448 = vmatpush.bf16.msrb.mxu3 %v5391_v34  ;;  %v5314_v16 = vcvt.s32.f32 %v5186_v5  ;;  %v5316_v60 = vcvt.s32.f32 %v5188_v19  ;;  %v5178_v42 = vunpack.c.0.s8 %v5074_v56  ;;  %v5310_v30 = vcvt.s32.f32 %v5182_v14  ;;  %v5540_v15 = vld [vmem:[#allocation14 + $0x48] sm:$0xff]  ;;  %v5539_v23 = vld [vmem:[#allocation14 + $0x40] sm:$0xff]  ;;  %v5558_v14 = vld [vmem:[#allocation14 + $0xd8] sm:$0xff] }
 0x3fb   :  { %v5312_v39 = vcvt.s32.f32 %v5184_v21  ;;  %v5180_v13 = vunpack.c.1.s8 %v5074_v56  ;;  %v5028_v51 = vperm.slane %v5723_v11, 3  ;;  %v5535_v19 = vld [vmem:[#allocation14 + $0x20] sm:$0xff]  ;;  %v5556_v21 = vld [vmem:[#allocation14 + $0xc8] sm:$0xff] }
 0x3fc   :  { %v5390_v34 = vpack.c.bf16 %v5316_v60, %v5314_v16  ;;  %v5559_v56 = vld [vmem:[#allocation14 + $0xe0] sm:$0xff]  ;;  %v5557_v16 = vld [vmem:[#allocation14 + $0xd0] sm:$0xff]  ;;  %v5532_v60 = vld [vmem:[#allocation14 + $0x8] sm:$0xff] }
 0x3fd   :  { %v5308_v3 = vcvt.s32.f32 %v5180_v13  ;;  %v5551_v13 = vld [vmem:[#allocation14 + $0xa0] sm:$0xff] }
 0x3fe   :  { %5485 = vmatpush.bf16.msra.mxu2 %v5380_v41  ;;  %5449 = vmatpush.bf16.msrb.mxu3 %v5389_v10  ;;  %v5305_v41 = vcvt.s32.f32 %v5177_v52  ;;  %v5306_v10 = vcvt.s32.f32 %v5178_v42  ;;  %v5555_v42 = vld [vmem:[#allocation14 + $0xc0] sm:$0xff] }
 0x400   :  { %v5385_v47 = vpack.c.bf16 %v5307_v40, %v5305_v41 }
 0x402   :  { %5486 = vmatpush.bf16.msra.mxu2 %v5378_v43  ;;  %5450 = vmatpush.bf16.msrb.mxu3 %v5387_v44  ;;  %v5386_v44 = vpack.c.bf16 %v5308_v3, %v5306_v10 }
 0x406   :  { %5487 = vmatpush.bf16.msra.mxu2 %v5376_v6  ;;  %5451 = vmatpush.bf16.msrb.mxu3 %v5385_v47  ;;  %v5198_v6 = vunpack.c.2.s8 %v5078_v20 }
 0x408   :  { %v5326_v48 = vcvt.s32.f32 %v5198_v6 }
 0x40a   :  { %5488 = vmatpush.bf16.msra.mxu2 %v5374_v59  ;;  %5496 = vmatpush.bf16.msra.mxu3 %v5400_v27  ;;  %v5398_v59 = vpack.c.bf16 %v5332_v45, %v5330_v49  ;;  %v5396_v62 = vpack.c.bf16 %v5328_v9, %v5326_v48  ;;  %v5545_v49 = vld [vmem:[#allocation14 + $0x70] sm:$0xff]  ;;  %v5544_v45 = vld [vmem:[#allocation14 + $0x68] sm:$0xff]  ;;  %v5562_v9 = vld [vmem:[#allocation14 + $0xf8] sm:$0xff] }
 0x40b   :  { %5568 = vmatpush.msrb.mxu0 %v5545_v49  ;;  %5587 = vmatpush.msrb.mxu1 %v5562_v9 }
 0x40d   :  { %5569 = vmatpush.msrb.mxu0 %v5544_v45 }
 0x40e   :  { %5489 = vmatpush.bf16.msra.mxu2 %v5372_v35  ;;  %v4940_v29 = vpop.f32.mrf.mxu2  ;;  %5497 = vmatpush.bf16.msra.mxu3 %v5398_v59  ;;  %v5392_v35 = vpack.c.bf16 %v5320_v4, %v5318_v50  ;;  %v5561_v59 = vld [vmem:[#allocation14 + $0xf0] sm:$0xff] }
 0x40f   :  { %v4941_v55 = vadd.f32 %v4940_v29, %v4928_v58  ;;  %v5722_v29 = vld [vmem:[%s6719_s7] sm:$0xf]  ;;  %5588 = vmatpush.msrb.mxu1 %v5561_v59  ;;  %5570 = vmatpush.msrb.mxu0 %v5543_v1 }
 0x410   :  { %v4953_v28 = vpop.f32.mrf.mxu3  ;;  %v5014_v52 = vperm.slane %v5722_v29, 3  ;;  %v5538_v58 = vld [vmem:[#allocation14 + $0x38] sm:$0xff]  ;;  %v5547_v29 = vld [vmem:[#allocation14 + $0x80] sm:$0xff] }
 0x411   :  { %v4954_v0 = vadd.f32 %v4953_v28, %v4941_v55  ;;  %v5388_v28 = vpack.c.bf16 %v5312_v39, %v5310_v30  ;;  %5589 = vmatpush.msrb.mxu1 %v5560_v7  ;;  %5571 = vmatpush.msrb.mxu0 %v5542_v24  ;;  %v5537_v55 = vld [vmem:[#allocation14 + $0x30] sm:$0xff]  ;;  %v5552_v39 = vld [vmem:[#allocation14 + $0xa8] sm:$0xff] }
 0x412   :  { %5490 = vmatpush.bf16.msra.mxu2 %v5370_v46  ;;  %5498 = vmatpush.bf16.msra.mxu3 %v5396_v62  ;;  %v5541_v62 = vld [vmem:[#allocation14 + $0x50] sm:$0xff] }
 0x413   :  { %5572 = vmatpush.msrb.mxu0 %v5541_v62  ;;  %5590 = vmatpush.msrb.mxu1 %v5559_v56  ;;  %v5553_v30 = vld [vmem:[#allocation14 + $0xb0] sm:$0xff] }
 0x415   :  { %5491 = vmatmul.bf16.vlgmr.msra.gmra.mxu2 %v6686_v12  ;;  %5573 = vmatpush.msrb.mxu0 %v5540_v15 }
 0x416   :  { %v4942_v38 = vpop.f32.mrf.mxu2  ;;  %5499 = vmatpush.bf16.msra.mxu3 %v5394_v57  ;;  %v5536_v57 = vld [vmem:[#allocation14 + $0x28] sm:$0xff]  ;;  %5591 = vmatpush.msrb.mxu1 %v5558_v14 }
 0x417   :  { %5574 = vmatpush.msrb.mxu0 %v5539_v23 }
 0x418   :  { %v4955_v37 = vpop.f32.mrf.mxu3  ;;  %5592 = vmatpush.msrb.mxu1 %v5557_v16 }
 0x419   :  { %5575 = vmatpush.msrb.mxu0 %v5538_v58 }
 0x41a   :  { %5500 = vmatpush.bf16.msra.mxu3 %v5392_v35  ;;  %v5533_v35 = vld [vmem:[#allocation14 + $0x10] sm:$0xff]  ;;  %5593 = vmatpush.msrb.mxu1 %v5556_v21 }
 0x41b   :  { %5576 = vmatpush.msrb.mxu0 %v5537_v55 }
 0x41c   :  { %5594 = vmatpush.msrb.mxu1 %v5555_v42 }
 0x41d   :  { %v4966_v43 = vpop.f32.mrf.mxu0  ;;  %5577 = vmatpush.msrb.mxu0 %v5536_v57 }
 0x41e   :  { %v4979_v61 = vpop.f32.mrf.mxu1  ;;  %v4967_v63 = vadd.f32 %v4966_v43, %v4954_v0  ;;  %5501 = vmatpush.bf16.msra.mxu3 %v5390_v34  ;;  %v5534_v0 = vld [vmem:[#allocation14 + $0x18] sm:$0xff] }
 0x41f   :  { %5578 = vmatpush.msrb.mxu0 %v5535_v19  ;;  %v5554_v34 = vld [vmem:[#allocation14 + $0xb8] sm:$0xff] }
 0x420   :  { %v4980_v8 = vadd.f32 %v4979_v61, %v4967_v63  ;;  %v5531_v63 = vld [vmem:[#allocation14] sm:$0xff]  ;;  %5595 = vmatpush.msrb.mxu1 %v5554_v34 }
 0x421   :  { %5579 = vmatpush.msrb.mxu0 %v5534_v0 }
 0x422   :  { %5502 = vmatpush.bf16.msra.mxu3 %v5388_v28  ;;  %5596 = vmatpush.msrb.mxu1 %v5553_v30 }
 0x423   :  { %5580 = vmatpush.msrb.mxu0 %v5533_v35 }
 0x424   :  { %5597 = vmatpush.msrb.mxu1 %v5552_v39 }
 0x425   :  { %v4968_v18 = vpop.f32.mrf.mxu0  ;;  %5581 = vmatpush.msrb.mxu0 %v5532_v60 }
 0x426   :  { %v4981_v12 = vpop.f32.mrf.mxu1  ;;  %5503 = vmatpush.bf16.msra.mxu3 %v5386_v44  ;;  %5598 = vmatpush.msrb.mxu1 %v5551_v13 }
 0x427   :  { %5582 = vmatpush.msrb.mxu0 %v5531_v63 }
 0x439   :  { %v4992_v32 = vpop.f32.mrf.mxu2 }
 0x43a   :  { %v4993_v46 = vadd.f32 %v4992_v32, %v4980_v8  ;;  %v5005_v17 = vpop.f32.mrf.mxu3  ;;  %v5550_v8 = vld [vmem:[#allocation14 + $0x98] sm:$0xff]  ;;  %v5549_v32 = vld [vmem:[#allocation14 + $0x90] sm:$0xff] }
 0x43b   :  { %5599 = vmatpush.msrb.mxu1 %v5550_v8 }
 0x43c   :  { %v5006_v26 = vadd.f32 %v5005_v17, %v4993_v46  ;;  %v5548_v46 = vld [vmem:[#allocation14 + $0x88] sm:$0xff]  ;;  %v5509_v17 = vld [vmem:[%s6722_s10] sm:$0x3] }
 0x43d   :  { %5600 = vmatpush.msrb.mxu1 %v5549_v32  ;;  %v5511_v28 = vperm.slane %v5509_v17, 0 }
 0x43e   :  { %v5022_v31 = vmul.f32 %v5014_v52, %v5006_v26  ;;  %v5517_v52 = vld [vmem:[#allocation13] sm:$0x3] }
 0x43f   :  { %5601 = vmatpush.msrb.mxu1 %v5548_v46  ;;  %v5519_v26 = vperm.slane %v5517_v52, 0 }
 0x440   :  { %v5036_v41 = vadd.f32 %v5028_v51, %v5022_v31 }
 0x441   :  { %v4994_v40 = vpop.f32.mrf.mxu2  ;;  %5602 = vmatpush.msrb.mxu1 %v5547_v29 }
 0x442   :  { %vm5040_vm13 = vcmp.gt.f32.partialorder %v5036_v41, 0.0  ;;  %v5044_v2 = vmul.f32 0.2, %v5036_v41  ;;  %v5414_v53 = vpop.f32.mrf.mxu0  ;;  %v5007_v38 = vpop.f32.mrf.mxu3  ;;  %v5512_v40 = vperm.slane %v5509_v17, 1 }
 0x443   :  { %v5520_v38 = vperm.slane %v5517_v52, 1 }
 0x444   :  { %v5048_v37 = vsel %vm5040_vm13, %v5036_v41, %v5044_v2 }
 0x445   :  { %v5404_v47 = vpack.c.bf16 %v5048_v37, %v5048_v37 }
 0x447   :  { %5452 = vmatmul.bf16.vlgmr.msrb.gmra.mxu3 %v5404_v47  ;;  %v5427_v27 = vpop.f32.mrf.mxu1 }
 0x448   :  { %v5428_v43 = vadd.f32 %v5427_v27, %v5414_v53 }
 0x44a   :  { %v5416_v61 = vpop.f32.mrf.mxu0 }
 0x44f   :  { %v5429_v18 = vpop.f32.mrf.mxu1 }
 0x450   :  { %v5717_v18 = vld [vmem:[%s6725_s13] ss:$0 sm:$0xff] }
 0x457   :  { %5504 = vmatmul.bf16.vlgmr.msra.gmra.mxu3 %v5404_v47 }
 0x462   :  { %v5466_v54 = vpop.f32.mrf.mxu0 }
 0x465   :  { %v5479_v36 = vpop.f32.mrf.mxu1 }
 0x466   :  { %v5480_v20 = vadd.f32 %v5479_v36, %v5466_v54 }
 0x46a   :  { %v5468_v12 = vpop.f32.mrf.mxu0 }
 0x46d   :  { %v5481_v6 = vpop.f32.mrf.mxu1 }
 0x478   :  { %v5440_v25 = vpop.f32.mrf.mxu2 }
 0x479   :  { %v6700_v33 = vadd.f32 %v5440_v25, %v5428_v43 }
 0x480   :  { %v5442_v48 = vpop.f32.mrf.mxu2 }
 0x498   :  { %v5492_v50 = vpop.f32.mrf.mxu2 }
 0x499   :  { %v5493_v4 = vadd.f32 %v5492_v50, %v5480_v20 }
 0x4a0   :  { %v5494_v5 = vpop.f32.mrf.mxu2 }
 0x4ca   :  { %v5453_v10 = vpop.f32.mrf.mxu3 }
 0x4cb   :  { %v5454_v3 = vadd.f32 %v5453_v10, %v6700_v33 }
 0x4cd   :  { %v5515_v11 = vmul.f32 %v5511_v28, %v5454_v3 }
 0x4cf   :  { %v5523_v51 = vadd.f32 %v5519_v26, %v5515_v11 }
 0x4d1   :  { %v5527_v31 = vmul.f32 0.2, %v5523_v51  ;;  %vm5525_vm14 = vcmp.gt.f32.partialorder %v5523_v51, 0.0 }
 0x4d2   :  { %v5455_v44 = vpop.f32.mrf.mxu3 }
 0x4d3   :  { %v5529_v41 = vsel %vm5525_vm14, %v5523_v51, %v5527_v31 }
 0x4d4   :  { %5583 = vmatmul.f32.vlgmr.msrb.gmra.mxu0 %v5529_v41 }
 0x4da   :  { %v5505_v2 = vpop.f32.mrf.mxu3 }
 0x4db   :  { %v5506_v53 = vadd.f32 %v5505_v2, %v5493_v4 }
 0x4dd   :  { %v5516_v37 = vmul.f32 %v5512_v40, %v5506_v53 }
 0x4df   :  { %v5524_v47 = vadd.f32 %v5520_v38, %v5516_v37 }
 0x4e1   :  { %v5528_v27 = vmul.f32 0.2, %v5524_v47  ;;  %vm5526_vm15 = vcmp.gt.f32.partialorder %v5524_v47, 0.0 }
 0x4e2   :  { %v5507_v43 = vpop.f32.mrf.mxu3 }
 0x4e3   :  { %v5530_v61 = vsel %vm5526_vm15, %v5524_v47, %v5528_v27 }
 0x4e4   :  { %5603 = vmatmul.f32.vlgmr.msrb.gmra.mxu1 %v5530_v61 }
 0x551   :  { %v5584_v54 = vpop.f32.mrf.mxu0 }
 0x552   :  { %v5585_v36 = vadd.f32 %v5717_v18, %v5584_v54 }
 0x561   :  { %v5604_v20 = vpop.f32.mrf.mxu1 }
 0x562   :  { %v5605_v12 = vadd.f32 %v5604_v20, %v5585_v36 }
 0x564   :  { %v5688_v6 = vmul.f32 -1.442695, %v5605_v12 }
 0x566   :  { %5718 = vpow2.f32 %v5688_v6 }
 0x56c   :  { %v5719_v25 = vpop.eup %5718 }
 0x56d   :  { %v5610_v33 = vadd.f32 1.0, %v5719_v25 }
 0x56f   :  { %5720 = vrcp.f32 %v5610_v33  ;;  %v5622_v48 = vand.u32 2147483648, %v5610_v33  ;;  %v5620_v59 = vand.u32 2147483647, %v5610_v33  ;;  %vm5616_vm1 = vweird.f32 %v5610_v33 }
 0x571   :  { %v5623_v7 = vor.u32 1.1754944e-38, %v5622_v48  ;;  %vm5621_vm3 = vcmp.eq.f32.partialorder %v5620_v59, 8.507059e+37 }
 0x575   :  { %v5721_v22 = vpop.eup %5720 }
 0x576   :  { %v5612_v49 = vmul.f32 %v5721_v22, %v5610_v33  ;;  %vm5617_vm0 = vweird.f32 %v5721_v22 }
 0x577   :  { %vm5618_vm2 = vmor %vm5616_vm1, %vm5617_vm0 }
 0x578   :  { %v5613_v45 = vsub.f32 1.0, %v5612_v49 }
 0x57a   :  { %v5614_v9 = vmul.f32 %v5721_v22, %v5613_v45 }
 0x57c   :  { %v5615_v1 = vadd.f32 %v5721_v22, %v5614_v9 }
 0x57e   :  { %v5619_v24 = vsel %vm5618_vm2, %v5721_v22, %v5615_v1 }
 0x57f   :  { %v5624_v62 = vsel %vm5621_vm3, %v5623_v7, %v5619_v24 }
 0x580   :  { %5626 = vst [vmem:[#allocation16] sm:$0xff] %v5624_v62 }
 0x581   :  { %5637 = dma.vmem_to_hbm [thread:$0]  %s5633_s29, 128, %s5635_s3, [#allocation4]  }
 0x582   :  { %5950 = dma.done.wait [#allocation4], 128  }
 0x583   :  { %5951 = vsyncadd [#allocation4], 4294967168 }
 0x584   :  { %5642 = vsyncpa [#allocation3], 1 }
 0x585   :  { %5643 = vsyncpa [#allocation6], 1 }
 0x586   :  { %5644 = vsyncpa [#allocation9], 1 }
 0x587   :  { %5645 = vsyncpa [#allocation12], 1 }
 0x588   :  { %5646 = vsyncpa [#allocation15], 1 }
 0x589   :  { %5647 = vsyncpa [#allocation4], 1 }

</bundles_post_ra>
